<compile_context>
chip_gen: v7x
topology: tpu7x:2x2x1
jax: 0.10.0
libtpu: 0.0.40
codegen_flags: <defaults>
</compile_context>

<pallas_src>
import jax
import jax.numpy as jnp
import numpy as np
from jax.experimental import pallas as pl
from jax.experimental.pallas import tpu as pltpu

_LEAKY_SLOPE = 0.1  # activation_layer('leaky_relu') -> nn.LeakyReLU(0.1)


def _leaky_relu(v):
    # max(v, slope*v) == LeakyReLU(v) for 0 < slope < 1; 2 VPU ops, no select.
    return jnp.maximum(v, _LEAKY_SLOPE * v)


def _round_up(x, m):
    return ((x + m - 1) // m) * m


def _cfe_kernel(x_ref, w1_ref, b1_ref, w2_ref, b2_ref, o_ref):
    # x_ref: (bb, 3*ncf); w1_ref: (3*ncf, 3*C); w2_ref: (3*C, 3*C)
    x = x_ref[...]
    h = jnp.dot(x, w1_ref[...], preferred_element_type=jnp.float32) + b1_ref[...]
    h = _leaky_relu(h)
    y = jnp.dot(h, w2_ref[...], preferred_element_type=jnp.float32) + b2_ref[...]
    y = _leaky_relu(y)
    o_ref[...] = y.astype(o_ref.dtype)


def build_augmented_params(params, dtype=jnp.float32):
    """params = [(w1, b1, w2, b2)] * 3 with w in (in, out) layout (== torch W.T).

    Call ONCE (e.g. at init) and reuse the result; do not rebuild per forward.
    """
    (w1a, b1a, w2a, b2a), (w1b, b1b, w2b, b2b), (w1c, b1c, w2c, b2c) = params
    ncf, C = w1a.shape

    W1 = jnp.zeros((3 * ncf, 3 * C), dtype)
    W1 = W1.at[0 * ncf:1 * ncf, 0 * C:1 * C].set(w1a.astype(dtype))
    W1 = W1.at[1 * ncf:2 * ncf, 1 * C:2 * C].set(w1b.astype(dtype))
    W1 = W1.at[2 * ncf:3 * ncf, 2 * C:3 * C].set(w1c.astype(dtype))
    B1 = jnp.concatenate([b1a, b1b, b1c]).reshape(1, 3 * C).astype(dtype)

    W2 = jnp.zeros((3 * C, 3 * C), dtype)
    W2 = W2.at[0 * C:1 * C, 0 * C:1 * C].set(w2a.astype(dtype))
    W2 = W2.at[1 * C:2 * C, 1 * C:2 * C].set(w2b.astype(dtype))
    W2 = W2.at[2 * C:3 * C, 2 * C:3 * C].set(w2c.astype(dtype))
    B2 = jnp.concatenate([b2a, b2b, b2c]).reshape(1, 3 * C).astype(dtype)
    return W1, B1, W2, B2


def continuous_feature_embedding(x, W1, B1, W2, B2, *, block_b=8192,
                                 min_rows_for_kernel=512):
    """x: (B, 3*ncf). Returns (B, 3*C) == cat([embed1, embed2, embed3], -1)."""
    B, F_in = x.shape
    F3, C3 = W1.shape
    assert F_in == F3, "x must have exactly 3*ncf features (slice upstream if wider)"

    # ---- Small-problem fallback: whole problem fits well under one tile, so
    # the fixed pallas_call + pipeline overhead would dominate.  Same math
    # (f32 accumulate, cast to x.dtype) as the kernel.
    if B < min_rows_for_kernel:
        h = _leaky_relu(jnp.dot(x, W1, preferred_element_type=jnp.float32) + B1)
        y = _leaky_relu(jnp.dot(h, W2, preferred_element_type=jnp.float32) + B2)
        return y.astype(x.dtype)

    itemsize = jnp.dtype(x.dtype).itemsize
    sub = 16 if itemsize == 2 else 8          # sublane multiple (bf16 vs f32)

    # Row tile: large (amortize per-step overhead) but keep >= 2 grid steps so
    # v7x's two TensorCores both get work via dimension_semantics=("parallel",).
    bb = min(block_b, _round_up(pl.cdiv(B, 2), sub))

    # VMEM cap uses the PADDED lane width (last dims pad to 128 in VMEM).
    lanes_in = _round_up(F3, 128)
    lanes_out = _round_up(C3, 128)
    per_row_bytes = 2 * (lanes_in + lanes_out) * itemsize   # double-buffered in+out
    vmem_budget = 48 * 1024 * 1024                          # safe under v7x's 64 MiB
    max_bb = max(sub, (vmem_budget // per_row_bytes) // sub * sub)
    bb = max(sub, min(bb, max_bb) // sub * sub)

    grid = (pl.cdiv(B, bb),)

    # Weights/biases are tiny but double-buffered and lane-padded; count them.
    weight_bytes = 2 * itemsize * (
        _round_up(F3, sub) * _round_up(C3, 128)       # W1
        + _round_up(C3, sub) * _round_up(C3, 128)     # W2
        + 2 * sub * _round_up(C3, 128)                # B1, B2
    )
    vmem_limit = bb * per_row_bytes + weight_bytes + (4 << 20)   # + compiler scratch
    vmem_limit = max(32 * 1024 * 1024, min(vmem_limit, 56 * 1024 * 1024))

    return pl.pallas_call(
        _cfe_kernel,
        out_shape=jax.ShapeDtypeStruct((B, C3), x.dtype),
        grid=grid,
        in_specs=[
            pl.BlockSpec((bb, F3), lambda i: (i, 0)),
            # Constant index_map -> weights/biases stay resident across steps.
            pl.BlockSpec((F3, C3), lambda i: (0, 0)),
            pl.BlockSpec((1, C3), lambda i: (0, 0)),
            pl.BlockSpec((C3, C3), lambda i: (0, 0)),
            pl.BlockSpec((1, C3), lambda i: (0, 0)),
        ],
        out_specs=pl.BlockSpec((bb, C3), lambda i: (i, 0)),
        compiler_params=pltpu.CompilerParams(
            dimension_semantics=("parallel",),
            vmem_limit_bytes=int(vmem_limit),
        ),
    )(x, W1, B1, W2, B2)


def _reference(x, params, ncf):
    """Pure-JAX reference matching the PyTorch forward (use_bn=False)."""
    def dnn(z, w1, b1, w2, b2):
        h = jnp.where(z @ w1 + b1 > 0, z @ w1 + b1, _LEAKY_SLOPE * (z @ w1 + b1))
        o = h @ w2 + b2
        return jnp.where(o > 0, o, _LEAKY_SLOPE * o)
    outs = [dnn(x[:, i * ncf:(i + 1) * ncf], *params[i]) for i in range(3)]
    return jnp.concatenate(outs, axis=-1)


if __name__ == "__main__":
    key = jax.random.PRNGKey(0)
    keys = jax.random.split(key, 14)

    ncf, C = 8, 4                       # x features = 24, out features = 12

    # Three independent 2-layer MLP branches; weights in (in, out) layout.
    params = []
    ki = 1
    for _ in range(3):
        w1 = jax.random.normal(keys[ki], (ncf, C), dtype=jnp.float32) * 0.1; ki += 1
        b1 = jax.random.normal(keys[ki], (C,), dtype=jnp.float32) * 0.1;     ki += 1
        w2 = jax.random.normal(keys[ki], (C, C), dtype=jnp.float32) * 0.1;   ki += 1
        b2 = jax.random.normal(keys[ki], (C, ), dtype=jnp.float32) * 0.1;    ki += 1
        params.append((w1, b1, w2, b2))

    # Built once (hoisted out of the per-call path).
    W1, B1, W2, B2 = build_augmented_params(params, dtype=jnp.float32)

    # 1) Pallas kernel path: B large enough for >= 2 grid steps and a partial
    #    last tile (4100 rows -> bb = 2056, grid = 2).
    B_kern = 4100
    x_kern = jax.random.normal(keys[0], (B_kern, 3 * ncf), dtype=jnp.float32)
    out_kern = continuous_feature_embedding(x_kern, W1, B1, W2, B2)
    out_kern = jax.block_until_ready(out_kern)
    ref_kern = _reference(x_kern, params, ncf)
    np.testing.assert_allclose(np.asarray(out_kern), np.asarray(ref_kern),
                               rtol=1e-5, atol=1e-5)
    assert out_kern.shape == (B_kern, 3 * C)

    # 2) Kernel path with a smaller explicit tile (more grid steps exercised).
    out_tiled = continuous_feature_embedding(x_kern, W1, B1, W2, B2, block_b=1024)
    out_tiled = jax.block_until_ready(out_tiled)
    np.testing.assert_allclose(np.asarray(out_tiled), np.asarray(ref_kern),
                               rtol=1e-5, atol=1e-5)

    # 3) Small-B fallback path (B below min_rows_for_kernel).
    B_small = 64
    x_small = jax.random.normal(keys[13], (B_small, 3 * ncf), dtype=jnp.float32)
    out_small = jax.block_until_ready(
        continuous_feature_embedding(x_small, W1, B1, W2, B2))
    ref_small = _reference(x_small, params, ncf)
    np.testing.assert_allclose(np.asarray(out_small), np.asarray(ref_small),
                               rtol=1e-5, atol=1e-5)

    print("KERNEL_OK")
</pallas_src>

<mosaic_0001>
module attributes {stable_mosaic.version = 11 : i64} {
  func.func @_cfe_kernel(%arg0: i32, %arg1: memref<2056x24xf32, #tpu.memory_space<vmem>>, %arg2: memref<24x12xf32, #tpu.memory_space<vmem>>, %arg3: memref<1x12xf32, #tpu.memory_space<vmem>>, %arg4: memref<12x12xf32, #tpu.memory_space<vmem>>, %arg5: memref<1x12xf32, #tpu.memory_space<vmem>>, %arg6: memref<2056x12xf32, #tpu.memory_space<vmem>>) attributes {dimension_semantics = [#tpu.dimension_semantics<parallel>], iteration_bounds = array<i64: 2>, scalar_prefetch = 0 : i64, scratch_operands = 0 : i64, tpu.core_type = #tpu.core_type<tc>, window_params = [{transform_indices = @transform_0, window_bounds = array<i64: 2056, 24>}, {pipeline_mode = #tpu.pipeline_mode<synchronous>, transform_indices = @transform_1, window_bounds = array<i64: 24, 12>}, {pipeline_mode = #tpu.pipeline_mode<synchronous>, transform_indices = @transform_2, window_bounds = array<i64: 1, 12>}, {pipeline_mode = #tpu.pipeline_mode<synchronous>, transform_indices = @transform_3, window_bounds = array<i64: 12, 12>}, {pipeline_mode = #tpu.pipeline_mode<synchronous>, transform_indices = @transform_4, window_bounds = array<i64: 1, 12>}, {transform_indices = @transform_5, window_bounds = array<i64: 2056, 12>}]} {
    %c0 = arith.constant 0 : index
    %c0_0 = arith.constant 0 : index
    %0 = vector.load %arg1[%c0, %c0_0] : memref<2056x24xf32, #tpu.memory_space<vmem>>, vector<2056x24xf32>
    %c0_1 = arith.constant 0 : index
    %c0_2 = arith.constant 0 : index
    %1 = vector.load %arg2[%c0_1, %c0_2] : memref<24x12xf32, #tpu.memory_space<vmem>>, vector<24x12xf32>
    %cst = arith.constant dense<0.000000e+00> : vector<2056x12xf32>
    %2 = tpu.matmul %0, %1, %cst {dimension_numbers = #tpu.dot_dimension_numbers<[1], [0], [0], [1], [0, 0, 1, 1], [], []>} : vector<2056x24xf32>, vector<24x12xf32>, vector<2056x12xf32> -> vector<2056x12xf32>
    %c0_3 = arith.constant 0 : index
    %c0_4 = arith.constant 0 : index
    %3 = vector.load %arg3[%c0_3, %c0_4] : memref<1x12xf32, #tpu.memory_space<vmem>>, vector<1x12xf32>
    %4 = vector.broadcast %3 : vector<1x12xf32> to vector<2056x12xf32>
    %5 = arith.addf %2, %4 : vector<2056x12xf32>
    %cst_5 = arith.constant 1.000000e-01 : f32
    %6 = vector.broadcast %cst_5 : f32 to vector<2056x12xf32>
    %7 = arith.mulf %6, %5 : vector<2056x12xf32>
    %8 = arith.maximumf %5, %7 : vector<2056x12xf32>
    %c0_6 = arith.constant 0 : index
    %c0_7 = arith.constant 0 : index
    %9 = vector.load %arg4[%c0_6, %c0_7] : memref<12x12xf32, #tpu.memory_space<vmem>>, vector<12x12xf32>
    %cst_8 = arith.constant dense<0.000000e+00> : vector<2056x12xf32>
    %10 = tpu.matmul %8, %9, %cst_8 {dimension_numbers = #tpu.dot_dimension_numbers<[1], [0], [0], [1], [0, 0, 1, 1], [], []>} : vector<2056x12xf32>, vector<12x12xf32>, vector<2056x12xf32> -> vector<2056x12xf32>
    %c0_9 = arith.constant 0 : index
    %c0_10 = arith.constant 0 : index
    %11 = vector.load %arg5[%c0_9, %c0_10] : memref<1x12xf32, #tpu.memory_space<vmem>>, vector<1x12xf32>
    %12 = vector.broadcast %11 : vector<1x12xf32> to vector<2056x12xf32>
    %13 = arith.addf %10, %12 : vector<2056x12xf32>
    %cst_11 = arith.constant 1.000000e-01 : f32
    %14 = vector.broadcast %cst_11 : f32 to vector<2056x12xf32>
    %15 = arith.mulf %14, %13 : vector<2056x12xf32>
    %16 = arith.maximumf %13, %15 : vector<2056x12xf32>
    %c0_12 = arith.constant 0 : index
    %c0_13 = arith.constant 0 : index
    %17 = vector.load %arg6[%c0_12, %c0_13] : memref<2056x12xf32, #tpu.memory_space<vmem>>, vector<2056x12xf32>
    tpu.vector_store %arg6[%c0_12, %c0_13], %16 {strides = array<i32>} : memref<2056x12xf32, #tpu.memory_space<vmem>>, vector<2056x12xf32>,
    return
  }
  func.func @transform_0(%arg0: i32) -> (i32, i32) {
    %c0_i32 = arith.constant 0 : i32
    %c0_i32_0 = arith.constant 0 : i32
    return %arg0, %c0_i32 : i32, i32
  }
  func.func @transform_1(%arg0: i32) -> (i32, i32) {
    %c0_i32 = arith.constant 0 : i32
    %c0_i32_0 = arith.constant 0 : i32
    %c0_i32_1 = arith.constant 0 : i32
    return %c0_i32, %c0_i32_0 : i32, i32
  }
  func.func @transform_2(%arg0: i32) -> (i32, i32) {
    %c0_i32 = arith.constant 0 : i32
    %c0_i32_0 = arith.constant 0 : i32
    %c0_i32_1 = arith.constant 0 : i32
    return %c0_i32, %c0_i32_0 : i32, i32
  }
  func.func @transform_3(%arg0: i32) -> (i32, i32) {
    %c0_i32 = arith.constant 0 : i32
    %c0_i32_0 = arith.constant 0 : i32
    %c0_i32_1 = arith.constant 0 : i32
    return %c0_i32, %c0_i32_0 : i32, i32
  }
  func.func @transform_4(%arg0: i32) -> (i32, i32) {
    %c0_i32 = arith.constant 0 : i32
    %c0_i32_0 = arith.constant 0 : i32
    %c0_i32_1 = arith.constant 0 : i32
    return %c0_i32, %c0_i32_0 : i32, i32
  }
  func.func @transform_5(%arg0: i32) -> (i32, i32) {
    %c0_i32 = arith.constant 0 : i32
    %c0_i32_0 = arith.constant 0 : i32
    return %arg0, %c0_i32 : i32, i32
  }
}

</mosaic_0001>

<bundles_post_ra>
// kernel: tpu_custom_call.1
= control target key start
LH: loop header
LB: loop body
LE: loop exit
PB: predicated region body
PF: predicated region fallthrough
CT: control target
= control target key end

     0   :  { %s9368_s18 = smov 0   ;;  %s9370_s19 = smov 0   ;;  %s12529_s0 = inlined_call_operand.vmem [shape: f32[4100,24], index: 0, kind: input, shape index: {}]   ;;  %s12530_s1 = inlined_call_operand.vmem [shape: f32[24,12], index: 1, kind: input, shape index: {}]   ;;  %s12531_s2 = inlined_call_operand.vmem [shape: f32[1,12], index: 2, kind: input, shape index: {}]   ;;  %s12532_s3 = inlined_call_operand.vmem [shape: f32[12,12], index: 3, kind: input, shape index: {}]   ;;  %s12533_s4 = inlined_call_operand.vmem [shape: f32[1,12], index: 4, kind: input, shape index: {}]   ;;  %s12534_s5 = inlined_call_operand.vmem [shape: f32[4100,12], index: 5, kind: output, shape index: {}]  }
   0x1   :  { %s9372_s20 = smov 0  }
   0x2 LB: > { %s9381_s21 = sadd.s32 4294967295, %s9300_s20   ;;  %s9383_s22 = sadd.s32 1, %s9300_s20   ;;  %s9300_s20 = sphi %s9372_s20, %s12543_s20   ;;  %s9296_s19 = sphi %s9370_s19, %s12542_s19   ;;  %s9292_s18 = sphi %s9368_s18, %s12541_s18  }
   0x3   : > { %s129_s23 = ssub.s32 %s9300_s20, %s9383_s22  ;;  %s132_s24 = sadd.s32 1, %s9296_s19 }
   0x4   : > { %p130_p0 = scmp.eq.s32.totalorder %s129_s23, 0  ;;  %p142_p1 = scmp.ne.s32.totalorder %s9296_s19, %s9292_s18 }
   0x5   : > { %p143_p2 = scmp.eq.s32.totalorder %s9381_s21, 1  ;;  %p6525_p3 = scmp.ge.s32.totalorder %s9300_s20, 1 }
   0x6   : > { %s9391_s25 = scalar_select %p130_p0, %s9296_s19, %s132_s24  }
   0x7   : > { %p9393_p4 = por %p143_p2, %p142_p1  ;;  %p196_p5 = scmp.lt.s32.totalorder %s9300_s20, 3 }
   0x9   : > { %p197_p6 = pnand %p6525_p3, %p196_p5 }
   0xa   : > { %v503_v0 = vld [vmem:[%s12530_s1] sm:$0xff] (!%p197_p6)  ;;  %v504_v1 = vld [vmem:[%s12530_s1 + $0x8] sm:$0xff] (!%p197_p6)  ;;  %v9334_v2 = vmov (!%p197_p6), 0.0|0.0   ;;  %vm9335_vm0 = vmmov (!%p197_p6), 0   ;;  %v9336_v4 = vmov (!%p197_p6), 0.0   ;;  %s9406_s6 = smul.u32 (!%p197_p6), 257, %s9381_s21 }
   0xb   : > { %200 = sbr.rel (%p197_p6) target bundleno = 1556 (0x614), region = 40  ;;  %9133 = vmatprep.subr.bf16.mxu0 (!%p197_p6), %v9334_v2  ;;  %v9134_v3 = vpack.c.bf16 (!%p197_p6), %v504_v1, %v503_v0  ;;  %7587 = vmatprep.mubr.msk.f32.mxu0 (!%p197_p6), %vm9335_vm0, %v9336_v4  ;;  %v505_v5 = vld [vmem:[%s12530_s1 + $0x10] sm:$0xff] (!%p197_p6)  ;;  %vm513_vm1 = vcmask (!%p197_p6), 195584   ;;  %v3149_v28 = vld [vmem:[%s12532_s3] sm:$0xff] (!%p197_p6)  ;;  %v3150_v29 = vld [vmem:[%s12532_s3 + $0x8] sm:$0xf] (!%p197_p6) }
   0xc   : > { %9136 = vmatprep.subr.bf16.mxu1 (!%p197_p6), %v9334_v2  ;;  %8362 = vmatprep.mubr.msk.f32.mxu1 (!%p197_p6), %vm9335_vm0, %v9336_v4  ;;  %p232_p7 = scmp.lt.s32.totalorder (!%p197_p6), %s9406_s6, 512  ;;  %vm3930_vm2 = vcmask (!%p197_p6), 1043456   ;;  %v9137_v31 = vpack.c.bf16 (!%p197_p6), %v3150_v29, %v3149_v28  ;;  %vm9337_vm3 = vmmov (!%p197_p6), 1   ;;  %v9640_v62 = vld [vmem:[%s12531_s2] ss:$0 sm:$0xff] (!%p197_p6)  ;;  %vm3158_vm5 = vcmask (!%p197_p6), 97280  }
   0xd   : > { %9135 = vmatpush3.bf16.msra.mxu0 (!%p197_p6), %v9134_v3  ;;  %vm9138_vm4 = vmpackc.low (!%p197_p6), %vm3930_vm2, %vm9337_vm3  ;;  %s224_s28 = sand.u32 (!%p197_p6), 1, %s9292_s18  }
   0xe   : > { %7585 = vmatprep.subr.mxu0 (!%p197_p6), %v9336_v4  ;;  %9139 = vmatpush3.bf16.msk.msra.mxu1 (!%p197_p6), %vm9138_vm4, %v9137_v31  ;;  %s9140_s7 = smul.u32 (!%p197_p6), 2056, %s224_s28 }
  0x10   : > { %s10103_s18 = scalar_lea.vmem (!%p197_p6), [#allocation2], %s9140_s7  }
  0x11   : > { %7586 = vmatpush3.msra.mxu0 (!%p197_p6), %v505_v5 }
  0x12   : > { %s233_s9 = scalar_select %p232_p7, %s9406_s6, 512 }
  0x13   : > { %s6063_s15 = ssub.s32 (%p9393_p4), 513, %s9406_s6  ;;  %s7059_s16 = smul.u32 (%p9393_p4), 2056, %s9381_s21 }
  0x14   : > { %s6526_s10 = sshll.u32 %s233_s9, 3  ;;  %p6064_p8 = scmp.lt.s32.totalorder (%p9393_p4), %s6063_s15, 257 }
  0x15   : > { %s9419_s13 = scalar_lea.vmem %s12529_s0, %s6526_s10  ;;  %s12330_s23 = scalar_lea.vmem (%p9393_p4), %s12534_s5, %s7059_s16  }
  0x16   : > { %v246_v6 = vld [vmem:[%s9419_s13] sm:$0xff]  ;;  %v247_v7 = vld [vmem:[%s9419_s13 + $0x8] sm:$0xff]  ;;  %v248_v8 = vld [vmem:[%s9419_s13 + $0x10] sm:$0xff] }
  0x17   : > { %7588 = vmatmul.mubr.msk.f32.vlgmr.msra.gmra.mrb[0].mxu0 %vm513_vm1, %v246_v6  ;;  %v249_v9 = vld [vmem:[%s9419_s13 + $0x18] sm:$0xff]  ;;  %v250_v10 = vld [vmem:[%s9419_s13 + $0x20] sm:$0xff]  ;;  %v251_v11 = vld [vmem:[%s9419_s13 + $0x28] sm:$0xff] }
  0x18   : > { %7590 = vmatprep.mubr.msk.f32.mxu0 %vm9335_vm0, %v9336_v4  ;;  %v252_v12 = vld [vmem:[%s9419_s13 + $0x30] sm:$0xff]  ;;  %v253_v13 = vld [vmem:[%s9419_s13 + $0x38] sm:$0xff]  ;;  %v254_v14 = vld [vmem:[%s9419_s13 + $0x40] sm:$0xff] }
  0x19   : > { %v255_v15 = vld [vmem:[%s9419_s13 + $0x48] sm:$0xff]  ;;  %v256_v16 = vld [vmem:[%s9419_s13 + $0x50] sm:$0xff]  ;;  %v257_v17 = vld [vmem:[%s9419_s13 + $0x58] sm:$0xff] }
  0x1a   : > { %v258_v18 = vld [vmem:[%s9419_s13 + $0x60] sm:$0xff]  ;;  %v259_v19 = vld [vmem:[%s9419_s13 + $0x68] sm:$0xff]  ;;  %v260_v20 = vld [vmem:[%s9419_s13 + $0x70] sm:$0xff] }
  0x1b   : > { %7591 = vmatmul.mubr.msk.f32.gmra.mrb[2].mxu0 %vm513_vm1, %v247_v7  ;;  %v261_v21 = vld [vmem:[%s9419_s13 + $0x78] sm:$0xff]  ;;  %v262_v22 = vld [vmem:[%s9419_s13 + $0x80] sm:$0xff]  ;;  %v263_v23 = vld [vmem:[%s9419_s13 + $0x88] sm:$0xff] }
  0x1c   : > { %7593 = vmatprep.mubr.msk.f32.mxu0 %vm9335_vm0, %v9336_v4  ;;  %v264_v24 = vld [vmem:[%s9419_s13 + $0x90] sm:$0xff]  ;;  %v265_v25 = vld [vmem:[%s9419_s13 + $0x98] sm:$0xff]  ;;  %v266_v26 = vld [vmem:[%s9419_s13 + $0xa0] sm:$0xff] }
  0x1d   : > { %v267_v27 = vld [vmem:[%s9419_s13 + $0xa8] sm:$0xff]  ;;  %v268_v30 = vld [vmem:[%s9419_s13 + $0xb0] sm:$0xff]  ;;  %v269_v32 = vld [vmem:[%s9419_s13 + $0xb8] sm:$0xff] }
  0x1e   : > { %v270_v33 = vld [vmem:[%s9419_s13 + $0xc0] sm:$0xff]  ;;  %v271_v34 = vld [vmem:[%s9419_s13 + $0xc8] sm:$0xff]  ;;  %v272_v35 = vld [vmem:[%s9419_s13 + $0xd0] sm:$0xff] }
  0x1f   : > { %7594 = vmatmul.mubr.msk.f32.gmra.mrb[4].mxu0 %vm513_vm1, %v248_v8  ;;  %v273_v36 = vld [vmem:[%s9419_s13 + $0xd8] sm:$0xff]  ;;  %v274_v37 = vld [vmem:[%s9419_s13 + $0xe0] sm:$0xff]  ;;  %v275_v38 = vld [vmem:[%s9419_s13 + $0xe8] sm:$0xff] }
  0x20   : > { %7596 = vmatprep.mubr.msk.f32.mxu0 %vm9335_vm0, %v9336_v4  ;;  %v276_v39 = vld [vmem:[%s9419_s13 + $0xf0] sm:$0xff]  ;;  %v277_v40 = vld [vmem:[%s9419_s13 + $0xf8] sm:$0xff]  ;;  %v278_v41 = vld [vmem:[%s9419_s13 + $0x100] sm:$0xff] }
  0x21   : > { %v279_v42 = vld [vmem:[%s9419_s13 + $0x108] sm:$0xff]  ;;  %v280_v43 = vld [vmem:[%s9419_s13 + $0x110] sm:$0xff]  ;;  %v281_v44 = vld [vmem:[%s9419_s13 + $0x118] sm:$0xff] }
  0x22   : > { %v282_v45 = vld [vmem:[%s9419_s13 + $0x120] sm:$0xff]  ;;  %v283_v46 = vld [vmem:[%s9419_s13 + $0x128] sm:$0xff]  ;;  %v284_v47 = vld [vmem:[%s9419_s13 + $0x130] sm:$0xff] }
  0x23   : > { %7597 = vmatmul.mubr.msk.f32.gmra.mrb[6].mxu0 %vm513_vm1, %v249_v9  ;;  %v285_v48 = vld [vmem:[%s9419_s13 + $0x138] sm:$0xff]  ;;  %v286_v49 = vld [vmem:[%s9419_s13 + $0x140] sm:$0xff]  ;;  %v287_v50 = vld [vmem:[%s9419_s13 + $0x148] sm:$0xff] }
  0x24   : > { %7599 = vmatprep.mubr.msk.f32.mxu0 %vm9335_vm0, %v9336_v4  ;;  %v288_v51 = vld [vmem:[%s9419_s13 + $0x150] sm:$0xff]  ;;  %v289_v52 = vld [vmem:[%s9419_s13 + $0x158] sm:$0xff]  ;;  %v290_v53 = vld [vmem:[%s9419_s13 + $0x160] sm:$0xff] }
  0x25   : > { %v291_v54 = vld [vmem:[%s9419_s13 + $0x168] sm:$0xff]  ;;  %v292_v55 = vld [vmem:[%s9419_s13 + $0x170] sm:$0xff]  ;;  %v293_v56 = vld [vmem:[%s9419_s13 + $0x178] sm:$0xff] }
  0x26   : > { %v294_v57 = vld [vmem:[%s9419_s13 + $0x180] sm:$0xff]  ;;  %v295_v58 = vld [vmem:[%s9419_s13 + $0x188] sm:$0xff]  ;;  %v296_v59 = vld [vmem:[%s9419_s13 + $0x190] sm:$0xff] }
  0x27   : > { %7600 = vmatmul.mubr.msk.f32.gmra.mrb[8].mxu0 %vm513_vm1, %v250_v10  ;;  %v297_v60 = vld [vmem:[%s9419_s13 + $0x198] sm:$0xff]  ;;  %v298_v61 = vld [vmem:[%s9419_s13 + $0x1a0] sm:$0xff]  ;;  %v299_v63 = vld [vmem:[%s9419_s13 + $0x1a8] sm:$0xff] }
  0x28   : > { %7602 = vmatprep.mubr.msk.f32.mxu0 %vm9335_vm0, %v9336_v4  ;;  %v300_v3 = vld [vmem:[%s9419_s13 + $0x1b0] sm:$0xff]  ;;  %v301_v10 = vld [vmem:[%s9419_s13 + $0x1b8] sm:$0xff] }
  0x29   : > { %v304_v28 = vld [vmem:[%s9419_s13 + $0x1d0] sm:$0xff] }
  0x2b   : > { %7603 = vmatmul.mubr.msk.f32.gmra.mrb[10].mxu0 %vm513_vm1, %v251_v11 }
  0x2c   : > { %7605 = vmatprep.mubr.msk.f32.mxu0 %vm9335_vm0, %v9336_v4 }
  0x2f   : > { %7606 = vmatmul.mubr.msk.f32.gmra.mrb[12].mxu0 %vm513_vm1, %v252_v12 }
  0x30   : > { %7608 = vmatprep.mubr.msk.f32.mxu0 %vm9335_vm0, %v9336_v4 }
  0x33   : > { %7609 = vmatmul.mubr.msk.f32.gmra.mrb[14].mxu0 %vm513_vm1, %v253_v13 }
  0x34   : > { %7611 = vmatprep.mubr.msk.f32.mxu0 %vm9335_vm0, %v9336_v4 }
  0x37   : > { %7612 = vmatmul.mubr.msk.f32.gmra.mrb[16].mxu0 %vm513_vm1, %v254_v14 }
  0x38   : > { %7614 = vmatprep.mubr.msk.f32.mxu0 %vm9335_vm0, %v9336_v4 }
  0x3b   : > { %7615 = vmatmul.mubr.msk.f32.gmra.mrb[18].mxu0 %vm513_vm1, %v255_v15 }
  0x3c   : > { %7617 = vmatprep.mubr.msk.f32.mxu0 %vm9335_vm0, %v9336_v4 }
  0x3f   : > { %7618 = vmatmul.mubr.msk.f32.gmra.mrb[20].mxu0 %vm513_vm1, %v256_v16  ;;  %v302_v16 = vld [vmem:[%s9419_s13 + $0x1c0] sm:$0xff] }
  0x40   : > { %7620 = vmatprep.mubr.msk.f32.mxu0 %vm9335_vm0, %v9336_v4 }
  0x43   : > { %7621 = vmatmul.mubr.msk.f32.gmra.mrb[22].mxu0 %vm513_vm1, %v257_v17 }
  0x44   : > { %7623 = vmatprep.mubr.msk.f32.mxu0 %vm9335_vm0, %v9336_v4 }
  0x47   : > { %7624 = vmatmul.mubr.msk.f32.gmra.mrb[24].mxu0 %vm513_vm1, %v258_v18 }
  0x48   : > { %7626 = vmatprep.mubr.msk.f32.mxu0 %vm9335_vm0, %v9336_v4 }
  0x4b   : > { %7627 = vmatmul.mubr.msk.f32.gmra.mrb[26].mxu0 %vm513_vm1, %v259_v19 }
  0x4c   : > { %7629 = vmatprep.mubr.msk.f32.mxu0 %vm9335_vm0, %v9336_v4 }
  0x4f   : > { %7630 = vmatmul.mubr.msk.f32.gmra.mrb[28].mxu0 %vm513_vm1, %v260_v20 }
  0x50   : > { %7632 = vmatprep.mubr.msk.f32.mxu0 %vm9335_vm0, %v9336_v4 }
  0x53   : > { %7633 = vmatmul.mubr.msk.f32.gmra.mrb[30].mxu0 %vm513_vm1, %v261_v21 }
  0x54   : > { %7635 = vmatprep.mubr.msk.f32.mxu0 %vm9335_vm0, %v9336_v4 }
  0x57   : > { %7636 = vmatmul.mubr.msk.f32.gmra.mrb[32].mxu0 %vm513_vm1, %v262_v22  ;;  %v303_v22 = vld [vmem:[%s9419_s13 + $0x1c8] sm:$0xff] }
  0x58   : > { %7638 = vmatprep.mubr.msk.f32.mxu0 %vm9335_vm0, %v9336_v4 }
  0x5b   : > { %7639 = vmatmul.mubr.msk.f32.gmra.mrb[34].mxu0 %vm513_vm1, %v263_v23 }
  0x5c   : > { %7641 = vmatprep.mubr.msk.f32.mxu0 %vm9335_vm0, %v9336_v4 }
  0x5f   : > { %7642 = vmatmul.mubr.msk.f32.gmra.mrb[36].mxu0 %vm513_vm1, %v264_v24 }
  0x60   : > { %7644 = vmatprep.mubr.msk.f32.mxu0 %vm9335_vm0, %v9336_v4 }
  0x63   : > { %7645 = vmatmul.mubr.msk.f32.gmra.mrb[38].mxu0 %vm513_vm1, %v265_v25 }
  0x64   : > { %7647 = vmatprep.mubr.msk.f32.mxu0 %vm9335_vm0, %v9336_v4 }
  0x67   : > { %7648 = vmatmul.mubr.msk.f32.gmra.mrb[40].mxu0 %vm513_vm1, %v266_v26 }
  0x68   : > { %7650 = vmatprep.mubr.msk.f32.mxu0 %vm9335_vm0, %v9336_v4 }
  0x6b   : > { %7651 = vmatmul.mubr.msk.f32.gmra.mrb[42].mxu0 %vm513_vm1, %v267_v27 }
  0x6c   : > { %7653 = vmatprep.mubr.msk.f32.mxu0 %vm9335_vm0, %v9336_v4 }
  0x6f   : > { %7654 = vmatmul.mubr.msk.f32.gmra.mrb[44].mxu0 %vm513_vm1, %v268_v30 }
  0x70   : > { %7656 = vmatprep.mubr.msk.f32.mxu0 %vm9335_vm0, %v9336_v4 }
  0x73   : > { %7657 = vmatmul.mubr.msk.f32.gmra.mrb[46].mxu0 %vm513_vm1, %v269_v32 }
  0x74   : > { %7659 = vmatprep.mubr.msk.f32.mxu0 %vm9335_vm0, %v9336_v4 }
  0x77   : > { %7660 = vmatmul.mubr.msk.f32.gmra.mrb[48].mxu0 %vm513_vm1, %v270_v33 }
  0x78   : > { %7662 = vmatprep.mubr.msk.f32.mxu0 %vm9335_vm0, %v9336_v4 }
  0x7b   : > { %7663 = vmatmul.mubr.msk.f32.gmra.mrb[50].mxu0 %vm513_vm1, %v271_v34  ;;  %v305_v34 = vld [vmem:[%s9419_s13 + $0x1d8] sm:$0xff] }
  0x7c   : > { %7665 = vmatprep.mubr.msk.f32.mxu0 %vm9335_vm0, %v9336_v4 }
  0x7f   : > { %7666 = vmatmul.mubr.msk.f32.gmra.mrb[52].mxu0 %vm513_vm1, %v272_v35 }
  0x80   : > { %7668 = vmatprep.mubr.msk.f32.mxu0 %vm9335_vm0, %v9336_v4 }
  0x83   : > { %7669 = vmatmul.mubr.msk.f32.gmra.mrb[54].mxu0 %vm513_vm1, %v273_v36 }
  0x84   : > { %7671 = vmatprep.mubr.msk.f32.mxu0 %vm9335_vm0, %v9336_v4 }
  0x87   : > { %7672 = vmatmul.mubr.msk.f32.gmra.mrb[56].mxu0 %vm513_vm1, %v274_v37 }
  0x88   : > { %7674 = vmatprep.mubr.msk.f32.mxu0 %vm9335_vm0, %v9336_v4 }
  0x8b   : > { %7675 = vmatmul.mubr.msk.f32.gmra.mrb[58].mxu0 %vm513_vm1, %v275_v38 }
  0x8c   : > { %7677 = vmatprep.mubr.msk.f32.mxu0 %vm9335_vm0, %v9336_v4 }
  0x8f   : > { %7678 = vmatmul.mubr.msk.f32.gmra.mrb[60].mxu0 %vm513_vm1, %v276_v39 }
  0x90   : > { %7680 = vmatprep.mubr.msk.f32.mxu0 %vm9335_vm0, %v9336_v4 }
  0x93   : > { %7681 = vmatmul.mubr.msk.f32.gmra.mrb[62].mxu0 %vm513_vm1, %v277_v40  ;;  %v306_v40 = vld [vmem:[%s9419_s13 + $0x1e0] sm:$0xff] }
  0x94   : > { %7683 = vmatprep.mubr.msk.f32.mxu0 %vm9335_vm0, %v9336_v4 }
  0x97   : > { %7684 = vmatmul.mubr.msk.f32.gmra.mrb[64].mxu0 %vm513_vm1, %v278_v41 }
  0x98   : > { %7686 = vmatprep.mubr.msk.f32.mxu0 %vm9335_vm0, %v9336_v4 }
  0x9b   : > { %7687 = vmatmul.mubr.msk.f32.gmra.mrb[66].mxu0 %vm513_vm1, %v279_v42 }
  0x9c   : > { %7689 = vmatprep.mubr.msk.f32.mxu0 %vm9335_vm0, %v9336_v4 }
  0x9f   : > { %7690 = vmatmul.mubr.msk.f32.gmra.mrb[68].mxu0 %vm513_vm1, %v280_v43 }
  0xa0   : > { %7692 = vmatprep.mubr.msk.f32.mxu0 %vm9335_vm0, %v9336_v4 }
  0xa3   : > { %7693 = vmatmul.mubr.msk.f32.gmra.mrb[70].mxu0 %vm513_vm1, %v281_v44 }
  0xa4   : > { %7695 = vmatprep.mubr.msk.f32.mxu0 %vm9335_vm0, %v9336_v4 }
  0xa7   : > { %7696 = vmatmul.mubr.msk.f32.gmra.mrb[72].mxu0 %vm513_vm1, %v282_v45 }
  0xa8   : > { %7698 = vmatprep.mubr.msk.f32.mxu0 %vm9335_vm0, %v9336_v4 }
  0xab   : > { %7699 = vmatmul.mubr.msk.f32.gmra.mrb[74].mxu0 %vm513_vm1, %v283_v46  ;;  %v307_v46 = vld [vmem:[%s9419_s13 + $0x1e8] sm:$0xff] }
  0xac   : > { %7701 = vmatprep.mubr.msk.f32.mxu0 %vm9335_vm0, %v9336_v4 }
  0xaf   : > { %7702 = vmatmul.mubr.msk.f32.gmra.mrb[76].mxu0 %vm513_vm1, %v284_v47 }
  0xb0   : > { %7704 = vmatprep.mubr.msk.f32.mxu0 %vm9335_vm0, %v9336_v4 }
  0xb3   : > { %7705 = vmatmul.mubr.msk.f32.gmra.mrb[78].mxu0 %vm513_vm1, %v285_v48 }
  0xb4   : > { %7707 = vmatprep.mubr.msk.f32.mxu0 %vm9335_vm0, %v9336_v4 }
  0xb7   : > { %7708 = vmatmul.mubr.msk.f32.gmra.mrb[80].mxu0 %vm513_vm1, %v286_v49 }
  0xb8   : > { %7710 = vmatprep.mubr.msk.f32.mxu0 %vm9335_vm0, %v9336_v4 }
  0xbb   : > { %7711 = vmatmul.mubr.msk.f32.gmra.mrb[82].mxu0 %vm513_vm1, %v287_v50 }
  0xbc   : > { %7713 = vmatprep.mubr.msk.f32.mxu0 %vm9335_vm0, %v9336_v4 }
  0xbf   : > { %7714 = vmatmul.mubr.msk.f32.gmra.mrb[84].mxu0 %vm513_vm1, %v288_v51 }
  0xc0   : > { %7716 = vmatprep.mubr.msk.f32.mxu0 %vm9335_vm0, %v9336_v4 }
  0xc3   : > { %7717 = vmatmul.mubr.msk.f32.gmra.mrb[86].mxu0 %vm513_vm1, %v289_v52  ;;  %v308_v52 = vld [vmem:[%s9419_s13 + $0x1f0] sm:$0xff] }
  0xc4   : > { %7719 = vmatprep.mubr.msk.f32.mxu0 %vm9335_vm0, %v9336_v4 }
  0xc7   : > { %7720 = vmatmul.mubr.msk.f32.gmra.mrb[88].mxu0 %vm513_vm1, %v290_v53 }
  0xc8   : > { %7722 = vmatprep.mubr.msk.f32.mxu0 %vm9335_vm0, %v9336_v4 }
  0xcb   : > { %7723 = vmatmul.mubr.msk.f32.gmra.mrb[90].mxu0 %vm513_vm1, %v291_v54 }
  0xcc   : > { %7725 = vmatprep.mubr.msk.f32.mxu0 %vm9335_vm0, %v9336_v4 }
  0xcf   : > { %7726 = vmatmul.mubr.msk.f32.gmra.mrb[92].mxu0 %vm513_vm1, %v292_v55 }
  0xd0   : > { %7728 = vmatprep.mubr.msk.f32.mxu0 %vm9335_vm0, %v9336_v4 }
  0xd3   : > { %7729 = vmatmul.mubr.msk.f32.gmra.mrb[94].mxu0 %vm513_vm1, %v293_v56 }
  0xd4   : > { %7731 = vmatprep.mubr.msk.f32.mxu0 %vm9335_vm0, %v9336_v4 }
  0xd7   : > { %7732 = vmatmul.mubr.msk.f32.gmra.mrb[96].mxu0 %vm513_vm1, %v294_v57 }
  0xd8   : > { %7734 = vmatprep.mubr.msk.f32.mxu0 %vm9335_vm0, %v9336_v4 }
  0xdb   : > { %7735 = vmatmul.mubr.msk.f32.gmra.mrb[98].mxu0 %vm513_vm1, %v295_v58  ;;  %v309_v58 = vld [vmem:[%s9419_s13 + $0x1f8] sm:$0xff] }
  0xdc   : > { %7737 = vmatprep.mubr.msk.f32.mxu0 %vm9335_vm0, %v9336_v4 }
  0xdf   : > { %7738 = vmatmul.mubr.msk.f32.gmra.mrb[100].mxu0 %vm513_vm1, %v296_v59 }
  0xe0   : > { %7740 = vmatprep.mubr.msk.f32.mxu0 %vm9335_vm0, %v9336_v4 }
  0xe3   : > { %7741 = vmatmul.mubr.msk.f32.gmra.mrb[102].mxu0 %vm513_vm1, %v297_v60 }
  0xe4   : > { %7743 = vmatprep.mubr.msk.f32.mxu0 %vm9335_vm0, %v9336_v4 }
  0xe7   : > { %7744 = vmatmul.mubr.msk.f32.gmra.mrb[104].mxu0 %vm513_vm1, %v298_v61 }
  0xe8   : > { %7746 = vmatprep.mubr.msk.f32.mxu0 %vm9335_vm0, %v9336_v4 }
  0xea   : > { %v1351_v0 = vpop.f32.mrb[0].mxu0 }
  0xeb   : > { %v1352_v1 = vadd.f32 %v9640_v62, %v1351_v0  ;;  %v7589_v2 = vpop.f32.mrb[1].mxu0  ;;  %7747 = vmatmul.mubr.msk.f32.gmra.mrb[106].mxu0 %vm513_vm1, %v299_v63 }
  0xec   : > { %7749 = vmatprep.mubr.msk.f32.mxu0 %vm9335_vm0, %v9336_v4 }
  0xed   : > { %v2635_v5 = vmul.f32 0.1, %v1352_v1 }
  0xee   : > { %v1356_v6 = vpop.f32.mrb[2].mxu0 }
  0xef   : > { %v2892_v7 = vmax.f32 %v1352_v1, %v2635_v5  ;;  %v1357_v8 = vadd.f32 %v9640_v62, %v1356_v6  ;;  %v7592_v9 = vpop.f32.mrb[3].mxu0  ;;  %7750 = vmatmul.mubr.msk.f32.gmra.mrb[108].mxu0 %vm513_vm1, %v300_v3  ;;  %v310_v1 = vld [vmem:[%s9419_s13 + $0x200] sm:$0xff] }
  0xf0   : > { %7752 = vmatprep.mubr.msk.f32.mxu0 %vm9335_vm0, %v9336_v4 }
  0xf1   : > { %v2636_v11 = vmul.f32 0.1, %v1357_v8  ;;  %8363 = vmatmul.mubr.msk.f32.vlgmr.msra.gmra.mrb[0].mxu1 %vm3158_vm5, %v2892_v7 }
  0xf2   : > { %v1361_v12 = vpop.f32.mrb[4].mxu0  ;;  %8365 = vmatprep.mubr.msk.f32.mxu1 %vm9335_vm0, %v9336_v4 }
  0xf3   : > { %v2893_v13 = vmax.f32 %v1357_v8, %v2636_v11  ;;  %v1362_v14 = vadd.f32 %v9640_v62, %v1361_v12  ;;  %v7595_v15 = vpop.f32.mrb[5].mxu0  ;;  %7753 = vmatmul.mubr.msk.f32.gmra.mrb[110].mxu0 %vm513_vm1, %v301_v10  ;;  %v311_v8 = vld [vmem:[%s9419_s13 + $0x208] sm:$0xff] }
  0xf4   : > { %7755 = vmatprep.mubr.msk.f32.mxu0 %vm9335_vm0, %v9336_v4 }
  0xf5   : > { %v2637_v17 = vmul.f32 0.1, %v1362_v14  ;;  %8366 = vmatmul.mubr.msk.f32.gmra.mrb[2].mxu1 %vm3158_vm5, %v2893_v13 }
  0xf6   : > { %v1366_v18 = vpop.f32.mrb[6].mxu0  ;;  %8368 = vmatprep.mubr.msk.f32.mxu1 %vm9335_vm0, %v9336_v4 }
  0xf7   : > { %v2894_v19 = vmax.f32 %v1362_v14, %v2637_v17  ;;  %v1367_v20 = vadd.f32 %v9640_v62, %v1366_v18  ;;  %v7598_v21 = vpop.f32.mrb[7].mxu0  ;;  %7756 = vmatmul.mubr.msk.f32.gmra.mrb[112].mxu0 %vm513_vm1, %v302_v16  ;;  %v312_v14 = vld [vmem:[%s9419_s13 + $0x210] sm:$0xff] }
  0xf8   : > { %7758 = vmatprep.mubr.msk.f32.mxu0 %vm9335_vm0, %v9336_v4 }
  0xf9   : > { %v2638_v23 = vmul.f32 0.1, %v1367_v20  ;;  %8369 = vmatmul.mubr.msk.f32.gmra.mrb[4].mxu1 %vm3158_vm5, %v2894_v19 }
  0xfa   : > { %v1371_v24 = vpop.f32.mrb[8].mxu0  ;;  %8371 = vmatprep.mubr.msk.f32.mxu1 %vm9335_vm0, %v9336_v4 }
  0xfb   : > { %v2895_v25 = vmax.f32 %v1367_v20, %v2638_v23  ;;  %v1372_v26 = vadd.f32 %v9640_v62, %v1371_v24  ;;  %v7601_v27 = vpop.f32.mrb[9].mxu0  ;;  %7759 = vmatmul.mubr.msk.f32.gmra.mrb[114].mxu0 %vm513_vm1, %v303_v22  ;;  %v313_v20 = vld [vmem:[%s9419_s13 + $0x218] sm:$0xff] }
  0xfc   : > { %7761 = vmatprep.mubr.msk.f32.mxu0 %vm9335_vm0, %v9336_v4 }
  0xfd   : > { %v2639_v29 = vmul.f32 0.1, %v1372_v26  ;;  %8372 = vmatmul.mubr.msk.f32.gmra.mrb[6].mxu1 %vm3158_vm5, %v2895_v25 }
  0xfe   : > { %v1376_v30 = vpop.f32.mrb[10].mxu0  ;;  %8374 = vmatprep.mubr.msk.f32.mxu1 %vm9335_vm0, %v9336_v4 }
  0xff   : > { %v2896_v31 = vmax.f32 %v1372_v26, %v2639_v29  ;;  %v1377_v32 = vadd.f32 %v9640_v62, %v1376_v30  ;;  %v7604_v33 = vpop.f32.mrb[11].mxu0  ;;  %7762 = vmatmul.mubr.msk.f32.gmra.mrb[116].mxu0 %vm513_vm1, %v304_v28  ;;  %v314_v26 = vld [vmem:[%s9419_s13 + $0x220] sm:$0xff] }
 0x100   : > { %7764 = vmatprep.mubr.msk.f32.mxu0 %vm9335_vm0, %v9336_v4 }
 0x101   : > { %v2640_v35 = vmul.f32 0.1, %v1377_v32  ;;  %8375 = vmatmul.mubr.msk.f32.gmra.mrb[8].mxu1 %vm3158_vm5, %v2896_v31 }
 0x102   : > { %v1381_v36 = vpop.f32.mrb[12].mxu0  ;;  %8377 = vmatprep.mubr.msk.f32.mxu1 %vm9335_vm0, %v9336_v4 }
 0x103   : > { %v2897_v37 = vmax.f32 %v1377_v32, %v2640_v35  ;;  %v1382_v38 = vadd.f32 %v9640_v62, %v1381_v36  ;;  %v7607_v39 = vpop.f32.mrb[13].mxu0  ;;  %7765 = vmatmul.mubr.msk.f32.gmra.mrb[118].mxu0 %vm513_vm1, %v305_v34  ;;  %v315_v32 = vld [vmem:[%s9419_s13 + $0x228] sm:$0xff] }
 0x104   : > { %7767 = vmatprep.mubr.msk.f32.mxu0 %vm9335_vm0, %v9336_v4 }
 0x105   : > { %v2641_v41 = vmul.f32 0.1, %v1382_v38  ;;  %8378 = vmatmul.mubr.msk.f32.gmra.mrb[10].mxu1 %vm3158_vm5, %v2897_v37 }
 0x106   : > { %v1386_v42 = vpop.f32.mrb[14].mxu0  ;;  %8380 = vmatprep.mubr.msk.f32.mxu1 %vm9335_vm0, %v9336_v4 }
 0x107   : > { %v2898_v43 = vmax.f32 %v1382_v38, %v2641_v41  ;;  %v1387_v44 = vadd.f32 %v9640_v62, %v1386_v42  ;;  %v7610_v45 = vpop.f32.mrb[15].mxu0  ;;  %7768 = vmatmul.mubr.msk.f32.gmra.mrb[120].mxu0 %vm513_vm1, %v306_v40  ;;  %v316_v38 = vld [vmem:[%s9419_s13 + $0x230] sm:$0xff] }
 0x108   : > { %7770 = vmatprep.mubr.msk.f32.mxu0 %vm9335_vm0, %v9336_v4 }
 0x109   : > { %v2642_v47 = vmul.f32 0.1, %v1387_v44  ;;  %8381 = vmatmul.mubr.msk.f32.gmra.mrb[12].mxu1 %vm3158_vm5, %v2898_v43 }
 0x10a   : > { %v1391_v48 = vpop.f32.mrb[16].mxu0  ;;  %8383 = vmatprep.mubr.msk.f32.mxu1 %vm9335_vm0, %v9336_v4 }
 0x10b   : > { %v2899_v49 = vmax.f32 %v1387_v44, %v2642_v47  ;;  %v1392_v50 = vadd.f32 %v9640_v62, %v1391_v48  ;;  %v7613_v51 = vpop.f32.mrb[17].mxu0  ;;  %7771 = vmatmul.mubr.msk.f32.gmra.mrb[122].mxu0 %vm513_vm1, %v307_v46  ;;  %v317_v44 = vld [vmem:[%s9419_s13 + $0x238] sm:$0xff] }
 0x10c   : > { %7773 = vmatprep.mubr.msk.f32.mxu0 %vm9335_vm0, %v9336_v4 }
 0x10d   : > { %v2643_v53 = vmul.f32 0.1, %v1392_v50  ;;  %8384 = vmatmul.mubr.msk.f32.gmra.mrb[14].mxu1 %vm3158_vm5, %v2899_v49 }
 0x10e   : > { %v1396_v54 = vpop.f32.mrb[18].mxu0  ;;  %8386 = vmatprep.mubr.msk.f32.mxu1 %vm9335_vm0, %v9336_v4 }
 0x10f   : > { %v2900_v55 = vmax.f32 %v1392_v50, %v2643_v53  ;;  %v1397_v56 = vadd.f32 %v9640_v62, %v1396_v54  ;;  %v7616_v57 = vpop.f32.mrb[19].mxu0  ;;  %7774 = vmatmul.mubr.msk.f32.gmra.mrb[124].mxu0 %vm513_vm1, %v308_v52  ;;  %v318_v50 = vld [vmem:[%s9419_s13 + $0x240] sm:$0xff] }
 0x110   : > { %7776 = vmatprep.mubr.msk.f32.mxu0 %vm9335_vm0, %v9336_v4 }
 0x111   : > { %v2644_v59 = vmul.f32 0.1, %v1397_v56  ;;  %8387 = vmatmul.mubr.msk.f32.gmra.mrb[16].mxu1 %vm3158_vm5, %v2900_v55 }
 0x112   : > { %v1401_v60 = vpop.f32.mrb[20].mxu0  ;;  %8389 = vmatprep.mubr.msk.f32.mxu1 %vm9335_vm0, %v9336_v4 }
 0x113   : > { %v2901_v61 = vmax.f32 %v1397_v56, %v2644_v59  ;;  %v1402_v63 = vadd.f32 %v9640_v62, %v1401_v60  ;;  %v7619_v0 = vpop.f32.mrb[21].mxu0  ;;  %7777 = vmatmul.mubr.msk.f32.gmra.mrb[126].mxu0 %vm513_vm1, %v309_v58  ;;  %v319_v56 = vld [vmem:[%s9419_s13 + $0x248] sm:$0xff] }
 0x114   : > { %7779 = vmatprep.mubr.msk.f32.mxu0 %vm9335_vm0, %v9336_v4 }
 0x115   : > { %v2645_v2 = vmul.f32 0.1, %v1402_v63  ;;  %8390 = vmatmul.mubr.msk.f32.gmra.mrb[18].mxu1 %vm3158_vm5, %v2901_v61 }
 0x116   : > { %v1406_v3 = vpop.f32.mrb[22].mxu0  ;;  %8392 = vmatprep.mubr.msk.f32.mxu1 %vm9335_vm0, %v9336_v4 }
 0x117   : > { %v2902_v5 = vmax.f32 %v1402_v63, %v2645_v2  ;;  %v1407_v6 = vadd.f32 %v9640_v62, %v1406_v3  ;;  %v7622_v7 = vpop.f32.mrb[23].mxu0  ;;  %7780 = vmatmul.mubr.msk.f32.gmra.mrb[128].mxu0 %vm513_vm1, %v310_v1  ;;  %v320_v63 = vld [vmem:[%s9419_s13 + $0x250] sm:$0xff] }
 0x118   : > { %7782 = vmatprep.mubr.msk.f32.mxu0 %vm9335_vm0, %v9336_v4 }
 0x119   : > { %v2646_v9 = vmul.f32 0.1, %v1407_v6  ;;  %8393 = vmatmul.mubr.msk.f32.gmra.mrb[20].mxu1 %vm3158_vm5, %v2902_v5 }
 0x11a   : > { %v1411_v10 = vpop.f32.mrb[24].mxu0  ;;  %8395 = vmatprep.mubr.msk.f32.mxu1 %vm9335_vm0, %v9336_v4 }
 0x11b   : > { %v2903_v11 = vmax.f32 %v1407_v6, %v2646_v9  ;;  %v1412_v12 = vadd.f32 %v9640_v62, %v1411_v10  ;;  %v7625_v13 = vpop.f32.mrb[25].mxu0  ;;  %7783 = vmatmul.mubr.msk.f32.gmra.mrb[130].mxu0 %vm513_vm1, %v311_v8  ;;  %v321_v6 = vld [vmem:[%s9419_s13 + $0x258] sm:$0xff] }
 0x11c   : > { %7785 = vmatprep.mubr.msk.f32.mxu0 %vm9335_vm0, %v9336_v4 }
 0x11d   : > { %v2647_v15 = vmul.f32 0.1, %v1412_v12  ;;  %8396 = vmatmul.mubr.msk.f32.gmra.mrb[22].mxu1 %vm3158_vm5, %v2903_v11 }
 0x11e   : > { %v1416_v16 = vpop.f32.mrb[26].mxu0  ;;  %8398 = vmatprep.mubr.msk.f32.mxu1 %vm9335_vm0, %v9336_v4 }
 0x11f   : > { %v2904_v17 = vmax.f32 %v1412_v12, %v2647_v15  ;;  %v1417_v18 = vadd.f32 %v9640_v62, %v1416_v16  ;;  %v7628_v19 = vpop.f32.mrb[27].mxu0  ;;  %7786 = vmatmul.mubr.msk.f32.gmra.mrb[132].mxu0 %vm513_vm1, %v312_v14  ;;  %v322_v12 = vld [vmem:[%s9419_s13 + $0x260] sm:$0xff] }
 0x120   : > { %7788 = vmatprep.mubr.msk.f32.mxu0 %vm9335_vm0, %v9336_v4 }
 0x121   : > { %v2648_v21 = vmul.f32 0.1, %v1417_v18  ;;  %8399 = vmatmul.mubr.msk.f32.gmra.mrb[24].mxu1 %vm3158_vm5, %v2904_v17 }
 0x122   : > { %v1421_v22 = vpop.f32.mrb[28].mxu0  ;;  %8401 = vmatprep.mubr.msk.f32.mxu1 %vm9335_vm0, %v9336_v4 }
 0x123   : > { %v2905_v23 = vmax.f32 %v1417_v18, %v2648_v21  ;;  %v1422_v24 = vadd.f32 %v9640_v62, %v1421_v22  ;;  %v7631_v25 = vpop.f32.mrb[29].mxu0  ;;  %7789 = vmatmul.mubr.msk.f32.gmra.mrb[134].mxu0 %vm513_vm1, %v313_v20  ;;  %v323_v18 = vld [vmem:[%s9419_s13 + $0x268] sm:$0xff] }
 0x124   : > { %7791 = vmatprep.mubr.msk.f32.mxu0 %vm9335_vm0, %v9336_v4 }
 0x125   : > { %v2649_v27 = vmul.f32 0.1, %v1422_v24  ;;  %8402 = vmatmul.mubr.msk.f32.gmra.mrb[26].mxu1 %vm3158_vm5, %v2905_v23 }
 0x126   : > { %v1426_v28 = vpop.f32.mrb[30].mxu0  ;;  %8404 = vmatprep.mubr.msk.f32.mxu1 %vm9335_vm0, %v9336_v4 }
 0x127   : > { %v2906_v29 = vmax.f32 %v1422_v24, %v2649_v27  ;;  %v1427_v30 = vadd.f32 %v9640_v62, %v1426_v28  ;;  %v7634_v31 = vpop.f32.mrb[31].mxu0  ;;  %7792 = vmatmul.mubr.msk.f32.gmra.mrb[136].mxu0 %vm513_vm1, %v314_v26  ;;  %v324_v24 = vld [vmem:[%s9419_s13 + $0x270] sm:$0xff] }
 0x128   : > { %7794 = vmatprep.mubr.msk.f32.mxu0 %vm9335_vm0, %v9336_v4 }
 0x129   : > { %v2650_v33 = vmul.f32 0.1, %v1427_v30  ;;  %8405 = vmatmul.mubr.msk.f32.gmra.mrb[28].mxu1 %vm3158_vm5, %v2906_v29 }
 0x12a   : > { %v1431_v34 = vpop.f32.mrb[32].mxu0  ;;  %8407 = vmatprep.mubr.msk.f32.mxu1 %vm9335_vm0, %v9336_v4 }
 0x12b   : > { %v2907_v35 = vmax.f32 %v1427_v30, %v2650_v33  ;;  %v1432_v36 = vadd.f32 %v9640_v62, %v1431_v34  ;;  %v7637_v37 = vpop.f32.mrb[33].mxu0  ;;  %7795 = vmatmul.mubr.msk.f32.gmra.mrb[138].mxu0 %vm513_vm1, %v315_v32  ;;  %v325_v30 = vld [vmem:[%s9419_s13 + $0x278] sm:$0xff] }
 0x12c   : > { %7797 = vmatprep.mubr.msk.f32.mxu0 %vm9335_vm0, %v9336_v4 }
 0x12d   : > { %v2651_v39 = vmul.f32 0.1, %v1432_v36  ;;  %8408 = vmatmul.mubr.msk.f32.gmra.mrb[30].mxu1 %vm3158_vm5, %v2907_v35 }
 0x12e   : > { %v1436_v40 = vpop.f32.mrb[34].mxu0  ;;  %8410 = vmatprep.mubr.msk.f32.mxu1 %vm9335_vm0, %v9336_v4 }
 0x12f   : > { %v2908_v41 = vmax.f32 %v1432_v36, %v2651_v39  ;;  %v1437_v42 = vadd.f32 %v9640_v62, %v1436_v40  ;;  %v7640_v43 = vpop.f32.mrb[35].mxu0  ;;  %7798 = vmatmul.mubr.msk.f32.gmra.mrb[140].mxu0 %vm513_vm1, %v316_v38  ;;  %v326_v36 = vld [vmem:[%s9419_s13 + $0x280] sm:$0xff] }
 0x130   : > { %7800 = vmatprep.mubr.msk.f32.mxu0 %vm9335_vm0, %v9336_v4 }
 0x131   : > { %v2652_v45 = vmul.f32 0.1, %v1437_v42  ;;  %8411 = vmatmul.mubr.msk.f32.gmra.mrb[32].mxu1 %vm3158_vm5, %v2908_v41 }
 0x132   : > { %v1441_v46 = vpop.f32.mrb[36].mxu0  ;;  %8413 = vmatprep.mubr.msk.f32.mxu1 %vm9335_vm0, %v9336_v4 }
 0x133   : > { %v2909_v47 = vmax.f32 %v1437_v42, %v2652_v45  ;;  %v1442_v48 = vadd.f32 %v9640_v62, %v1441_v46  ;;  %v7643_v49 = vpop.f32.mrb[37].mxu0  ;;  %7801 = vmatmul.mubr.msk.f32.gmra.mrb[142].mxu0 %vm513_vm1, %v317_v44  ;;  %v327_v42 = vld [vmem:[%s9419_s13 + $0x288] sm:$0xff] }
 0x134   : > { %7803 = vmatprep.mubr.msk.f32.mxu0 %vm9335_vm0, %v9336_v4 }
 0x135   : > { %v2653_v51 = vmul.f32 0.1, %v1442_v48  ;;  %8414 = vmatmul.mubr.msk.f32.gmra.mrb[34].mxu1 %vm3158_vm5, %v2909_v47 }
 0x136   : > { %v1446_v52 = vpop.f32.mrb[38].mxu0  ;;  %8416 = vmatprep.mubr.msk.f32.mxu1 %vm9335_vm0, %v9336_v4 }
 0x137   : > { %v2910_v53 = vmax.f32 %v1442_v48, %v2653_v51  ;;  %v1447_v54 = vadd.f32 %v9640_v62, %v1446_v52  ;;  %v7646_v55 = vpop.f32.mrb[39].mxu0  ;;  %7804 = vmatmul.mubr.msk.f32.gmra.mrb[144].mxu0 %vm513_vm1, %v318_v50  ;;  %v328_v48 = vld [vmem:[%s9419_s13 + $0x290] sm:$0xff] }
 0x138   : > { %7806 = vmatprep.mubr.msk.f32.mxu0 %vm9335_vm0, %v9336_v4 }
 0x139   : > { %v2654_v57 = vmul.f32 0.1, %v1447_v54  ;;  %8417 = vmatmul.mubr.msk.f32.gmra.mrb[36].mxu1 %vm3158_vm5, %v2910_v53 }
 0x13a   : > { %v1451_v58 = vpop.f32.mrb[40].mxu0  ;;  %8419 = vmatprep.mubr.msk.f32.mxu1 %vm9335_vm0, %v9336_v4 }
 0x13b   : > { %v2911_v59 = vmax.f32 %v1447_v54, %v2654_v57  ;;  %v1452_v60 = vadd.f32 %v9640_v62, %v1451_v58  ;;  %v7649_v61 = vpop.f32.mrb[41].mxu0  ;;  %7807 = vmatmul.mubr.msk.f32.gmra.mrb[146].mxu0 %vm513_vm1, %v319_v56  ;;  %v329_v54 = vld [vmem:[%s9419_s13 + $0x298] sm:$0xff] }
 0x13c   : > { %7809 = vmatprep.mubr.msk.f32.mxu0 %vm9335_vm0, %v9336_v4 }
 0x13d   : > { %v2655_v0 = vmul.f32 0.1, %v1452_v60  ;;  %8420 = vmatmul.mubr.msk.f32.gmra.mrb[38].mxu1 %vm3158_vm5, %v2911_v59 }
 0x13e   : > { %v1456_v1 = vpop.f32.mrb[42].mxu0  ;;  %8422 = vmatprep.mubr.msk.f32.mxu1 %vm9335_vm0, %v9336_v4 }
 0x13f   : > { %v2912_v2 = vmax.f32 %v1452_v60, %v2655_v0  ;;  %v1457_v3 = vadd.f32 %v9640_v62, %v1456_v1  ;;  %v7652_v5 = vpop.f32.mrb[43].mxu0  ;;  %7810 = vmatmul.mubr.msk.f32.gmra.mrb[148].mxu0 %vm513_vm1, %v320_v63  ;;  %v330_v60 = vld [vmem:[%s9419_s13 + $0x2a0] sm:$0xff] }
 0x140   : > { %7812 = vmatprep.mubr.msk.f32.mxu0 %vm9335_vm0, %v9336_v4 }
 0x141   : > { %v2656_v7 = vmul.f32 0.1, %v1457_v3  ;;  %8423 = vmatmul.mubr.msk.f32.gmra.mrb[40].mxu1 %vm3158_vm5, %v2912_v2 }
 0x142   : > { %v1461_v8 = vpop.f32.mrb[44].mxu0  ;;  %8425 = vmatprep.mubr.msk.f32.mxu1 %vm9335_vm0, %v9336_v4 }
 0x143   : > { %v2913_v9 = vmax.f32 %v1457_v3, %v2656_v7  ;;  %v1462_v10 = vadd.f32 %v9640_v62, %v1461_v8  ;;  %v7655_v11 = vpop.f32.mrb[45].mxu0  ;;  %7813 = vmatmul.mubr.msk.f32.gmra.mrb[150].mxu0 %vm513_vm1, %v321_v6  ;;  %v331_v3 = vld [vmem:[%s9419_s13 + $0x2a8] sm:$0xff] }
 0x144   : > { %7815 = vmatprep.mubr.msk.f32.mxu0 %vm9335_vm0, %v9336_v4 }
 0x145   : > { %v2657_v13 = vmul.f32 0.1, %v1462_v10  ;;  %8426 = vmatmul.mubr.msk.f32.gmra.mrb[42].mxu1 %vm3158_vm5, %v2913_v9 }
 0x146   : > { %v1466_v14 = vpop.f32.mrb[46].mxu0  ;;  %8428 = vmatprep.mubr.msk.f32.mxu1 %vm9335_vm0, %v9336_v4 }
 0x147   : > { %v2914_v15 = vmax.f32 %v1462_v10, %v2657_v13  ;;  %v1467_v16 = vadd.f32 %v9640_v62, %v1466_v14  ;;  %v7658_v17 = vpop.f32.mrb[47].mxu0  ;;  %7816 = vmatmul.mubr.msk.f32.gmra.mrb[152].mxu0 %vm513_vm1, %v322_v12  ;;  %v332_v10 = vld [vmem:[%s9419_s13 + $0x2b0] sm:$0xff] }
 0x148   : > { %7818 = vmatprep.mubr.msk.f32.mxu0 %vm9335_vm0, %v9336_v4 }
 0x149   : > { %v2658_v19 = vmul.f32 0.1, %v1467_v16  ;;  %8429 = vmatmul.mubr.msk.f32.gmra.mrb[44].mxu1 %vm3158_vm5, %v2914_v15 }
 0x14a   : > { %v1471_v20 = vpop.f32.mrb[48].mxu0  ;;  %8431 = vmatprep.mubr.msk.f32.mxu1 %vm9335_vm0, %v9336_v4 }
 0x14b   : > { %v2915_v21 = vmax.f32 %v1467_v16, %v2658_v19  ;;  %v1472_v22 = vadd.f32 %v9640_v62, %v1471_v20  ;;  %v7661_v23 = vpop.f32.mrb[49].mxu0  ;;  %7819 = vmatmul.mubr.msk.f32.gmra.mrb[154].mxu0 %vm513_vm1, %v323_v18  ;;  %v333_v16 = vld [vmem:[%s9419_s13 + $0x2b8] sm:$0xff] }
 0x14c   : > { %7821 = vmatprep.mubr.msk.f32.mxu0 %vm9335_vm0, %v9336_v4 }
 0x14d   : > { %v2659_v25 = vmul.f32 0.1, %v1472_v22  ;;  %8432 = vmatmul.mubr.msk.f32.gmra.mrb[46].mxu1 %vm3158_vm5, %v2915_v21 }
 0x14e   : > { %v1476_v26 = vpop.f32.mrb[50].mxu0  ;;  %8434 = vmatprep.mubr.msk.f32.mxu1 %vm9335_vm0, %v9336_v4 }
 0x14f   : > { %v2916_v27 = vmax.f32 %v1472_v22, %v2659_v25  ;;  %v1477_v28 = vadd.f32 %v9640_v62, %v1476_v26  ;;  %v7664_v29 = vpop.f32.mrb[51].mxu0  ;;  %7822 = vmatmul.mubr.msk.f32.gmra.mrb[156].mxu0 %vm513_vm1, %v324_v24  ;;  %v334_v22 = vld [vmem:[%s9419_s13 + $0x2c0] sm:$0xff] }
 0x150   : > { %7824 = vmatprep.mubr.msk.f32.mxu0 %vm9335_vm0, %v9336_v4 }
 0x151   : > { %v2660_v31 = vmul.f32 0.1, %v1477_v28  ;;  %8435 = vmatmul.mubr.msk.f32.gmra.mrb[48].mxu1 %vm3158_vm5, %v2916_v27 }
 0x152   : > { %v1481_v32 = vpop.f32.mrb[52].mxu0  ;;  %8437 = vmatprep.mubr.msk.f32.mxu1 %vm9335_vm0, %v9336_v4 }
 0x153   : > { %v2917_v33 = vmax.f32 %v1477_v28, %v2660_v31  ;;  %v1482_v34 = vadd.f32 %v9640_v62, %v1481_v32  ;;  %v7667_v35 = vpop.f32.mrb[53].mxu0  ;;  %7825 = vmatmul.mubr.msk.f32.gmra.mrb[158].mxu0 %vm513_vm1, %v325_v30  ;;  %v335_v28 = vld [vmem:[%s9419_s13 + $0x2c8] sm:$0xff] }
 0x154   : > { %7827 = vmatprep.mubr.msk.f32.mxu0 %vm9335_vm0, %v9336_v4 }
 0x155   : > { %v2661_v37 = vmul.f32 0.1, %v1482_v34  ;;  %8438 = vmatmul.mubr.msk.f32.gmra.mrb[50].mxu1 %vm3158_vm5, %v2917_v33 }
 0x156   : > { %v1486_v38 = vpop.f32.mrb[54].mxu0  ;;  %8440 = vmatprep.mubr.msk.f32.mxu1 %vm9335_vm0, %v9336_v4 }
 0x157   : > { %v2918_v39 = vmax.f32 %v1482_v34, %v2661_v37  ;;  %v1487_v40 = vadd.f32 %v9640_v62, %v1486_v38  ;;  %v7670_v41 = vpop.f32.mrb[55].mxu0  ;;  %7828 = vmatmul.mubr.msk.f32.gmra.mrb[160].mxu0 %vm513_vm1, %v326_v36  ;;  %v336_v34 = vld [vmem:[%s9419_s13 + $0x2d0] sm:$0xff] }
 0x158   : > { %7830 = vmatprep.mubr.msk.f32.mxu0 %vm9335_vm0, %v9336_v4 }
 0x159   : > { %v2662_v43 = vmul.f32 0.1, %v1487_v40  ;;  %8441 = vmatmul.mubr.msk.f32.gmra.mrb[52].mxu1 %vm3158_vm5, %v2918_v39 }
 0x15a   : > { %v1491_v44 = vpop.f32.mrb[56].mxu0  ;;  %8443 = vmatprep.mubr.msk.f32.mxu1 %vm9335_vm0, %v9336_v4 }
 0x15b   : > { %v2919_v45 = vmax.f32 %v1487_v40, %v2662_v43  ;;  %v1492_v46 = vadd.f32 %v9640_v62, %v1491_v44  ;;  %v7673_v47 = vpop.f32.mrb[57].mxu0  ;;  %7831 = vmatmul.mubr.msk.f32.gmra.mrb[162].mxu0 %vm513_vm1, %v327_v42  ;;  %v337_v40 = vld [vmem:[%s9419_s13 + $0x2d8] sm:$0xff] }
 0x15c   : > { %7833 = vmatprep.mubr.msk.f32.mxu0 %vm9335_vm0, %v9336_v4 }
 0x15d   : > { %v2663_v49 = vmul.f32 0.1, %v1492_v46  ;;  %8444 = vmatmul.mubr.msk.f32.gmra.mrb[54].mxu1 %vm3158_vm5, %v2919_v45 }
 0x15e   : > { %v1496_v50 = vpop.f32.mrb[58].mxu0  ;;  %8446 = vmatprep.mubr.msk.f32.mxu1 %vm9335_vm0, %v9336_v4 }
 0x15f   : > { %v2920_v51 = vmax.f32 %v1492_v46, %v2663_v49  ;;  %v1497_v52 = vadd.f32 %v9640_v62, %v1496_v50  ;;  %v7676_v53 = vpop.f32.mrb[59].mxu0  ;;  %7834 = vmatmul.mubr.msk.f32.gmra.mrb[164].mxu0 %vm513_vm1, %v328_v48  ;;  %v338_v46 = vld [vmem:[%s9419_s13 + $0x2e0] sm:$0xff] }
 0x160   : > { %7836 = vmatprep.mubr.msk.f32.mxu0 %vm9335_vm0, %v9336_v4 }
 0x161   : > { %v2664_v55 = vmul.f32 0.1, %v1497_v52  ;;  %8447 = vmatmul.mubr.msk.f32.gmra.mrb[56].mxu1 %vm3158_vm5, %v2920_v51 }
 0x162   : > { %v1501_v56 = vpop.f32.mrb[60].mxu0  ;;  %8449 = vmatprep.mubr.msk.f32.mxu1 %vm9335_vm0, %v9336_v4 }
 0x163   : > { %v2921_v57 = vmax.f32 %v1497_v52, %v2664_v55  ;;  %v1502_v58 = vadd.f32 %v9640_v62, %v1501_v56  ;;  %v7679_v59 = vpop.f32.mrb[61].mxu0  ;;  %7837 = vmatmul.mubr.msk.f32.gmra.mrb[166].mxu0 %vm513_vm1, %v329_v54  ;;  %v339_v52 = vld [vmem:[%s9419_s13 + $0x2e8] sm:$0xff] }
 0x164   : > { %7839 = vmatprep.mubr.msk.f32.mxu0 %vm9335_vm0, %v9336_v4 }
 0x165   : > { %v2665_v61 = vmul.f32 0.1, %v1502_v58  ;;  %8450 = vmatmul.mubr.msk.f32.gmra.mrb[58].mxu1 %vm3158_vm5, %v2921_v57 }
 0x166   : > { %v1506_v63 = vpop.f32.mrb[62].mxu0  ;;  %8452 = vmatprep.mubr.msk.f32.mxu1 %vm9335_vm0, %v9336_v4 }
 0x167   : > { %v2922_v0 = vmax.f32 %v1502_v58, %v2665_v61  ;;  %v1507_v1 = vadd.f32 %v9640_v62, %v1506_v63  ;;  %v7682_v2 = vpop.f32.mrb[63].mxu0  ;;  %7840 = vmatmul.mubr.msk.f32.gmra.mrb[168].mxu0 %vm513_vm1, %v330_v60  ;;  %v340_v58 = vld [vmem:[%s9419_s13 + $0x2f0] sm:$0xff] }
 0x168   : > { %7842 = vmatprep.mubr.msk.f32.mxu0 %vm9335_vm0, %v9336_v4 }
 0x169   : > { %v2666_v5 = vmul.f32 0.1, %v1507_v1  ;;  %8453 = vmatmul.mubr.msk.f32.gmra.mrb[60].mxu1 %vm3158_vm5, %v2922_v0 }
 0x16a   : > { %v1511_v6 = vpop.f32.mrb[64].mxu0  ;;  %8455 = vmatprep.mubr.msk.f32.mxu1 %vm9335_vm0, %v9336_v4 }
 0x16b   : > { %v2923_v7 = vmax.f32 %v1507_v1, %v2666_v5  ;;  %v1512_v8 = vadd.f32 %v9640_v62, %v1511_v6  ;;  %v7685_v9 = vpop.f32.mrb[65].mxu0  ;;  %7843 = vmatmul.mubr.msk.f32.gmra.mrb[170].mxu0 %vm513_vm1, %v331_v3  ;;  %v341_v1 = vld [vmem:[%s9419_s13 + $0x2f8] sm:$0xff] }
 0x16c   : > { %7845 = vmatprep.mubr.msk.f32.mxu0 %vm9335_vm0, %v9336_v4 }
 0x16d   : > { %v2667_v11 = vmul.f32 0.1, %v1512_v8  ;;  %8456 = vmatmul.mubr.msk.f32.gmra.mrb[62].mxu1 %vm3158_vm5, %v2923_v7 }
 0x16e   : > { %v1516_v12 = vpop.f32.mrb[66].mxu0  ;;  %8458 = vmatprep.mubr.msk.f32.mxu1 %vm9335_vm0, %v9336_v4 }
 0x16f   : > { %v2924_v13 = vmax.f32 %v1512_v8, %v2667_v11  ;;  %v1517_v14 = vadd.f32 %v9640_v62, %v1516_v12  ;;  %v7688_v15 = vpop.f32.mrb[67].mxu0  ;;  %7846 = vmatmul.mubr.msk.f32.gmra.mrb[172].mxu0 %vm513_vm1, %v332_v10  ;;  %v342_v8 = vld [vmem:[%s9419_s13 + $0x300] sm:$0xff] }
 0x170   : > { %7848 = vmatprep.mubr.msk.f32.mxu0 %vm9335_vm0, %v9336_v4 }
 0x171   : > { %v2668_v17 = vmul.f32 0.1, %v1517_v14  ;;  %8459 = vmatmul.mubr.msk.f32.gmra.mrb[64].mxu1 %vm3158_vm5, %v2924_v13 }
 0x172   : > { %v1521_v18 = vpop.f32.mrb[68].mxu0  ;;  %8461 = vmatprep.mubr.msk.f32.mxu1 %vm9335_vm0, %v9336_v4 }
 0x173   : > { %v2925_v19 = vmax.f32 %v1517_v14, %v2668_v17  ;;  %v1522_v20 = vadd.f32 %v9640_v62, %v1521_v18  ;;  %v7691_v21 = vpop.f32.mrb[69].mxu0  ;;  %7849 = vmatmul.mubr.msk.f32.gmra.mrb[174].mxu0 %vm513_vm1, %v333_v16  ;;  %v343_v14 = vld [vmem:[%s9419_s13 + $0x308] sm:$0xff] }
 0x174   : > { %7851 = vmatprep.mubr.msk.f32.mxu0 %vm9335_vm0, %v9336_v4 }
 0x175   : > { %v2669_v23 = vmul.f32 0.1, %v1522_v20  ;;  %8462 = vmatmul.mubr.msk.f32.gmra.mrb[66].mxu1 %vm3158_vm5, %v2925_v19 }
 0x176   : > { %v1526_v24 = vpop.f32.mrb[70].mxu0  ;;  %8464 = vmatprep.mubr.msk.f32.mxu1 %vm9335_vm0, %v9336_v4 }
 0x177   : > { %v2926_v25 = vmax.f32 %v1522_v20, %v2669_v23  ;;  %v1527_v26 = vadd.f32 %v9640_v62, %v1526_v24  ;;  %v7694_v27 = vpop.f32.mrb[71].mxu0  ;;  %7852 = vmatmul.mubr.msk.f32.gmra.mrb[176].mxu0 %vm513_vm1, %v334_v22  ;;  %v344_v20 = vld [vmem:[%s9419_s13 + $0x310] sm:$0xff] }
 0x178   : > { %7854 = vmatprep.mubr.msk.f32.mxu0 %vm9335_vm0, %v9336_v4 }
 0x179   : > { %v2670_v29 = vmul.f32 0.1, %v1527_v26  ;;  %8465 = vmatmul.mubr.msk.f32.gmra.mrb[68].mxu1 %vm3158_vm5, %v2926_v25 }
 0x17a   : > { %v1531_v30 = vpop.f32.mrb[72].mxu0  ;;  %8467 = vmatprep.mubr.msk.f32.mxu1 %vm9335_vm0, %v9336_v4 }
 0x17b   : > { %v2927_v31 = vmax.f32 %v1527_v26, %v2670_v29  ;;  %v1532_v32 = vadd.f32 %v9640_v62, %v1531_v30  ;;  %v7697_v33 = vpop.f32.mrb[73].mxu0  ;;  %7855 = vmatmul.mubr.msk.f32.gmra.mrb[178].mxu0 %vm513_vm1, %v335_v28  ;;  %v345_v26 = vld [vmem:[%s9419_s13 + $0x318] sm:$0xff] }
 0x17c   : > { %7857 = vmatprep.mubr.msk.f32.mxu0 %vm9335_vm0, %v9336_v4 }
 0x17d   : > { %v2671_v35 = vmul.f32 0.1, %v1532_v32  ;;  %8468 = vmatmul.mubr.msk.f32.gmra.mrb[70].mxu1 %vm3158_vm5, %v2927_v31 }
 0x17e   : > { %v1536_v36 = vpop.f32.mrb[74].mxu0  ;;  %8470 = vmatprep.mubr.msk.f32.mxu1 %vm9335_vm0, %v9336_v4 }
 0x17f   : > { %v2928_v37 = vmax.f32 %v1532_v32, %v2671_v35  ;;  %v1537_v38 = vadd.f32 %v9640_v62, %v1536_v36  ;;  %v7700_v39 = vpop.f32.mrb[75].mxu0  ;;  %7858 = vmatmul.mubr.msk.f32.gmra.mrb[180].mxu0 %vm513_vm1, %v336_v34  ;;  %v346_v32 = vld [vmem:[%s9419_s13 + $0x320] sm:$0xff] }
 0x180   : > { %7860 = vmatprep.mubr.msk.f32.mxu0 %vm9335_vm0, %v9336_v4 }
 0x181   : > { %v2672_v41 = vmul.f32 0.1, %v1537_v38  ;;  %8471 = vmatmul.mubr.msk.f32.gmra.mrb[72].mxu1 %vm3158_vm5, %v2928_v37 }
 0x182   : > { %v1541_v42 = vpop.f32.mrb[76].mxu0  ;;  %8473 = vmatprep.mubr.msk.f32.mxu1 %vm9335_vm0, %v9336_v4 }
 0x183   : > { %v2929_v43 = vmax.f32 %v1537_v38, %v2672_v41  ;;  %v1542_v44 = vadd.f32 %v9640_v62, %v1541_v42  ;;  %v7703_v45 = vpop.f32.mrb[77].mxu0  ;;  %7861 = vmatmul.mubr.msk.f32.gmra.mrb[182].mxu0 %vm513_vm1, %v337_v40  ;;  %v347_v38 = vld [vmem:[%s9419_s13 + $0x328] sm:$0xff] }
 0x184   : > { %7863 = vmatprep.mubr.msk.f32.mxu0 %vm9335_vm0, %v9336_v4 }
 0x185   : > { %v2673_v47 = vmul.f32 0.1, %v1542_v44  ;;  %8474 = vmatmul.mubr.msk.f32.gmra.mrb[74].mxu1 %vm3158_vm5, %v2929_v43 }
 0x186   : > { %v1546_v48 = vpop.f32.mrb[78].mxu0  ;;  %8476 = vmatprep.mubr.msk.f32.mxu1 %vm9335_vm0, %v9336_v4 }
 0x187   : > { %v2930_v49 = vmax.f32 %v1542_v44, %v2673_v47  ;;  %v1547_v50 = vadd.f32 %v9640_v62, %v1546_v48  ;;  %v7706_v51 = vpop.f32.mrb[79].mxu0  ;;  %7864 = vmatmul.mubr.msk.f32.gmra.mrb[184].mxu0 %vm513_vm1, %v338_v46  ;;  %v348_v44 = vld [vmem:[%s9419_s13 + $0x330] sm:$0xff] }
 0x188   : > { %7866 = vmatprep.mubr.msk.f32.mxu0 %vm9335_vm0, %v9336_v4 }
 0x189   : > { %v2674_v53 = vmul.f32 0.1, %v1547_v50  ;;  %8477 = vmatmul.mubr.msk.f32.gmra.mrb[76].mxu1 %vm3158_vm5, %v2930_v49 }
 0x18a   : > { %v1551_v54 = vpop.f32.mrb[80].mxu0  ;;  %8479 = vmatprep.mubr.msk.f32.mxu1 %vm9335_vm0, %v9336_v4 }
 0x18b   : > { %v2931_v55 = vmax.f32 %v1547_v50, %v2674_v53  ;;  %v1552_v56 = vadd.f32 %v9640_v62, %v1551_v54  ;;  %v7709_v57 = vpop.f32.mrb[81].mxu0  ;;  %7867 = vmatmul.mubr.msk.f32.gmra.mrb[186].mxu0 %vm513_vm1, %v339_v52  ;;  %v349_v50 = vld [vmem:[%s9419_s13 + $0x338] sm:$0xff] }
 0x18c   : > { %7869 = vmatprep.mubr.msk.f32.mxu0 %vm9335_vm0, %v9336_v4 }
 0x18d   : > { %v2675_v59 = vmul.f32 0.1, %v1552_v56  ;;  %8480 = vmatmul.mubr.msk.f32.gmra.mrb[78].mxu1 %vm3158_vm5, %v2931_v55 }
 0x18e   : > { %v1556_v60 = vpop.f32.mrb[82].mxu0  ;;  %8482 = vmatprep.mubr.msk.f32.mxu1 %vm9335_vm0, %v9336_v4 }
 0x18f   : > { %v2932_v61 = vmax.f32 %v1552_v56, %v2675_v59  ;;  %v1557_v63 = vadd.f32 %v9640_v62, %v1556_v60  ;;  %v7712_v0 = vpop.f32.mrb[83].mxu0  ;;  %7870 = vmatmul.mubr.msk.f32.gmra.mrb[188].mxu0 %vm513_vm1, %v340_v58  ;;  %v350_v56 = vld [vmem:[%s9419_s13 + $0x340] sm:$0xff] }
 0x190   : > { %7872 = vmatprep.mubr.msk.f32.mxu0 %vm9335_vm0, %v9336_v4 }
 0x191   : > { %v2676_v2 = vmul.f32 0.1, %v1557_v63  ;;  %8483 = vmatmul.mubr.msk.f32.gmra.mrb[80].mxu1 %vm3158_vm5, %v2932_v61 }
 0x192   : > { %v1561_v3 = vpop.f32.mrb[84].mxu0  ;;  %8485 = vmatprep.mubr.msk.f32.mxu1 %vm9335_vm0, %v9336_v4 }
 0x193   : > { %v2933_v5 = vmax.f32 %v1557_v63, %v2676_v2  ;;  %v1562_v6 = vadd.f32 %v9640_v62, %v1561_v3  ;;  %v7715_v7 = vpop.f32.mrb[85].mxu0  ;;  %7873 = vmatmul.mubr.msk.f32.gmra.mrb[190].mxu0 %vm513_vm1, %v341_v1  ;;  %v351_v63 = vld [vmem:[%s9419_s13 + $0x348] sm:$0xff] }
 0x194   : > { %7875 = vmatprep.mubr.msk.f32.mxu0 %vm9335_vm0, %v9336_v4 }
 0x195   : > { %v2677_v9 = vmul.f32 0.1, %v1562_v6  ;;  %8486 = vmatmul.mubr.msk.f32.gmra.mrb[82].mxu1 %vm3158_vm5, %v2933_v5 }
 0x196   : > { %v1566_v10 = vpop.f32.mrb[86].mxu0  ;;  %8488 = vmatprep.mubr.msk.f32.mxu1 %vm9335_vm0, %v9336_v4 }
 0x197   : > { %v2934_v11 = vmax.f32 %v1562_v6, %v2677_v9  ;;  %v1567_v12 = vadd.f32 %v9640_v62, %v1566_v10  ;;  %v7718_v13 = vpop.f32.mrb[87].mxu0  ;;  %7876 = vmatmul.mubr.msk.f32.gmra.mrb[192].mxu0 %vm513_vm1, %v342_v8  ;;  %v352_v6 = vld [vmem:[%s9419_s13 + $0x350] sm:$0xff] }
 0x198   : > { %7878 = vmatprep.mubr.msk.f32.mxu0 %vm9335_vm0, %v9336_v4 }
 0x199   : > { %v2678_v15 = vmul.f32 0.1, %v1567_v12  ;;  %8489 = vmatmul.mubr.msk.f32.gmra.mrb[84].mxu1 %vm3158_vm5, %v2934_v11 }
 0x19a   : > { %v1571_v16 = vpop.f32.mrb[88].mxu0  ;;  %8491 = vmatprep.mubr.msk.f32.mxu1 %vm9335_vm0, %v9336_v4 }
 0x19b   : > { %v2935_v17 = vmax.f32 %v1567_v12, %v2678_v15  ;;  %v1572_v18 = vadd.f32 %v9640_v62, %v1571_v16  ;;  %v7721_v19 = vpop.f32.mrb[89].mxu0  ;;  %7879 = vmatmul.mubr.msk.f32.gmra.mrb[194].mxu0 %vm513_vm1, %v343_v14  ;;  %v353_v12 = vld [vmem:[%s9419_s13 + $0x358] sm:$0xff]  ;;  %v10081_v15 = vld [vmem:[%s12533_s4] ss:$0 sm:$0xff] }
 0x19c   : > { %7881 = vmatprep.mubr.msk.f32.mxu0 %vm9335_vm0, %v9336_v4 }
 0x19d   : > { %v2679_v21 = vmul.f32 0.1, %v1572_v18  ;;  %8492 = vmatmul.mubr.msk.f32.gmra.mrb[86].mxu1 %vm3158_vm5, %v2935_v17 }
 0x19e   : > { %v1576_v22 = vpop.f32.mrb[90].mxu0  ;;  %8494 = vmatprep.mubr.msk.f32.mxu1 %vm9335_vm0, %v9336_v4 }
 0x19f   : > { %v2936_v23 = vmax.f32 %v1572_v18, %v2679_v21  ;;  %v1577_v24 = vadd.f32 %v9640_v62, %v1576_v22  ;;  %v7724_v25 = vpop.f32.mrb[91].mxu0  ;;  %7882 = vmatmul.mubr.msk.f32.gmra.mrb[196].mxu0 %vm513_vm1, %v344_v20  ;;  %v354_v20 = vld [vmem:[%s9419_s13 + $0x360] sm:$0xff] }
 0x1a0   : > { %7884 = vmatprep.mubr.msk.f32.mxu0 %vm9335_vm0, %v9336_v4 }
 0x1a1   : > { %v2680_v27 = vmul.f32 0.1, %v1577_v24  ;;  %8495 = vmatmul.mubr.msk.f32.gmra.mrb[88].mxu1 %vm3158_vm5, %v2936_v23 }
 0x1a2   : > { %v1581_v28 = vpop.f32.mrb[92].mxu0  ;;  %8497 = vmatprep.mubr.msk.f32.mxu1 %vm9335_vm0, %v9336_v4 }
 0x1a3   : > { %v2937_v29 = vmax.f32 %v1577_v24, %v2680_v27  ;;  %v1582_v30 = vadd.f32 %v9640_v62, %v1581_v28  ;;  %v7727_v31 = vpop.f32.mrb[93].mxu0  ;;  %7885 = vmatmul.mubr.msk.f32.gmra.mrb[198].mxu0 %vm513_vm1, %v345_v26 }
 0x1a4   : > { %7887 = vmatprep.mubr.msk.f32.mxu0 %vm9335_vm0, %v9336_v4 }
 0x1a5   : > { %v2681_v33 = vmul.f32 0.1, %v1582_v30  ;;  %8498 = vmatmul.mubr.msk.f32.gmra.mrb[90].mxu1 %vm3158_vm5, %v2937_v29 }
 0x1a6   : > { %v1586_v34 = vpop.f32.mrb[94].mxu0  ;;  %8500 = vmatprep.mubr.msk.f32.mxu1 %vm9335_vm0, %v9336_v4 }
 0x1a7   : > { %v2938_v35 = vmax.f32 %v1582_v30, %v2681_v33  ;;  %v1587_v36 = vadd.f32 %v9640_v62, %v1586_v34  ;;  %v7730_v37 = vpop.f32.mrb[95].mxu0  ;;  %7888 = vmatmul.mubr.msk.f32.gmra.mrb[200].mxu0 %vm513_vm1, %v346_v32  ;;  %v355_v30 = vld [vmem:[%s9419_s13 + $0x368] sm:$0xff] }
 0x1a8   : > { %7890 = vmatprep.mubr.msk.f32.mxu0 %vm9335_vm0, %v9336_v4 }
 0x1a9   : > { %v2682_v39 = vmul.f32 0.1, %v1587_v36  ;;  %8501 = vmatmul.mubr.msk.f32.gmra.mrb[92].mxu1 %vm3158_vm5, %v2938_v35 }
 0x1aa   : > { %v1591_v40 = vpop.f32.mrb[96].mxu0  ;;  %8503 = vmatprep.mubr.msk.f32.mxu1 %vm9335_vm0, %v9336_v4 }
 0x1ab   : > { %v2939_v41 = vmax.f32 %v1587_v36, %v2682_v39  ;;  %v1592_v42 = vadd.f32 %v9640_v62, %v1591_v40  ;;  %v7733_v43 = vpop.f32.mrb[97].mxu0  ;;  %7891 = vmatmul.mubr.msk.f32.gmra.mrb[202].mxu0 %vm513_vm1, %v347_v38 }
 0x1ac   : > { %7893 = vmatprep.mubr.msk.f32.mxu0 %vm9335_vm0, %v9336_v4 }
 0x1ad   : > { %v2683_v45 = vmul.f32 0.1, %v1592_v42  ;;  %8504 = vmatmul.mubr.msk.f32.gmra.mrb[94].mxu1 %vm3158_vm5, %v2939_v41  ;;  %v356_v41 = vld [vmem:[%s9419_s13 + $0x370] sm:$0xff] }
 0x1ae   : > { %v1596_v46 = vpop.f32.mrb[98].mxu0  ;;  %8506 = vmatprep.mubr.msk.f32.mxu1 %vm9335_vm0, %v9336_v4 }
 0x1af   : > { %v2940_v47 = vmax.f32 %v1592_v42, %v2683_v45  ;;  %v1597_v48 = vadd.f32 %v9640_v62, %v1596_v46  ;;  %v7736_v49 = vpop.f32.mrb[99].mxu0  ;;  %7894 = vmatmul.mubr.msk.f32.gmra.mrb[204].mxu0 %vm513_vm1, %v348_v44 }
 0x1b0   : > { %7896 = vmatprep.mubr.msk.f32.mxu0 %vm9335_vm0, %v9336_v4 }
 0x1b1   : > { %v2684_v51 = vmul.f32 0.1, %v1597_v48  ;;  %8507 = vmatmul.mubr.msk.f32.gmra.mrb[96].mxu1 %vm3158_vm5, %v2940_v47 }
 0x1b2   : > { %v1601_v52 = vpop.f32.mrb[100].mxu0  ;;  %8509 = vmatprep.mubr.msk.f32.mxu1 %vm9335_vm0, %v9336_v4 }
 0x1b3   : > { %v2941_v53 = vmax.f32 %v1597_v48, %v2684_v51  ;;  %v1602_v54 = vadd.f32 %v9640_v62, %v1601_v52  ;;  %v7739_v55 = vpop.f32.mrb[101].mxu0  ;;  %7897 = vmatmul.mubr.msk.f32.gmra.mrb[206].mxu0 %vm513_vm1, %v349_v50  ;;  %v10053_v62 = vld [vmem:[%s12531_s2] ss:$0 sm:$0xff]  ;;  %v357_v52 = vld [vmem:[%s9419_s13 + $0x378] sm:$0xff] }
 0x1b4   : > { %7899 = vmatprep.mubr.msk.f32.mxu0 %vm9335_vm0, %v9336_v4 }
 0x1b5   : > { %v2685_v57 = vmul.f32 0.1, %v1602_v54  ;;  %8510 = vmatmul.mubr.msk.f32.gmra.mrb[98].mxu1 %vm3158_vm5, %v2941_v53 }
 0x1b6   : > { %v1606_v58 = vpop.f32.mrb[102].mxu0  ;;  %8512 = vmatprep.mubr.msk.f32.mxu1 %vm9335_vm0, %v9336_v4 }
 0x1b7   : > { %v2942_v59 = vmax.f32 %v1602_v54, %v2685_v57  ;;  %v1607_v60 = vadd.f32 %v10053_v62, %v1606_v58  ;;  %v7742_v61 = vpop.f32.mrb[103].mxu0  ;;  %7900 = vmatmul.mubr.msk.f32.gmra.mrb[208].mxu0 %vm513_vm1, %v350_v56 }
 0x1b8   : > { %7902 = vmatprep.mubr.msk.f32.mxu0 %vm9335_vm0, %v9336_v4 }
 0x1b9   : > { %v2686_v0 = vmul.f32 0.1, %v1607_v60  ;;  %8513 = vmatmul.mubr.msk.f32.gmra.mrb[100].mxu1 %vm3158_vm5, %v2942_v59 }
 0x1ba   : > { %v1611_v1 = vpop.f32.mrb[104].mxu0  ;;  %8515 = vmatprep.mubr.msk.f32.mxu1 %vm9335_vm0, %v9336_v4 }
 0x1bb   : > { %v2943_v2 = vmax.f32 %v1607_v60, %v2686_v0  ;;  %v1612_v3 = vadd.f32 %v10053_v62, %v1611_v1  ;;  %v7745_v5 = vpop.f32.mrb[105].mxu0  ;;  %7903 = vmatmul.mubr.msk.f32.gmra.mrb[210].mxu0 %vm513_vm1, %v351_v63  ;;  %v358_v0 = vld [vmem:[%s9419_s13 + $0x380] sm:$0xff] }
 0x1bc   : > { %7905 = vmatprep.mubr.msk.f32.mxu0 %vm9335_vm0, %v9336_v4 }
 0x1bd   : > { %v2687_v7 = vmul.f32 0.1, %v1612_v3  ;;  %8516 = vmatmul.mubr.msk.f32.gmra.mrb[102].mxu1 %vm3158_vm5, %v2943_v2 }
 0x1be   : > { %v1616_v8 = vpop.f32.mrb[106].mxu0  ;;  %8518 = vmatprep.mubr.msk.f32.mxu1 %vm9335_vm0, %v9336_v4 }
 0x1bf   : > { %v2944_v9 = vmax.f32 %v1612_v3, %v2687_v7  ;;  %v1617_v10 = vadd.f32 %v10053_v62, %v1616_v8  ;;  %v7748_v11 = vpop.f32.mrb[107].mxu0  ;;  %7906 = vmatmul.mubr.msk.f32.gmra.mrb[212].mxu0 %vm513_vm1, %v352_v6 }
 0x1c0   : > { %7908 = vmatprep.mubr.msk.f32.mxu0 %vm9335_vm0, %v9336_v4 }
 0x1c1   : > { %v2688_v13 = vmul.f32 0.1, %v1617_v10  ;;  %8519 = vmatmul.mubr.msk.f32.gmra.mrb[104].mxu1 %vm3158_vm5, %v2944_v9 }
 0x1c2   : > { %v1621_v14 = vpop.f32.mrb[108].mxu0  ;;  %8521 = vmatprep.mubr.msk.f32.mxu1 %vm9335_vm0, %v9336_v4 }
 0x1c3   : > { %v2945_v16 = vmax.f32 %v1617_v10, %v2688_v13  ;;  %v1622_v17 = vadd.f32 %v10053_v62, %v1621_v14  ;;  %v7751_v18 = vpop.f32.mrb[109].mxu0  ;;  %7909 = vmatmul.mubr.msk.f32.gmra.mrb[214].mxu0 %vm513_vm1, %v353_v12  ;;  %v359_v12 = vld [vmem:[%s9419_s13 + $0x388] sm:$0xff] }
 0x1c4   : > { %v4000_v19 = vpop.f32.mrb[0].mxu1  ;;  %7911 = vmatprep.mubr.msk.f32.mxu0 %vm9335_vm0, %v9336_v4 }
 0x1c5   : > { %v2689_v21 = vmul.f32 0.1, %v1622_v17  ;;  %v4001_v22 = vadd.f32 %v10081_v15, %v4000_v19  ;;  %v8364_v23 = vpop.f32.mrb[1].mxu1  ;;  %8522 = vmatmul.mubr.msk.f32.gmra.mrb[106].mxu1 %vm3158_vm5, %v2945_v16 }
 0x1c6   : > { %v1626_v24 = vpop.f32.mrb[110].mxu0  ;;  %8524 = vmatprep.mubr.msk.f32.mxu1 %vm9335_vm0, %v9336_v4 }
 0x1c7   : > { %v2946_v25 = vmax.f32 %v1622_v17, %v2689_v21  ;;  %v5284_v26 = vmul.f32 0.1, %v4001_v22  ;;  %v1627_v27 = vadd.f32 %v10053_v62, %v1626_v24  ;;  %v7754_v28 = vpop.f32.mrb[111].mxu0  ;;  %7912 = vmatmul.mubr.msk.f32.gmra.mrb[216].mxu0 %vm513_vm1, %v354_v20  ;;  %v360_v24 = vld [vmem:[%s9419_s13 + $0x390] sm:$0xff] }
 0x1c8   : > { %v4005_v29 = vpop.f32.mrb[2].mxu1  ;;  %7914 = vmatprep.mubr.msk.f32.mxu0 %vm9335_vm0, %v9336_v4 }
 0x1c9   : > { %v5541_v31 = vmax.f32 %v4001_v22, %v5284_v26  ;;  %v2690_v32 = vmul.f32 0.1, %v1627_v27  ;;  %v4006_v33 = vadd.f32 %v10081_v15, %v4005_v29  ;;  %v8367_v34 = vpop.f32.mrb[3].mxu1  ;;  %8525 = vmatmul.mubr.msk.f32.gmra.mrb[108].mxu1 %vm3158_vm5, %v2946_v25 }
 0x1ca   : > { %v1631_v35 = vpop.f32.mrb[112].mxu0  ;;  %8527 = vmatprep.mubr.msk.f32.mxu1 %vm9335_vm0, %v9336_v4 }
 0x1cb   : > { %5798 = vst.msk [vmem:[%s10103_s18] sm:$0xff] %vm3158_vm5, %v5541_v31  ;;  %v2947_v36 = vmax.f32 %v1627_v27, %v2690_v32  ;;  %v5285_v37 = vmul.f32 0.1, %v4006_v33  ;;  %v1632_v38 = vadd.f32 %v10053_v62, %v1631_v35  ;;  %v7757_v39 = vpop.f32.mrb[113].mxu0  ;;  %7915 = vmatmul.mubr.msk.f32.gmra.mrb[218].mxu0 %vm513_vm1, %v355_v30  ;;  %v361_v35 = vld [vmem:[%s9419_s13 + $0x398] sm:$0xff] }
 0x1cc   : > { %v4010_v40 = vpop.f32.mrb[4].mxu1  ;;  %7917 = vmatprep.mubr.msk.f32.mxu0 %vm9335_vm0, %v9336_v4 }
 0x1cd   : > { %v5542_v42 = vmax.f32 %v4006_v33, %v5285_v37  ;;  %v2691_v43 = vmul.f32 0.1, %v1632_v38  ;;  %v4011_v44 = vadd.f32 %v10081_v15, %v4010_v40  ;;  %v8370_v45 = vpop.f32.mrb[5].mxu1  ;;  %8528 = vmatmul.mubr.msk.f32.gmra.mrb[110].mxu1 %vm3158_vm5, %v2947_v36 }
 0x1ce   : > { %v1636_v46 = vpop.f32.mrb[114].mxu0  ;;  %8530 = vmatprep.mubr.msk.f32.mxu1 %vm9335_vm0, %v9336_v4 }
 0x1cf   : > { %5799 = vst.msk [vmem:[%s10103_s18 + $0x8] sm:$0xff] %vm3158_vm5, %v5542_v42  ;;  %v2948_v47 = vmax.f32 %v1632_v38, %v2691_v43  ;;  %v5286_v48 = vmul.f32 0.1, %v4011_v44  ;;  %v1637_v49 = vadd.f32 %v10053_v62, %v1636_v46  ;;  %v7760_v50 = vpop.f32.mrb[115].mxu0  ;;  %7918 = vmatmul.mubr.msk.f32.gmra.mrb[220].mxu0 %vm513_vm1, %v356_v41  ;;  %v362_v46 = vld [vmem:[%s9419_s13 + $0x3a0] sm:$0xff] }
 0x1d0   : > { %v4015_v51 = vpop.f32.mrb[6].mxu1  ;;  %7920 = vmatprep.mubr.msk.f32.mxu0 %vm9335_vm0, %v9336_v4 }
 0x1d1   : > { %v5543_v53 = vmax.f32 %v4011_v44, %v5286_v48  ;;  %v2692_v54 = vmul.f32 0.1, %v1637_v49  ;;  %v4016_v55 = vadd.f32 %v10081_v15, %v4015_v51  ;;  %v8373_v56 = vpop.f32.mrb[7].mxu1  ;;  %8531 = vmatmul.mubr.msk.f32.gmra.mrb[112].mxu1 %vm3158_vm5, %v2948_v47 }
 0x1d2   : > { %v1641_v57 = vpop.f32.mrb[116].mxu0  ;;  %8533 = vmatprep.mubr.msk.f32.mxu1 %vm9335_vm0, %v9336_v4 }
 0x1d3   : > { %5800 = vst.msk [vmem:[%s10103_s18 + $0x10] sm:$0xff] %vm3158_vm5, %v5543_v53  ;;  %v2949_v58 = vmax.f32 %v1637_v49, %v2692_v54  ;;  %v5287_v59 = vmul.f32 0.1, %v4016_v55  ;;  %v1642_v60 = vadd.f32 %v10053_v62, %v1641_v57  ;;  %v7763_v61 = vpop.f32.mrb[117].mxu0  ;;  %7921 = vmatmul.mubr.msk.f32.gmra.mrb[222].mxu0 %vm513_vm1, %v357_v52  ;;  %v363_v57 = vld [vmem:[%s9419_s13 + $0x3a8] sm:$0xff] }
 0x1d4   : > { %v4020_v63 = vpop.f32.mrb[8].mxu1  ;;  %7923 = vmatprep.mubr.msk.f32.mxu0 %vm9335_vm0, %v9336_v4 }
 0x1d5   : > { %v5544_v1 = vmax.f32 %v4016_v55, %v5287_v59  ;;  %v2693_v2 = vmul.f32 0.1, %v1642_v60  ;;  %v4021_v3 = vadd.f32 %v10081_v15, %v4020_v63  ;;  %v8376_v5 = vpop.f32.mrb[9].mxu1  ;;  %8534 = vmatmul.mubr.msk.f32.gmra.mrb[114].mxu1 %vm3158_vm5, %v2949_v58 }
 0x1d6   : > { %v1646_v6 = vpop.f32.mrb[118].mxu0  ;;  %8536 = vmatprep.mubr.msk.f32.mxu1 %vm9335_vm0, %v9336_v4 }
 0x1d7   : > { %5801 = vst.msk [vmem:[%s10103_s18 + $0x18] sm:$0xff] %vm3158_vm5, %v5544_v1  ;;  %v2950_v7 = vmax.f32 %v1642_v60, %v2693_v2  ;;  %v5288_v8 = vmul.f32 0.1, %v4021_v3  ;;  %v1647_v9 = vadd.f32 %v10053_v62, %v1646_v6  ;;  %v7766_v10 = vpop.f32.mrb[119].mxu0  ;;  %7924 = vmatmul.mubr.msk.f32.gmra.mrb[224].mxu0 %vm513_vm1, %v358_v0  ;;  %v364_v6 = vld [vmem:[%s9419_s13 + $0x3b0] sm:$0xff] }
 0x1d8   : > { %v4025_v11 = vpop.f32.mrb[10].mxu1  ;;  %7926 = vmatprep.mubr.msk.f32.mxu0 %vm9335_vm0, %v9336_v4 }
 0x1d9   : > { %v5545_v13 = vmax.f32 %v4021_v3, %v5288_v8  ;;  %v2694_v14 = vmul.f32 0.1, %v1647_v9  ;;  %v4026_v16 = vadd.f32 %v10081_v15, %v4025_v11  ;;  %v8379_v17 = vpop.f32.mrb[11].mxu1  ;;  %8537 = vmatmul.mubr.msk.f32.gmra.mrb[116].mxu1 %vm3158_vm5, %v2950_v7 }
 0x1da   : > { %v1651_v18 = vpop.f32.mrb[120].mxu0  ;;  %8539 = vmatprep.mubr.msk.f32.mxu1 %vm9335_vm0, %v9336_v4 }
 0x1db   : > { %5802 = vst.msk [vmem:[%s10103_s18 + $0x20] sm:$0xff] %vm3158_vm5, %v5545_v13  ;;  %v2951_v19 = vmax.f32 %v1647_v9, %v2694_v14  ;;  %v5289_v20 = vmul.f32 0.1, %v4026_v16  ;;  %v1652_v21 = vadd.f32 %v10053_v62, %v1651_v18  ;;  %v7769_v22 = vpop.f32.mrb[121].mxu0  ;;  %7927 = vmatmul.mubr.msk.f32.gmra.mrb[226].mxu0 %vm513_vm1, %v359_v12  ;;  %v365_v18 = vld [vmem:[%s9419_s13 + $0x3b8] sm:$0xff] }
 0x1dc   : > { %v4030_v23 = vpop.f32.mrb[12].mxu1  ;;  %7929 = vmatprep.mubr.msk.f32.mxu0 %vm9335_vm0, %v9336_v4 }
 0x1dd   : > { %v5546_v25 = vmax.f32 %v4026_v16, %v5289_v20  ;;  %v2695_v26 = vmul.f32 0.1, %v1652_v21  ;;  %v4031_v27 = vadd.f32 %v10081_v15, %v4030_v23  ;;  %v8382_v28 = vpop.f32.mrb[13].mxu1  ;;  %8540 = vmatmul.mubr.msk.f32.gmra.mrb[118].mxu1 %vm3158_vm5, %v2951_v19 }
 0x1de   : > { %v1656_v29 = vpop.f32.mrb[122].mxu0  ;;  %8542 = vmatprep.mubr.msk.f32.mxu1 %vm9335_vm0, %v9336_v4 }
 0x1df   : > { %5803 = vst.msk [vmem:[%s10103_s18 + $0x28] sm:$0xff] %vm3158_vm5, %v5546_v25  ;;  %v2952_v30 = vmax.f32 %v1652_v21, %v2695_v26  ;;  %v5290_v31 = vmul.f32 0.1, %v4031_v27  ;;  %v1657_v32 = vadd.f32 %v10053_v62, %v1656_v29  ;;  %v7772_v33 = vpop.f32.mrb[123].mxu0  ;;  %7930 = vmatmul.mubr.msk.f32.gmra.mrb[228].mxu0 %vm513_vm1, %v360_v24  ;;  %v366_v29 = vld [vmem:[%s9419_s13 + $0x3c0] sm:$0xff] }
 0x1e0   : > { %v4035_v34 = vpop.f32.mrb[14].mxu1  ;;  %7932 = vmatprep.mubr.msk.f32.mxu0 %vm9335_vm0, %v9336_v4 }
 0x1e1   : > { %v5547_v36 = vmax.f32 %v4031_v27, %v5290_v31  ;;  %v2696_v37 = vmul.f32 0.1, %v1657_v32  ;;  %v4036_v38 = vadd.f32 %v10081_v15, %v4035_v34  ;;  %v8385_v39 = vpop.f32.mrb[15].mxu1  ;;  %8543 = vmatmul.mubr.msk.f32.gmra.mrb[120].mxu1 %vm3158_vm5, %v2952_v30 }
 0x1e2   : > { %v1661_v40 = vpop.f32.mrb[124].mxu0  ;;  %8545 = vmatprep.mubr.msk.f32.mxu1 %vm9335_vm0, %v9336_v4 }
 0x1e3   : > { %5804 = vst.msk [vmem:[%s10103_s18 + $0x30] sm:$0xff] %vm3158_vm5, %v5547_v36  ;;  %v2953_v41 = vmax.f32 %v1657_v32, %v2696_v37  ;;  %v5291_v42 = vmul.f32 0.1, %v4036_v38  ;;  %v1662_v43 = vadd.f32 %v10053_v62, %v1661_v40  ;;  %v7775_v44 = vpop.f32.mrb[125].mxu0  ;;  %7933 = vmatmul.mubr.msk.f32.gmra.mrb[230].mxu0 %vm513_vm1, %v361_v35  ;;  %v367_v40 = vld [vmem:[%s9419_s13 + $0x3c8] sm:$0xff] }
 0x1e4   : > { %v4040_v45 = vpop.f32.mrb[16].mxu1  ;;  %7935 = vmatprep.mubr.msk.f32.mxu0 %vm9335_vm0, %v9336_v4 }
 0x1e5   : > { %v5548_v47 = vmax.f32 %v4036_v38, %v5291_v42  ;;  %v2697_v48 = vmul.f32 0.1, %v1662_v43  ;;  %v4041_v49 = vadd.f32 %v10081_v15, %v4040_v45  ;;  %v8388_v50 = vpop.f32.mrb[17].mxu1  ;;  %8546 = vmatmul.mubr.msk.f32.gmra.mrb[122].mxu1 %vm3158_vm5, %v2953_v41 }
 0x1e6   : > { %v1666_v51 = vpop.f32.mrb[126].mxu0  ;;  %8548 = vmatprep.mubr.msk.f32.mxu1 %vm9335_vm0, %v9336_v4 }
 0x1e7   : > { %5805 = vst.msk [vmem:[%s10103_s18 + $0x38] sm:$0xff] %vm3158_vm5, %v5548_v47  ;;  %v2954_v52 = vmax.f32 %v1662_v43, %v2697_v48  ;;  %v5292_v53 = vmul.f32 0.1, %v4041_v49  ;;  %v1667_v54 = vadd.f32 %v10053_v62, %v1666_v51  ;;  %v7778_v55 = vpop.f32.mrb[127].mxu0  ;;  %7936 = vmatmul.mubr.msk.f32.gmra.mrb[232].mxu0 %vm513_vm1, %v362_v46  ;;  %v368_v51 = vld [vmem:[%s9419_s13 + $0x3d0] sm:$0xff] }
 0x1e8   : > { %v4045_v56 = vpop.f32.mrb[18].mxu1  ;;  %7938 = vmatprep.mubr.msk.f32.mxu0 %vm9335_vm0, %v9336_v4 }
 0x1e9   : > { %v5549_v58 = vmax.f32 %v4041_v49, %v5292_v53  ;;  %v2698_v59 = vmul.f32 0.1, %v1667_v54  ;;  %v4046_v60 = vadd.f32 %v10081_v15, %v4045_v56  ;;  %v8391_v61 = vpop.f32.mrb[19].mxu1  ;;  %8549 = vmatmul.mubr.msk.f32.gmra.mrb[124].mxu1 %vm3158_vm5, %v2954_v52 }
 0x1ea   : > { %v1671_v63 = vpop.f32.mrb[128].mxu0  ;;  %8551 = vmatprep.mubr.msk.f32.mxu1 %vm9335_vm0, %v9336_v4 }
 0x1eb   : > { %5806 = vst.msk [vmem:[%s10103_s18 + $0x40] sm:$0xff] %vm3158_vm5, %v5549_v58  ;;  %v2955_v0 = vmax.f32 %v1667_v54, %v2698_v59  ;;  %v5293_v1 = vmul.f32 0.1, %v4046_v60  ;;  %v1672_v2 = vadd.f32 %v10053_v62, %v1671_v63  ;;  %v7781_v3 = vpop.f32.mrb[129].mxu0  ;;  %7939 = vmatmul.mubr.msk.f32.gmra.mrb[234].mxu0 %vm513_vm1, %v363_v57  ;;  %v369_v63 = vld [vmem:[%s9419_s13 + $0x3d8] sm:$0xff] }
 0x1ec   : > { %v4050_v5 = vpop.f32.mrb[20].mxu1  ;;  %7941 = vmatprep.mubr.msk.f32.mxu0 %vm9335_vm0, %v9336_v4 }
 0x1ed   : > { %v5550_v7 = vmax.f32 %v4046_v60, %v5293_v1  ;;  %v2699_v8 = vmul.f32 0.1, %v1672_v2  ;;  %v4051_v9 = vadd.f32 %v10081_v15, %v4050_v5  ;;  %v8394_v10 = vpop.f32.mrb[21].mxu1  ;;  %8552 = vmatmul.mubr.msk.f32.gmra.mrb[126].mxu1 %vm3158_vm5, %v2955_v0 }
 0x1ee   : > { %v1676_v11 = vpop.f32.mrb[130].mxu0  ;;  %8554 = vmatprep.mubr.msk.f32.mxu1 %vm9335_vm0, %v9336_v4 }
 0x1ef   : > { %5807 = vst.msk [vmem:[%s10103_s18 + $0x48] sm:$0xff] %vm3158_vm5, %v5550_v7  ;;  %v2956_v12 = vmax.f32 %v1672_v2, %v2699_v8  ;;  %v5294_v13 = vmul.f32 0.1, %v4051_v9  ;;  %v1677_v14 = vadd.f32 %v10053_v62, %v1676_v11  ;;  %v7784_v16 = vpop.f32.mrb[131].mxu0  ;;  %7942 = vmatmul.mubr.msk.f32.gmra.mrb[236].mxu0 %vm513_vm1, %v364_v6  ;;  %v370_v11 = vld [vmem:[%s9419_s13 + $0x3e0] sm:$0xff] }
 0x1f0   : > { %v4055_v17 = vpop.f32.mrb[22].mxu1  ;;  %7944 = vmatprep.mubr.msk.f32.mxu0 %vm9335_vm0, %v9336_v4 }
 0x1f1   : > { %v5551_v19 = vmax.f32 %v4051_v9, %v5294_v13  ;;  %v2700_v20 = vmul.f32 0.1, %v1677_v14  ;;  %v4056_v21 = vadd.f32 %v10081_v15, %v4055_v17  ;;  %v8397_v22 = vpop.f32.mrb[23].mxu1  ;;  %8555 = vmatmul.mubr.msk.f32.gmra.mrb[128].mxu1 %vm3158_vm5, %v2956_v12 }
 0x1f2   : > { %v1681_v23 = vpop.f32.mrb[132].mxu0  ;;  %8557 = vmatprep.mubr.msk.f32.mxu1 %vm9335_vm0, %v9336_v4 }
 0x1f3   : > { %5808 = vst.msk [vmem:[%s10103_s18 + $0x50] sm:$0xff] %vm3158_vm5, %v5551_v19  ;;  %v2957_v24 = vmax.f32 %v1677_v14, %v2700_v20  ;;  %v5295_v25 = vmul.f32 0.1, %v4056_v21  ;;  %v1682_v26 = vadd.f32 %v10053_v62, %v1681_v23  ;;  %v7787_v27 = vpop.f32.mrb[133].mxu0  ;;  %7945 = vmatmul.mubr.msk.f32.gmra.mrb[238].mxu0 %vm513_vm1, %v365_v18  ;;  %v371_v23 = vld [vmem:[%s9419_s13 + $0x3e8] sm:$0xff] }
 0x1f4   : > { %v4060_v28 = vpop.f32.mrb[24].mxu1  ;;  %7947 = vmatprep.mubr.msk.f32.mxu0 %vm9335_vm0, %v9336_v4 }
 0x1f5   : > { %v5552_v30 = vmax.f32 %v4056_v21, %v5295_v25  ;;  %v2701_v31 = vmul.f32 0.1, %v1682_v26  ;;  %v4061_v32 = vadd.f32 %v10081_v15, %v4060_v28  ;;  %v8400_v33 = vpop.f32.mrb[25].mxu1  ;;  %8558 = vmatmul.mubr.msk.f32.gmra.mrb[130].mxu1 %vm3158_vm5, %v2957_v24 }
 0x1f6   : > { %v1686_v34 = vpop.f32.mrb[134].mxu0  ;;  %8560 = vmatprep.mubr.msk.f32.mxu1 %vm9335_vm0, %v9336_v4 }
 0x1f7   : > { %5809 = vst.msk [vmem:[%s10103_s18 + $0x58] sm:$0xff] %vm3158_vm5, %v5552_v30  ;;  %v2958_v35 = vmax.f32 %v1682_v26, %v2701_v31  ;;  %v5296_v36 = vmul.f32 0.1, %v4061_v32  ;;  %v1687_v37 = vadd.f32 %v10053_v62, %v1686_v34  ;;  %v7790_v38 = vpop.f32.mrb[135].mxu0  ;;  %7948 = vmatmul.mubr.msk.f32.gmra.mrb[240].mxu0 %vm513_vm1, %v366_v29  ;;  %v372_v34 = vld [vmem:[%s9419_s13 + $0x3f0] sm:$0xff] }
 0x1f8   : > { %v4065_v39 = vpop.f32.mrb[26].mxu1  ;;  %7950 = vmatprep.mubr.msk.f32.mxu0 %vm9335_vm0, %v9336_v4 }
 0x1f9   : > { %v5553_v41 = vmax.f32 %v4061_v32, %v5296_v36  ;;  %v2702_v42 = vmul.f32 0.1, %v1687_v37  ;;  %v4066_v43 = vadd.f32 %v10081_v15, %v4065_v39  ;;  %v8403_v44 = vpop.f32.mrb[27].mxu1  ;;  %8561 = vmatmul.mubr.msk.f32.gmra.mrb[132].mxu1 %vm3158_vm5, %v2958_v35 }
 0x1fa   : > { %v1691_v45 = vpop.f32.mrb[136].mxu0  ;;  %8563 = vmatprep.mubr.msk.f32.mxu1 %vm9335_vm0, %v9336_v4 }
 0x1fb   : > { %5810 = vst.msk [vmem:[%s10103_s18 + $0x60] sm:$0xff] %vm3158_vm5, %v5553_v41  ;;  %v2959_v46 = vmax.f32 %v1687_v37, %v2702_v42  ;;  %v5297_v47 = vmul.f32 0.1, %v4066_v43  ;;  %v1692_v48 = vadd.f32 %v10053_v62, %v1691_v45  ;;  %v7793_v49 = vpop.f32.mrb[137].mxu0  ;;  %7951 = vmatmul.mubr.msk.f32.gmra.mrb[242].mxu0 %vm513_vm1, %v367_v40  ;;  %v373_v45 = vld [vmem:[%s9419_s13 + $0x3f8] sm:$0xff] }
 0x1fc   : > { %v4070_v50 = vpop.f32.mrb[28].mxu1  ;;  %7953 = vmatprep.mubr.msk.f32.mxu0 %vm9335_vm0, %v9336_v4 }
 0x1fd   : > { %v5554_v52 = vmax.f32 %v4066_v43, %v5297_v47  ;;  %v2703_v53 = vmul.f32 0.1, %v1692_v48  ;;  %v4071_v54 = vadd.f32 %v10081_v15, %v4070_v50  ;;  %v8406_v55 = vpop.f32.mrb[29].mxu1  ;;  %8564 = vmatmul.mubr.msk.f32.gmra.mrb[134].mxu1 %vm3158_vm5, %v2959_v46 }
 0x1fe   : > { %v1696_v56 = vpop.f32.mrb[138].mxu0  ;;  %8566 = vmatprep.mubr.msk.f32.mxu1 %vm9335_vm0, %v9336_v4 }
 0x1ff   : > { %5811 = vst.msk [vmem:[%s10103_s18 + $0x68] sm:$0xff] %vm3158_vm5, %v5554_v52  ;;  %v2960_v57 = vmax.f32 %v1692_v48, %v2703_v53  ;;  %v5298_v58 = vmul.f32 0.1, %v4071_v54  ;;  %v1697_v59 = vadd.f32 %v10053_v62, %v1696_v56  ;;  %v7796_v60 = vpop.f32.mrb[139].mxu0  ;;  %7954 = vmatmul.mubr.msk.f32.gmra.mrb[244].mxu0 %vm513_vm1, %v368_v51  ;;  %v374_v56 = vld [vmem:[%s9419_s13 + $0x400] sm:$0xff] }
 0x200   : > { %v4075_v61 = vpop.f32.mrb[30].mxu1  ;;  %7956 = vmatprep.mubr.msk.f32.mxu0 %vm9335_vm0, %v9336_v4 }
 0x201   : > { %v5555_v0 = vmax.f32 %v4071_v54, %v5298_v58  ;;  %v2704_v1 = vmul.f32 0.1, %v1697_v59  ;;  %v4076_v2 = vadd.f32 %v10081_v15, %v4075_v61  ;;  %v8409_v3 = vpop.f32.mrb[31].mxu1  ;;  %8567 = vmatmul.mubr.msk.f32.gmra.mrb[136].mxu1 %vm3158_vm5, %v2960_v57 }
 0x202   : > { %v1701_v5 = vpop.f32.mrb[140].mxu0  ;;  %8569 = vmatprep.mubr.msk.f32.mxu1 %vm9335_vm0, %v9336_v4 }
 0x203   : > { %5812 = vst.msk [vmem:[%s10103_s18 + $0x70] sm:$0xff] %vm3158_vm5, %v5555_v0  ;;  %v2961_v6 = vmax.f32 %v1697_v59, %v2704_v1  ;;  %v5299_v7 = vmul.f32 0.1, %v4076_v2  ;;  %v1702_v8 = vadd.f32 %v10053_v62, %v1701_v5  ;;  %v7799_v9 = vpop.f32.mrb[141].mxu0  ;;  %7957 = vmatmul.mubr.msk.f32.gmra.mrb[246].mxu0 %vm513_vm1, %v369_v63  ;;  %v375_v5 = vld [vmem:[%s9419_s13 + $0x408] sm:$0xff] }
 0x204   : > { %v4080_v10 = vpop.f32.mrb[32].mxu1  ;;  %7959 = vmatprep.mubr.msk.f32.mxu0 %vm9335_vm0, %v9336_v4 }
 0x205   : > { %v5556_v12 = vmax.f32 %v4076_v2, %v5299_v7  ;;  %v2705_v13 = vmul.f32 0.1, %v1702_v8  ;;  %v4081_v14 = vadd.f32 %v10081_v15, %v4080_v10  ;;  %v8412_v16 = vpop.f32.mrb[33].mxu1  ;;  %8570 = vmatmul.mubr.msk.f32.gmra.mrb[138].mxu1 %vm3158_vm5, %v2961_v6 }
 0x206   : > { %v1706_v17 = vpop.f32.mrb[142].mxu0  ;;  %8572 = vmatprep.mubr.msk.f32.mxu1 %vm9335_vm0, %v9336_v4 }
 0x207   : > { %5813 = vst.msk [vmem:[%s10103_s18 + $0x78] sm:$0xff] %vm3158_vm5, %v5556_v12  ;;  %v2962_v18 = vmax.f32 %v1702_v8, %v2705_v13  ;;  %v5300_v19 = vmul.f32 0.1, %v4081_v14  ;;  %v1707_v20 = vadd.f32 %v10053_v62, %v1706_v17  ;;  %v7802_v21 = vpop.f32.mrb[143].mxu0  ;;  %7960 = vmatmul.mubr.msk.f32.gmra.mrb[248].mxu0 %vm513_vm1, %v370_v11  ;;  %v376_v17 = vld [vmem:[%s9419_s13 + $0x410] sm:$0xff] }
 0x208   : > { %v4085_v22 = vpop.f32.mrb[34].mxu1  ;;  %7962 = vmatprep.mubr.msk.f32.mxu0 %vm9335_vm0, %v9336_v4 }
 0x209   : > { %v5557_v24 = vmax.f32 %v4081_v14, %v5300_v19  ;;  %v2706_v25 = vmul.f32 0.1, %v1707_v20  ;;  %v4086_v26 = vadd.f32 %v10081_v15, %v4085_v22  ;;  %v8415_v27 = vpop.f32.mrb[35].mxu1  ;;  %8573 = vmatmul.mubr.msk.f32.gmra.mrb[140].mxu1 %vm3158_vm5, %v2962_v18 }
 0x20a   : > { %v1711_v28 = vpop.f32.mrb[144].mxu0  ;;  %8575 = vmatprep.mubr.msk.f32.mxu1 %vm9335_vm0, %v9336_v4 }
 0x20b   : > { %5814 = vst.msk [vmem:[%s10103_s18 + $0x80] sm:$0xff] %vm3158_vm5, %v5557_v24  ;;  %v2963_v29 = vmax.f32 %v1707_v20, %v2706_v25  ;;  %v5301_v30 = vmul.f32 0.1, %v4086_v26  ;;  %v1712_v31 = vadd.f32 %v10053_v62, %v1711_v28  ;;  %v7805_v32 = vpop.f32.mrb[145].mxu0  ;;  %7963 = vmatmul.mubr.msk.f32.gmra.mrb[250].mxu0 %vm513_vm1, %v371_v23  ;;  %v377_v28 = vld [vmem:[%s9419_s13 + $0x418] sm:$0xff] }
 0x20c   : > { %v4090_v33 = vpop.f32.mrb[36].mxu1  ;;  %7965 = vmatprep.mubr.msk.f32.mxu0 %vm9335_vm0, %v9336_v4 }
 0x20d   : > { %v5558_v35 = vmax.f32 %v4086_v26, %v5301_v30  ;;  %v2707_v36 = vmul.f32 0.1, %v1712_v31  ;;  %v4091_v37 = vadd.f32 %v10081_v15, %v4090_v33  ;;  %v8418_v38 = vpop.f32.mrb[37].mxu1  ;;  %8576 = vmatmul.mubr.msk.f32.gmra.mrb[142].mxu1 %vm3158_vm5, %v2963_v29 }
 0x20e   : > { %v1716_v39 = vpop.f32.mrb[146].mxu0  ;;  %8578 = vmatprep.mubr.msk.f32.mxu1 %vm9335_vm0, %v9336_v4 }
 0x20f   : > { %5815 = vst.msk [vmem:[%s10103_s18 + $0x88] sm:$0xff] %vm3158_vm5, %v5558_v35  ;;  %v2964_v40 = vmax.f32 %v1712_v31, %v2707_v36  ;;  %v5302_v41 = vmul.f32 0.1, %v4091_v37  ;;  %v1717_v42 = vadd.f32 %v10053_v62, %v1716_v39  ;;  %v7808_v43 = vpop.f32.mrb[147].mxu0  ;;  %7966 = vmatmul.mubr.msk.f32.gmra.mrb[252].mxu0 %vm513_vm1, %v372_v34  ;;  %v378_v39 = vld [vmem:[%s9419_s13 + $0x420] sm:$0xff] }
 0x210   : > { %v4095_v44 = vpop.f32.mrb[38].mxu1  ;;  %7968 = vmatprep.mubr.msk.f32.mxu0 %vm9335_vm0, %v9336_v4 }
 0x211   : > { %v5559_v46 = vmax.f32 %v4091_v37, %v5302_v41  ;;  %v2708_v47 = vmul.f32 0.1, %v1717_v42  ;;  %v4096_v48 = vadd.f32 %v10081_v15, %v4095_v44  ;;  %v8421_v49 = vpop.f32.mrb[39].mxu1  ;;  %8579 = vmatmul.mubr.msk.f32.gmra.mrb[144].mxu1 %vm3158_vm5, %v2964_v40 }
 0x212   : > { %v1721_v50 = vpop.f32.mrb[148].mxu0  ;;  %8581 = vmatprep.mubr.msk.f32.mxu1 %vm9335_vm0, %v9336_v4 }
 0x213   : > { %5816 = vst.msk [vmem:[%s10103_s18 + $0x90] sm:$0xff] %vm3158_vm5, %v5559_v46  ;;  %v2965_v51 = vmax.f32 %v1717_v42, %v2708_v47  ;;  %v5303_v52 = vmul.f32 0.1, %v4096_v48  ;;  %v1722_v53 = vadd.f32 %v10053_v62, %v1721_v50  ;;  %v7811_v54 = vpop.f32.mrb[149].mxu0  ;;  %7969 = vmatmul.mubr.msk.f32.gmra.mrb[254].mxu0 %vm513_vm1, %v373_v45  ;;  %v379_v50 = vld [vmem:[%s9419_s13 + $0x428] sm:$0xff] }
 0x214   : > { %v4100_v55 = vpop.f32.mrb[40].mxu1  ;;  %7971 = vmatprep.mubr.msk.f32.mxu0 %vm9335_vm0, %v9336_v4 }
 0x215   : > { %v5560_v57 = vmax.f32 %v4096_v48, %v5303_v52  ;;  %v2709_v58 = vmul.f32 0.1, %v1722_v53  ;;  %v4101_v59 = vadd.f32 %v10081_v15, %v4100_v55  ;;  %v8424_v60 = vpop.f32.mrb[41].mxu1  ;;  %8582 = vmatmul.mubr.msk.f32.gmra.mrb[146].mxu1 %vm3158_vm5, %v2965_v51 }
 0x216   : > { %v1726_v61 = vpop.f32.mrb[150].mxu0  ;;  %8584 = vmatprep.mubr.msk.f32.mxu1 %vm9335_vm0, %v9336_v4 }
 0x217   : > { %5817 = vst.msk [vmem:[%s10103_s18 + $0x98] sm:$0xff] %vm3158_vm5, %v5560_v57  ;;  %v2966_v63 = vmax.f32 %v1722_v53, %v2709_v58  ;;  %v5304_v0 = vmul.f32 0.1, %v4101_v59  ;;  %v1727_v1 = vadd.f32 %v10053_v62, %v1726_v61  ;;  %v7814_v2 = vpop.f32.mrb[151].mxu0  ;;  %7972 = vmatmul.mubr.msk.f32.gmra.mrb[0].mxu0 %vm513_vm1, %v374_v56  ;;  %v380_v61 = vld [vmem:[%s9419_s13 + $0x430] sm:$0xff] }
 0x218   : > { %v4105_v3 = vpop.f32.mrb[42].mxu1  ;;  %7974 = vmatprep.mubr.msk.f32.mxu0 %vm9335_vm0, %v9336_v4 }
 0x219   : > { %v5561_v6 = vmax.f32 %v4101_v59, %v5304_v0  ;;  %v2710_v7 = vmul.f32 0.1, %v1727_v1  ;;  %v4106_v8 = vadd.f32 %v10081_v15, %v4105_v3  ;;  %v8427_v9 = vpop.f32.mrb[43].mxu1  ;;  %8585 = vmatmul.mubr.msk.f32.gmra.mrb[148].mxu1 %vm3158_vm5, %v2966_v63 }
 0x21a   : > { %v1731_v10 = vpop.f32.mrb[152].mxu0  ;;  %8587 = vmatprep.mubr.msk.f32.mxu1 %vm9335_vm0, %v9336_v4 }
 0x21b   : > { %5818 = vst.msk [vmem:[%s10103_s18 + $0xa0] sm:$0xff] %vm3158_vm5, %v5561_v6  ;;  %v2967_v11 = vmax.f32 %v1727_v1, %v2710_v7  ;;  %v5305_v12 = vmul.f32 0.1, %v4106_v8  ;;  %v1732_v13 = vadd.f32 %v10053_v62, %v1731_v10  ;;  %v7817_v14 = vpop.f32.mrb[153].mxu0  ;;  %7975 = vmatmul.mubr.msk.f32.gmra.mrb[2].mxu0 %vm513_vm1, %v375_v5  ;;  %v381_v10 = vld [vmem:[%s9419_s13 + $0x438] sm:$0xff] }
 0x21c   : > { %v4110_v16 = vpop.f32.mrb[44].mxu1  ;;  %7977 = vmatprep.mubr.msk.f32.mxu0 %vm9335_vm0, %v9336_v4 }
 0x21d   : > { %v5562_v18 = vmax.f32 %v4106_v8, %v5305_v12  ;;  %v2711_v19 = vmul.f32 0.1, %v1732_v13  ;;  %v4111_v20 = vadd.f32 %v10081_v15, %v4110_v16  ;;  %v8430_v21 = vpop.f32.mrb[45].mxu1  ;;  %8588 = vmatmul.mubr.msk.f32.gmra.mrb[150].mxu1 %vm3158_vm5, %v2967_v11 }
 0x21e   : > { %v1736_v22 = vpop.f32.mrb[154].mxu0  ;;  %8590 = vmatprep.mubr.msk.f32.mxu1 %vm9335_vm0, %v9336_v4 }
 0x21f   : > { %5819 = vst.msk [vmem:[%s10103_s18 + $0xa8] sm:$0xff] %vm3158_vm5, %v5562_v18  ;;  %v2968_v23 = vmax.f32 %v1732_v13, %v2711_v19  ;;  %v5306_v24 = vmul.f32 0.1, %v4111_v20  ;;  %v1737_v25 = vadd.f32 %v10053_v62, %v1736_v22  ;;  %v7820_v26 = vpop.f32.mrb[155].mxu0  ;;  %7978 = vmatmul.mubr.msk.f32.gmra.mrb[4].mxu0 %vm513_vm1, %v376_v17  ;;  %v382_v22 = vld [vmem:[%s9419_s13 + $0x440] sm:$0xff] }
 0x220   : > { %v4115_v27 = vpop.f32.mrb[46].mxu1  ;;  %7980 = vmatprep.mubr.msk.f32.mxu0 %vm9335_vm0, %v9336_v4 }
 0x221   : > { %v5563_v29 = vmax.f32 %v4111_v20, %v5306_v24  ;;  %v2712_v30 = vmul.f32 0.1, %v1737_v25  ;;  %v4116_v31 = vadd.f32 %v10081_v15, %v4115_v27  ;;  %v8433_v32 = vpop.f32.mrb[47].mxu1  ;;  %8591 = vmatmul.mubr.msk.f32.gmra.mrb[152].mxu1 %vm3158_vm5, %v2968_v23 }
 0x222   : > { %v1741_v33 = vpop.f32.mrb[156].mxu0  ;;  %8593 = vmatprep.mubr.msk.f32.mxu1 %vm9335_vm0, %v9336_v4 }
 0x223   : > { %5820 = vst.msk [vmem:[%s10103_s18 + $0xb0] sm:$0xff] %vm3158_vm5, %v5563_v29  ;;  %v2969_v34 = vmax.f32 %v1737_v25, %v2712_v30  ;;  %v5307_v35 = vmul.f32 0.1, %v4116_v31  ;;  %v1742_v36 = vadd.f32 %v10053_v62, %v1741_v33  ;;  %v7823_v37 = vpop.f32.mrb[157].mxu0  ;;  %7981 = vmatmul.mubr.msk.f32.gmra.mrb[6].mxu0 %vm513_vm1, %v377_v28  ;;  %v383_v33 = vld [vmem:[%s9419_s13 + $0x448] sm:$0xff] }
 0x224   : > { %v4120_v38 = vpop.f32.mrb[48].mxu1  ;;  %7983 = vmatprep.mubr.msk.f32.mxu0 %vm9335_vm0, %v9336_v4 }
 0x225   : > { %v5564_v40 = vmax.f32 %v4116_v31, %v5307_v35  ;;  %v2713_v41 = vmul.f32 0.1, %v1742_v36  ;;  %v4121_v42 = vadd.f32 %v10081_v15, %v4120_v38  ;;  %v8436_v43 = vpop.f32.mrb[49].mxu1  ;;  %8594 = vmatmul.mubr.msk.f32.gmra.mrb[154].mxu1 %vm3158_vm5, %v2969_v34 }
 0x226   : > { %v1746_v44 = vpop.f32.mrb[158].mxu0  ;;  %8596 = vmatprep.mubr.msk.f32.mxu1 %vm9335_vm0, %v9336_v4 }
 0x227   : > { %5821 = vst.msk [vmem:[%s10103_s18 + $0xb8] sm:$0xff] %vm3158_vm5, %v5564_v40  ;;  %v2970_v45 = vmax.f32 %v1742_v36, %v2713_v41  ;;  %v5308_v46 = vmul.f32 0.1, %v4121_v42  ;;  %v1747_v47 = vadd.f32 %v10053_v62, %v1746_v44  ;;  %v7826_v48 = vpop.f32.mrb[159].mxu0  ;;  %7984 = vmatmul.mubr.msk.f32.gmra.mrb[8].mxu0 %vm513_vm1, %v378_v39  ;;  %v10418_v40 = vld [vmem:[%s12531_s2] ss:$0 sm:$0xff] }
 0x228   : > { %v4125_v49 = vpop.f32.mrb[50].mxu1  ;;  %7986 = vmatprep.mubr.msk.f32.mxu0 %vm9335_vm0, %v9336_v4  ;;  %v384_v44 = vld [vmem:[%s9419_s13 + $0x450] sm:$0xff] }
 0x229   : > { %v5565_v51 = vmax.f32 %v4121_v42, %v5308_v46  ;;  %v2714_v52 = vmul.f32 0.1, %v1747_v47  ;;  %v4126_v53 = vadd.f32 %v10081_v15, %v4125_v49  ;;  %v8439_v54 = vpop.f32.mrb[51].mxu1  ;;  %8597 = vmatmul.mubr.msk.f32.gmra.mrb[156].mxu1 %vm3158_vm5, %v2970_v45 }
 0x22a   : > { %v1751_v55 = vpop.f32.mrb[160].mxu0  ;;  %8599 = vmatprep.mubr.msk.f32.mxu1 %vm9335_vm0, %v9336_v4 }
 0x22b   : > { %5822 = vst.msk [vmem:[%s10103_s18 + $0xc0] sm:$0xff] %vm3158_vm5, %v5565_v51  ;;  %v2971_v56 = vmax.f32 %v1747_v47, %v2714_v52  ;;  %v5309_v57 = vmul.f32 0.1, %v4126_v53  ;;  %v1752_v58 = vadd.f32 %v10053_v62, %v1751_v55  ;;  %v7829_v59 = vpop.f32.mrb[161].mxu0  ;;  %7987 = vmatmul.mubr.msk.f32.gmra.mrb[10].mxu0 %vm513_vm1, %v379_v50  ;;  %v385_v55 = vld [vmem:[%s9419_s13 + $0x458] sm:$0xff] }
 0x22c   : > { %v4130_v60 = vpop.f32.mrb[52].mxu1  ;;  %7989 = vmatprep.mubr.msk.f32.mxu0 %vm9335_vm0, %v9336_v4 }
 0x22d   : > { %v5566_v63 = vmax.f32 %v4126_v53, %v5309_v57  ;;  %v2715_v0 = vmul.f32 0.1, %v1752_v58  ;;  %v4131_v1 = vadd.f32 %v10081_v15, %v4130_v60  ;;  %v8442_v2 = vpop.f32.mrb[53].mxu1  ;;  %8600 = vmatmul.mubr.msk.f32.gmra.mrb[158].mxu1 %vm3158_vm5, %v2971_v56 }
 0x22e   : > { %v1756_v3 = vpop.f32.mrb[162].mxu0  ;;  %8602 = vmatprep.mubr.msk.f32.mxu1 %vm9335_vm0, %v9336_v4 }
 0x22f   : > { %5823 = vst.msk [vmem:[%s10103_s18 + $0xc8] sm:$0xff] %vm3158_vm5, %v5566_v63  ;;  %v2972_v5 = vmax.f32 %v1752_v58, %v2715_v0  ;;  %v5310_v6 = vmul.f32 0.1, %v4131_v1  ;;  %v1757_v7 = vadd.f32 %v10053_v62, %v1756_v3  ;;  %v7832_v8 = vpop.f32.mrb[163].mxu0  ;;  %7990 = vmatmul.mubr.msk.f32.gmra.mrb[12].mxu0 %vm513_vm1, %v380_v61 }
 0x230   : > { %v4135_v9 = vpop.f32.mrb[54].mxu1  ;;  %7992 = vmatprep.mubr.msk.f32.mxu0 %vm9335_vm0, %v9336_v4 }
 0x231   : > { %v5567_v11 = vmax.f32 %v4131_v1, %v5310_v6  ;;  %v2716_v12 = vmul.f32 0.1, %v1757_v7  ;;  %v4136_v13 = vadd.f32 %v10081_v15, %v4135_v9  ;;  %v8445_v14 = vpop.f32.mrb[55].mxu1  ;;  %8603 = vmatmul.mubr.msk.f32.gmra.mrb[160].mxu1 %vm3158_vm5, %v2972_v5  ;;  %v10450_v6 = vld [vmem:[%s12533_s4] ss:$0 sm:$0xff] }
 0x232   : > { %v1761_v16 = vpop.f32.mrb[164].mxu0  ;;  %8605 = vmatprep.mubr.msk.f32.mxu1 %vm9335_vm0, %v9336_v4 }
 0x233   : > { %5824 = vst.msk [vmem:[%s10103_s18 + $0xd0] sm:$0xff] %vm3158_vm5, %v5567_v11  ;;  %v2973_v17 = vmax.f32 %v1757_v7, %v2716_v12  ;;  %v5311_v18 = vmul.f32 0.1, %v4136_v13  ;;  %v1762_v19 = vadd.f32 %v10053_v62, %v1761_v16  ;;  %v7835_v20 = vpop.f32.mrb[165].mxu0  ;;  %7993 = vmatmul.mubr.msk.f32.gmra.mrb[14].mxu0 %vm513_vm1, %v381_v10  ;;  %v387_v16 = vld [vmem:[%s9419_s13 + $0x468] sm:$0xff] }
 0x234   : > { %v4140_v21 = vpop.f32.mrb[56].mxu1  ;;  %7995 = vmatprep.mubr.msk.f32.mxu0 %vm9335_vm0, %v9336_v4 }
 0x235   : > { %v5568_v23 = vmax.f32 %v4136_v13, %v5311_v18  ;;  %v2717_v24 = vmul.f32 0.1, %v1762_v19  ;;  %v4141_v25 = vadd.f32 %v10081_v15, %v4140_v21  ;;  %v8448_v26 = vpop.f32.mrb[57].mxu1  ;;  %8606 = vmatmul.mubr.msk.f32.gmra.mrb[162].mxu1 %vm3158_vm5, %v2973_v17 }
 0x236   : > { %v1766_v27 = vpop.f32.mrb[166].mxu0  ;;  %8608 = vmatprep.mubr.msk.f32.mxu1 %vm9335_vm0, %v9336_v4 }
 0x237   : > { %5825 = vst.msk [vmem:[%s10103_s18 + $0xd8] sm:$0xff] %vm3158_vm5, %v5568_v23  ;;  %v2974_v28 = vmax.f32 %v1762_v19, %v2717_v24  ;;  %v5312_v29 = vmul.f32 0.1, %v4141_v25  ;;  %v1767_v30 = vadd.f32 %v10053_v62, %v1766_v27  ;;  %v7838_v31 = vpop.f32.mrb[167].mxu0  ;;  %7996 = vmatmul.mubr.msk.f32.gmra.mrb[16].mxu0 %vm513_vm1, %v382_v22  ;;  %v388_v27 = vld [vmem:[%s9419_s13 + $0x470] sm:$0xff] }
 0x238   : > { %v4145_v32 = vpop.f32.mrb[58].mxu1  ;;  %7998 = vmatprep.mubr.msk.f32.mxu0 %vm9335_vm0, %v9336_v4 }
 0x239   : > { %v5569_v34 = vmax.f32 %v4141_v25, %v5312_v29  ;;  %v2718_v35 = vmul.f32 0.1, %v1767_v30  ;;  %v4146_v36 = vadd.f32 %v10081_v15, %v4145_v32  ;;  %v8451_v37 = vpop.f32.mrb[59].mxu1  ;;  %8609 = vmatmul.mubr.msk.f32.gmra.mrb[164].mxu1 %vm3158_vm5, %v2974_v28 }
 0x23a   : > { %v1771_v38 = vpop.f32.mrb[168].mxu0  ;;  %8611 = vmatprep.mubr.msk.f32.mxu1 %vm9335_vm0, %v9336_v4 }
 0x23b   : > { %5826 = vst.msk [vmem:[%s10103_s18 + $0xe0] sm:$0xff] %vm3158_vm5, %v5569_v34  ;;  %v2975_v62 = vmax.f32 %v1767_v30, %v2718_v35  ;;  %v5313_v39 = vmul.f32 0.1, %v4146_v36  ;;  %v1772_v41 = vadd.f32 %v10418_v40, %v1771_v38  ;;  %v7841_v42 = vpop.f32.mrb[169].mxu0  ;;  %7999 = vmatmul.mubr.msk.f32.gmra.mrb[18].mxu0 %vm513_vm1, %v383_v33  ;;  %v389_v38 = vld [vmem:[%s9419_s13 + $0x478] sm:$0xff] }
 0x23c   : > { %v4150_v43 = vpop.f32.mrb[60].mxu1  ;;  %8001 = vmatprep.mubr.msk.f32.mxu0 %vm9335_vm0, %v9336_v4 }
 0x23d   : > { %v5570_v45 = vmax.f32 %v4146_v36, %v5313_v39  ;;  %v2719_v46 = vmul.f32 0.1, %v1772_v41  ;;  %v4151_v47 = vadd.f32 %v10081_v15, %v4150_v43  ;;  %v8454_v48 = vpop.f32.mrb[61].mxu1  ;;  %8612 = vmatmul.mubr.msk.f32.gmra.mrb[166].mxu1 %vm3158_vm5, %v2975_v62 }
 0x23e   : > { %v1776_v49 = vpop.f32.mrb[170].mxu0  ;;  %8614 = vmatprep.mubr.msk.f32.mxu1 %vm9335_vm0, %v9336_v4 }
 0x23f   : > { %5827 = vst.msk [vmem:[%s10103_s18 + $0xe8] sm:$0xff] %vm3158_vm5, %v5570_v45  ;;  %v2976_v50 = vmax.f32 %v1772_v41, %v2719_v46  ;;  %v5314_v51 = vmul.f32 0.1, %v4151_v47  ;;  %v1777_v52 = vadd.f32 %v10418_v40, %v1776_v49  ;;  %v7844_v53 = vpop.f32.mrb[171].mxu0  ;;  %8002 = vmatmul.mubr.msk.f32.gmra.mrb[20].mxu0 %vm513_vm1, %v384_v44  ;;  %v390_v49 = vld [vmem:[%s9419_s13 + $0x480] sm:$0xff] }
 0x240   : > { %v4155_v54 = vpop.f32.mrb[62].mxu1  ;;  %8004 = vmatprep.mubr.msk.f32.mxu0 %vm9335_vm0, %v9336_v4 }
 0x241   : > { %v5571_v56 = vmax.f32 %v4151_v47, %v5314_v51  ;;  %v2720_v57 = vmul.f32 0.1, %v1777_v52  ;;  %v4156_v58 = vadd.f32 %v10081_v15, %v4155_v54  ;;  %v8457_v59 = vpop.f32.mrb[63].mxu1  ;;  %8615 = vmatmul.mubr.msk.f32.gmra.mrb[168].mxu1 %vm3158_vm5, %v2976_v50  ;;  %v386_v15 = vld [vmem:[%s9419_s13 + $0x460] sm:$0xff] }
 0x242   : > { %v1781_v60 = vpop.f32.mrb[172].mxu0  ;;  %8617 = vmatprep.mubr.msk.f32.mxu1 %vm9335_vm0, %v9336_v4 }
 0x243   : > { %5828 = vst.msk [vmem:[%s10103_s18 + $0xf0] sm:$0xff] %vm3158_vm5, %v5571_v56  ;;  %v2977_v61 = vmax.f32 %v1777_v52, %v2720_v57  ;;  %v5315_v63 = vmul.f32 0.1, %v4156_v58  ;;  %v1782_v0 = vadd.f32 %v10418_v40, %v1781_v60  ;;  %v7847_v1 = vpop.f32.mrb[173].mxu0  ;;  %8005 = vmatmul.mubr.msk.f32.gmra.mrb[22].mxu0 %vm513_vm1, %v385_v55  ;;  %v391_v60 = vld [vmem:[%s9419_s13 + $0x488] sm:$0xff] }
 0x244   : > { %v4160_v2 = vpop.f32.mrb[64].mxu1  ;;  %8007 = vmatprep.mubr.msk.f32.mxu0 %vm9335_vm0, %v9336_v4 }
 0x245   : > { %v5572_v3 = vmax.f32 %v4156_v58, %v5315_v63  ;;  %v2721_v5 = vmul.f32 0.1, %v1782_v0  ;;  %v4161_v7 = vadd.f32 %v10450_v6, %v4160_v2  ;;  %v8460_v8 = vpop.f32.mrb[65].mxu1  ;;  %8618 = vmatmul.mubr.msk.f32.gmra.mrb[170].mxu1 %vm3158_vm5, %v2977_v61 }
 0x246   : > { %v1786_v9 = vpop.f32.mrb[174].mxu0  ;;  %8620 = vmatprep.mubr.msk.f32.mxu1 %vm9335_vm0, %v9336_v4 }
 0x247   : > { %5829 = vst.msk [vmem:[%s10103_s18 + $0xf8] sm:$0xff] %vm3158_vm5, %v5572_v3  ;;  %v2978_v10 = vmax.f32 %v1782_v0, %v2721_v5  ;;  %v5316_v11 = vmul.f32 0.1, %v4161_v7  ;;  %v1787_v12 = vadd.f32 %v10418_v40, %v1786_v9  ;;  %v7850_v13 = vpop.f32.mrb[175].mxu0  ;;  %8008 = vmatmul.mubr.msk.f32.gmra.mrb[24].mxu0 %vm513_vm1, %v386_v15  ;;  %v392_v9 = vld [vmem:[%s9419_s13 + $0x490] sm:$0xff] }
 0x248   : > { %v4165_v14 = vpop.f32.mrb[66].mxu1  ;;  %8010 = vmatprep.mubr.msk.f32.mxu0 %vm9335_vm0, %v9336_v4 }
 0x249   : > { %v5573_v17 = vmax.f32 %v4161_v7, %v5316_v11  ;;  %v2722_v18 = vmul.f32 0.1, %v1787_v12  ;;  %v4166_v19 = vadd.f32 %v10450_v6, %v4165_v14  ;;  %v8463_v20 = vpop.f32.mrb[67].mxu1  ;;  %8621 = vmatmul.mubr.msk.f32.gmra.mrb[172].mxu1 %vm3158_vm5, %v2978_v10 }
 0x24a   : > { %v1791_v21 = vpop.f32.mrb[176].mxu0  ;;  %8623 = vmatprep.mubr.msk.f32.mxu1 %vm9335_vm0, %v9336_v4 }
 0x24b   : > { %5830 = vst.msk [vmem:[%s10103_s18 + $0x100] sm:$0xff] %vm3158_vm5, %v5573_v17  ;;  %v2979_v22 = vmax.f32 %v1787_v12, %v2722_v18  ;;  %v5317_v23 = vmul.f32 0.1, %v4166_v19  ;;  %v1792_v24 = vadd.f32 %v10418_v40, %v1791_v21  ;;  %v7853_v25 = vpop.f32.mrb[177].mxu0  ;;  %8011 = vmatmul.mubr.msk.f32.gmra.mrb[26].mxu0 %vm513_vm1, %v387_v16  ;;  %v393_v21 = vld [vmem:[%s9419_s13 + $0x498] sm:$0xff] }
 0x24c   : > { %v4170_v26 = vpop.f32.mrb[68].mxu1  ;;  %8013 = vmatprep.mubr.msk.f32.mxu0 %vm9335_vm0, %v9336_v4 }
 0x24d   : > { %v5574_v28 = vmax.f32 %v4166_v19, %v5317_v23  ;;  %v2723_v29 = vmul.f32 0.1, %v1792_v24  ;;  %v4171_v30 = vadd.f32 %v10450_v6, %v4170_v26  ;;  %v8466_v31 = vpop.f32.mrb[69].mxu1  ;;  %8624 = vmatmul.mubr.msk.f32.gmra.mrb[174].mxu1 %vm3158_vm5, %v2979_v22 }
 0x24e   : > { %v1796_v32 = vpop.f32.mrb[178].mxu0  ;;  %8626 = vmatprep.mubr.msk.f32.mxu1 %vm9335_vm0, %v9336_v4 }
 0x24f   : > { %5831 = vst.msk [vmem:[%s10103_s18 + $0x108] sm:$0xff] %vm3158_vm5, %v5574_v28  ;;  %v2980_v33 = vmax.f32 %v1792_v24, %v2723_v29  ;;  %v5318_v34 = vmul.f32 0.1, %v4171_v30  ;;  %v1797_v35 = vadd.f32 %v10418_v40, %v1796_v32  ;;  %v7856_v36 = vpop.f32.mrb[179].mxu0  ;;  %8014 = vmatmul.mubr.msk.f32.gmra.mrb[28].mxu0 %vm513_vm1, %v388_v27  ;;  %v394_v32 = vld [vmem:[%s9419_s13 + $0x4a0] sm:$0xff] }
 0x250   : > { %v4175_v37 = vpop.f32.mrb[70].mxu1  ;;  %8016 = vmatprep.mubr.msk.f32.mxu0 %vm9335_vm0, %v9336_v4 }
 0x251   : > { %v5575_v62 = vmax.f32 %v4171_v30, %v5318_v34  ;;  %v2724_v39 = vmul.f32 0.1, %v1797_v35  ;;  %v4176_v41 = vadd.f32 %v10450_v6, %v4175_v37  ;;  %v8469_v42 = vpop.f32.mrb[71].mxu1  ;;  %8627 = vmatmul.mubr.msk.f32.gmra.mrb[176].mxu1 %vm3158_vm5, %v2980_v33 }
 0x252   : > { %v1801_v43 = vpop.f32.mrb[180].mxu0  ;;  %8629 = vmatprep.mubr.msk.f32.mxu1 %vm9335_vm0, %v9336_v4 }
 0x253   : > { %5832 = vst.msk [vmem:[%s10103_s18 + $0x110] sm:$0xff] %vm3158_vm5, %v5575_v62  ;;  %v2981_v44 = vmax.f32 %v1797_v35, %v2724_v39  ;;  %v5319_v45 = vmul.f32 0.1, %v4176_v41  ;;  %v1802_v46 = vadd.f32 %v10418_v40, %v1801_v43  ;;  %v7859_v47 = vpop.f32.mrb[181].mxu0  ;;  %8017 = vmatmul.mubr.msk.f32.gmra.mrb[30].mxu0 %vm513_vm1, %v389_v38  ;;  %v395_v43 = vld [vmem:[%s9419_s13 + $0x4a8] sm:$0xff] }
 0x254   : > { %v4180_v48 = vpop.f32.mrb[72].mxu1  ;;  %8019 = vmatprep.mubr.msk.f32.mxu0 %vm9335_vm0, %v9336_v4 }
 0x255   : > { %v5576_v50 = vmax.f32 %v4176_v41, %v5319_v45  ;;  %v2725_v51 = vmul.f32 0.1, %v1802_v46  ;;  %v4181_v52 = vadd.f32 %v10450_v6, %v4180_v48  ;;  %v8472_v53 = vpop.f32.mrb[73].mxu1  ;;  %8630 = vmatmul.mubr.msk.f32.gmra.mrb[178].mxu1 %vm3158_vm5, %v2981_v44 }
 0x256   : > { %v1806_v54 = vpop.f32.mrb[182].mxu0  ;;  %8632 = vmatprep.mubr.msk.f32.mxu1 %vm9335_vm0, %v9336_v4 }
 0x257   : > { %5833 = vst.msk [vmem:[%s10103_s18 + $0x118] sm:$0xff] %vm3158_vm5, %v5576_v50  ;;  %v2982_v55 = vmax.f32 %v1802_v46, %v2725_v51  ;;  %v5320_v56 = vmul.f32 0.1, %v4181_v52  ;;  %v1807_v57 = vadd.f32 %v10418_v40, %v1806_v54  ;;  %v7862_v58 = vpop.f32.mrb[183].mxu0  ;;  %8020 = vmatmul.mubr.msk.f32.gmra.mrb[32].mxu0 %vm513_vm1, %v390_v49  ;;  %v396_v54 = vld [vmem:[%s9419_s13 + $0x4b0] sm:$0xff] }
 0x258   : > { %v4185_v59 = vpop.f32.mrb[74].mxu1  ;;  %8022 = vmatprep.mubr.msk.f32.mxu0 %vm9335_vm0, %v9336_v4 }
 0x259   : > { %v5577_v61 = vmax.f32 %v4181_v52, %v5320_v56  ;;  %v2726_v63 = vmul.f32 0.1, %v1807_v57  ;;  %v4186_v0 = vadd.f32 %v10450_v6, %v4185_v59  ;;  %v8475_v1 = vpop.f32.mrb[75].mxu1  ;;  %8633 = vmatmul.mubr.msk.f32.gmra.mrb[180].mxu1 %vm3158_vm5, %v2982_v55 }
 0x25a   : > { %v1811_v2 = vpop.f32.mrb[184].mxu0  ;;  %8635 = vmatprep.mubr.msk.f32.mxu1 %vm9335_vm0, %v9336_v4 }
 0x25b   : > { %5834 = vst.msk [vmem:[%s10103_s18 + $0x120] sm:$0xff] %vm3158_vm5, %v5577_v61  ;;  %v2983_v15 = vmax.f32 %v1807_v57, %v2726_v63  ;;  %v5321_v3 = vmul.f32 0.1, %v4186_v0  ;;  %v1812_v5 = vadd.f32 %v10418_v40, %v1811_v2  ;;  %v7865_v7 = vpop.f32.mrb[185].mxu0  ;;  %8023 = vmatmul.mubr.msk.f32.gmra.mrb[34].mxu0 %vm513_vm1, %v391_v60  ;;  %v397_v2 = vld [vmem:[%s9419_s13 + $0x4b8] sm:$0xff] }
 0x25c   : > { %v4190_v8 = vpop.f32.mrb[76].mxu1  ;;  %8025 = vmatprep.mubr.msk.f32.mxu0 %vm9335_vm0, %v9336_v4 }
 0x25d   : > { %v5578_v10 = vmax.f32 %v4186_v0, %v5321_v3  ;;  %v2727_v11 = vmul.f32 0.1, %v1812_v5  ;;  %v4191_v12 = vadd.f32 %v10450_v6, %v4190_v8  ;;  %v8478_v13 = vpop.f32.mrb[77].mxu1  ;;  %8636 = vmatmul.mubr.msk.f32.gmra.mrb[182].mxu1 %vm3158_vm5, %v2983_v15 }
 0x25e   : > { %v1816_v14 = vpop.f32.mrb[186].mxu0  ;;  %8638 = vmatprep.mubr.msk.f32.mxu1 %vm9335_vm0, %v9336_v4 }
 0x25f   : > { %5835 = vst.msk [vmem:[%s10103_s18 + $0x128] sm:$0xff] %vm3158_vm5, %v5578_v10  ;;  %v2984_v16 = vmax.f32 %v1812_v5, %v2727_v11  ;;  %v5322_v17 = vmul.f32 0.1, %v4191_v12  ;;  %v1817_v18 = vadd.f32 %v10418_v40, %v1816_v14  ;;  %v7868_v19 = vpop.f32.mrb[187].mxu0  ;;  %8026 = vmatmul.mubr.msk.f32.gmra.mrb[36].mxu0 %vm513_vm1, %v392_v9  ;;  %v398_v14 = vld [vmem:[%s9419_s13 + $0x4c0] sm:$0xff] }
 0x260   : > { %v4195_v20 = vpop.f32.mrb[78].mxu1  ;;  %8028 = vmatprep.mubr.msk.f32.mxu0 %vm9335_vm0, %v9336_v4 }
 0x261   : > { %v5579_v22 = vmax.f32 %v4191_v12, %v5322_v17  ;;  %v2728_v23 = vmul.f32 0.1, %v1817_v18  ;;  %v4196_v24 = vadd.f32 %v10450_v6, %v4195_v20  ;;  %v8481_v25 = vpop.f32.mrb[79].mxu1  ;;  %8639 = vmatmul.mubr.msk.f32.gmra.mrb[184].mxu1 %vm3158_vm5, %v2984_v16 }
 0x262   : > { %v1821_v26 = vpop.f32.mrb[188].mxu0  ;;  %8641 = vmatprep.mubr.msk.f32.mxu1 %vm9335_vm0, %v9336_v4 }
 0x263   : > { %5836 = vst.msk [vmem:[%s10103_s18 + $0x130] sm:$0xff] %vm3158_vm5, %v5579_v22  ;;  %v2985_v27 = vmax.f32 %v1817_v18, %v2728_v23  ;;  %v5323_v28 = vmul.f32 0.1, %v4196_v24  ;;  %v1822_v29 = vadd.f32 %v10418_v40, %v1821_v26  ;;  %v7871_v30 = vpop.f32.mrb[189].mxu0  ;;  %8029 = vmatmul.mubr.msk.f32.gmra.mrb[38].mxu0 %vm513_vm1, %v393_v21  ;;  %v399_v26 = vld [vmem:[%s9419_s13 + $0x4c8] sm:$0xff] }
 0x264   : > { %v4200_v31 = vpop.f32.mrb[80].mxu1  ;;  %8031 = vmatprep.mubr.msk.f32.mxu0 %vm9335_vm0, %v9336_v4 }
 0x265   : > { %v5580_v33 = vmax.f32 %v4196_v24, %v5323_v28  ;;  %v2729_v34 = vmul.f32 0.1, %v1822_v29  ;;  %v4201_v35 = vadd.f32 %v10450_v6, %v4200_v31  ;;  %v8484_v36 = vpop.f32.mrb[81].mxu1  ;;  %8642 = vmatmul.mubr.msk.f32.gmra.mrb[186].mxu1 %vm3158_vm5, %v2985_v27 }
 0x266   : > { %v1826_v37 = vpop.f32.mrb[190].mxu0  ;;  %8644 = vmatprep.mubr.msk.f32.mxu1 %vm9335_vm0, %v9336_v4 }
 0x267   : > { %5837 = vst.msk [vmem:[%s10103_s18 + $0x138] sm:$0xff] %vm3158_vm5, %v5580_v33  ;;  %v2986_v38 = vmax.f32 %v1822_v29, %v2729_v34  ;;  %v5324_v62 = vmul.f32 0.1, %v4201_v35  ;;  %v1827_v39 = vadd.f32 %v10418_v40, %v1826_v37  ;;  %v7874_v41 = vpop.f32.mrb[191].mxu0  ;;  %8032 = vmatmul.mubr.msk.f32.gmra.mrb[40].mxu0 %vm513_vm1, %v394_v32  ;;  %v400_v37 = vld [vmem:[%s9419_s13 + $0x4d0] sm:$0xff] }
 0x268   : > { %v4205_v42 = vpop.f32.mrb[82].mxu1  ;;  %8034 = vmatprep.mubr.msk.f32.mxu0 %vm9335_vm0, %v9336_v4 }
 0x269   : > { %v5581_v44 = vmax.f32 %v4201_v35, %v5324_v62  ;;  %v2730_v45 = vmul.f32 0.1, %v1827_v39  ;;  %v4206_v46 = vadd.f32 %v10450_v6, %v4205_v42  ;;  %v8487_v47 = vpop.f32.mrb[83].mxu1  ;;  %8645 = vmatmul.mubr.msk.f32.gmra.mrb[188].mxu1 %vm3158_vm5, %v2986_v38 }
 0x26a   : > { %v1831_v48 = vpop.f32.mrb[192].mxu0  ;;  %8647 = vmatprep.mubr.msk.f32.mxu1 %vm9335_vm0, %v9336_v4 }
 0x26b   : > { %5838 = vst.msk [vmem:[%s10103_s18 + $0x140] sm:$0xff] %vm3158_vm5, %v5581_v44  ;;  %v2987_v49 = vmax.f32 %v1827_v39, %v2730_v45  ;;  %v5325_v50 = vmul.f32 0.1, %v4206_v46  ;;  %v1832_v51 = vadd.f32 %v10418_v40, %v1831_v48  ;;  %v7877_v52 = vpop.f32.mrb[193].mxu0  ;;  %8035 = vmatmul.mubr.msk.f32.gmra.mrb[42].mxu0 %vm513_vm1, %v395_v43  ;;  %v401_v48 = vld [vmem:[%s9419_s13 + $0x4d8] sm:$0xff] }
 0x26c   : > { %v4210_v53 = vpop.f32.mrb[84].mxu1  ;;  %8037 = vmatprep.mubr.msk.f32.mxu0 %vm9335_vm0, %v9336_v4 }
 0x26d   : > { %v5582_v55 = vmax.f32 %v4206_v46, %v5325_v50  ;;  %v2731_v56 = vmul.f32 0.1, %v1832_v51  ;;  %v4211_v57 = vadd.f32 %v10450_v6, %v4210_v53  ;;  %v8490_v58 = vpop.f32.mrb[85].mxu1  ;;  %8648 = vmatmul.mubr.msk.f32.gmra.mrb[190].mxu1 %vm3158_vm5, %v2987_v49 }
 0x26e   : > { %v1836_v59 = vpop.f32.mrb[194].mxu0  ;;  %8650 = vmatprep.mubr.msk.f32.mxu1 %vm9335_vm0, %v9336_v4 }
 0x26f   : > { %5839 = vst.msk [vmem:[%s10103_s18 + $0x148] sm:$0xff] %vm3158_vm5, %v5582_v55  ;;  %v2988_v60 = vmax.f32 %v1832_v51, %v2731_v56  ;;  %v5326_v61 = vmul.f32 0.1, %v4211_v57  ;;  %v1837_v63 = vadd.f32 %v10418_v40, %v1836_v59  ;;  %v7880_v0 = vpop.f32.mrb[195].mxu0  ;;  %8038 = vmatmul.mubr.msk.f32.gmra.mrb[44].mxu0 %vm513_vm1, %v396_v54  ;;  %v402_v59 = vld [vmem:[%s9419_s13 + $0x4e0] sm:$0xff] }
 0x270   : > { %v4215_v1 = vpop.f32.mrb[86].mxu1  ;;  %8040 = vmatprep.mubr.msk.f32.mxu0 %vm9335_vm0, %v9336_v4 }
 0x271   : > { %v5583_v15 = vmax.f32 %v4211_v57, %v5326_v61  ;;  %v2732_v3 = vmul.f32 0.1, %v1837_v63  ;;  %v4216_v5 = vadd.f32 %v10450_v6, %v4215_v1  ;;  %v8493_v7 = vpop.f32.mrb[87].mxu1  ;;  %8651 = vmatmul.mubr.msk.f32.gmra.mrb[192].mxu1 %vm3158_vm5, %v2988_v60 }
 0x272   : > { %v1841_v8 = vpop.f32.mrb[196].mxu0  ;;  %8653 = vmatprep.mubr.msk.f32.mxu1 %vm9335_vm0, %v9336_v4 }
 0x273   : > { %5840 = vst.msk [vmem:[%s10103_s18 + $0x150] sm:$0xff] %vm3158_vm5, %v5583_v15  ;;  %v2989_v9 = vmax.f32 %v1837_v63, %v2732_v3  ;;  %v5327_v10 = vmul.f32 0.1, %v4216_v5  ;;  %v1842_v11 = vadd.f32 %v10418_v40, %v1841_v8  ;;  %v7883_v12 = vpop.f32.mrb[197].mxu0  ;;  %8041 = vmatmul.mubr.msk.f32.gmra.mrb[46].mxu0 %vm513_vm1, %v397_v2  ;;  %v403_v8 = vld [vmem:[%s9419_s13 + $0x4e8] sm:$0xff] }
 0x274   : > { %v4220_v13 = vpop.f32.mrb[88].mxu1  ;;  %8043 = vmatprep.mubr.msk.f32.mxu0 %vm9335_vm0, %v9336_v4 }
 0x275   : > { %v5584_v16 = vmax.f32 %v4216_v5, %v5327_v10  ;;  %v2733_v17 = vmul.f32 0.1, %v1842_v11  ;;  %v4221_v18 = vadd.f32 %v10450_v6, %v4220_v13  ;;  %v8496_v19 = vpop.f32.mrb[89].mxu1  ;;  %8654 = vmatmul.mubr.msk.f32.gmra.mrb[194].mxu1 %vm3158_vm5, %v2989_v9 }
 0x276   : > { %v1846_v20 = vpop.f32.mrb[198].mxu0  ;;  %8656 = vmatprep.mubr.msk.f32.mxu1 %vm9335_vm0, %v9336_v4 }
 0x277   : > { %5841 = vst.msk [vmem:[%s10103_s18 + $0x158] sm:$0xff] %vm3158_vm5, %v5584_v16  ;;  %v2990_v21 = vmax.f32 %v1842_v11, %v2733_v17  ;;  %v5328_v22 = vmul.f32 0.1, %v4221_v18  ;;  %v1847_v23 = vadd.f32 %v10418_v40, %v1846_v20  ;;  %v7886_v24 = vpop.f32.mrb[199].mxu0  ;;  %8044 = vmatmul.mubr.msk.f32.gmra.mrb[48].mxu0 %vm513_vm1, %v398_v14  ;;  %v404_v20 = vld [vmem:[%s9419_s13 + $0x4f0] sm:$0xff] }
 0x278   : > { %v4225_v25 = vpop.f32.mrb[90].mxu1  ;;  %8046 = vmatprep.mubr.msk.f32.mxu0 %vm9335_vm0, %v9336_v4 }
 0x279   : > { %v5585_v27 = vmax.f32 %v4221_v18, %v5328_v22  ;;  %v2734_v28 = vmul.f32 0.1, %v1847_v23  ;;  %v4226_v29 = vadd.f32 %v10450_v6, %v4225_v25  ;;  %v8499_v30 = vpop.f32.mrb[91].mxu1  ;;  %8657 = vmatmul.mubr.msk.f32.gmra.mrb[196].mxu1 %vm3158_vm5, %v2990_v21 }
 0x27a   : > { %v1851_v31 = vpop.f32.mrb[200].mxu0  ;;  %8659 = vmatprep.mubr.msk.f32.mxu1 %vm9335_vm0, %v9336_v4 }
 0x27b   : > { %5842 = vst.msk [vmem:[%s10103_s18 + $0x160] sm:$0xff] %vm3158_vm5, %v5585_v27  ;;  %v2991_v32 = vmax.f32 %v1847_v23, %v2734_v28  ;;  %v5329_v33 = vmul.f32 0.1, %v4226_v29  ;;  %v1852_v34 = vadd.f32 %v10418_v40, %v1851_v31  ;;  %v7889_v35 = vpop.f32.mrb[201].mxu0  ;;  %8047 = vmatmul.mubr.msk.f32.gmra.mrb[50].mxu0 %vm513_vm1, %v399_v26  ;;  %v405_v31 = vld [vmem:[%s9419_s13 + $0x4f8] sm:$0xff] }
 0x27c   : > { %v4230_v36 = vpop.f32.mrb[92].mxu1  ;;  %8049 = vmatprep.mubr.msk.f32.mxu0 %vm9335_vm0, %v9336_v4 }
 0x27d   : > { %v5586_v38 = vmax.f32 %v4226_v29, %v5329_v33  ;;  %v2735_v62 = vmul.f32 0.1, %v1852_v34  ;;  %v4231_v39 = vadd.f32 %v10450_v6, %v4230_v36  ;;  %v8502_v41 = vpop.f32.mrb[93].mxu1  ;;  %8660 = vmatmul.mubr.msk.f32.gmra.mrb[198].mxu1 %vm3158_vm5, %v2991_v32 }
 0x27e   : > { %v1856_v42 = vpop.f32.mrb[202].mxu0  ;;  %8662 = vmatprep.mubr.msk.f32.mxu1 %vm9335_vm0, %v9336_v4 }
 0x27f   : > { %5843 = vst.msk [vmem:[%s10103_s18 + $0x168] sm:$0xff] %vm3158_vm5, %v5586_v38  ;;  %v2992_v43 = vmax.f32 %v1852_v34, %v2735_v62  ;;  %v5330_v44 = vmul.f32 0.1, %v4231_v39  ;;  %v1857_v45 = vadd.f32 %v10418_v40, %v1856_v42  ;;  %v7892_v46 = vpop.f32.mrb[203].mxu0  ;;  %8050 = vmatmul.mubr.msk.f32.gmra.mrb[52].mxu0 %vm513_vm1, %v400_v37  ;;  %v406_v42 = vld [vmem:[%s9419_s13 + $0x500] sm:$0xff] }
 0x280   : > { %v4235_v47 = vpop.f32.mrb[94].mxu1  ;;  %8052 = vmatprep.mubr.msk.f32.mxu0 %vm9335_vm0, %v9336_v4 }
 0x281   : > { %v5587_v49 = vmax.f32 %v4231_v39, %v5330_v44  ;;  %v2736_v50 = vmul.f32 0.1, %v1857_v45  ;;  %v4236_v51 = vadd.f32 %v10450_v6, %v4235_v47  ;;  %v8505_v52 = vpop.f32.mrb[95].mxu1  ;;  %8663 = vmatmul.mubr.msk.f32.gmra.mrb[200].mxu1 %vm3158_vm5, %v2992_v43 }
 0x282   : > { %v1861_v53 = vpop.f32.mrb[204].mxu0  ;;  %8665 = vmatprep.mubr.msk.f32.mxu1 %vm9335_vm0, %v9336_v4 }
 0x283   : > { %5844 = vst.msk [vmem:[%s10103_s18 + $0x170] sm:$0xff] %vm3158_vm5, %v5587_v49  ;;  %v2993_v54 = vmax.f32 %v1857_v45, %v2736_v50  ;;  %v5331_v55 = vmul.f32 0.1, %v4236_v51  ;;  %v1862_v56 = vadd.f32 %v10418_v40, %v1861_v53  ;;  %v7895_v57 = vpop.f32.mrb[205].mxu0  ;;  %8053 = vmatmul.mubr.msk.f32.gmra.mrb[54].mxu0 %vm513_vm1, %v401_v48  ;;  %v407_v53 = vld [vmem:[%s9419_s13 + $0x508] sm:$0xff] }
 0x284   : > { %v4240_v58 = vpop.f32.mrb[96].mxu1  ;;  %8055 = vmatprep.mubr.msk.f32.mxu0 %vm9335_vm0, %v9336_v4 }
 0x285   : > { %v5588_v60 = vmax.f32 %v4236_v51, %v5331_v55  ;;  %v2737_v61 = vmul.f32 0.1, %v1862_v56  ;;  %v4241_v63 = vadd.f32 %v10450_v6, %v4240_v58  ;;  %v8508_v0 = vpop.f32.mrb[97].mxu1  ;;  %8666 = vmatmul.mubr.msk.f32.gmra.mrb[202].mxu1 %vm3158_vm5, %v2993_v54 }
 0x286   : > { %v1866_v1 = vpop.f32.mrb[206].mxu0  ;;  %8668 = vmatprep.mubr.msk.f32.mxu1 %vm9335_vm0, %v9336_v4 }
 0x287   : > { %5845 = vst.msk [vmem:[%s10103_s18 + $0x178] sm:$0xff] %vm3158_vm5, %v5588_v60  ;;  %v2994_v2 = vmax.f32 %v1862_v56, %v2737_v61  ;;  %v5332_v15 = vmul.f32 0.1, %v4241_v63  ;;  %v1867_v3 = vadd.f32 %v10418_v40, %v1866_v1  ;;  %v7898_v5 = vpop.f32.mrb[207].mxu0  ;;  %8056 = vmatmul.mubr.msk.f32.gmra.mrb[56].mxu0 %vm513_vm1, %v402_v59  ;;  %v408_v1 = vld [vmem:[%s9419_s13 + $0x510] sm:$0xff] }
 0x288   : > { %v4245_v7 = vpop.f32.mrb[98].mxu1  ;;  %8058 = vmatprep.mubr.msk.f32.mxu0 %vm9335_vm0, %v9336_v4 }
 0x289   : > { %v5589_v9 = vmax.f32 %v4241_v63, %v5332_v15  ;;  %v2738_v10 = vmul.f32 0.1, %v1867_v3  ;;  %v4246_v11 = vadd.f32 %v10450_v6, %v4245_v7  ;;  %v8511_v12 = vpop.f32.mrb[99].mxu1  ;;  %8669 = vmatmul.mubr.msk.f32.gmra.mrb[204].mxu1 %vm3158_vm5, %v2994_v2 }
 0x28a   : > { %v1871_v13 = vpop.f32.mrb[208].mxu0  ;;  %8671 = vmatprep.mubr.msk.f32.mxu1 %vm9335_vm0, %v9336_v4 }
 0x28b   : > { %5846 = vst.msk [vmem:[%s10103_s18 + $0x180] sm:$0xff] %vm3158_vm5, %v5589_v9  ;;  %v2995_v14 = vmax.f32 %v1867_v3, %v2738_v10  ;;  %v5333_v16 = vmul.f32 0.1, %v4246_v11  ;;  %v1872_v17 = vadd.f32 %v10418_v40, %v1871_v13  ;;  %v7901_v18 = vpop.f32.mrb[209].mxu0  ;;  %8059 = vmatmul.mubr.msk.f32.gmra.mrb[58].mxu0 %vm513_vm1, %v403_v8  ;;  %v409_v13 = vld [vmem:[%s9419_s13 + $0x518] sm:$0xff] }
 0x28c   : > { %v4250_v19 = vpop.f32.mrb[100].mxu1  ;;  %8061 = vmatprep.mubr.msk.f32.mxu0 %vm9335_vm0, %v9336_v4 }
 0x28d   : > { %v5590_v21 = vmax.f32 %v4246_v11, %v5333_v16  ;;  %v2739_v22 = vmul.f32 0.1, %v1872_v17  ;;  %v4251_v23 = vadd.f32 %v10450_v6, %v4250_v19  ;;  %v8514_v24 = vpop.f32.mrb[101].mxu1  ;;  %8672 = vmatmul.mubr.msk.f32.gmra.mrb[206].mxu1 %vm3158_vm5, %v2995_v14 }
 0x28e   : > { %v1876_v25 = vpop.f32.mrb[210].mxu0  ;;  %8674 = vmatprep.mubr.msk.f32.mxu1 %vm9335_vm0, %v9336_v4 }
 0x28f   : > { %5847 = vst.msk [vmem:[%s10103_s18 + $0x188] sm:$0xff] %vm3158_vm5, %v5590_v21  ;;  %v2996_v26 = vmax.f32 %v1872_v17, %v2739_v22  ;;  %v5334_v27 = vmul.f32 0.1, %v4251_v23  ;;  %v1877_v28 = vadd.f32 %v10418_v40, %v1876_v25  ;;  %v7904_v29 = vpop.f32.mrb[211].mxu0  ;;  %8062 = vmatmul.mubr.msk.f32.gmra.mrb[60].mxu0 %vm513_vm1, %v404_v20  ;;  %v410_v25 = vld [vmem:[%s9419_s13 + $0x520] sm:$0xff] }
 0x290   : > { %v4255_v30 = vpop.f32.mrb[102].mxu1  ;;  %8064 = vmatprep.mubr.msk.f32.mxu0 %vm9335_vm0, %v9336_v4 }
 0x291   : > { %v5591_v32 = vmax.f32 %v4251_v23, %v5334_v27  ;;  %v2740_v33 = vmul.f32 0.1, %v1877_v28  ;;  %v4256_v34 = vadd.f32 %v10450_v6, %v4255_v30  ;;  %v8517_v35 = vpop.f32.mrb[103].mxu1  ;;  %8675 = vmatmul.mubr.msk.f32.gmra.mrb[208].mxu1 %vm3158_vm5, %v2996_v26 }
 0x292   : > { %v1881_v36 = vpop.f32.mrb[212].mxu0  ;;  %8677 = vmatprep.mubr.msk.f32.mxu1 %vm9335_vm0, %v9336_v4 }
 0x293   : > { %5848 = vst.msk [vmem:[%s10103_s18 + $0x190] sm:$0xff] %vm3158_vm5, %v5591_v32  ;;  %v2997_v37 = vmax.f32 %v1877_v28, %v2740_v33  ;;  %v5335_v38 = vmul.f32 0.1, %v4256_v34  ;;  %v1882_v62 = vadd.f32 %v10418_v40, %v1881_v36  ;;  %v7907_v39 = vpop.f32.mrb[213].mxu0  ;;  %8065 = vmatmul.mubr.msk.f32.gmra.mrb[62].mxu0 %vm513_vm1, %v405_v31  ;;  %v411_v36 = vld [vmem:[%s9419_s13 + $0x528] sm:$0xff] }
 0x294   : > { %v4260_v41 = vpop.f32.mrb[104].mxu1  ;;  %8067 = vmatprep.mubr.msk.f32.mxu0 %vm9335_vm0, %v9336_v4 }
 0x295   : > { %v5592_v43 = vmax.f32 %v4256_v34, %v5335_v38  ;;  %v2741_v44 = vmul.f32 0.1, %v1882_v62  ;;  %v4261_v45 = vadd.f32 %v10450_v6, %v4260_v41  ;;  %v8520_v46 = vpop.f32.mrb[105].mxu1  ;;  %8678 = vmatmul.mubr.msk.f32.gmra.mrb[210].mxu1 %vm3158_vm5, %v2997_v37 }
 0x296   : > { %v1886_v47 = vpop.f32.mrb[214].mxu0  ;;  %8680 = vmatprep.mubr.msk.f32.mxu1 %vm9335_vm0, %v9336_v4 }
 0x297   : > { %5849 = vst.msk [vmem:[%s10103_s18 + $0x198] sm:$0xff] %vm3158_vm5, %v5592_v43  ;;  %v2998_v48 = vmax.f32 %v1882_v62, %v2741_v44  ;;  %v5336_v49 = vmul.f32 0.1, %v4261_v45  ;;  %v1887_v50 = vadd.f32 %v10418_v40, %v1886_v47  ;;  %v7910_v51 = vpop.f32.mrb[215].mxu0  ;;  %8068 = vmatmul.mubr.msk.f32.gmra.mrb[64].mxu0 %vm513_vm1, %v406_v42  ;;  %v412_v47 = vld [vmem:[%s9419_s13 + $0x530] sm:$0xff] }
 0x298   : > { %v4265_v52 = vpop.f32.mrb[106].mxu1  ;;  %8070 = vmatprep.mubr.msk.f32.mxu0 %vm9335_vm0, %v9336_v4 }
 0x299   : > { %v5593_v54 = vmax.f32 %v4261_v45, %v5336_v49  ;;  %v2742_v55 = vmul.f32 0.1, %v1887_v50  ;;  %v4266_v56 = vadd.f32 %v10450_v6, %v4265_v52  ;;  %v8523_v57 = vpop.f32.mrb[107].mxu1  ;;  %8681 = vmatmul.mubr.msk.f32.gmra.mrb[212].mxu1 %vm3158_vm5, %v2998_v48 }
 0x29a   : > { %v1891_v58 = vpop.f32.mrb[216].mxu0  ;;  %8683 = vmatprep.mubr.msk.f32.mxu1 %vm9335_vm0, %v9336_v4 }
 0x29b   : > { %5850 = vst.msk [vmem:[%s10103_s18 + $0x1a0] sm:$0xff] %vm3158_vm5, %v5593_v54  ;;  %v2999_v59 = vmax.f32 %v1887_v50, %v2742_v55  ;;  %v5337_v60 = vmul.f32 0.1, %v4266_v56  ;;  %v1892_v61 = vadd.f32 %v10418_v40, %v1891_v58  ;;  %v7913_v63 = vpop.f32.mrb[217].mxu0  ;;  %8071 = vmatmul.mubr.msk.f32.gmra.mrb[66].mxu0 %vm513_vm1, %v407_v53  ;;  %v413_v58 = vld [vmem:[%s9419_s13 + $0x538] sm:$0xff] }
 0x29c   : > { %v4270_v0 = vpop.f32.mrb[108].mxu1  ;;  %8073 = vmatprep.mubr.msk.f32.mxu0 %vm9335_vm0, %v9336_v4 }
 0x29d   : > { %v5594_v2 = vmax.f32 %v4266_v56, %v5337_v60  ;;  %v2743_v15 = vmul.f32 0.1, %v1892_v61  ;;  %v4271_v3 = vadd.f32 %v10450_v6, %v4270_v0  ;;  %v8526_v5 = vpop.f32.mrb[109].mxu1  ;;  %8684 = vmatmul.mubr.msk.f32.gmra.mrb[214].mxu1 %vm3158_vm5, %v2999_v59 }
 0x29e   : > { %v1896_v7 = vpop.f32.mrb[218].mxu0  ;;  %8686 = vmatprep.mubr.msk.f32.mxu1 %vm9335_vm0, %v9336_v4 }
 0x29f   : > { %5851 = vst.msk [vmem:[%s10103_s18 + $0x1a8] sm:$0xff] %vm3158_vm5, %v5594_v2  ;;  %v3000_v8 = vmax.f32 %v1892_v61, %v2743_v15  ;;  %v5338_v9 = vmul.f32 0.1, %v4271_v3  ;;  %v1897_v10 = vadd.f32 %v10418_v40, %v1896_v7  ;;  %v7916_v11 = vpop.f32.mrb[219].mxu0  ;;  %8074 = vmatmul.mubr.msk.f32.gmra.mrb[68].mxu0 %vm513_vm1, %v408_v1  ;;  %v414_v7 = vld [vmem:[%s9419_s13 + $0x540] sm:$0xff] }
 0x2a0   : > { %v4275_v12 = vpop.f32.mrb[110].mxu1  ;;  %8076 = vmatprep.mubr.msk.f32.mxu0 %vm9335_vm0, %v9336_v4 }
 0x2a1   : > { %v5595_v14 = vmax.f32 %v4271_v3, %v5338_v9  ;;  %v2744_v16 = vmul.f32 0.1, %v1897_v10  ;;  %v4276_v17 = vadd.f32 %v10450_v6, %v4275_v12  ;;  %v8529_v18 = vpop.f32.mrb[111].mxu1  ;;  %8687 = vmatmul.mubr.msk.f32.gmra.mrb[216].mxu1 %vm3158_vm5, %v3000_v8 }
 0x2a2   : > { %v1901_v19 = vpop.f32.mrb[220].mxu0  ;;  %8689 = vmatprep.mubr.msk.f32.mxu1 %vm9335_vm0, %v9336_v4 }
 0x2a3   : > { %5852 = vst.msk [vmem:[%s10103_s18 + $0x1b0] sm:$0xff] %vm3158_vm5, %v5595_v14  ;;  %v3001_v20 = vmax.f32 %v1897_v10, %v2744_v16  ;;  %v5339_v21 = vmul.f32 0.1, %v4276_v17  ;;  %v1902_v22 = vadd.f32 %v10418_v40, %v1901_v19  ;;  %v7919_v23 = vpop.f32.mrb[221].mxu0  ;;  %8077 = vmatmul.mubr.msk.f32.gmra.mrb[70].mxu0 %vm513_vm1, %v409_v13  ;;  %v415_v19 = vld [vmem:[%s9419_s13 + $0x548] sm:$0xff] }
 0x2a4   : > { %v4280_v24 = vpop.f32.mrb[112].mxu1  ;;  %8079 = vmatprep.mubr.msk.f32.mxu0 %vm9335_vm0, %v9336_v4 }
 0x2a5   : > { %v5596_v26 = vmax.f32 %v4276_v17, %v5339_v21  ;;  %v2745_v27 = vmul.f32 0.1, %v1902_v22  ;;  %v4281_v28 = vadd.f32 %v10450_v6, %v4280_v24  ;;  %v8532_v29 = vpop.f32.mrb[113].mxu1  ;;  %8690 = vmatmul.mubr.msk.f32.gmra.mrb[218].mxu1 %vm3158_vm5, %v3001_v20 }
 0x2a6   : > { %v1906_v30 = vpop.f32.mrb[222].mxu0  ;;  %8692 = vmatprep.mubr.msk.f32.mxu1 %vm9335_vm0, %v9336_v4 }
 0x2a7   : > { %5853 = vst.msk [vmem:[%s10103_s18 + $0x1b8] sm:$0xff] %vm3158_vm5, %v5596_v26  ;;  %v3002_v31 = vmax.f32 %v1902_v22, %v2745_v27  ;;  %v5340_v32 = vmul.f32 0.1, %v4281_v28  ;;  %v1907_v33 = vadd.f32 %v10418_v40, %v1906_v30  ;;  %v7922_v34 = vpop.f32.mrb[223].mxu0  ;;  %8080 = vmatmul.mubr.msk.f32.gmra.mrb[72].mxu0 %vm513_vm1, %v410_v25  ;;  %v10780_v26 = vld [vmem:[%s12531_s2] ss:$0 sm:$0xff] }
 0x2a8   : > { %v4285_v35 = vpop.f32.mrb[114].mxu1  ;;  %8082 = vmatprep.mubr.msk.f32.mxu0 %vm9335_vm0, %v9336_v4  ;;  %v416_v30 = vld [vmem:[%s9419_s13 + $0x550] sm:$0xff] }
 0x2a9   : > { %v5597_v37 = vmax.f32 %v4281_v28, %v5340_v32  ;;  %v2746_v38 = vmul.f32 0.1, %v1907_v33  ;;  %v4286_v62 = vadd.f32 %v10450_v6, %v4285_v35  ;;  %v8535_v39 = vpop.f32.mrb[115].mxu1  ;;  %8693 = vmatmul.mubr.msk.f32.gmra.mrb[220].mxu1 %vm3158_vm5, %v3002_v31 }
 0x2aa   : > { %v1911_v41 = vpop.f32.mrb[224].mxu0  ;;  %8695 = vmatprep.mubr.msk.f32.mxu1 %vm9335_vm0, %v9336_v4 }
 0x2ab   : > { %5854 = vst.msk [vmem:[%s10103_s18 + $0x1c0] sm:$0xff] %vm3158_vm5, %v5597_v37  ;;  %v3003_v42 = vmax.f32 %v1907_v33, %v2746_v38  ;;  %v5341_v43 = vmul.f32 0.1, %v4286_v62  ;;  %v1912_v44 = vadd.f32 %v10418_v40, %v1911_v41  ;;  %v7925_v45 = vpop.f32.mrb[225].mxu0  ;;  %8083 = vmatmul.mubr.msk.f32.gmra.mrb[74].mxu0 %vm513_vm1, %v411_v36  ;;  %v417_v41 = vld [vmem:[%s9419_s13 + $0x558] sm:$0xff] }
 0x2ac   : > { %v4290_v46 = vpop.f32.mrb[116].mxu1  ;;  %8085 = vmatprep.mubr.msk.f32.mxu0 %vm9335_vm0, %v9336_v4 }
 0x2ad   : > { %v5598_v48 = vmax.f32 %v4286_v62, %v5341_v43  ;;  %v2747_v49 = vmul.f32 0.1, %v1912_v44  ;;  %v4291_v50 = vadd.f32 %v10450_v6, %v4290_v46  ;;  %v8538_v51 = vpop.f32.mrb[117].mxu1  ;;  %8696 = vmatmul.mubr.msk.f32.gmra.mrb[222].mxu1 %vm3158_vm5, %v3003_v42 }
 0x2ae   : > { %v1916_v52 = vpop.f32.mrb[226].mxu0  ;;  %8698 = vmatprep.mubr.msk.f32.mxu1 %vm9335_vm0, %v9336_v4 }
 0x2af   : > { %5855 = vst.msk [vmem:[%s10103_s18 + $0x1c8] sm:$0xff] %vm3158_vm5, %v5598_v48  ;;  %v3004_v53 = vmax.f32 %v1912_v44, %v2747_v49  ;;  %v5342_v54 = vmul.f32 0.1, %v4291_v50  ;;  %v1917_v55 = vadd.f32 %v10418_v40, %v1916_v52  ;;  %v7928_v56 = vpop.f32.mrb[227].mxu0  ;;  %8086 = vmatmul.mubr.msk.f32.gmra.mrb[76].mxu0 %vm513_vm1, %v412_v47 }
 0x2b0   : > { %v4295_v57 = vpop.f32.mrb[118].mxu1  ;;  %8088 = vmatprep.mubr.msk.f32.mxu0 %vm9335_vm0, %v9336_v4 }
 0x2b1   : > { %v5599_v59 = vmax.f32 %v4291_v50, %v5342_v54  ;;  %v2748_v60 = vmul.f32 0.1, %v1917_v55  ;;  %v4296_v61 = vadd.f32 %v10450_v6, %v4295_v57  ;;  %v8541_v63 = vpop.f32.mrb[119].mxu1  ;;  %8699 = vmatmul.mubr.msk.f32.gmra.mrb[224].mxu1 %vm3158_vm5, %v3004_v53  ;;  %v10812_v54 = vld [vmem:[%s12533_s4] ss:$0 sm:$0xff] }
 0x2b2   : > { %v1921_v0 = vpop.f32.mrb[228].mxu0  ;;  %8701 = vmatprep.mubr.msk.f32.mxu1 %vm9335_vm0, %v9336_v4 }
 0x2b3   : > { %5856 = vst.msk [vmem:[%s10103_s18 + $0x1d0] sm:$0xff] %vm3158_vm5, %v5599_v59  ;;  %v3005_v1 = vmax.f32 %v1917_v55, %v2748_v60  ;;  %v5343_v2 = vmul.f32 0.1, %v4296_v61  ;;  %v1922_v15 = vadd.f32 %v10418_v40, %v1921_v0  ;;  %v7931_v3 = vpop.f32.mrb[229].mxu0  ;;  %8089 = vmatmul.mubr.msk.f32.gmra.mrb[78].mxu0 %vm513_vm1, %v413_v58  ;;  %v419_v0 = vld [vmem:[%s9419_s13 + $0x568] sm:$0xff] }
 0x2b4   : > { %v4300_v5 = vpop.f32.mrb[120].mxu1  ;;  %8091 = vmatprep.mubr.msk.f32.mxu0 %vm9335_vm0, %v9336_v4 }
 0x2b5   : > { %v5600_v8 = vmax.f32 %v4296_v61, %v5343_v2  ;;  %v2749_v9 = vmul.f32 0.1, %v1922_v15  ;;  %v4301_v10 = vadd.f32 %v10450_v6, %v4300_v5  ;;  %v8544_v11 = vpop.f32.mrb[121].mxu1  ;;  %8702 = vmatmul.mubr.msk.f32.gmra.mrb[226].mxu1 %vm3158_vm5, %v3005_v1 }
 0x2b6   : > { %v1926_v12 = vpop.f32.mrb[230].mxu0  ;;  %8704 = vmatprep.mubr.msk.f32.mxu1 %vm9335_vm0, %v9336_v4 }
 0x2b7   : > { %5857 = vst.msk [vmem:[%s10103_s18 + $0x1d8] sm:$0xff] %vm3158_vm5, %v5600_v8  ;;  %v3006_v13 = vmax.f32 %v1922_v15, %v2749_v9  ;;  %v5344_v14 = vmul.f32 0.1, %v4301_v10  ;;  %v1927_v16 = vadd.f32 %v10418_v40, %v1926_v12  ;;  %v7934_v17 = vpop.f32.mrb[231].mxu0  ;;  %8092 = vmatmul.mubr.msk.f32.gmra.mrb[80].mxu0 %vm513_vm1, %v414_v7  ;;  %v420_v12 = vld [vmem:[%s9419_s13 + $0x570] sm:$0xff] }
 0x2b8   : > { %v4305_v18 = vpop.f32.mrb[122].mxu1  ;;  %8094 = vmatprep.mubr.msk.f32.mxu0 %vm9335_vm0, %v9336_v4 }
 0x2b9   : > { %v5601_v20 = vmax.f32 %v4301_v10, %v5344_v14  ;;  %v2750_v21 = vmul.f32 0.1, %v1927_v16  ;;  %v4306_v22 = vadd.f32 %v10450_v6, %v4305_v18  ;;  %v8547_v23 = vpop.f32.mrb[123].mxu1  ;;  %8705 = vmatmul.mubr.msk.f32.gmra.mrb[228].mxu1 %vm3158_vm5, %v3006_v13 }
 0x2ba   : > { %v1931_v24 = vpop.f32.mrb[232].mxu0  ;;  %8707 = vmatprep.mubr.msk.f32.mxu1 %vm9335_vm0, %v9336_v4 }
 0x2bb   : > { %5858 = vst.msk [vmem:[%s10103_s18 + $0x1e0] sm:$0xff] %vm3158_vm5, %v5601_v20  ;;  %v3007_v40 = vmax.f32 %v1927_v16, %v2750_v21  ;;  %v5345_v25 = vmul.f32 0.1, %v4306_v22  ;;  %v1932_v27 = vadd.f32 %v10780_v26, %v1931_v24  ;;  %v7937_v28 = vpop.f32.mrb[233].mxu0  ;;  %8095 = vmatmul.mubr.msk.f32.gmra.mrb[82].mxu0 %vm513_vm1, %v415_v19  ;;  %v421_v24 = vld [vmem:[%s9419_s13 + $0x578] sm:$0xff] }
 0x2bc   : > { %v4310_v29 = vpop.f32.mrb[124].mxu1  ;;  %8097 = vmatprep.mubr.msk.f32.mxu0 %vm9335_vm0, %v9336_v4 }
 0x2bd   : > { %v5602_v31 = vmax.f32 %v4306_v22, %v5345_v25  ;;  %v2751_v32 = vmul.f32 0.1, %v1932_v27  ;;  %v4311_v33 = vadd.f32 %v10450_v6, %v4310_v29  ;;  %v8550_v34 = vpop.f32.mrb[125].mxu1  ;;  %8708 = vmatmul.mubr.msk.f32.gmra.mrb[230].mxu1 %vm3158_vm5, %v3007_v40 }
 0x2be   : > { %v1936_v35 = vpop.f32.mrb[234].mxu0  ;;  %8710 = vmatprep.mubr.msk.f32.mxu1 %vm9335_vm0, %v9336_v4 }
 0x2bf   : > { %5859 = vst.msk [vmem:[%s10103_s18 + $0x1e8] sm:$0xff] %vm3158_vm5, %v5602_v31  ;;  %v3008_v36 = vmax.f32 %v1932_v27, %v2751_v32  ;;  %v5346_v37 = vmul.f32 0.1, %v4311_v33  ;;  %v1937_v38 = vadd.f32 %v10780_v26, %v1936_v35  ;;  %v7940_v62 = vpop.f32.mrb[235].mxu0  ;;  %8098 = vmatmul.mubr.msk.f32.gmra.mrb[84].mxu0 %vm513_vm1, %v416_v30  ;;  %v422_v35 = vld [vmem:[%s9419_s13 + $0x580] sm:$0xff] }
 0x2c0   : > { %v4315_v39 = vpop.f32.mrb[126].mxu1  ;;  %8100 = vmatprep.mubr.msk.f32.mxu0 %vm9335_vm0, %v9336_v4 }
 0x2c1   : > { %v5603_v42 = vmax.f32 %v4311_v33, %v5346_v37  ;;  %v2752_v43 = vmul.f32 0.1, %v1937_v38  ;;  %v4316_v44 = vadd.f32 %v10450_v6, %v4315_v39  ;;  %v8553_v45 = vpop.f32.mrb[127].mxu1  ;;  %8711 = vmatmul.mubr.msk.f32.gmra.mrb[232].mxu1 %vm3158_vm5, %v3008_v36  ;;  %v418_v6 = vld [vmem:[%s9419_s13 + $0x560] sm:$0xff] }
 0x2c2   : > { %v1941_v46 = vpop.f32.mrb[236].mxu0  ;;  %8713 = vmatprep.mubr.msk.f32.mxu1 %vm9335_vm0, %v9336_v4 }
 0x2c3   : > { %5860 = vst.msk [vmem:[%s10103_s18 + $0x1f0] sm:$0xff] %vm3158_vm5, %v5603_v42  ;;  %v3009_v47 = vmax.f32 %v1937_v38, %v2752_v43  ;;  %v5347_v48 = vmul.f32 0.1, %v4316_v44  ;;  %v1942_v49 = vadd.f32 %v10780_v26, %v1941_v46  ;;  %v7943_v50 = vpop.f32.mrb[237].mxu0  ;;  %8101 = vmatmul.mubr.msk.f32.gmra.mrb[86].mxu0 %vm513_vm1, %v417_v41  ;;  %v423_v46 = vld [vmem:[%s9419_s13 + $0x588] sm:$0xff] }
 0x2c4   : > { %v4320_v51 = vpop.f32.mrb[128].mxu1  ;;  %8103 = vmatprep.mubr.msk.f32.mxu0 %vm9335_vm0, %v9336_v4 }
 0x2c5   : > { %v5604_v52 = vmax.f32 %v4316_v44, %v5347_v48  ;;  %v2753_v53 = vmul.f32 0.1, %v1942_v49  ;;  %v4321_v55 = vadd.f32 %v10812_v54, %v4320_v51  ;;  %v8556_v56 = vpop.f32.mrb[129].mxu1  ;;  %8714 = vmatmul.mubr.msk.f32.gmra.mrb[234].mxu1 %vm3158_vm5, %v3009_v47 }
 0x2c6   : > { %v1946_v57 = vpop.f32.mrb[238].mxu0  ;;  %8716 = vmatprep.mubr.msk.f32.mxu1 %vm9335_vm0, %v9336_v4 }
 0x2c7   : > { %5861 = vst.msk [vmem:[%s10103_s18 + $0x1f8] sm:$0xff] %vm3158_vm5, %v5604_v52  ;;  %v3010_v58 = vmax.f32 %v1942_v49, %v2753_v53  ;;  %v5348_v59 = vmul.f32 0.1, %v4321_v55  ;;  %v1947_v60 = vadd.f32 %v10780_v26, %v1946_v57  ;;  %v7946_v61 = vpop.f32.mrb[239].mxu0  ;;  %8104 = vmatmul.mubr.msk.f32.gmra.mrb[88].mxu0 %vm513_vm1, %v418_v6  ;;  %v424_v57 = vld [vmem:[%s9419_s13 + $0x590] sm:$0xff] }
 0x2c8   : > { %v4325_v63 = vpop.f32.mrb[130].mxu1  ;;  %8106 = vmatprep.mubr.msk.f32.mxu0 %vm9335_vm0, %v9336_v4 }
 0x2c9   : > { %v5605_v1 = vmax.f32 %v4321_v55, %v5348_v59  ;;  %v2754_v2 = vmul.f32 0.1, %v1947_v60  ;;  %v4326_v15 = vadd.f32 %v10812_v54, %v4325_v63  ;;  %v8559_v3 = vpop.f32.mrb[131].mxu1  ;;  %8717 = vmatmul.mubr.msk.f32.gmra.mrb[236].mxu1 %vm3158_vm5, %v3010_v58 }
 0x2ca   : > { %v1951_v5 = vpop.f32.mrb[240].mxu0  ;;  %8719 = vmatprep.mubr.msk.f32.mxu1 %vm9335_vm0, %v9336_v4 }
 0x2cb   : > { %5862 = vst.msk [vmem:[%s10103_s18 + $0x200] sm:$0xff] %vm3158_vm5, %v5605_v1  ;;  %v3011_v7 = vmax.f32 %v1947_v60, %v2754_v2  ;;  %v5349_v8 = vmul.f32 0.1, %v4326_v15  ;;  %v1952_v9 = vadd.f32 %v10780_v26, %v1951_v5  ;;  %v7949_v10 = vpop.f32.mrb[241].mxu0  ;;  %8107 = vmatmul.mubr.msk.f32.gmra.mrb[90].mxu0 %vm513_vm1, %v419_v0  ;;  %v425_v5 = vld [vmem:[%s9419_s13 + $0x598] sm:$0xff] }
 0x2cc   : > { %v4330_v11 = vpop.f32.mrb[132].mxu1  ;;  %8109 = vmatprep.mubr.msk.f32.mxu0 %vm9335_vm0, %v9336_v4 }
 0x2cd   : > { %v5606_v13 = vmax.f32 %v4326_v15, %v5349_v8  ;;  %v2755_v14 = vmul.f32 0.1, %v1952_v9  ;;  %v4331_v16 = vadd.f32 %v10812_v54, %v4330_v11  ;;  %v8562_v17 = vpop.f32.mrb[133].mxu1  ;;  %8720 = vmatmul.mubr.msk.f32.gmra.mrb[238].mxu1 %vm3158_vm5, %v3011_v7 }
 0x2ce   : > { %v1956_v18 = vpop.f32.mrb[242].mxu0  ;;  %8722 = vmatprep.mubr.msk.f32.mxu1 %vm9335_vm0, %v9336_v4 }
 0x2cf   : > { %5863 = vst.msk [vmem:[%s10103_s18 + $0x208] sm:$0xff] %vm3158_vm5, %v5606_v13  ;;  %v3012_v19 = vmax.f32 %v1952_v9, %v2755_v14  ;;  %v5350_v20 = vmul.f32 0.1, %v4331_v16  ;;  %v1957_v21 = vadd.f32 %v10780_v26, %v1956_v18  ;;  %v7952_v22 = vpop.f32.mrb[243].mxu0  ;;  %8110 = vmatmul.mubr.msk.f32.gmra.mrb[92].mxu0 %vm513_vm1, %v420_v12  ;;  %v426_v18 = vld [vmem:[%s9419_s13 + $0x5a0] sm:$0xff] }
 0x2d0   : > { %v4335_v23 = vpop.f32.mrb[134].mxu1  ;;  %8112 = vmatprep.mubr.msk.f32.mxu0 %vm9335_vm0, %v9336_v4 }
 0x2d1   : > { %v5607_v40 = vmax.f32 %v4331_v16, %v5350_v20  ;;  %v2756_v25 = vmul.f32 0.1, %v1957_v21  ;;  %v4336_v27 = vadd.f32 %v10812_v54, %v4335_v23  ;;  %v8565_v28 = vpop.f32.mrb[135].mxu1  ;;  %8723 = vmatmul.mubr.msk.f32.gmra.mrb[240].mxu1 %vm3158_vm5, %v3012_v19 }
 0x2d2   : > { %v1961_v29 = vpop.f32.mrb[244].mxu0  ;;  %8725 = vmatprep.mubr.msk.f32.mxu1 %vm9335_vm0, %v9336_v4 }
 0x2d3   : > { %5864 = vst.msk [vmem:[%s10103_s18 + $0x210] sm:$0xff] %vm3158_vm5, %v5607_v40  ;;  %v3013_v30 = vmax.f32 %v1957_v21, %v2756_v25  ;;  %v5351_v31 = vmul.f32 0.1, %v4336_v27  ;;  %v1962_v32 = vadd.f32 %v10780_v26, %v1961_v29  ;;  %v7955_v33 = vpop.f32.mrb[245].mxu0  ;;  %8113 = vmatmul.mubr.msk.f32.gmra.mrb[94].mxu0 %vm513_vm1, %v421_v24  ;;  %v427_v29 = vld [vmem:[%s9419_s13 + $0x5a8] sm:$0xff] }
 0x2d4   : > { %v4340_v34 = vpop.f32.mrb[136].mxu1  ;;  %8115 = vmatprep.mubr.msk.f32.mxu0 %vm9335_vm0, %v9336_v4 }
 0x2d5   : > { %v5608_v36 = vmax.f32 %v4336_v27, %v5351_v31  ;;  %v2757_v37 = vmul.f32 0.1, %v1962_v32  ;;  %v4341_v38 = vadd.f32 %v10812_v54, %v4340_v34  ;;  %v8568_v62 = vpop.f32.mrb[137].mxu1  ;;  %8726 = vmatmul.mubr.msk.f32.gmra.mrb[242].mxu1 %vm3158_vm5, %v3013_v30 }
 0x2d6   : > { %v1966_v39 = vpop.f32.mrb[246].mxu0  ;;  %8728 = vmatprep.mubr.msk.f32.mxu1 %vm9335_vm0, %v9336_v4 }
 0x2d7   : > { %5865 = vst.msk [vmem:[%s10103_s18 + $0x218] sm:$0xff] %vm3158_vm5, %v5608_v36  ;;  %v3014_v41 = vmax.f32 %v1962_v32, %v2757_v37  ;;  %v5352_v42 = vmul.f32 0.1, %v4341_v38  ;;  %v1967_v43 = vadd.f32 %v10780_v26, %v1966_v39  ;;  %v7958_v44 = vpop.f32.mrb[247].mxu0  ;;  %8116 = vmatmul.mubr.msk.f32.gmra.mrb[96].mxu0 %vm513_vm1, %v422_v35  ;;  %v428_v39 = vld [vmem:[%s9419_s13 + $0x5b0] sm:$0xff] }
 0x2d8   : > { %v4345_v45 = vpop.f32.mrb[138].mxu1  ;;  %8118 = vmatprep.mubr.msk.f32.mxu0 %vm9335_vm0, %v9336_v4 }
 0x2d9   : > { %v5609_v47 = vmax.f32 %v4341_v38, %v5352_v42  ;;  %v2758_v48 = vmul.f32 0.1, %v1967_v43  ;;  %v4346_v49 = vadd.f32 %v10812_v54, %v4345_v45  ;;  %v8571_v50 = vpop.f32.mrb[139].mxu1  ;;  %8729 = vmatmul.mubr.msk.f32.gmra.mrb[244].mxu1 %vm3158_vm5, %v3014_v41 }
 0x2da   : > { %v1971_v51 = vpop.f32.mrb[248].mxu0  ;;  %8731 = vmatprep.mubr.msk.f32.mxu1 %vm9335_vm0, %v9336_v4 }
 0x2db   : > { %5866 = vst.msk [vmem:[%s10103_s18 + $0x220] sm:$0xff] %vm3158_vm5, %v5609_v47  ;;  %v3015_v6 = vmax.f32 %v1967_v43, %v2758_v48  ;;  %v5353_v52 = vmul.f32 0.1, %v4346_v49  ;;  %v1972_v53 = vadd.f32 %v10780_v26, %v1971_v51  ;;  %v7961_v55 = vpop.f32.mrb[249].mxu0  ;;  %8119 = vmatmul.mubr.msk.f32.gmra.mrb[98].mxu0 %vm513_vm1, %v423_v46  ;;  %v429_v51 = vld [vmem:[%s9419_s13 + $0x5b8] sm:$0xff] }
 0x2dc   : > { %v4350_v56 = vpop.f32.mrb[140].mxu1  ;;  %8121 = vmatprep.mubr.msk.f32.mxu0 %vm9335_vm0, %v9336_v4 }
 0x2dd   : > { %v5610_v58 = vmax.f32 %v4346_v49, %v5353_v52  ;;  %v2759_v59 = vmul.f32 0.1, %v1972_v53  ;;  %v4351_v60 = vadd.f32 %v10812_v54, %v4350_v56  ;;  %v8574_v61 = vpop.f32.mrb[141].mxu1  ;;  %8732 = vmatmul.mubr.msk.f32.gmra.mrb[246].mxu1 %vm3158_vm5, %v3015_v6 }
 0x2de   : > { %v1976_v63 = vpop.f32.mrb[250].mxu0  ;;  %8734 = vmatprep.mubr.msk.f32.mxu1 %vm9335_vm0, %v9336_v4 }
 0x2df   : > { %5867 = vst.msk [vmem:[%s10103_s18 + $0x228] sm:$0xff] %vm3158_vm5, %v5610_v58  ;;  %v3016_v0 = vmax.f32 %v1972_v53, %v2759_v59  ;;  %v5354_v1 = vmul.f32 0.1, %v4351_v60  ;;  %v1977_v2 = vadd.f32 %v10780_v26, %v1976_v63  ;;  %v7964_v15 = vpop.f32.mrb[251].mxu0  ;;  %8122 = vmatmul.mubr.msk.f32.gmra.mrb[100].mxu0 %vm513_vm1, %v424_v57  ;;  %v430_v63 = vld [vmem:[%s9419_s13 + $0x5c0] sm:$0xff] }
 0x2e0   : > { %v4355_v3 = vpop.f32.mrb[142].mxu1  ;;  %8124 = vmatprep.mubr.msk.f32.mxu0 %vm9335_vm0, %v9336_v4 }
 0x2e1   : > { %v5611_v7 = vmax.f32 %v4351_v60, %v5354_v1  ;;  %v2760_v8 = vmul.f32 0.1, %v1977_v2  ;;  %v4356_v9 = vadd.f32 %v10812_v54, %v4355_v3  ;;  %v8577_v10 = vpop.f32.mrb[143].mxu1  ;;  %8735 = vmatmul.mubr.msk.f32.gmra.mrb[248].mxu1 %vm3158_vm5, %v3016_v0 }
 0x2e2   : > { %v1981_v11 = vpop.f32.mrb[252].mxu0  ;;  %8737 = vmatprep.mubr.msk.f32.mxu1 %vm9335_vm0, %v9336_v4 }
 0x2e3   : > { %5868 = vst.msk [vmem:[%s10103_s18 + $0x230] sm:$0xff] %vm3158_vm5, %v5611_v7  ;;  %v3017_v12 = vmax.f32 %v1977_v2, %v2760_v8  ;;  %v5355_v13 = vmul.f32 0.1, %v4356_v9  ;;  %v1982_v14 = vadd.f32 %v10780_v26, %v1981_v11  ;;  %v7967_v16 = vpop.f32.mrb[253].mxu0  ;;  %8125 = vmatmul.mubr.msk.f32.gmra.mrb[102].mxu0 %vm513_vm1, %v425_v5  ;;  %v431_v11 = vld [vmem:[%s9419_s13 + $0x5c8] sm:$0xff] }
 0x2e4   : > { %v4360_v17 = vpop.f32.mrb[144].mxu1  ;;  %8127 = vmatprep.mubr.msk.f32.mxu0 %vm9335_vm0, %v9336_v4 }
 0x2e5   : > { %v5612_v19 = vmax.f32 %v4356_v9, %v5355_v13  ;;  %v2761_v20 = vmul.f32 0.1, %v1982_v14  ;;  %v4361_v21 = vadd.f32 %v10812_v54, %v4360_v17  ;;  %v8580_v22 = vpop.f32.mrb[145].mxu1  ;;  %8738 = vmatmul.mubr.msk.f32.gmra.mrb[250].mxu1 %vm3158_vm5, %v3017_v12 }
 0x2e6   : > { %v1986_v23 = vpop.f32.mrb[254].mxu0  ;;  %8740 = vmatprep.mubr.msk.f32.mxu1 %vm9335_vm0, %v9336_v4 }
 0x2e7   : > { %5869 = vst.msk [vmem:[%s10103_s18 + $0x238] sm:$0xff] %vm3158_vm5, %v5612_v19  ;;  %v3018_v24 = vmax.f32 %v1982_v14, %v2761_v20  ;;  %v5356_v40 = vmul.f32 0.1, %v4361_v21  ;;  %v1987_v25 = vadd.f32 %v10780_v26, %v1986_v23  ;;  %v7970_v27 = vpop.f32.mrb[255].mxu0  ;;  %8128 = vmatmul.mubr.msk.f32.gmra.mrb[104].mxu0 %vm513_vm1, %v426_v18  ;;  %v432_v23 = vld [vmem:[%s9419_s13 + $0x5d0] sm:$0xff] }
 0x2e8   : > { %v4365_v28 = vpop.f32.mrb[146].mxu1  ;;  %8130 = vmatprep.mubr.msk.f32.mxu0 %vm9335_vm0, %v9336_v4 }
 0x2e9   : > { %v5613_v30 = vmax.f32 %v4361_v21, %v5356_v40  ;;  %v2762_v31 = vmul.f32 0.1, %v1987_v25  ;;  %v4366_v32 = vadd.f32 %v10812_v54, %v4365_v28  ;;  %v8583_v33 = vpop.f32.mrb[147].mxu1  ;;  %8741 = vmatmul.mubr.msk.f32.gmra.mrb[252].mxu1 %vm3158_vm5, %v3018_v24 }
 0x2ea   : > { %v1991_v34 = vpop.f32.mrb[0].mxu0  ;;  %8743 = vmatprep.mubr.msk.f32.mxu1 %vm9335_vm0, %v9336_v4 }
 0x2eb   : > { %5870 = vst.msk [vmem:[%s10103_s18 + $0x240] sm:$0xff] %vm3158_vm5, %v5613_v30  ;;  %v3019_v35 = vmax.f32 %v1987_v25, %v2762_v31  ;;  %v5357_v36 = vmul.f32 0.1, %v4366_v32  ;;  %v1992_v37 = vadd.f32 %v10780_v26, %v1991_v34  ;;  %v7973_v38 = vpop.f32.mrb[1].mxu0  ;;  %8131 = vmatmul.mubr.msk.f32.gmra.mrb[106].mxu0 %vm513_vm1, %v427_v29  ;;  %v433_v34 = vld [vmem:[%s9419_s13 + $0x5d8] sm:$0xff] }
 0x2ec   : > { %v4370_v62 = vpop.f32.mrb[148].mxu1  ;;  %8133 = vmatprep.mubr.msk.f32.mxu0 %vm9335_vm0, %v9336_v4 }
 0x2ed   : > { %v5614_v41 = vmax.f32 %v4366_v32, %v5357_v36  ;;  %v2763_v42 = vmul.f32 0.1, %v1992_v37  ;;  %v4371_v43 = vadd.f32 %v10812_v54, %v4370_v62  ;;  %v8586_v44 = vpop.f32.mrb[149].mxu1  ;;  %8744 = vmatmul.mubr.msk.f32.gmra.mrb[254].mxu1 %vm3158_vm5, %v3019_v35 }
 0x2ee   : > { %v1996_v45 = vpop.f32.mrb[2].mxu0  ;;  %8746 = vmatprep.mubr.msk.f32.mxu1 %vm9335_vm0, %v9336_v4 }
 0x2ef   : > { %5871 = vst.msk [vmem:[%s10103_s18 + $0x248] sm:$0xff] %vm3158_vm5, %v5614_v41  ;;  %v3020_v46 = vmax.f32 %v1992_v37, %v2763_v42  ;;  %v5358_v47 = vmul.f32 0.1, %v4371_v43  ;;  %v1997_v48 = vadd.f32 %v10780_v26, %v1996_v45  ;;  %v7976_v49 = vpop.f32.mrb[3].mxu0  ;;  %8134 = vmatmul.mubr.msk.f32.gmra.mrb[108].mxu0 %vm513_vm1, %v428_v39  ;;  %v434_v45 = vld [vmem:[%s9419_s13 + $0x5e0] sm:$0xff] }
 0x2f0   : > { %v4375_v50 = vpop.f32.mrb[150].mxu1  ;;  %8136 = vmatprep.mubr.msk.f32.mxu0 %vm9335_vm0, %v9336_v4 }
 0x2f1   : > { %v5615_v6 = vmax.f32 %v4371_v43, %v5358_v47  ;;  %v2764_v52 = vmul.f32 0.1, %v1997_v48  ;;  %v4376_v53 = vadd.f32 %v10812_v54, %v4375_v50  ;;  %v8589_v55 = vpop.f32.mrb[151].mxu1  ;;  %8747 = vmatmul.mubr.msk.f32.gmra.mrb[0].mxu1 %vm3158_vm5, %v3020_v46 }
 0x2f2   : > { %v2001_v56 = vpop.f32.mrb[4].mxu0  ;;  %8749 = vmatprep.mubr.msk.f32.mxu1 %vm9335_vm0, %v9336_v4 }
 0x2f3   : > { %5872 = vst.msk [vmem:[%s10103_s18 + $0x250] sm:$0xff] %vm3158_vm5, %v5615_v6  ;;  %v3021_v57 = vmax.f32 %v1997_v48, %v2764_v52  ;;  %v5359_v58 = vmul.f32 0.1, %v4376_v53  ;;  %v2002_v59 = vadd.f32 %v10780_v26, %v2001_v56  ;;  %v7979_v60 = vpop.f32.mrb[5].mxu0  ;;  %8137 = vmatmul.mubr.msk.f32.gmra.mrb[110].mxu0 %vm513_vm1, %v429_v51  ;;  %v435_v56 = vld [vmem:[%s9419_s13 + $0x5e8] sm:$0xff] }
 0x2f4   : > { %v4380_v61 = vpop.f32.mrb[152].mxu1  ;;  %8139 = vmatprep.mubr.msk.f32.mxu0 %vm9335_vm0, %v9336_v4 }
 0x2f5   : > { %v5616_v0 = vmax.f32 %v4376_v53, %v5359_v58  ;;  %v2765_v1 = vmul.f32 0.1, %v2002_v59  ;;  %v4381_v2 = vadd.f32 %v10812_v54, %v4380_v61  ;;  %v8592_v15 = vpop.f32.mrb[153].mxu1  ;;  %8750 = vmatmul.mubr.msk.f32.gmra.mrb[2].mxu1 %vm3158_vm5, %v3021_v57 }
 0x2f6   : > { %v2006_v3 = vpop.f32.mrb[6].mxu0  ;;  %8752 = vmatprep.mubr.msk.f32.mxu1 %vm9335_vm0, %v9336_v4 }
 0x2f7   : > { %5873 = vst.msk [vmem:[%s10103_s18 + $0x258] sm:$0xff] %vm3158_vm5, %v5616_v0  ;;  %v3022_v5 = vmax.f32 %v2002_v59, %v2765_v1  ;;  %v5360_v7 = vmul.f32 0.1, %v4381_v2  ;;  %v2007_v8 = vadd.f32 %v10780_v26, %v2006_v3  ;;  %v7982_v9 = vpop.f32.mrb[7].mxu0  ;;  %8140 = vmatmul.mubr.msk.f32.gmra.mrb[112].mxu0 %vm513_vm1, %v430_v63  ;;  %v436_v3 = vld [vmem:[%s9419_s13 + $0x5f0] sm:$0xff] }
 0x2f8   : > { %v4385_v10 = vpop.f32.mrb[154].mxu1  ;;  %8142 = vmatprep.mubr.msk.f32.mxu0 %vm9335_vm0, %v9336_v4 }
 0x2f9   : > { %v5617_v12 = vmax.f32 %v4381_v2, %v5360_v7  ;;  %v2766_v13 = vmul.f32 0.1, %v2007_v8  ;;  %v4386_v14 = vadd.f32 %v10812_v54, %v4385_v10  ;;  %v8595_v16 = vpop.f32.mrb[155].mxu1  ;;  %8753 = vmatmul.mubr.msk.f32.gmra.mrb[4].mxu1 %vm3158_vm5, %v3022_v5 }
 0x2fa   : > { %v2011_v17 = vpop.f32.mrb[8].mxu0  ;;  %8755 = vmatprep.mubr.msk.f32.mxu1 %vm9335_vm0, %v9336_v4 }
 0x2fb   : > { %5874 = vst.msk [vmem:[%s10103_s18 + $0x260] sm:$0xff] %vm3158_vm5, %v5617_v12  ;;  %v3023_v18 = vmax.f32 %v2007_v8, %v2766_v13  ;;  %v5361_v19 = vmul.f32 0.1, %v4386_v14  ;;  %v2012_v20 = vadd.f32 %v10780_v26, %v2011_v17  ;;  %v7985_v21 = vpop.f32.mrb[9].mxu0  ;;  %8143 = vmatmul.mubr.msk.f32.gmra.mrb[114].mxu0 %vm513_vm1, %v431_v11  ;;  %v437_v17 = vld [vmem:[%s9419_s13 + $0x5f8] sm:$0xff] }
 0x2fc   : > { %v4390_v22 = vpop.f32.mrb[156].mxu1  ;;  %8145 = vmatprep.mubr.msk.f32.mxu0 %vm9335_vm0, %v9336_v4 }
 0x2fd   : > { %v5618_v24 = vmax.f32 %v4386_v14, %v5361_v19  ;;  %v2767_v40 = vmul.f32 0.1, %v2012_v20  ;;  %v4391_v25 = vadd.f32 %v10812_v54, %v4390_v22  ;;  %v8598_v27 = vpop.f32.mrb[157].mxu1  ;;  %8756 = vmatmul.mubr.msk.f32.gmra.mrb[6].mxu1 %vm3158_vm5, %v3023_v18 }
 0x2fe   : > { %v2016_v28 = vpop.f32.mrb[10].mxu0  ;;  %8758 = vmatprep.mubr.msk.f32.mxu1 %vm9335_vm0, %v9336_v4 }
 0x2ff   : > { %5875 = vst.msk [vmem:[%s10103_s18 + $0x268] sm:$0xff] %vm3158_vm5, %v5618_v24  ;;  %v3024_v29 = vmax.f32 %v2012_v20, %v2767_v40  ;;  %v5362_v30 = vmul.f32 0.1, %v4391_v25  ;;  %v2017_v31 = vadd.f32 %v10780_v26, %v2016_v28  ;;  %v7988_v32 = vpop.f32.mrb[11].mxu0  ;;  %8146 = vmatmul.mubr.msk.f32.gmra.mrb[116].mxu0 %vm513_vm1, %v432_v23  ;;  %v438_v28 = vld [vmem:[%s9419_s13 + $0x600] sm:$0xff] }
 0x300   : > { %v4395_v33 = vpop.f32.mrb[158].mxu1  ;;  %8148 = vmatprep.mubr.msk.f32.mxu0 %vm9335_vm0, %v9336_v4 }
 0x301   : > { %v5619_v35 = vmax.f32 %v4391_v25, %v5362_v30  ;;  %v2768_v36 = vmul.f32 0.1, %v2017_v31  ;;  %v4396_v37 = vadd.f32 %v10812_v54, %v4395_v33  ;;  %v8601_v38 = vpop.f32.mrb[159].mxu1  ;;  %8759 = vmatmul.mubr.msk.f32.gmra.mrb[8].mxu1 %vm3158_vm5, %v3024_v29 }
 0x302   : > { %v2021_v62 = vpop.f32.mrb[12].mxu0  ;;  %8761 = vmatprep.mubr.msk.f32.mxu1 %vm9335_vm0, %v9336_v4 }
 0x303   : > { %5876 = vst.msk [vmem:[%s10103_s18 + $0x270] sm:$0xff] %vm3158_vm5, %v5619_v35  ;;  %v3025_v39 = vmax.f32 %v2017_v31, %v2768_v36  ;;  %v5363_v41 = vmul.f32 0.1, %v4396_v37  ;;  %v2022_v42 = vadd.f32 %v10780_v26, %v2021_v62  ;;  %v7991_v43 = vpop.f32.mrb[13].mxu0  ;;  %8149 = vmatmul.mubr.msk.f32.gmra.mrb[118].mxu0 %vm513_vm1, %v433_v34  ;;  %v439_v62 = vld [vmem:[%s9419_s13 + $0x608] sm:$0xff] }
 0x304   : > { %v4400_v44 = vpop.f32.mrb[160].mxu1  ;;  %8151 = vmatprep.mubr.msk.f32.mxu0 %vm9335_vm0, %v9336_v4 }
 0x305   : > { %v5620_v46 = vmax.f32 %v4396_v37, %v5363_v41  ;;  %v2769_v47 = vmul.f32 0.1, %v2022_v42  ;;  %v4401_v48 = vadd.f32 %v10812_v54, %v4400_v44  ;;  %v8604_v49 = vpop.f32.mrb[161].mxu1  ;;  %8762 = vmatmul.mubr.msk.f32.gmra.mrb[10].mxu1 %vm3158_vm5, %v3025_v39 }
 0x306   : > { %v2026_v50 = vpop.f32.mrb[14].mxu0  ;;  %8764 = vmatprep.mubr.msk.f32.mxu1 %vm9335_vm0, %v9336_v4 }
 0x307   : > { %5877 = vst.msk [vmem:[%s10103_s18 + $0x278] sm:$0xff] %vm3158_vm5, %v5620_v46  ;;  %v3026_v51 = vmax.f32 %v2022_v42, %v2769_v47  ;;  %v5364_v6 = vmul.f32 0.1, %v4401_v48  ;;  %v2027_v52 = vadd.f32 %v10780_v26, %v2026_v50  ;;  %v7994_v53 = vpop.f32.mrb[15].mxu0  ;;  %8152 = vmatmul.mubr.msk.f32.gmra.mrb[120].mxu0 %vm513_vm1, %v434_v45  ;;  %v440_v50 = vld [vmem:[%s9419_s13 + $0x610] sm:$0xff] }
 0x308   : > { %v4405_v55 = vpop.f32.mrb[162].mxu1  ;;  %8154 = vmatprep.mubr.msk.f32.mxu0 %vm9335_vm0, %v9336_v4 }
 0x309   : > { %v5621_v57 = vmax.f32 %v4401_v48, %v5364_v6  ;;  %v2770_v58 = vmul.f32 0.1, %v2027_v52  ;;  %v4406_v59 = vadd.f32 %v10812_v54, %v4405_v55  ;;  %v8607_v60 = vpop.f32.mrb[163].mxu1  ;;  %8765 = vmatmul.mubr.msk.f32.gmra.mrb[12].mxu1 %vm3158_vm5, %v3026_v51 }
 0x30a   : > { %v2031_v61 = vpop.f32.mrb[16].mxu0  ;;  %8767 = vmatprep.mubr.msk.f32.mxu1 %vm9335_vm0, %v9336_v4 }
 0x30b   : > { %5878 = vst.msk [vmem:[%s10103_s18 + $0x280] sm:$0xff] %vm3158_vm5, %v5621_v57  ;;  %v3027_v63 = vmax.f32 %v2027_v52, %v2770_v58  ;;  %v5365_v0 = vmul.f32 0.1, %v4406_v59  ;;  %v2032_v1 = vadd.f32 %v10780_v26, %v2031_v61  ;;  %v7997_v2 = vpop.f32.mrb[17].mxu0  ;;  %8155 = vmatmul.mubr.msk.f32.gmra.mrb[122].mxu0 %vm513_vm1, %v435_v56  ;;  %v441_v61 = vld [vmem:[%s9419_s13 + $0x618] sm:$0xff] }
 0x30c   : > { %v4410_v15 = vpop.f32.mrb[164].mxu1  ;;  %8157 = vmatprep.mubr.msk.f32.mxu0 %vm9335_vm0, %v9336_v4 }
 0x30d   : > { %v5622_v5 = vmax.f32 %v4406_v59, %v5365_v0  ;;  %v2771_v7 = vmul.f32 0.1, %v2032_v1  ;;  %v4411_v8 = vadd.f32 %v10812_v54, %v4410_v15  ;;  %v8610_v9 = vpop.f32.mrb[165].mxu1  ;;  %8768 = vmatmul.mubr.msk.f32.gmra.mrb[14].mxu1 %vm3158_vm5, %v3027_v63 }
 0x30e   : > { %v2036_v10 = vpop.f32.mrb[18].mxu0  ;;  %8770 = vmatprep.mubr.msk.f32.mxu1 %vm9335_vm0, %v9336_v4 }
 0x30f   : > { %5879 = vst.msk [vmem:[%s10103_s18 + $0x288] sm:$0xff] %vm3158_vm5, %v5622_v5  ;;  %v3028_v11 = vmax.f32 %v2032_v1, %v2771_v7  ;;  %v5366_v12 = vmul.f32 0.1, %v4411_v8  ;;  %v2037_v13 = vadd.f32 %v10780_v26, %v2036_v10  ;;  %v8000_v14 = vpop.f32.mrb[19].mxu0  ;;  %8158 = vmatmul.mubr.msk.f32.gmra.mrb[124].mxu0 %vm513_vm1, %v436_v3  ;;  %v442_v10 = vld [vmem:[%s9419_s13 + $0x620] sm:$0xff] }
 0x310   : > { %v4415_v16 = vpop.f32.mrb[166].mxu1  ;;  %8160 = vmatprep.mubr.msk.f32.mxu0 %vm9335_vm0, %v9336_v4 }
 0x311   : > { %v5623_v18 = vmax.f32 %v4411_v8, %v5366_v12  ;;  %v2772_v19 = vmul.f32 0.1, %v2037_v13  ;;  %v4416_v20 = vadd.f32 %v10812_v54, %v4415_v16  ;;  %v8613_v21 = vpop.f32.mrb[167].mxu1  ;;  %8771 = vmatmul.mubr.msk.f32.gmra.mrb[16].mxu1 %vm3158_vm5, %v3028_v11 }
 0x312   : > { %v2041_v22 = vpop.f32.mrb[20].mxu0  ;;  %8773 = vmatprep.mubr.msk.f32.mxu1 %vm9335_vm0, %v9336_v4 }
 0x313   : > { %5880 = vst.msk [vmem:[%s10103_s18 + $0x290] sm:$0xff] %vm3158_vm5, %v5623_v18  ;;  %v3029_v23 = vmax.f32 %v2037_v13, %v2772_v19  ;;  %v5367_v24 = vmul.f32 0.1, %v4416_v20  ;;  %v2042_v40 = vadd.f32 %v10780_v26, %v2041_v22  ;;  %v8003_v25 = vpop.f32.mrb[21].mxu0  ;;  %8161 = vmatmul.mubr.msk.f32.gmra.mrb[126].mxu0 %vm513_vm1, %v437_v17  ;;  %v443_v22 = vld [vmem:[%s9419_s13 + $0x628] sm:$0xff] }
 0x314   : > { %v4420_v27 = vpop.f32.mrb[168].mxu1  ;;  %8163 = vmatprep.mubr.msk.f32.mxu0 %vm9335_vm0, %v9336_v4 }
 0x315   : > { %v5624_v29 = vmax.f32 %v4416_v20, %v5367_v24  ;;  %v2773_v30 = vmul.f32 0.1, %v2042_v40  ;;  %v4421_v31 = vadd.f32 %v10812_v54, %v4420_v27  ;;  %v8616_v32 = vpop.f32.mrb[169].mxu1  ;;  %8774 = vmatmul.mubr.msk.f32.gmra.mrb[18].mxu1 %vm3158_vm5, %v3029_v23 }
 0x316   : > { %v2046_v33 = vpop.f32.mrb[22].mxu0  ;;  %8776 = vmatprep.mubr.msk.f32.mxu1 %vm9335_vm0, %v9336_v4 }
 0x317   : > { %5881 = vst.msk [vmem:[%s10103_s18 + $0x298] sm:$0xff] %vm3158_vm5, %v5624_v29  ;;  %v3030_v34 = vmax.f32 %v2042_v40, %v2773_v30  ;;  %v5368_v35 = vmul.f32 0.1, %v4421_v31  ;;  %v2047_v36 = vadd.f32 %v10780_v26, %v2046_v33  ;;  %v8006_v37 = vpop.f32.mrb[23].mxu0  ;;  %8164 = vmatmul.mubr.msk.f32.gmra.mrb[128].mxu0 %vm513_vm1, %v438_v28  ;;  %v444_v33 = vld [vmem:[%s9419_s13 + $0x630] sm:$0xff] }
 0x318   : > { %v4425_v38 = vpop.f32.mrb[170].mxu1  ;;  %8166 = vmatprep.mubr.msk.f32.mxu0 %vm9335_vm0, %v9336_v4 }
 0x319   : > { %v5625_v39 = vmax.f32 %v4421_v31, %v5368_v35  ;;  %v2774_v41 = vmul.f32 0.1, %v2047_v36  ;;  %v4426_v42 = vadd.f32 %v10812_v54, %v4425_v38  ;;  %v8619_v43 = vpop.f32.mrb[171].mxu1  ;;  %8777 = vmatmul.mubr.msk.f32.gmra.mrb[20].mxu1 %vm3158_vm5, %v3030_v34 }
 0x31a   : > { %v2051_v44 = vpop.f32.mrb[24].mxu0  ;;  %8779 = vmatprep.mubr.msk.f32.mxu1 %vm9335_vm0, %v9336_v4 }
 0x31b   : > { %5882 = vst.msk [vmem:[%s10103_s18 + $0x2a0] sm:$0xff] %vm3158_vm5, %v5625_v39  ;;  %v3031_v45 = vmax.f32 %v2047_v36, %v2774_v41  ;;  %v5369_v46 = vmul.f32 0.1, %v4426_v42  ;;  %v2052_v47 = vadd.f32 %v10780_v26, %v2051_v44  ;;  %v8009_v48 = vpop.f32.mrb[25].mxu0  ;;  %8167 = vmatmul.mubr.msk.f32.gmra.mrb[130].mxu0 %vm513_vm1, %v439_v62  ;;  %v445_v44 = vld [vmem:[%s9419_s13 + $0x638] sm:$0xff] }
 0x31c   : > { %v4430_v49 = vpop.f32.mrb[172].mxu1  ;;  %8169 = vmatprep.mubr.msk.f32.mxu0 %vm9335_vm0, %v9336_v4 }
 0x31d   : > { %v5626_v51 = vmax.f32 %v4426_v42, %v5369_v46  ;;  %v2775_v6 = vmul.f32 0.1, %v2052_v47  ;;  %v4431_v52 = vadd.f32 %v10812_v54, %v4430_v49  ;;  %v8622_v53 = vpop.f32.mrb[173].mxu1  ;;  %8780 = vmatmul.mubr.msk.f32.gmra.mrb[22].mxu1 %vm3158_vm5, %v3031_v45 }
 0x31e   : > { %v2056_v55 = vpop.f32.mrb[26].mxu0  ;;  %8782 = vmatprep.mubr.msk.f32.mxu1 %vm9335_vm0, %v9336_v4 }
 0x31f   : > { %5883 = vst.msk [vmem:[%s10103_s18 + $0x2a8] sm:$0xff] %vm3158_vm5, %v5626_v51  ;;  %v3032_v56 = vmax.f32 %v2052_v47, %v2775_v6  ;;  %v5370_v57 = vmul.f32 0.1, %v4431_v52  ;;  %v2057_v58 = vadd.f32 %v10780_v26, %v2056_v55  ;;  %v8012_v59 = vpop.f32.mrb[27].mxu0  ;;  %8170 = vmatmul.mubr.msk.f32.gmra.mrb[132].mxu0 %vm513_vm1, %v440_v50  ;;  %v446_v55 = vld [vmem:[%s9419_s13 + $0x640] sm:$0xff] }
 0x320   : > { %v4435_v60 = vpop.f32.mrb[174].mxu1  ;;  %8172 = vmatprep.mubr.msk.f32.mxu0 %vm9335_vm0, %v9336_v4 }
 0x321   : > { %v5627_v63 = vmax.f32 %v4431_v52, %v5370_v57  ;;  %v2776_v0 = vmul.f32 0.1, %v2057_v58  ;;  %v4436_v1 = vadd.f32 %v10812_v54, %v4435_v60  ;;  %v8625_v2 = vpop.f32.mrb[175].mxu1  ;;  %8783 = vmatmul.mubr.msk.f32.gmra.mrb[24].mxu1 %vm3158_vm5, %v3032_v56 }
 0x322   : > { %v2061_v15 = vpop.f32.mrb[28].mxu0  ;;  %8785 = vmatprep.mubr.msk.f32.mxu1 %vm9335_vm0, %v9336_v4 }
 0x323   : > { %5884 = vst.msk [vmem:[%s10103_s18 + $0x2b0] sm:$0xff] %vm3158_vm5, %v5627_v63  ;;  %v3033_v3 = vmax.f32 %v2057_v58, %v2776_v0  ;;  %v5371_v5 = vmul.f32 0.1, %v4436_v1  ;;  %v2062_v7 = vadd.f32 %v10780_v26, %v2061_v15  ;;  %v8015_v8 = vpop.f32.mrb[29].mxu0  ;;  %8173 = vmatmul.mubr.msk.f32.gmra.mrb[134].mxu0 %vm513_vm1, %v441_v61  ;;  %v447_v15 = vld [vmem:[%s9419_s13 + $0x648] sm:$0xff] }
 0x324   : > { %v4440_v9 = vpop.f32.mrb[176].mxu1  ;;  %8175 = vmatprep.mubr.msk.f32.mxu0 %vm9335_vm0, %v9336_v4 }
 0x325   : > { %v5628_v11 = vmax.f32 %v4436_v1, %v5371_v5  ;;  %v2777_v12 = vmul.f32 0.1, %v2062_v7  ;;  %v4441_v13 = vadd.f32 %v10812_v54, %v4440_v9  ;;  %v8628_v14 = vpop.f32.mrb[177].mxu1  ;;  %8786 = vmatmul.mubr.msk.f32.gmra.mrb[26].mxu1 %vm3158_vm5, %v3033_v3 }
 0x326   : > { %v2066_v16 = vpop.f32.mrb[30].mxu0  ;;  %8788 = vmatprep.mubr.msk.f32.mxu1 %vm9335_vm0, %v9336_v4 }
 0x327   : > { %5885 = vst.msk [vmem:[%s10103_s18 + $0x2b8] sm:$0xff] %vm3158_vm5, %v5628_v11  ;;  %v3034_v17 = vmax.f32 %v2062_v7, %v2777_v12  ;;  %v5372_v18 = vmul.f32 0.1, %v4441_v13  ;;  %v2067_v19 = vadd.f32 %v10780_v26, %v2066_v16  ;;  %v8018_v20 = vpop.f32.mrb[31].mxu0  ;;  %8176 = vmatmul.mubr.msk.f32.gmra.mrb[136].mxu0 %vm513_vm1, %v442_v10  ;;  %v11142_v11 = vld [vmem:[%s12531_s2] ss:$0 sm:$0xff] }
 0x328   : > { %v4445_v21 = vpop.f32.mrb[178].mxu1  ;;  %8178 = vmatprep.mubr.msk.f32.mxu0 %vm9335_vm0, %v9336_v4  ;;  %v448_v16 = vld [vmem:[%s9419_s13 + $0x650] sm:$0xff] }
 0x329   : > { %v5629_v23 = vmax.f32 %v4441_v13, %v5372_v18  ;;  %v2778_v24 = vmul.f32 0.1, %v2067_v19  ;;  %v4446_v40 = vadd.f32 %v10812_v54, %v4445_v21  ;;  %v8631_v25 = vpop.f32.mrb[179].mxu1  ;;  %8789 = vmatmul.mubr.msk.f32.gmra.mrb[28].mxu1 %vm3158_vm5, %v3034_v17 }
 0x32a   : > { %v2071_v27 = vpop.f32.mrb[32].mxu0  ;;  %8791 = vmatprep.mubr.msk.f32.mxu1 %vm9335_vm0, %v9336_v4 }
 0x32b   : > { %5886 = vst.msk [vmem:[%s10103_s18 + $0x2c0] sm:$0xff] %vm3158_vm5, %v5629_v23  ;;  %v3035_v28 = vmax.f32 %v2067_v19, %v2778_v24  ;;  %v5373_v29 = vmul.f32 0.1, %v4446_v40  ;;  %v2072_v30 = vadd.f32 %v10780_v26, %v2071_v27  ;;  %v8021_v31 = vpop.f32.mrb[33].mxu0  ;;  %8179 = vmatmul.mubr.msk.f32.gmra.mrb[138].mxu0 %vm513_vm1, %v443_v22  ;;  %v449_v27 = vld [vmem:[%s9419_s13 + $0x658] sm:$0xff] }
 0x32c   : > { %v4450_v32 = vpop.f32.mrb[180].mxu1  ;;  %8181 = vmatprep.mubr.msk.f32.mxu0 %vm9335_vm0, %v9336_v4 }
 0x32d   : > { %v5630_v34 = vmax.f32 %v4446_v40, %v5373_v29  ;;  %v2779_v35 = vmul.f32 0.1, %v2072_v30  ;;  %v4451_v36 = vadd.f32 %v10812_v54, %v4450_v32  ;;  %v8634_v37 = vpop.f32.mrb[181].mxu1  ;;  %8792 = vmatmul.mubr.msk.f32.gmra.mrb[30].mxu1 %vm3158_vm5, %v3035_v28 }
 0x32e   : > { %v2076_v38 = vpop.f32.mrb[34].mxu0  ;;  %8794 = vmatprep.mubr.msk.f32.mxu1 %vm9335_vm0, %v9336_v4 }
 0x32f   : > { %5887 = vst.msk [vmem:[%s10103_s18 + $0x2c8] sm:$0xff] %vm3158_vm5, %v5630_v34  ;;  %v3036_v62 = vmax.f32 %v2072_v30, %v2779_v35  ;;  %v5374_v39 = vmul.f32 0.1, %v4451_v36  ;;  %v2077_v41 = vadd.f32 %v10780_v26, %v2076_v38  ;;  %v8024_v42 = vpop.f32.mrb[35].mxu0  ;;  %8182 = vmatmul.mubr.msk.f32.gmra.mrb[140].mxu0 %vm513_vm1, %v444_v33 }
 0x330   : > { %v4455_v43 = vpop.f32.mrb[182].mxu1  ;;  %8184 = vmatprep.mubr.msk.f32.mxu0 %vm9335_vm0, %v9336_v4 }
 0x331   : > { %v5631_v45 = vmax.f32 %v4451_v36, %v5374_v39  ;;  %v2780_v46 = vmul.f32 0.1, %v2077_v41  ;;  %v4456_v47 = vadd.f32 %v10812_v54, %v4455_v43  ;;  %v8637_v48 = vpop.f32.mrb[183].mxu1  ;;  %8795 = vmatmul.mubr.msk.f32.gmra.mrb[32].mxu1 %vm3158_vm5, %v3036_v62  ;;  %v11174_v39 = vld [vmem:[%s12533_s4] ss:$0 sm:$0xff] }
 0x332   : > { %v2081_v49 = vpop.f32.mrb[36].mxu0  ;;  %8797 = vmatprep.mubr.msk.f32.mxu1 %vm9335_vm0, %v9336_v4 }
 0x333   : > { %5888 = vst.msk [vmem:[%s10103_s18 + $0x2d0] sm:$0xff] %vm3158_vm5, %v5631_v45  ;;  %v3037_v50 = vmax.f32 %v2077_v41, %v2780_v46  ;;  %v5375_v51 = vmul.f32 0.1, %v4456_v47  ;;  %v2082_v6 = vadd.f32 %v10780_v26, %v2081_v49  ;;  %v8027_v52 = vpop.f32.mrb[37].mxu0  ;;  %8185 = vmatmul.mubr.msk.f32.gmra.mrb[142].mxu0 %vm513_vm1, %v445_v44  ;;  %v451_v49 = vld [vmem:[%s9419_s13 + $0x668] sm:$0xff] }
 0x334   : > { %v4460_v53 = vpop.f32.mrb[184].mxu1  ;;  %8187 = vmatprep.mubr.msk.f32.mxu0 %vm9335_vm0, %v9336_v4 }
 0x335   : > { %v5632_v56 = vmax.f32 %v4456_v47, %v5375_v51  ;;  %v2781_v57 = vmul.f32 0.1, %v2082_v6  ;;  %v4461_v58 = vadd.f32 %v10812_v54, %v4460_v53  ;;  %v8640_v59 = vpop.f32.mrb[185].mxu1  ;;  %8798 = vmatmul.mubr.msk.f32.gmra.mrb[34].mxu1 %vm3158_vm5, %v3037_v50 }
 0x336   : > { %v2086_v60 = vpop.f32.mrb[38].mxu0  ;;  %8800 = vmatprep.mubr.msk.f32.mxu1 %vm9335_vm0, %v9336_v4 }
 0x337   : > { %5889 = vst.msk [vmem:[%s10103_s18 + $0x2d8] sm:$0xff] %vm3158_vm5, %v5632_v56  ;;  %v3038_v61 = vmax.f32 %v2082_v6, %v2781_v57  ;;  %v5376_v63 = vmul.f32 0.1, %v4461_v58  ;;  %v2087_v0 = vadd.f32 %v10780_v26, %v2086_v60  ;;  %v8030_v1 = vpop.f32.mrb[39].mxu0  ;;  %8188 = vmatmul.mubr.msk.f32.gmra.mrb[144].mxu0 %vm513_vm1, %v446_v55  ;;  %v452_v60 = vld [vmem:[%s9419_s13 + $0x670] sm:$0xff] }
 0x338   : > { %v4465_v2 = vpop.f32.mrb[186].mxu1  ;;  %8190 = vmatprep.mubr.msk.f32.mxu0 %vm9335_vm0, %v9336_v4 }
 0x339   : > { %v5633_v3 = vmax.f32 %v4461_v58, %v5376_v63  ;;  %v2782_v5 = vmul.f32 0.1, %v2087_v0  ;;  %v4466_v7 = vadd.f32 %v10812_v54, %v4465_v2  ;;  %v8643_v8 = vpop.f32.mrb[187].mxu1  ;;  %8801 = vmatmul.mubr.msk.f32.gmra.mrb[36].mxu1 %vm3158_vm5, %v3038_v61 }
 0x33a   : > { %v2091_v9 = vpop.f32.mrb[40].mxu0  ;;  %8803 = vmatprep.mubr.msk.f32.mxu1 %vm9335_vm0, %v9336_v4 }
 0x33b   : > { %5890 = vst.msk [vmem:[%s10103_s18 + $0x2e0] sm:$0xff] %vm3158_vm5, %v5633_v3  ;;  %v3039_v26 = vmax.f32 %v2087_v0, %v2782_v5  ;;  %v5377_v10 = vmul.f32 0.1, %v4466_v7  ;;  %v2092_v12 = vadd.f32 %v11142_v11, %v2091_v9  ;;  %v8033_v13 = vpop.f32.mrb[41].mxu0  ;;  %8191 = vmatmul.mubr.msk.f32.gmra.mrb[146].mxu0 %vm513_vm1, %v447_v15  ;;  %v453_v9 = vld [vmem:[%s9419_s13 + $0x678] sm:$0xff] }
 0x33c   : > { %v4470_v14 = vpop.f32.mrb[188].mxu1  ;;  %8193 = vmatprep.mubr.msk.f32.mxu0 %vm9335_vm0, %v9336_v4 }
 0x33d   : > { %v5634_v17 = vmax.f32 %v4466_v7, %v5377_v10  ;;  %v2783_v18 = vmul.f32 0.1, %v2092_v12  ;;  %v4471_v19 = vadd.f32 %v10812_v54, %v4470_v14  ;;  %v8646_v20 = vpop.f32.mrb[189].mxu1  ;;  %8804 = vmatmul.mubr.msk.f32.gmra.mrb[38].mxu1 %vm3158_vm5, %v3039_v26 }
 0x33e   : > { %v2096_v21 = vpop.f32.mrb[42].mxu0  ;;  %8806 = vmatprep.mubr.msk.f32.mxu1 %vm9335_vm0, %v9336_v4 }
 0x33f   : > { %5891 = vst.msk [vmem:[%s10103_s18 + $0x2e8] sm:$0xff] %vm3158_vm5, %v5634_v17  ;;  %v3040_v22 = vmax.f32 %v2092_v12, %v2783_v18  ;;  %v5378_v23 = vmul.f32 0.1, %v4471_v19  ;;  %v2097_v24 = vadd.f32 %v11142_v11, %v2096_v21  ;;  %v8036_v40 = vpop.f32.mrb[43].mxu0  ;;  %8194 = vmatmul.mubr.msk.f32.gmra.mrb[148].mxu0 %vm513_vm1, %v448_v16  ;;  %v454_v21 = vld [vmem:[%s9419_s13 + $0x680] sm:$0xff] }
 0x340   : > { %v4475_v25 = vpop.f32.mrb[190].mxu1  ;;  %8196 = vmatprep.mubr.msk.f32.mxu0 %vm9335_vm0, %v9336_v4 }
 0x341   : > { %v5635_v28 = vmax.f32 %v4471_v19, %v5378_v23  ;;  %v2784_v29 = vmul.f32 0.1, %v2097_v24  ;;  %v4476_v30 = vadd.f32 %v10812_v54, %v4475_v25  ;;  %v8649_v31 = vpop.f32.mrb[191].mxu1  ;;  %8807 = vmatmul.mubr.msk.f32.gmra.mrb[40].mxu1 %vm3158_vm5, %v3040_v22  ;;  %v450_v54 = vld [vmem:[%s9419_s13 + $0x660] sm:$0xff] }
 0x342   : > { %v2101_v32 = vpop.f32.mrb[44].mxu0  ;;  %8809 = vmatprep.mubr.msk.f32.mxu1 %vm9335_vm0, %v9336_v4 }
 0x343   : > { %5892 = vst.msk [vmem:[%s10103_s18 + $0x2f0] sm:$0xff] %vm3158_vm5, %v5635_v28  ;;  %v3041_v33 = vmax.f32 %v2097_v24, %v2784_v29  ;;  %v5379_v34 = vmul.f32 0.1, %v4476_v30  ;;  %v2102_v35 = vadd.f32 %v11142_v11, %v2101_v32  ;;  %v8039_v36 = vpop.f32.mrb[45].mxu0  ;;  %8197 = vmatmul.mubr.msk.f32.gmra.mrb[150].mxu0 %vm513_vm1, %v449_v27  ;;  %v455_v32 = vld [vmem:[%s9419_s13 + $0x688] sm:$0xff] }
 0x344   : > { %v4480_v37 = vpop.f32.mrb[192].mxu1  ;;  %8199 = vmatprep.mubr.msk.f32.mxu0 %vm9335_vm0, %v9336_v4 }
 0x345   : > { %v5636_v38 = vmax.f32 %v4476_v30, %v5379_v34  ;;  %v2785_v62 = vmul.f32 0.1, %v2102_v35  ;;  %v4481_v41 = vadd.f32 %v11174_v39, %v4480_v37  ;;  %v8652_v42 = vpop.f32.mrb[193].mxu1  ;;  %8810 = vmatmul.mubr.msk.f32.gmra.mrb[42].mxu1 %vm3158_vm5, %v3041_v33 }
 0x346   : > { %v2106_v43 = vpop.f32.mrb[46].mxu0  ;;  %8812 = vmatprep.mubr.msk.f32.mxu1 %vm9335_vm0, %v9336_v4 }
 0x347   : > { %5893 = vst.msk [vmem:[%s10103_s18 + $0x2f8] sm:$0xff] %vm3158_vm5, %v5636_v38  ;;  %v3042_v44 = vmax.f32 %v2102_v35, %v2785_v62  ;;  %v5380_v45 = vmul.f32 0.1, %v4481_v41  ;;  %v2107_v46 = vadd.f32 %v11142_v11, %v2106_v43  ;;  %v8042_v47 = vpop.f32.mrb[47].mxu0  ;;  %8200 = vmatmul.mubr.msk.f32.gmra.mrb[152].mxu0 %vm513_vm1, %v450_v54  ;;  %v456_v43 = vld [vmem:[%s9419_s13 + $0x690] sm:$0xff] }
 0x348   : > { %v4485_v48 = vpop.f32.mrb[194].mxu1  ;;  %8202 = vmatprep.mubr.msk.f32.mxu0 %vm9335_vm0, %v9336_v4 }
 0x349   : > { %v5637_v50 = vmax.f32 %v4481_v41, %v5380_v45  ;;  %v2786_v51 = vmul.f32 0.1, %v2107_v46  ;;  %v4486_v6 = vadd.f32 %v11174_v39, %v4485_v48  ;;  %v8655_v52 = vpop.f32.mrb[195].mxu1  ;;  %8813 = vmatmul.mubr.msk.f32.gmra.mrb[44].mxu1 %vm3158_vm5, %v3042_v44 }
 0x34a   : > { %v2111_v53 = vpop.f32.mrb[48].mxu0  ;;  %8815 = vmatprep.mubr.msk.f32.mxu1 %vm9335_vm0, %v9336_v4 }
 0x34b   : > { %5894 = vst.msk [vmem:[%s10103_s18 + $0x300] sm:$0xff] %vm3158_vm5, %v5637_v50  ;;  %v3043_v55 = vmax.f32 %v2107_v46, %v2786_v51  ;;  %v5381_v56 = vmul.f32 0.1, %v4486_v6  ;;  %v2112_v57 = vadd.f32 %v11142_v11, %v2111_v53  ;;  %v8045_v58 = vpop.f32.mrb[49].mxu0  ;;  %8203 = vmatmul.mubr.msk.f32.gmra.mrb[154].mxu0 %vm513_vm1, %v451_v49  ;;  %v457_v53 = vld [vmem:[%s9419_s13 + $0x698] sm:$0xff] }
 0x34c   : > { %v4490_v59 = vpop.f32.mrb[196].mxu1  ;;  %8205 = vmatprep.mubr.msk.f32.mxu0 %vm9335_vm0, %v9336_v4 }
 0x34d   : > { %v5638_v61 = vmax.f32 %v4486_v6, %v5381_v56  ;;  %v2787_v63 = vmul.f32 0.1, %v2112_v57  ;;  %v4491_v0 = vadd.f32 %v11174_v39, %v4490_v59  ;;  %v8658_v1 = vpop.f32.mrb[197].mxu1  ;;  %8816 = vmatmul.mubr.msk.f32.gmra.mrb[46].mxu1 %vm3158_vm5, %v3043_v55 }
 0x34e   : > { %v2116_v2 = vpop.f32.mrb[50].mxu0  ;;  %8818 = vmatprep.mubr.msk.f32.mxu1 %vm9335_vm0, %v9336_v4 }
 0x34f   : > { %5895 = vst.msk [vmem:[%s10103_s18 + $0x308] sm:$0xff] %vm3158_vm5, %v5638_v61  ;;  %v3044_v15 = vmax.f32 %v2112_v57, %v2787_v63  ;;  %v5382_v3 = vmul.f32 0.1, %v4491_v0  ;;  %v2117_v5 = vadd.f32 %v11142_v11, %v2116_v2  ;;  %v8048_v7 = vpop.f32.mrb[51].mxu0  ;;  %8206 = vmatmul.mubr.msk.f32.gmra.mrb[156].mxu0 %vm513_vm1, %v452_v60  ;;  %v458_v2 = vld [vmem:[%s9419_s13 + $0x6a0] sm:$0xff] }
 0x350   : > { %v4495_v8 = vpop.f32.mrb[198].mxu1  ;;  %8208 = vmatprep.mubr.msk.f32.mxu0 %vm9335_vm0, %v9336_v4 }
 0x351   : > { %v5639_v26 = vmax.f32 %v4491_v0, %v5382_v3  ;;  %v2788_v10 = vmul.f32 0.1, %v2117_v5  ;;  %v4496_v12 = vadd.f32 %v11174_v39, %v4495_v8  ;;  %v8661_v13 = vpop.f32.mrb[199].mxu1  ;;  %8819 = vmatmul.mubr.msk.f32.gmra.mrb[48].mxu1 %vm3158_vm5, %v3044_v15 }
 0x352   : > { %v2121_v14 = vpop.f32.mrb[52].mxu0  ;;  %8821 = vmatprep.mubr.msk.f32.mxu1 %vm9335_vm0, %v9336_v4 }
 0x353   : > { %5896 = vst.msk [vmem:[%s10103_s18 + $0x310] sm:$0xff] %vm3158_vm5, %v5639_v26  ;;  %v3045_v16 = vmax.f32 %v2117_v5, %v2788_v10  ;;  %v5383_v17 = vmul.f32 0.1, %v4496_v12  ;;  %v2122_v18 = vadd.f32 %v11142_v11, %v2121_v14  ;;  %v8051_v19 = vpop.f32.mrb[53].mxu0  ;;  %8209 = vmatmul.mubr.msk.f32.gmra.mrb[158].mxu0 %vm513_vm1, %v453_v9  ;;  %v459_v14 = vld [vmem:[%s9419_s13 + $0x6a8] sm:$0xff] }
 0x354   : > { %v4500_v20 = vpop.f32.mrb[200].mxu1  ;;  %8211 = vmatprep.mubr.msk.f32.mxu0 %vm9335_vm0, %v9336_v4 }
 0x355   : > { %v5640_v22 = vmax.f32 %v4496_v12, %v5383_v17  ;;  %v2789_v23 = vmul.f32 0.1, %v2122_v18  ;;  %v4501_v24 = vadd.f32 %v11174_v39, %v4500_v20  ;;  %v8664_v40 = vpop.f32.mrb[201].mxu1  ;;  %8822 = vmatmul.mubr.msk.f32.gmra.mrb[50].mxu1 %vm3158_vm5, %v3045_v16 }
 0x356   : > { %v2126_v25 = vpop.f32.mrb[54].mxu0  ;;  %8824 = vmatprep.mubr.msk.f32.mxu1 %vm9335_vm0, %v9336_v4 }
 0x357   : > { %5897 = vst.msk [vmem:[%s10103_s18 + $0x318] sm:$0xff] %vm3158_vm5, %v5640_v22  ;;  %v3046_v27 = vmax.f32 %v2122_v18, %v2789_v23  ;;  %v5384_v28 = vmul.f32 0.1, %v4501_v24  ;;  %v2127_v29 = vadd.f32 %v11142_v11, %v2126_v25  ;;  %v8054_v30 = vpop.f32.mrb[55].mxu0  ;;  %8212 = vmatmul.mubr.msk.f32.gmra.mrb[160].mxu0 %vm513_vm1, %v454_v21  ;;  %v460_v25 = vld [vmem:[%s9419_s13 + $0x6b0] sm:$0xff] }
 0x358   : > { %v4505_v31 = vpop.f32.mrb[202].mxu1  ;;  %8214 = vmatprep.mubr.msk.f32.mxu0 %vm9335_vm0, %v9336_v4 }
 0x359   : > { %v5641_v33 = vmax.f32 %v4501_v24, %v5384_v28  ;;  %v2790_v34 = vmul.f32 0.1, %v2127_v29  ;;  %v4506_v35 = vadd.f32 %v11174_v39, %v4505_v31  ;;  %v8667_v36 = vpop.f32.mrb[203].mxu1  ;;  %8825 = vmatmul.mubr.msk.f32.gmra.mrb[52].mxu1 %vm3158_vm5, %v3046_v27 }
 0x35a   : > { %v2131_v37 = vpop.f32.mrb[56].mxu0  ;;  %8827 = vmatprep.mubr.msk.f32.mxu1 %vm9335_vm0, %v9336_v4 }
 0x35b   : > { %5898 = vst.msk [vmem:[%s10103_s18 + $0x320] sm:$0xff] %vm3158_vm5, %v5641_v33  ;;  %v3047_v54 = vmax.f32 %v2127_v29, %v2790_v34  ;;  %v5385_v38 = vmul.f32 0.1, %v4506_v35  ;;  %v2132_v62 = vadd.f32 %v11142_v11, %v2131_v37  ;;  %v8057_v41 = vpop.f32.mrb[57].mxu0  ;;  %8215 = vmatmul.mubr.msk.f32.gmra.mrb[162].mxu0 %vm513_vm1, %v455_v32  ;;  %v461_v37 = vld [vmem:[%s9419_s13 + $0x6b8] sm:$0xff] }
 0x35c   : > { %v4510_v42 = vpop.f32.mrb[204].mxu1  ;;  %8217 = vmatprep.mubr.msk.f32.mxu0 %vm9335_vm0, %v9336_v4 }
 0x35d   : > { %v5642_v44 = vmax.f32 %v4506_v35, %v5385_v38  ;;  %v2791_v45 = vmul.f32 0.1, %v2132_v62  ;;  %v4511_v46 = vadd.f32 %v11174_v39, %v4510_v42  ;;  %v8670_v47 = vpop.f32.mrb[205].mxu1  ;;  %8828 = vmatmul.mubr.msk.f32.gmra.mrb[54].mxu1 %vm3158_vm5, %v3047_v54 }
 0x35e   : > { %v2136_v48 = vpop.f32.mrb[58].mxu0  ;;  %8830 = vmatprep.mubr.msk.f32.mxu1 %vm9335_vm0, %v9336_v4 }
 0x35f   : > { %5899 = vst.msk [vmem:[%s10103_s18 + $0x328] sm:$0xff] %vm3158_vm5, %v5642_v44  ;;  %v3048_v49 = vmax.f32 %v2132_v62, %v2791_v45  ;;  %v5386_v50 = vmul.f32 0.1, %v4511_v46  ;;  %v2137_v51 = vadd.f32 %v11142_v11, %v2136_v48  ;;  %v8060_v6 = vpop.f32.mrb[59].mxu0  ;;  %8218 = vmatmul.mubr.msk.f32.gmra.mrb[164].mxu0 %vm513_vm1, %v456_v43  ;;  %v462_v48 = vld [vmem:[%s9419_s13 + $0x6c0] sm:$0xff] }
 0x360   : > { %v4515_v52 = vpop.f32.mrb[206].mxu1  ;;  %8220 = vmatprep.mubr.msk.f32.mxu0 %vm9335_vm0, %v9336_v4 }
 0x361   : > { %v5643_v55 = vmax.f32 %v4511_v46, %v5386_v50  ;;  %v2792_v56 = vmul.f32 0.1, %v2137_v51  ;;  %v4516_v57 = vadd.f32 %v11174_v39, %v4515_v52  ;;  %v8673_v58 = vpop.f32.mrb[207].mxu1  ;;  %8831 = vmatmul.mubr.msk.f32.gmra.mrb[56].mxu1 %vm3158_vm5, %v3048_v49 }
 0x362   : > { %v2141_v59 = vpop.f32.mrb[60].mxu0  ;;  %8833 = vmatprep.mubr.msk.f32.mxu1 %vm9335_vm0, %v9336_v4 }
 0x363   : > { %5900 = vst.msk [vmem:[%s10103_s18 + $0x330] sm:$0xff] %vm3158_vm5, %v5643_v55  ;;  %v3049_v60 = vmax.f32 %v2137_v51, %v2792_v56  ;;  %v5387_v61 = vmul.f32 0.1, %v4516_v57  ;;  %v2142_v63 = vadd.f32 %v11142_v11, %v2141_v59  ;;  %v8063_v0 = vpop.f32.mrb[61].mxu0  ;;  %8221 = vmatmul.mubr.msk.f32.gmra.mrb[166].mxu0 %vm513_vm1, %v457_v53  ;;  %v463_v59 = vld [vmem:[%s9419_s13 + $0x6c8] sm:$0xff] }
 0x364   : > { %v4520_v1 = vpop.f32.mrb[208].mxu1  ;;  %8223 = vmatprep.mubr.msk.f32.mxu0 %vm9335_vm0, %v9336_v4 }
 0x365   : > { %v5644_v15 = vmax.f32 %v4516_v57, %v5387_v61  ;;  %v2793_v3 = vmul.f32 0.1, %v2142_v63  ;;  %v4521_v5 = vadd.f32 %v11174_v39, %v4520_v1  ;;  %v8676_v7 = vpop.f32.mrb[209].mxu1  ;;  %8834 = vmatmul.mubr.msk.f32.gmra.mrb[58].mxu1 %vm3158_vm5, %v3049_v60 }
 0x366   : > { %v2146_v8 = vpop.f32.mrb[62].mxu0  ;;  %8836 = vmatprep.mubr.msk.f32.mxu1 %vm9335_vm0, %v9336_v4 }
 0x367   : > { %5901 = vst.msk [vmem:[%s10103_s18 + $0x338] sm:$0xff] %vm3158_vm5, %v5644_v15  ;;  %v3050_v9 = vmax.f32 %v2142_v63, %v2793_v3  ;;  %v5388_v26 = vmul.f32 0.1, %v4521_v5  ;;  %v2147_v10 = vadd.f32 %v11142_v11, %v2146_v8  ;;  %v8066_v12 = vpop.f32.mrb[63].mxu0  ;;  %8224 = vmatmul.mubr.msk.f32.gmra.mrb[168].mxu0 %vm513_vm1, %v458_v2  ;;  %v464_v8 = vld [vmem:[%s9419_s13 + $0x6d0] sm:$0xff] }
 0x368   : > { %v4525_v13 = vpop.f32.mrb[210].mxu1  ;;  %8226 = vmatprep.mubr.msk.f32.mxu0 %vm9335_vm0, %v9336_v4 }
 0x369   : > { %v5645_v16 = vmax.f32 %v4521_v5, %v5388_v26  ;;  %v2794_v17 = vmul.f32 0.1, %v2147_v10  ;;  %v4526_v18 = vadd.f32 %v11174_v39, %v4525_v13  ;;  %v8679_v19 = vpop.f32.mrb[211].mxu1  ;;  %8837 = vmatmul.mubr.msk.f32.gmra.mrb[60].mxu1 %vm3158_vm5, %v3050_v9 }
 0x36a   : > { %v2151_v20 = vpop.f32.mrb[64].mxu0  ;;  %8839 = vmatprep.mubr.msk.f32.mxu1 %vm9335_vm0, %v9336_v4 }
 0x36b   : > { %5902 = vst.msk [vmem:[%s10103_s18 + $0x340] sm:$0xff] %vm3158_vm5, %v5645_v16  ;;  %v3051_v21 = vmax.f32 %v2147_v10, %v2794_v17  ;;  %v5389_v22 = vmul.f32 0.1, %v4526_v18  ;;  %v2152_v23 = vadd.f32 %v11142_v11, %v2151_v20  ;;  %v8069_v24 = vpop.f32.mrb[65].mxu0  ;;  %8227 = vmatmul.mubr.msk.f32.gmra.mrb[170].mxu0 %vm513_vm1, %v459_v14  ;;  %v465_v20 = vld [vmem:[%s9419_s13 + $0x6d8] sm:$0xff] }
 0x36c   : > { %v4530_v40 = vpop.f32.mrb[212].mxu1  ;;  %8229 = vmatprep.mubr.msk.f32.mxu0 %vm9335_vm0, %v9336_v4 }
 0x36d   : > { %v5646_v27 = vmax.f32 %v4526_v18, %v5389_v22  ;;  %v2795_v28 = vmul.f32 0.1, %v2152_v23  ;;  %v4531_v29 = vadd.f32 %v11174_v39, %v4530_v40  ;;  %v8682_v30 = vpop.f32.mrb[213].mxu1  ;;  %8840 = vmatmul.mubr.msk.f32.gmra.mrb[62].mxu1 %vm3158_vm5, %v3051_v21 }
 0x36e   : > { %v2156_v31 = vpop.f32.mrb[66].mxu0  ;;  %8842 = vmatprep.mubr.msk.f32.mxu1 %vm9335_vm0, %v9336_v4 }
 0x36f   : > { %5903 = vst.msk [vmem:[%s10103_s18 + $0x348] sm:$0xff] %vm3158_vm5, %v5646_v27  ;;  %v3052_v32 = vmax.f32 %v2152_v23, %v2795_v28  ;;  %v5390_v33 = vmul.f32 0.1, %v4531_v29  ;;  %v2157_v34 = vadd.f32 %v11142_v11, %v2156_v31  ;;  %v8072_v35 = vpop.f32.mrb[67].mxu0  ;;  %8230 = vmatmul.mubr.msk.f32.gmra.mrb[172].mxu0 %vm513_vm1, %v460_v25  ;;  %v466_v31 = vld [vmem:[%s9419_s13 + $0x6e0] sm:$0xff] }
 0x370   : > { %v4535_v36 = vpop.f32.mrb[214].mxu1  ;;  %8232 = vmatprep.mubr.msk.f32.mxu0 %vm9335_vm0, %v9336_v4 }
 0x371   : > { %v5647_v54 = vmax.f32 %v4531_v29, %v5390_v33  ;;  %v2796_v38 = vmul.f32 0.1, %v2157_v34  ;;  %v4536_v62 = vadd.f32 %v11174_v39, %v4535_v36  ;;  %v8685_v41 = vpop.f32.mrb[215].mxu1  ;;  %8843 = vmatmul.mubr.msk.f32.gmra.mrb[64].mxu1 %vm3158_vm5, %v3052_v32 }
 0x372   : > { %v2161_v42 = vpop.f32.mrb[68].mxu0  ;;  %8845 = vmatprep.mubr.msk.f32.mxu1 %vm9335_vm0, %v9336_v4 }
 0x373   : > { %5904 = vst.msk [vmem:[%s10103_s18 + $0x350] sm:$0xff] %vm3158_vm5, %v5647_v54  ;;  %v3053_v43 = vmax.f32 %v2157_v34, %v2796_v38  ;;  %v5391_v44 = vmul.f32 0.1, %v4536_v62  ;;  %v2162_v45 = vadd.f32 %v11142_v11, %v2161_v42  ;;  %v8075_v46 = vpop.f32.mrb[69].mxu0  ;;  %8233 = vmatmul.mubr.msk.f32.gmra.mrb[174].mxu0 %vm513_vm1, %v461_v37  ;;  %v467_v42 = vld [vmem:[%s9419_s13 + $0x6e8] sm:$0xff] }
 0x374   : > { %v4540_v47 = vpop.f32.mrb[216].mxu1  ;;  %8235 = vmatprep.mubr.msk.f32.mxu0 %vm9335_vm0, %v9336_v4 }
 0x375   : > { %v5648_v49 = vmax.f32 %v4536_v62, %v5391_v44  ;;  %v2797_v50 = vmul.f32 0.1, %v2162_v45  ;;  %v4541_v51 = vadd.f32 %v11174_v39, %v4540_v47  ;;  %v8688_v6 = vpop.f32.mrb[217].mxu1  ;;  %8846 = vmatmul.mubr.msk.f32.gmra.mrb[66].mxu1 %vm3158_vm5, %v3053_v43 }
 0x376   : > { %v2166_v52 = vpop.f32.mrb[70].mxu0  ;;  %8848 = vmatprep.mubr.msk.f32.mxu1 %vm9335_vm0, %v9336_v4 }
 0x377   : > { %5905 = vst.msk [vmem:[%s10103_s18 + $0x358] sm:$0xff] %vm3158_vm5, %v5648_v49  ;;  %v3054_v53 = vmax.f32 %v2162_v45, %v2797_v50  ;;  %v5392_v55 = vmul.f32 0.1, %v4541_v51  ;;  %v2167_v56 = vadd.f32 %v11142_v11, %v2166_v52  ;;  %v8078_v57 = vpop.f32.mrb[71].mxu0  ;;  %8236 = vmatmul.mubr.msk.f32.gmra.mrb[176].mxu0 %vm513_vm1, %v462_v48  ;;  %v468_v52 = vld [vmem:[%s9419_s13 + $0x6f0] sm:$0xff] }
 0x378   : > { %v4545_v58 = vpop.f32.mrb[218].mxu1  ;;  %8238 = vmatprep.mubr.msk.f32.mxu0 %vm9335_vm0, %v9336_v4 }
 0x379   : > { %v5649_v60 = vmax.f32 %v4541_v51, %v5392_v55  ;;  %v2798_v61 = vmul.f32 0.1, %v2167_v56  ;;  %v4546_v63 = vadd.f32 %v11174_v39, %v4545_v58  ;;  %v8691_v0 = vpop.f32.mrb[219].mxu1  ;;  %8849 = vmatmul.mubr.msk.f32.gmra.mrb[68].mxu1 %vm3158_vm5, %v3054_v53 }
 0x37a   : > { %v2171_v1 = vpop.f32.mrb[72].mxu0  ;;  %8851 = vmatprep.mubr.msk.f32.mxu1 %vm9335_vm0, %v9336_v4 }
 0x37b   : > { %5906 = vst.msk [vmem:[%s10103_s18 + $0x360] sm:$0xff] %vm3158_vm5, %v5649_v60  ;;  %v3055_v2 = vmax.f32 %v2167_v56, %v2798_v61  ;;  %v5393_v15 = vmul.f32 0.1, %v4546_v63  ;;  %v2172_v3 = vadd.f32 %v11142_v11, %v2171_v1  ;;  %v8081_v5 = vpop.f32.mrb[73].mxu0  ;;  %8239 = vmatmul.mubr.msk.f32.gmra.mrb[178].mxu0 %vm513_vm1, %v463_v59  ;;  %v469_v1 = vld [vmem:[%s9419_s13 + $0x6f8] sm:$0xff] }
 0x37c   : > { %v4550_v7 = vpop.f32.mrb[220].mxu1  ;;  %8241 = vmatprep.mubr.msk.f32.mxu0 %vm9335_vm0, %v9336_v4 }
 0x37d   : > { %v5650_v9 = vmax.f32 %v4546_v63, %v5393_v15  ;;  %v2799_v26 = vmul.f32 0.1, %v2172_v3  ;;  %v4551_v10 = vadd.f32 %v11174_v39, %v4550_v7  ;;  %v8694_v12 = vpop.f32.mrb[221].mxu1  ;;  %8852 = vmatmul.mubr.msk.f32.gmra.mrb[70].mxu1 %vm3158_vm5, %v3055_v2 }
 0x37e   : > { %v2176_v13 = vpop.f32.mrb[74].mxu0  ;;  %8854 = vmatprep.mubr.msk.f32.mxu1 %vm9335_vm0, %v9336_v4 }
 0x37f   : > { %5907 = vst.msk [vmem:[%s10103_s18 + $0x368] sm:$0xff] %vm3158_vm5, %v5650_v9  ;;  %v3056_v14 = vmax.f32 %v2172_v3, %v2799_v26  ;;  %v5394_v16 = vmul.f32 0.1, %v4551_v10  ;;  %v2177_v17 = vadd.f32 %v11142_v11, %v2176_v13  ;;  %v8084_v18 = vpop.f32.mrb[75].mxu0  ;;  %8242 = vmatmul.mubr.msk.f32.gmra.mrb[180].mxu0 %vm513_vm1, %v464_v8  ;;  %v470_v13 = vld [vmem:[%s9419_s13 + $0x700] sm:$0xff] }
 0x380   : > { %v4555_v19 = vpop.f32.mrb[222].mxu1  ;;  %8244 = vmatprep.mubr.msk.f32.mxu0 %vm9335_vm0, %v9336_v4 }
 0x381   : > { %v5651_v21 = vmax.f32 %v4551_v10, %v5394_v16  ;;  %v2800_v22 = vmul.f32 0.1, %v2177_v17  ;;  %v4556_v23 = vadd.f32 %v11174_v39, %v4555_v19  ;;  %v8697_v24 = vpop.f32.mrb[223].mxu1  ;;  %8855 = vmatmul.mubr.msk.f32.gmra.mrb[72].mxu1 %vm3158_vm5, %v3056_v14 }
 0x382   : > { %v2181_v40 = vpop.f32.mrb[76].mxu0  ;;  %8857 = vmatprep.mubr.msk.f32.mxu1 %vm9335_vm0, %v9336_v4 }
 0x383   : > { %5908 = vst.msk [vmem:[%s10103_s18 + $0x370] sm:$0xff] %vm3158_vm5, %v5651_v21  ;;  %v3057_v25 = vmax.f32 %v2177_v17, %v2800_v22  ;;  %v5395_v27 = vmul.f32 0.1, %v4556_v23  ;;  %v2182_v28 = vadd.f32 %v11142_v11, %v2181_v40  ;;  %v8087_v29 = vpop.f32.mrb[77].mxu0  ;;  %8245 = vmatmul.mubr.msk.f32.gmra.mrb[182].mxu0 %vm513_vm1, %v465_v20  ;;  %v471_v40 = vld [vmem:[%s9419_s13 + $0x708] sm:$0xff] }
 0x384   : > { %v4560_v30 = vpop.f32.mrb[224].mxu1  ;;  %8247 = vmatprep.mubr.msk.f32.mxu0 %vm9335_vm0, %v9336_v4 }
 0x385   : > { %v5652_v32 = vmax.f32 %v4556_v23, %v5395_v27  ;;  %v2801_v33 = vmul.f32 0.1, %v2182_v28  ;;  %v4561_v34 = vadd.f32 %v11174_v39, %v4560_v30  ;;  %v8700_v35 = vpop.f32.mrb[225].mxu1  ;;  %8858 = vmatmul.mubr.msk.f32.gmra.mrb[74].mxu1 %vm3158_vm5, %v3057_v25 }
 0x386   : > { %v2186_v36 = vpop.f32.mrb[78].mxu0  ;;  %8860 = vmatprep.mubr.msk.f32.mxu1 %vm9335_vm0, %v9336_v4 }
 0x387   : > { %5909 = vst.msk [vmem:[%s10103_s18 + $0x378] sm:$0xff] %vm3158_vm5, %v5652_v32  ;;  %v3058_v37 = vmax.f32 %v2182_v28, %v2801_v33  ;;  %v5396_v54 = vmul.f32 0.1, %v4561_v34  ;;  %v2187_v38 = vadd.f32 %v11142_v11, %v2186_v36  ;;  %v8090_v62 = vpop.f32.mrb[79].mxu0  ;;  %8248 = vmatmul.mubr.msk.f32.gmra.mrb[184].mxu0 %vm513_vm1, %v466_v31  ;;  %v472_v36 = vld [vmem:[%s9419_s13 + $0x710] sm:$0xff] }
 0x388   : > { %v4565_v41 = vpop.f32.mrb[226].mxu1  ;;  %8250 = vmatprep.mubr.msk.f32.mxu0 %vm9335_vm0, %v9336_v4 }
 0x389   : > { %v5653_v43 = vmax.f32 %v4561_v34, %v5396_v54  ;;  %v2802_v44 = vmul.f32 0.1, %v2187_v38  ;;  %v4566_v45 = vadd.f32 %v11174_v39, %v4565_v41  ;;  %v8703_v46 = vpop.f32.mrb[227].mxu1  ;;  %8861 = vmatmul.mubr.msk.f32.gmra.mrb[76].mxu1 %vm3158_vm5, %v3058_v37 }
 0x38a   : > { %v2191_v47 = vpop.f32.mrb[80].mxu0  ;;  %8863 = vmatprep.mubr.msk.f32.mxu1 %vm9335_vm0, %v9336_v4 }
 0x38b   : > { %5910 = vst.msk [vmem:[%s10103_s18 + $0x380] sm:$0xff] %vm3158_vm5, %v5653_v43  ;;  %v3059_v48 = vmax.f32 %v2187_v38, %v2802_v44  ;;  %v5397_v49 = vmul.f32 0.1, %v4566_v45  ;;  %v2192_v50 = vadd.f32 %v11142_v11, %v2191_v47  ;;  %v8093_v51 = vpop.f32.mrb[81].mxu0  ;;  %8251 = vmatmul.mubr.msk.f32.gmra.mrb[186].mxu0 %vm513_vm1, %v467_v42  ;;  %v473_v47 = vld [vmem:[%s9419_s13 + $0x718] sm:$0xff] }
 0x38c   : > { %v4570_v6 = vpop.f32.mrb[228].mxu1  ;;  %8253 = vmatprep.mubr.msk.f32.mxu0 %vm9335_vm0, %v9336_v4 }
 0x38d   : > { %v5654_v53 = vmax.f32 %v4566_v45, %v5397_v49  ;;  %v2803_v55 = vmul.f32 0.1, %v2192_v50  ;;  %v4571_v56 = vadd.f32 %v11174_v39, %v4570_v6  ;;  %v8706_v57 = vpop.f32.mrb[229].mxu1  ;;  %8864 = vmatmul.mubr.msk.f32.gmra.mrb[78].mxu1 %vm3158_vm5, %v3059_v48 }
 0x38e   : > { %v2196_v58 = vpop.f32.mrb[82].mxu0  ;;  %8866 = vmatprep.mubr.msk.f32.mxu1 %vm9335_vm0, %v9336_v4 }
 0x38f   : > { %5911 = vst.msk [vmem:[%s10103_s18 + $0x388] sm:$0xff] %vm3158_vm5, %v5654_v53  ;;  %v3060_v59 = vmax.f32 %v2192_v50, %v2803_v55  ;;  %v5398_v60 = vmul.f32 0.1, %v4571_v56  ;;  %v2197_v61 = vadd.f32 %v11142_v11, %v2196_v58  ;;  %v8096_v63 = vpop.f32.mrb[83].mxu0  ;;  %8254 = vmatmul.mubr.msk.f32.gmra.mrb[188].mxu0 %vm513_vm1, %v468_v52  ;;  %v474_v58 = vld [vmem:[%s9419_s13 + $0x720] sm:$0xff] }
 0x390   : > { %v4575_v0 = vpop.f32.mrb[230].mxu1  ;;  %8256 = vmatprep.mubr.msk.f32.mxu0 %vm9335_vm0, %v9336_v4 }
 0x391   : > { %v5655_v2 = vmax.f32 %v4571_v56, %v5398_v60  ;;  %v2804_v15 = vmul.f32 0.1, %v2197_v61  ;;  %v4576_v3 = vadd.f32 %v11174_v39, %v4575_v0  ;;  %v8709_v5 = vpop.f32.mrb[231].mxu1  ;;  %8867 = vmatmul.mubr.msk.f32.gmra.mrb[80].mxu1 %vm3158_vm5, %v3060_v59 }
 0x392   : > { %v2201_v7 = vpop.f32.mrb[84].mxu0  ;;  %8869 = vmatprep.mubr.msk.f32.mxu1 %vm9335_vm0, %v9336_v4 }
 0x393   : > { %5912 = vst.msk [vmem:[%s10103_s18 + $0x390] sm:$0xff] %vm3158_vm5, %v5655_v2  ;;  %v3061_v8 = vmax.f32 %v2197_v61, %v2804_v15  ;;  %v5399_v9 = vmul.f32 0.1, %v4576_v3  ;;  %v2202_v26 = vadd.f32 %v11142_v11, %v2201_v7  ;;  %v8099_v10 = vpop.f32.mrb[85].mxu0  ;;  %8257 = vmatmul.mubr.msk.f32.gmra.mrb[190].mxu0 %vm513_vm1, %v469_v1  ;;  %v475_v7 = vld [vmem:[%s9419_s13 + $0x728] sm:$0xff] }
 0x394   : > { %v4580_v12 = vpop.f32.mrb[232].mxu1  ;;  %8259 = vmatprep.mubr.msk.f32.mxu0 %vm9335_vm0, %v9336_v4 }
 0x395   : > { %v5656_v14 = vmax.f32 %v4576_v3, %v5399_v9  ;;  %v2805_v16 = vmul.f32 0.1, %v2202_v26  ;;  %v4581_v17 = vadd.f32 %v11174_v39, %v4580_v12  ;;  %v8712_v18 = vpop.f32.mrb[233].mxu1  ;;  %8870 = vmatmul.mubr.msk.f32.gmra.mrb[82].mxu1 %vm3158_vm5, %v3061_v8 }
 0x396   : > { %v2206_v19 = vpop.f32.mrb[86].mxu0  ;;  %8872 = vmatprep.mubr.msk.f32.mxu1 %vm9335_vm0, %v9336_v4 }
 0x397   : > { %5913 = vst.msk [vmem:[%s10103_s18 + $0x398] sm:$0xff] %vm3158_vm5, %v5656_v14  ;;  %v3062_v20 = vmax.f32 %v2202_v26, %v2805_v16  ;;  %v5400_v21 = vmul.f32 0.1, %v4581_v17  ;;  %v2207_v22 = vadd.f32 %v11142_v11, %v2206_v19  ;;  %v8102_v23 = vpop.f32.mrb[87].mxu0  ;;  %8260 = vmatmul.mubr.msk.f32.gmra.mrb[192].mxu0 %vm513_vm1, %v470_v13  ;;  %v476_v19 = vld [vmem:[%s9419_s13 + $0x730] sm:$0xff] }
 0x398   : > { %v4585_v24 = vpop.f32.mrb[234].mxu1  ;;  %8262 = vmatprep.mubr.msk.f32.mxu0 %vm9335_vm0, %v9336_v4 }
 0x399   : > { %v5657_v25 = vmax.f32 %v4581_v17, %v5400_v21  ;;  %v2806_v27 = vmul.f32 0.1, %v2207_v22  ;;  %v4586_v28 = vadd.f32 %v11174_v39, %v4585_v24  ;;  %v8715_v29 = vpop.f32.mrb[235].mxu1  ;;  %8873 = vmatmul.mubr.msk.f32.gmra.mrb[84].mxu1 %vm3158_vm5, %v3062_v20 }
 0x39a   : > { %v2211_v30 = vpop.f32.mrb[88].mxu0  ;;  %8875 = vmatprep.mubr.msk.f32.mxu1 %vm9335_vm0, %v9336_v4 }
 0x39b   : > { %5914 = vst.msk [vmem:[%s10103_s18 + $0x3a0] sm:$0xff] %vm3158_vm5, %v5657_v25  ;;  %v3063_v31 = vmax.f32 %v2207_v22, %v2806_v27  ;;  %v5401_v32 = vmul.f32 0.1, %v4586_v28  ;;  %v2212_v33 = vadd.f32 %v11142_v11, %v2211_v30  ;;  %v8105_v34 = vpop.f32.mrb[89].mxu0  ;;  %8263 = vmatmul.mubr.msk.f32.gmra.mrb[194].mxu0 %vm513_vm1, %v471_v40  ;;  %v477_v30 = vld [vmem:[%s9419_s13 + $0x738] sm:$0xff] }
 0x39c   : > { %v4590_v35 = vpop.f32.mrb[236].mxu1  ;;  %8265 = vmatprep.mubr.msk.f32.mxu0 %vm9335_vm0, %v9336_v4 }
 0x39d   : > { %v5658_v37 = vmax.f32 %v4586_v28, %v5401_v32  ;;  %v2807_v54 = vmul.f32 0.1, %v2212_v33  ;;  %v4591_v38 = vadd.f32 %v11174_v39, %v4590_v35  ;;  %v8718_v62 = vpop.f32.mrb[237].mxu1  ;;  %8876 = vmatmul.mubr.msk.f32.gmra.mrb[86].mxu1 %vm3158_vm5, %v3063_v31 }
 0x39e   : > { %v2216_v41 = vpop.f32.mrb[90].mxu0  ;;  %8878 = vmatprep.mubr.msk.f32.mxu1 %vm9335_vm0, %v9336_v4 }
 0x39f   : > { %5915 = vst.msk [vmem:[%s10103_s18 + $0x3a8] sm:$0xff] %vm3158_vm5, %v5658_v37  ;;  %v3064_v42 = vmax.f32 %v2212_v33, %v2807_v54  ;;  %v5402_v43 = vmul.f32 0.1, %v4591_v38  ;;  %v2217_v44 = vadd.f32 %v11142_v11, %v2216_v41  ;;  %v8108_v45 = vpop.f32.mrb[91].mxu0  ;;  %8266 = vmatmul.mubr.msk.f32.gmra.mrb[196].mxu0 %vm513_vm1, %v472_v36  ;;  %v478_v41 = vld [vmem:[%s9419_s13 + $0x740] sm:$0xff] }
 0x3a0   : > { %v4595_v46 = vpop.f32.mrb[238].mxu1  ;;  %8268 = vmatprep.mubr.msk.f32.mxu0 %vm9335_vm0, %v9336_v4 }
 0x3a1   : > { %v5659_v48 = vmax.f32 %v4591_v38, %v5402_v43  ;;  %v2808_v49 = vmul.f32 0.1, %v2217_v44  ;;  %v4596_v50 = vadd.f32 %v11174_v39, %v4595_v46  ;;  %v8721_v51 = vpop.f32.mrb[239].mxu1  ;;  %8879 = vmatmul.mubr.msk.f32.gmra.mrb[88].mxu1 %vm3158_vm5, %v3064_v42 }
 0x3a2   : > { %v2221_v6 = vpop.f32.mrb[92].mxu0  ;;  %8881 = vmatprep.mubr.msk.f32.mxu1 %vm9335_vm0, %v9336_v4 }
 0x3a3   : > { %5916 = vst.msk [vmem:[%s10103_s18 + $0x3b0] sm:$0xff] %vm3158_vm5, %v5659_v48  ;;  %v3065_v52 = vmax.f32 %v2217_v44, %v2808_v49  ;;  %v5403_v53 = vmul.f32 0.1, %v4596_v50  ;;  %v2222_v55 = vadd.f32 %v11142_v11, %v2221_v6  ;;  %v8111_v56 = vpop.f32.mrb[93].mxu0  ;;  %8269 = vmatmul.mubr.msk.f32.gmra.mrb[198].mxu0 %vm513_vm1, %v473_v47  ;;  %v479_v6 = vld [vmem:[%s9419_s13 + $0x748] sm:$0xff] }
 0x3a4   : > { %v4600_v57 = vpop.f32.mrb[240].mxu1  ;;  %8271 = vmatprep.mubr.msk.f32.mxu0 %vm9335_vm0, %v9336_v4 }
 0x3a5   : > { %v5660_v59 = vmax.f32 %v4596_v50, %v5403_v53  ;;  %v2809_v60 = vmul.f32 0.1, %v2222_v55  ;;  %v4601_v61 = vadd.f32 %v11174_v39, %v4600_v57  ;;  %v8724_v63 = vpop.f32.mrb[241].mxu1  ;;  %8882 = vmatmul.mubr.msk.f32.gmra.mrb[90].mxu1 %vm3158_vm5, %v3065_v52 }
 0x3a6   : > { %v2226_v0 = vpop.f32.mrb[94].mxu0  ;;  %8884 = vmatprep.mubr.msk.f32.mxu1 %vm9335_vm0, %v9336_v4 }
 0x3a7   : > { %5917 = vst.msk [vmem:[%s10103_s18 + $0x3b8] sm:$0xff] %vm3158_vm5, %v5660_v59  ;;  %v3066_v1 = vmax.f32 %v2222_v55, %v2809_v60  ;;  %v5404_v2 = vmul.f32 0.1, %v4601_v61  ;;  %v2227_v15 = vadd.f32 %v11142_v11, %v2226_v0  ;;  %v8114_v3 = vpop.f32.mrb[95].mxu0  ;;  %8272 = vmatmul.mubr.msk.f32.gmra.mrb[200].mxu0 %vm513_vm1, %v474_v58  ;;  %v11504_v59 = vld [vmem:[%s12531_s2] ss:$0 sm:$0xff] }
 0x3a8   : > { %v4605_v5 = vpop.f32.mrb[242].mxu1  ;;  %8274 = vmatprep.mubr.msk.f32.mxu0 %vm9335_vm0, %v9336_v4  ;;  %v480_v0 = vld [vmem:[%s9419_s13 + $0x750] sm:$0xff] }
 0x3a9   : > { %v5661_v8 = vmax.f32 %v4601_v61, %v5404_v2  ;;  %v2810_v9 = vmul.f32 0.1, %v2227_v15  ;;  %v4606_v26 = vadd.f32 %v11174_v39, %v4605_v5  ;;  %v8727_v10 = vpop.f32.mrb[243].mxu1  ;;  %8885 = vmatmul.mubr.msk.f32.gmra.mrb[92].mxu1 %vm3158_vm5, %v3066_v1 }
 0x3aa   : > { %v2231_v12 = vpop.f32.mrb[96].mxu0  ;;  %8887 = vmatprep.mubr.msk.f32.mxu1 %vm9335_vm0, %v9336_v4 }
 0x3ab   : > { %5918 = vst.msk [vmem:[%s10103_s18 + $0x3c0] sm:$0xff] %vm3158_vm5, %v5661_v8  ;;  %v3067_v13 = vmax.f32 %v2227_v15, %v2810_v9  ;;  %v5405_v14 = vmul.f32 0.1, %v4606_v26  ;;  %v2232_v16 = vadd.f32 %v11142_v11, %v2231_v12  ;;  %v8117_v17 = vpop.f32.mrb[97].mxu0  ;;  %8275 = vmatmul.mubr.msk.f32.gmra.mrb[202].mxu0 %vm513_vm1, %v475_v7  ;;  %v481_v12 = vld [vmem:[%s9419_s13 + $0x758] sm:$0xff] }
 0x3ac   : > { %v4610_v18 = vpop.f32.mrb[244].mxu1  ;;  %8277 = vmatprep.mubr.msk.f32.mxu0 %vm9335_vm0, %v9336_v4 }
 0x3ad   : > { %v5662_v20 = vmax.f32 %v4606_v26, %v5405_v14  ;;  %v2811_v21 = vmul.f32 0.1, %v2232_v16  ;;  %v4611_v22 = vadd.f32 %v11174_v39, %v4610_v18  ;;  %v8730_v23 = vpop.f32.mrb[245].mxu1  ;;  %8888 = vmatmul.mubr.msk.f32.gmra.mrb[94].mxu1 %vm3158_vm5, %v3067_v13 }
 0x3ae   : > { %v2236_v24 = vpop.f32.mrb[98].mxu0  ;;  %8890 = vmatprep.mubr.msk.f32.mxu1 %vm9335_vm0, %v9336_v4 }
 0x3af   : > { %5919 = vst.msk [vmem:[%s10103_s18 + $0x3c8] sm:$0xff] %vm3158_vm5, %v5662_v20  ;;  %v3068_v40 = vmax.f32 %v2232_v16, %v2811_v21  ;;  %v5406_v25 = vmul.f32 0.1, %v4611_v22  ;;  %v2237_v27 = vadd.f32 %v11142_v11, %v2236_v24  ;;  %v8120_v28 = vpop.f32.mrb[99].mxu0  ;;  %8278 = vmatmul.mubr.msk.f32.gmra.mrb[204].mxu0 %vm513_vm1, %v476_v19 }
 0x3b0   : > { %v4615_v29 = vpop.f32.mrb[246].mxu1  ;;  %8280 = vmatprep.mubr.msk.f32.mxu0 %vm9335_vm0, %v9336_v4 }
 0x3b1   : > { %v5663_v31 = vmax.f32 %v4611_v22, %v5406_v25  ;;  %v2812_v32 = vmul.f32 0.1, %v2237_v27  ;;  %v4616_v33 = vadd.f32 %v11174_v39, %v4615_v29  ;;  %v8733_v34 = vpop.f32.mrb[247].mxu1  ;;  %8891 = vmatmul.mubr.msk.f32.gmra.mrb[96].mxu1 %vm3158_vm5, %v3068_v40  ;;  %v11536_v25 = vld [vmem:[%s12533_s4] ss:$0 sm:$0xff] }
 0x3b2   : > { %v2241_v35 = vpop.f32.mrb[100].mxu0  ;;  %8893 = vmatprep.mubr.msk.f32.mxu1 %vm9335_vm0, %v9336_v4 }
 0x3b3   : > { %5920 = vst.msk [vmem:[%s10103_s18 + $0x3d0] sm:$0xff] %vm3158_vm5, %v5663_v31  ;;  %v3069_v36 = vmax.f32 %v2237_v27, %v2812_v32  ;;  %v5407_v37 = vmul.f32 0.1, %v4616_v33  ;;  %v2242_v54 = vadd.f32 %v11142_v11, %v2241_v35  ;;  %v8123_v38 = vpop.f32.mrb[101].mxu0  ;;  %8281 = vmatmul.mubr.msk.f32.gmra.mrb[206].mxu0 %vm513_vm1, %v477_v30  ;;  %v483_v35 = vld [vmem:[%s9419_s13 + $0x768] sm:$0xff] }
 0x3b4   : > { %v4620_v62 = vpop.f32.mrb[248].mxu1  ;;  %8283 = vmatprep.mubr.msk.f32.mxu0 %vm9335_vm0, %v9336_v4 }
 0x3b5   : > { %v5664_v42 = vmax.f32 %v4616_v33, %v5407_v37  ;;  %v2813_v43 = vmul.f32 0.1, %v2242_v54  ;;  %v4621_v44 = vadd.f32 %v11174_v39, %v4620_v62  ;;  %v8736_v45 = vpop.f32.mrb[249].mxu1  ;;  %8894 = vmatmul.mubr.msk.f32.gmra.mrb[98].mxu1 %vm3158_vm5, %v3069_v36 }
 0x3b6   : > { %v2246_v46 = vpop.f32.mrb[102].mxu0  ;;  %8896 = vmatprep.mubr.msk.f32.mxu1 %vm9335_vm0, %v9336_v4 }
 0x3b7   : > { %5921 = vst.msk [vmem:[%s10103_s18 + $0x3d8] sm:$0xff] %vm3158_vm5, %v5664_v42  ;;  %v3070_v47 = vmax.f32 %v2242_v54, %v2813_v43  ;;  %v5408_v48 = vmul.f32 0.1, %v4621_v44  ;;  %v2247_v49 = vadd.f32 %v11142_v11, %v2246_v46  ;;  %v8126_v50 = vpop.f32.mrb[103].mxu0  ;;  %8284 = vmatmul.mubr.msk.f32.gmra.mrb[208].mxu0 %vm513_vm1, %v478_v41  ;;  %v484_v46 = vld [vmem:[%s9419_s13 + $0x770] sm:$0xff] }
 0x3b8   : > { %v4625_v51 = vpop.f32.mrb[250].mxu1  ;;  %8286 = vmatprep.mubr.msk.f32.mxu0 %vm9335_vm0, %v9336_v4 }
 0x3b9   : > { %v5665_v52 = vmax.f32 %v4621_v44, %v5408_v48  ;;  %v2814_v53 = vmul.f32 0.1, %v2247_v49  ;;  %v4626_v55 = vadd.f32 %v11174_v39, %v4625_v51  ;;  %v8739_v56 = vpop.f32.mrb[251].mxu1  ;;  %8897 = vmatmul.mubr.msk.f32.gmra.mrb[100].mxu1 %vm3158_vm5, %v3070_v47 }
 0x3ba   : > { %v2251_v57 = vpop.f32.mrb[104].mxu0  ;;  %8899 = vmatprep.mubr.msk.f32.mxu1 %vm9335_vm0, %v9336_v4 }
 0x3bb   : > { %5922 = vst.msk [vmem:[%s10103_s18 + $0x3e0] sm:$0xff] %vm3158_vm5, %v5665_v52  ;;  %v3071_v11 = vmax.f32 %v2247_v49, %v2814_v53  ;;  %v5409_v58 = vmul.f32 0.1, %v4626_v55  ;;  %v2252_v60 = vadd.f32 %v11504_v59, %v2251_v57  ;;  %v8129_v61 = vpop.f32.mrb[105].mxu0  ;;  %8287 = vmatmul.mubr.msk.f32.gmra.mrb[210].mxu0 %vm513_vm1, %v479_v6  ;;  %v485_v57 = vld [vmem:[%s9419_s13 + $0x778] sm:$0xff] }
 0x3bc   : > { %v4630_v63 = vpop.f32.mrb[252].mxu1  ;;  %8289 = vmatprep.mubr.msk.f32.mxu0 %vm9335_vm0, %v9336_v4 }
 0x3bd   : > { %v5666_v1 = vmax.f32 %v4626_v55, %v5409_v58  ;;  %v2815_v2 = vmul.f32 0.1, %v2252_v60  ;;  %v4631_v15 = vadd.f32 %v11174_v39, %v4630_v63  ;;  %v8742_v3 = vpop.f32.mrb[253].mxu1  ;;  %8900 = vmatmul.mubr.msk.f32.gmra.mrb[102].mxu1 %vm3158_vm5, %v3071_v11 }
 0x3be   : > { %v2256_v5 = vpop.f32.mrb[106].mxu0  ;;  %8902 = vmatprep.mubr.msk.f32.mxu1 %vm9335_vm0, %v9336_v4 }
 0x3bf   : > { %5923 = vst.msk [vmem:[%s10103_s18 + $0x3e8] sm:$0xff] %vm3158_vm5, %v5666_v1  ;;  %v3072_v7 = vmax.f32 %v2252_v60, %v2815_v2  ;;  %v5410_v8 = vmul.f32 0.1, %v4631_v15  ;;  %v2257_v9 = vadd.f32 %v11504_v59, %v2256_v5  ;;  %v8132_v26 = vpop.f32.mrb[107].mxu0  ;;  %8290 = vmatmul.mubr.msk.f32.gmra.mrb[212].mxu0 %vm513_vm1, %v480_v0  ;;  %v486_v5 = vld [vmem:[%s9419_s13 + $0x780] sm:$0xff] }
 0x3c0   : > { %v4635_v10 = vpop.f32.mrb[254].mxu1  ;;  %8292 = vmatprep.mubr.msk.f32.mxu0 %vm9335_vm0, %v9336_v4 }
 0x3c1   : > { %v5667_v13 = vmax.f32 %v4631_v15, %v5410_v8  ;;  %v2816_v14 = vmul.f32 0.1, %v2257_v9  ;;  %v4636_v16 = vadd.f32 %v11174_v39, %v4635_v10  ;;  %v8745_v17 = vpop.f32.mrb[255].mxu1  ;;  %8903 = vmatmul.mubr.msk.f32.gmra.mrb[104].mxu1 %vm3158_vm5, %v3072_v7  ;;  %v482_v39 = vld [vmem:[%s9419_s13 + $0x760] sm:$0xff] }
 0x3c2   : > { %v2261_v18 = vpop.f32.mrb[108].mxu0  ;;  %8905 = vmatprep.mubr.msk.f32.mxu1 %vm9335_vm0, %v9336_v4 }
 0x3c3   : > { %5924 = vst.msk [vmem:[%s10103_s18 + $0x3f0] sm:$0xff] %vm3158_vm5, %v5667_v13  ;;  %v3073_v19 = vmax.f32 %v2257_v9, %v2816_v14  ;;  %v5411_v20 = vmul.f32 0.1, %v4636_v16  ;;  %v2262_v21 = vadd.f32 %v11504_v59, %v2261_v18  ;;  %v8135_v22 = vpop.f32.mrb[109].mxu0  ;;  %8293 = vmatmul.mubr.msk.f32.gmra.mrb[214].mxu0 %vm513_vm1, %v481_v12  ;;  %v487_v18 = vld [vmem:[%s9419_s13 + $0x788] sm:$0xff] }
 0x3c4   : > { %v4640_v23 = vpop.f32.mrb[0].mxu1  ;;  %8295 = vmatprep.mubr.msk.f32.mxu0 %vm9335_vm0, %v9336_v4 }
 0x3c5   : > { %v5668_v24 = vmax.f32 %v4636_v16, %v5411_v20  ;;  %v2817_v40 = vmul.f32 0.1, %v2262_v21  ;;  %v4641_v27 = vadd.f32 %v11536_v25, %v4640_v23  ;;  %v8748_v28 = vpop.f32.mrb[1].mxu1  ;;  %8906 = vmatmul.mubr.msk.f32.gmra.mrb[106].mxu1 %vm3158_vm5, %v3073_v19 }
 0x3c6   : > { %v2266_v29 = vpop.f32.mrb[110].mxu0  ;;  %8908 = vmatprep.mubr.msk.f32.mxu1 %vm9335_vm0, %v9336_v4 }
 0x3c7   : > { %5925 = vst.msk [vmem:[%s10103_s18 + $0x3f8] sm:$0xff] %vm3158_vm5, %v5668_v24  ;;  %v3074_v30 = vmax.f32 %v2262_v21, %v2817_v40  ;;  %v5412_v31 = vmul.f32 0.1, %v4641_v27  ;;  %v2267_v32 = vadd.f32 %v11504_v59, %v2266_v29  ;;  %v8138_v33 = vpop.f32.mrb[111].mxu0  ;;  %8296 = vmatmul.mubr.msk.f32.gmra.mrb[216].mxu0 %vm513_vm1, %v482_v39  ;;  %v488_v29 = vld [vmem:[%s9419_s13 + $0x790] sm:$0xff] }
 0x3c8   : > { %v4645_v34 = vpop.f32.mrb[2].mxu1  ;;  %8298 = vmatprep.mubr.msk.f32.mxu0 %vm9335_vm0, %v9336_v4 }
 0x3c9   : > { %v5669_v36 = vmax.f32 %v4641_v27, %v5412_v31  ;;  %v2818_v37 = vmul.f32 0.1, %v2267_v32  ;;  %v4646_v54 = vadd.f32 %v11536_v25, %v4645_v34  ;;  %v8751_v38 = vpop.f32.mrb[3].mxu1  ;;  %8909 = vmatmul.mubr.msk.f32.gmra.mrb[108].mxu1 %vm3158_vm5, %v3074_v30 }
 0x3ca   : > { %v2271_v62 = vpop.f32.mrb[112].mxu0  ;;  %8911 = vmatprep.mubr.msk.f32.mxu1 %vm9335_vm0, %v9336_v4 }
 0x3cb   : > { %5926 = vst.msk [vmem:[%s10103_s18 + $0x400] sm:$0xff] %vm3158_vm5, %v5669_v36  ;;  %v3075_v41 = vmax.f32 %v2267_v32, %v2818_v37  ;;  %v5413_v42 = vmul.f32 0.1, %v4646_v54  ;;  %v2272_v43 = vadd.f32 %v11504_v59, %v2271_v62  ;;  %v8141_v44 = vpop.f32.mrb[113].mxu0  ;;  %8299 = vmatmul.mubr.msk.f32.gmra.mrb[218].mxu0 %vm513_vm1, %v483_v35  ;;  %v489_v62 = vld [vmem:[%s9419_s13 + $0x798] sm:$0xff] }
 0x3cc   : > { %v4650_v45 = vpop.f32.mrb[4].mxu1  ;;  %8301 = vmatprep.mubr.msk.f32.mxu0 %vm9335_vm0, %v9336_v4 }
 0x3cd   : > { %v5670_v47 = vmax.f32 %v4646_v54, %v5413_v42  ;;  %v2819_v48 = vmul.f32 0.1, %v2272_v43  ;;  %v4651_v49 = vadd.f32 %v11536_v25, %v4650_v45  ;;  %v8754_v50 = vpop.f32.mrb[5].mxu1  ;;  %8912 = vmatmul.mubr.msk.f32.gmra.mrb[110].mxu1 %vm3158_vm5, %v3075_v41 }
 0x3ce   : > { %v2276_v51 = vpop.f32.mrb[114].mxu0  ;;  %8914 = vmatprep.mubr.msk.f32.mxu1 %vm9335_vm0, %v9336_v4 }
 0x3cf   : > { %5927 = vst.msk [vmem:[%s10103_s18 + $0x408] sm:$0xff] %vm3158_vm5, %v5670_v47  ;;  %v3076_v6 = vmax.f32 %v2272_v43, %v2819_v48  ;;  %v5414_v52 = vmul.f32 0.1, %v4651_v49  ;;  %v2277_v53 = vadd.f32 %v11504_v59, %v2276_v51  ;;  %v8144_v55 = vpop.f32.mrb[115].mxu0  ;;  %8302 = vmatmul.mubr.msk.f32.gmra.mrb[220].mxu0 %vm513_vm1, %v484_v46  ;;  %v490_v51 = vld [vmem:[%s9419_s13 + $0x7a0] sm:$0xff] }
 0x3d0   : > { %v4655_v56 = vpop.f32.mrb[6].mxu1  ;;  %8304 = vmatprep.mubr.msk.f32.mxu0 %vm9335_vm0, %v9336_v4 }
 0x3d1   : > { %v5671_v11 = vmax.f32 %v4651_v49, %v5414_v52  ;;  %v2820_v58 = vmul.f32 0.1, %v2277_v53  ;;  %v4656_v60 = vadd.f32 %v11536_v25, %v4655_v56  ;;  %v8757_v61 = vpop.f32.mrb[7].mxu1  ;;  %8915 = vmatmul.mubr.msk.f32.gmra.mrb[112].mxu1 %vm3158_vm5, %v3076_v6 }
 0x3d2   : > { %v2281_v63 = vpop.f32.mrb[116].mxu0  ;;  %8917 = vmatprep.mubr.msk.f32.mxu1 %vm9335_vm0, %v9336_v4 }
 0x3d3   : > { %5928 = vst.msk [vmem:[%s10103_s18 + $0x410] sm:$0xff] %vm3158_vm5, %v5671_v11  ;;  %v3077_v0 = vmax.f32 %v2277_v53, %v2820_v58  ;;  %v5415_v1 = vmul.f32 0.1, %v4656_v60  ;;  %v2282_v2 = vadd.f32 %v11504_v59, %v2281_v63  ;;  %v8147_v15 = vpop.f32.mrb[117].mxu0  ;;  %8305 = vmatmul.mubr.msk.f32.gmra.mrb[222].mxu0 %vm513_vm1, %v485_v57  ;;  %v491_v63 = vld [vmem:[%s9419_s13 + $0x7a8] sm:$0xff] }
 0x3d4   : > { %v4660_v3 = vpop.f32.mrb[8].mxu1  ;;  %8307 = vmatprep.mubr.msk.f32.mxu0 %vm9335_vm0, %v9336_v4 }
 0x3d5   : > { %v5672_v7 = vmax.f32 %v4656_v60, %v5415_v1  ;;  %v2821_v8 = vmul.f32 0.1, %v2282_v2  ;;  %v4661_v9 = vadd.f32 %v11536_v25, %v4660_v3  ;;  %v8760_v26 = vpop.f32.mrb[9].mxu1  ;;  %8918 = vmatmul.mubr.msk.f32.gmra.mrb[114].mxu1 %vm3158_vm5, %v3077_v0 }
 0x3d6   : > { %v2286_v10 = vpop.f32.mrb[118].mxu0  ;;  %8920 = vmatprep.mubr.msk.f32.mxu1 %vm9335_vm0, %v9336_v4 }
 0x3d7   : > { %5929 = vst.msk [vmem:[%s10103_s18 + $0x418] sm:$0xff] %vm3158_vm5, %v5672_v7  ;;  %v3078_v12 = vmax.f32 %v2282_v2, %v2821_v8  ;;  %v5416_v13 = vmul.f32 0.1, %v4661_v9  ;;  %v2287_v14 = vadd.f32 %v11504_v59, %v2286_v10  ;;  %v8150_v16 = vpop.f32.mrb[119].mxu0  ;;  %8308 = vmatmul.mubr.msk.f32.gmra.mrb[224].mxu0 %vm513_vm1, %v486_v5  ;;  %v492_v10 = vld [vmem:[%s9419_s13 + $0x7b0] sm:$0xff] }
 0x3d8   : > { %v4665_v17 = vpop.f32.mrb[10].mxu1  ;;  %8310 = vmatprep.mubr.msk.f32.mxu0 %vm9335_vm0, %v9336_v4 }
 0x3d9   : > { %v5673_v19 = vmax.f32 %v4661_v9, %v5416_v13  ;;  %v2822_v20 = vmul.f32 0.1, %v2287_v14  ;;  %v4666_v21 = vadd.f32 %v11536_v25, %v4665_v17  ;;  %v8763_v22 = vpop.f32.mrb[11].mxu1  ;;  %8921 = vmatmul.mubr.msk.f32.gmra.mrb[116].mxu1 %vm3158_vm5, %v3078_v12 }
 0x3da   : > { %v2291_v23 = vpop.f32.mrb[120].mxu0  ;;  %8923 = vmatprep.mubr.msk.f32.mxu1 %vm9335_vm0, %v9336_v4 }
 0x3db   : > { %5930 = vst.msk [vmem:[%s10103_s18 + $0x420] sm:$0xff] %vm3158_vm5, %v5673_v19  ;;  %v3079_v39 = vmax.f32 %v2287_v14, %v2822_v20  ;;  %v5417_v24 = vmul.f32 0.1, %v4666_v21  ;;  %v2292_v40 = vadd.f32 %v11504_v59, %v2291_v23  ;;  %v8153_v27 = vpop.f32.mrb[121].mxu0  ;;  %8311 = vmatmul.mubr.msk.f32.gmra.mrb[226].mxu0 %vm513_vm1, %v487_v18  ;;  %v493_v23 = vld [vmem:[%s9419_s13 + $0x7b8] sm:$0xff] }
 0x3dc   : > { %v4670_v28 = vpop.f32.mrb[12].mxu1  ;;  %8313 = vmatprep.mubr.msk.f32.mxu0 %vm9335_vm0, %v9336_v4 }
 0x3dd   : > { %v5674_v30 = vmax.f32 %v4666_v21, %v5417_v24  ;;  %v2823_v31 = vmul.f32 0.1, %v2292_v40  ;;  %v4671_v32 = vadd.f32 %v11536_v25, %v4670_v28  ;;  %v8766_v33 = vpop.f32.mrb[13].mxu1  ;;  %8924 = vmatmul.mubr.msk.f32.gmra.mrb[118].mxu1 %vm3158_vm5, %v3079_v39 }
 0x3de   : > { %v2296_v34 = vpop.f32.mrb[122].mxu0  ;;  %8926 = vmatprep.mubr.msk.f32.mxu1 %vm9335_vm0, %v9336_v4 }
 0x3df   : > { %5931 = vst.msk [vmem:[%s10103_s18 + $0x428] sm:$0xff] %vm3158_vm5, %v5674_v30  ;;  %v3080_v35 = vmax.f32 %v2292_v40, %v2823_v31  ;;  %v5418_v36 = vmul.f32 0.1, %v4671_v32  ;;  %v2297_v37 = vadd.f32 %v11504_v59, %v2296_v34  ;;  %v8156_v54 = vpop.f32.mrb[123].mxu0  ;;  %8314 = vmatmul.mubr.msk.f32.gmra.mrb[228].mxu0 %vm513_vm1, %v488_v29  ;;  %v494_v34 = vld [vmem:[%s9419_s13 + $0x7c0] sm:$0xff] }
 0x3e0   : > { %v4675_v38 = vpop.f32.mrb[14].mxu1  ;;  %8316 = vmatprep.mubr.msk.f32.mxu0 %vm9335_vm0, %v9336_v4 }
 0x3e1   : > { %v5675_v41 = vmax.f32 %v4671_v32, %v5418_v36  ;;  %v2824_v42 = vmul.f32 0.1, %v2297_v37  ;;  %v4676_v43 = vadd.f32 %v11536_v25, %v4675_v38  ;;  %v8769_v44 = vpop.f32.mrb[15].mxu1  ;;  %8927 = vmatmul.mubr.msk.f32.gmra.mrb[120].mxu1 %vm3158_vm5, %v3080_v35 }
 0x3e2   : > { %v2301_v45 = vpop.f32.mrb[124].mxu0  ;;  %8929 = vmatprep.mubr.msk.f32.mxu1 %vm9335_vm0, %v9336_v4 }
 0x3e3   : > { %5932 = vst.msk [vmem:[%s10103_s18 + $0x430] sm:$0xff] %vm3158_vm5, %v5675_v41  ;;  %v3081_v46 = vmax.f32 %v2297_v37, %v2824_v42  ;;  %v5419_v47 = vmul.f32 0.1, %v4676_v43  ;;  %v2302_v48 = vadd.f32 %v11504_v59, %v2301_v45  ;;  %v8159_v49 = vpop.f32.mrb[125].mxu0  ;;  %8317 = vmatmul.mubr.msk.f32.gmra.mrb[230].mxu0 %vm513_vm1, %v489_v62  ;;  %v495_v45 = vld [vmem:[%s9419_s13 + $0x7c8] sm:$0xff] }
 0x3e4   : > { %v4680_v50 = vpop.f32.mrb[16].mxu1  ;;  %8319 = vmatprep.mubr.msk.f32.mxu0 %vm9335_vm0, %v9336_v4 }
 0x3e5   : > { %v5676_v6 = vmax.f32 %v4676_v43, %v5419_v47  ;;  %v2825_v52 = vmul.f32 0.1, %v2302_v48  ;;  %v4681_v53 = vadd.f32 %v11536_v25, %v4680_v50  ;;  %v8772_v55 = vpop.f32.mrb[17].mxu1  ;;  %8930 = vmatmul.mubr.msk.f32.gmra.mrb[122].mxu1 %vm3158_vm5, %v3081_v46 }
 0x3e6   : > { %v2306_v56 = vpop.f32.mrb[126].mxu0  ;;  %8932 = vmatprep.mubr.msk.f32.mxu1 %vm9335_vm0, %v9336_v4 }
 0x3e7   : > { %5933 = vst.msk [vmem:[%s10103_s18 + $0x438] sm:$0xff] %vm3158_vm5, %v5676_v6  ;;  %v3082_v57 = vmax.f32 %v2302_v48, %v2825_v52  ;;  %v5420_v11 = vmul.f32 0.1, %v4681_v53  ;;  %v2307_v58 = vadd.f32 %v11504_v59, %v2306_v56  ;;  %v8162_v60 = vpop.f32.mrb[127].mxu0  ;;  %8320 = vmatmul.mubr.msk.f32.gmra.mrb[232].mxu0 %vm513_vm1, %v490_v51  ;;  %v496_v56 = vld [vmem:[%s9419_s13 + $0x7d0] sm:$0xff] }
 0x3e8   : > { %v4685_v61 = vpop.f32.mrb[18].mxu1  ;;  %8322 = vmatprep.mubr.msk.f32.mxu0 %vm9335_vm0, %v9336_v4 }
 0x3e9   : > { %v5677_v0 = vmax.f32 %v4681_v53, %v5420_v11  ;;  %v2826_v1 = vmul.f32 0.1, %v2307_v58  ;;  %v4686_v2 = vadd.f32 %v11536_v25, %v4685_v61  ;;  %v8775_v15 = vpop.f32.mrb[19].mxu1  ;;  %8933 = vmatmul.mubr.msk.f32.gmra.mrb[124].mxu1 %vm3158_vm5, %v3082_v57 }
 0x3ea   : > { %v2311_v3 = vpop.f32.mrb[128].mxu0  ;;  %8935 = vmatprep.mubr.msk.f32.mxu1 %vm9335_vm0, %v9336_v4 }
 0x3eb   : > { %5934 = vst.msk [vmem:[%s10103_s18 + $0x440] sm:$0xff] %vm3158_vm5, %v5677_v0  ;;  %v3083_v5 = vmax.f32 %v2307_v58, %v2826_v1  ;;  %v5421_v7 = vmul.f32 0.1, %v4686_v2  ;;  %v2312_v8 = vadd.f32 %v11504_v59, %v2311_v3  ;;  %v8165_v9 = vpop.f32.mrb[129].mxu0  ;;  %8323 = vmatmul.mubr.msk.f32.gmra.mrb[234].mxu0 %vm513_vm1, %v491_v63  ;;  %v497_v3 = vld [vmem:[%s9419_s13 + $0x7d8] sm:$0xff] }
 0x3ec   : > { %v4690_v26 = vpop.f32.mrb[20].mxu1  ;;  %8325 = vmatprep.mubr.msk.f32.mxu0 %vm9335_vm0, %v9336_v4 }
 0x3ed   : > { %v5678_v12 = vmax.f32 %v4686_v2, %v5421_v7  ;;  %v2827_v13 = vmul.f32 0.1, %v2312_v8  ;;  %v4691_v14 = vadd.f32 %v11536_v25, %v4690_v26  ;;  %v8778_v16 = vpop.f32.mrb[21].mxu1  ;;  %8936 = vmatmul.mubr.msk.f32.gmra.mrb[126].mxu1 %vm3158_vm5, %v3083_v5 }
 0x3ee   : > { %v2316_v17 = vpop.f32.mrb[130].mxu0  ;;  %8938 = vmatprep.mubr.msk.f32.mxu1 %vm9335_vm0, %v9336_v4 }
 0x3ef   : > { %5935 = vst.msk [vmem:[%s10103_s18 + $0x448] sm:$0xff] %vm3158_vm5, %v5678_v12  ;;  %v3084_v18 = vmax.f32 %v2312_v8, %v2827_v13  ;;  %v5422_v19 = vmul.f32 0.1, %v4691_v14  ;;  %v2317_v20 = vadd.f32 %v11504_v59, %v2316_v17  ;;  %v8168_v21 = vpop.f32.mrb[131].mxu0  ;;  %8326 = vmatmul.mubr.msk.f32.gmra.mrb[236].mxu0 %vm513_vm1, %v492_v10  ;;  %v498_v17 = vld [vmem:[%s9419_s13 + $0x7e0] sm:$0xff] }
 0x3f0   : > { %v4695_v22 = vpop.f32.mrb[22].mxu1  ;;  %8328 = vmatprep.mubr.msk.f32.mxu0 %vm9335_vm0, %v9336_v4 }
 0x3f1   : > { %v5679_v39 = vmax.f32 %v4691_v14, %v5422_v19  ;;  %v2828_v24 = vmul.f32 0.1, %v2317_v20  ;;  %v4696_v40 = vadd.f32 %v11536_v25, %v4695_v22  ;;  %v8781_v27 = vpop.f32.mrb[23].mxu1  ;;  %8939 = vmatmul.mubr.msk.f32.gmra.mrb[128].mxu1 %vm3158_vm5, %v3084_v18 }
 0x3f2   : > { %v2321_v28 = vpop.f32.mrb[132].mxu0  ;;  %8941 = vmatprep.mubr.msk.f32.mxu1 %vm9335_vm0, %v9336_v4 }
 0x3f3   : > { %5936 = vst.msk [vmem:[%s10103_s18 + $0x450] sm:$0xff] %vm3158_vm5, %v5679_v39  ;;  %v3085_v29 = vmax.f32 %v2317_v20, %v2828_v24  ;;  %v5423_v30 = vmul.f32 0.1, %v4696_v40  ;;  %v2322_v31 = vadd.f32 %v11504_v59, %v2321_v28  ;;  %v8171_v32 = vpop.f32.mrb[133].mxu0  ;;  %8329 = vmatmul.mubr.msk.f32.gmra.mrb[238].mxu0 %vm513_vm1, %v493_v23  ;;  %v499_v28 = vld [vmem:[%s9419_s13 + $0x7e8] sm:$0xff] }
 0x3f4   : > { %v4700_v33 = vpop.f32.mrb[24].mxu1  ;;  %8331 = vmatprep.mubr.msk.f32.mxu0 %vm9335_vm0, %v9336_v4 }
 0x3f5   : > { %v5680_v35 = vmax.f32 %v4696_v40, %v5423_v30  ;;  %v2829_v36 = vmul.f32 0.1, %v2322_v31  ;;  %v4701_v37 = vadd.f32 %v11536_v25, %v4700_v33  ;;  %v8784_v54 = vpop.f32.mrb[25].mxu1  ;;  %8942 = vmatmul.mubr.msk.f32.gmra.mrb[130].mxu1 %vm3158_vm5, %v3085_v29 }
 0x3f6   : > { %v2326_v38 = vpop.f32.mrb[134].mxu0  ;;  %8944 = vmatprep.mubr.msk.f32.mxu1 %vm9335_vm0, %v9336_v4 }
 0x3f7   : > { %5937 = vst.msk [vmem:[%s10103_s18 + $0x458] sm:$0xff] %vm3158_vm5, %v5680_v35  ;;  %v3086_v62 = vmax.f32 %v2322_v31, %v2829_v36  ;;  %v5424_v41 = vmul.f32 0.1, %v4701_v37  ;;  %v2327_v42 = vadd.f32 %v11504_v59, %v2326_v38  ;;  %v8174_v43 = vpop.f32.mrb[135].mxu0  ;;  %8332 = vmatmul.mubr.msk.f32.gmra.mrb[240].mxu0 %vm513_vm1, %v494_v34  ;;  %v500_v38 = vld [vmem:[%s9419_s13 + $0x7f0] sm:$0xff] }
 0x3f8   : > { %v4705_v44 = vpop.f32.mrb[26].mxu1  ;;  %8334 = vmatprep.mubr.msk.f32.mxu0 %vm9335_vm0, %v9336_v4 }
 0x3f9   : > { %v5681_v46 = vmax.f32 %v4701_v37, %v5424_v41  ;;  %v2830_v47 = vmul.f32 0.1, %v2327_v42  ;;  %v4706_v48 = vadd.f32 %v11536_v25, %v4705_v44  ;;  %v8787_v49 = vpop.f32.mrb[27].mxu1  ;;  %8945 = vmatmul.mubr.msk.f32.gmra.mrb[132].mxu1 %vm3158_vm5, %v3086_v62 }
 0x3fa   : > { %v2331_v50 = vpop.f32.mrb[136].mxu0  ;;  %8947 = vmatprep.mubr.msk.f32.mxu1 %vm9335_vm0, %v9336_v4 }
 0x3fb   : > { %5938 = vst.msk [vmem:[%s10103_s18 + $0x460] sm:$0xff] %vm3158_vm5, %v5681_v46  ;;  %v3087_v51 = vmax.f32 %v2327_v42, %v2830_v47  ;;  %v5425_v6 = vmul.f32 0.1, %v4706_v48  ;;  %v2332_v52 = vadd.f32 %v11504_v59, %v2331_v50  ;;  %v8177_v53 = vpop.f32.mrb[137].mxu0  ;;  %8335 = vmatmul.mubr.msk.f32.gmra.mrb[242].mxu0 %vm513_vm1, %v495_v45  ;;  %v501_v50 = vld [vmem:[%s9419_s13 + $0x7f8] sm:$0xff] }
 0x3fc   : > { %v4710_v55 = vpop.f32.mrb[28].mxu1  ;;  %8337 = vmatprep.mubr.msk.f32.mxu0 %vm9335_vm0, %v9336_v4 }
 0x3fd   : > { %v5682_v57 = vmax.f32 %v4706_v48, %v5425_v6  ;;  %v2831_v11 = vmul.f32 0.1, %v2332_v52  ;;  %v4711_v58 = vadd.f32 %v11536_v25, %v4710_v55  ;;  %v8790_v60 = vpop.f32.mrb[29].mxu1  ;;  %8948 = vmatmul.mubr.msk.f32.gmra.mrb[134].mxu1 %vm3158_vm5, %v3087_v51 }
 0x3fe   : > { %v2336_v61 = vpop.f32.mrb[138].mxu0  ;;  %8950 = vmatprep.mubr.msk.f32.mxu1 %vm9335_vm0, %v9336_v4 }
 0x3ff   : > { %5939 = vst.msk [vmem:[%s10103_s18 + $0x468] sm:$0xff] %vm3158_vm5, %v5682_v57  ;;  %v3088_v63 = vmax.f32 %v2332_v52, %v2831_v11  ;;  %v5426_v0 = vmul.f32 0.1, %v4711_v58  ;;  %v2337_v1 = vadd.f32 %v11504_v59, %v2336_v61  ;;  %v8180_v2 = vpop.f32.mrb[139].mxu0  ;;  %8338 = vmatmul.mubr.msk.f32.gmra.mrb[244].mxu0 %vm513_vm1, %v496_v56  ;;  %v502_v61 = vld [vmem:[%s9419_s13 + $0x800] sm:$0xff] }
 0x400   : > { %v4715_v15 = vpop.f32.mrb[30].mxu1  ;;  %8340 = vmatprep.mubr.msk.f32.mxu0 %vm9335_vm0, %v9336_v4 }
 0x401   : > { %v5683_v5 = vmax.f32 %v4711_v58, %v5426_v0  ;;  %v2832_v7 = vmul.f32 0.1, %v2337_v1  ;;  %v4716_v8 = vadd.f32 %v11536_v25, %v4715_v15  ;;  %v8793_v9 = vpop.f32.mrb[31].mxu1  ;;  %8951 = vmatmul.mubr.msk.f32.gmra.mrb[136].mxu1 %vm3158_vm5, %v3088_v63 }
 0x402   : > { %v2341_v26 = vpop.f32.mrb[140].mxu0  ;;  %8953 = vmatprep.mubr.msk.f32.mxu1 %vm9335_vm0, %v9336_v4 }
 0x403   : > { %5940 = vst.msk [vmem:[%s10103_s18 + $0x470] sm:$0xff] %vm3158_vm5, %v5683_v5  ;;  %v3089_v10 = vmax.f32 %v2337_v1, %v2832_v7  ;;  %v5427_v12 = vmul.f32 0.1, %v4716_v8  ;;  %v2342_v13 = vadd.f32 %v11504_v59, %v2341_v26  ;;  %v8183_v14 = vpop.f32.mrb[141].mxu0  ;;  %8341 = vmatmul.mubr.msk.f32.gmra.mrb[246].mxu0 %vm513_vm1, %v497_v3 }
 0x404   : > { %v4720_v16 = vpop.f32.mrb[32].mxu1  ;;  %8343 = vmatprep.mubr.msk.f32.mxu0 %vm9335_vm0, %v9336_v4 }
 0x405   : > { %v5684_v18 = vmax.f32 %v4716_v8, %v5427_v12  ;;  %v2833_v19 = vmul.f32 0.1, %v2342_v13  ;;  %v4721_v20 = vadd.f32 %v11536_v25, %v4720_v16  ;;  %v8796_v21 = vpop.f32.mrb[33].mxu1  ;;  %8954 = vmatmul.mubr.msk.f32.gmra.mrb[138].mxu1 %vm3158_vm5, %v3089_v10 }
 0x406   : > { %v2346_v22 = vpop.f32.mrb[142].mxu0  ;;  %8956 = vmatprep.mubr.msk.f32.mxu1 %vm9335_vm0, %v9336_v4 }
 0x407   : > { %5941 = vst.msk [vmem:[%s10103_s18 + $0x478] sm:$0xff] %vm3158_vm5, %v5684_v18  ;;  %v3090_v23 = vmax.f32 %v2342_v13, %v2833_v19  ;;  %v5428_v39 = vmul.f32 0.1, %v4721_v20  ;;  %v2347_v24 = vadd.f32 %v11504_v59, %v2346_v22  ;;  %v8186_v40 = vpop.f32.mrb[143].mxu0  ;;  %8344 = vmatmul.mubr.msk.f32.gmra.mrb[248].mxu0 %vm513_vm1, %v498_v17 }
 0x408   : > { %v4725_v27 = vpop.f32.mrb[34].mxu1  ;;  %8346 = vmatprep.mubr.msk.f32.mxu0 %vm9335_vm0, %v9336_v4 }
 0x409   : > { %v5685_v29 = vmax.f32 %v4721_v20, %v5428_v39  ;;  %v2834_v30 = vmul.f32 0.1, %v2347_v24  ;;  %v4726_v31 = vadd.f32 %v11536_v25, %v4725_v27  ;;  %v8799_v32 = vpop.f32.mrb[35].mxu1  ;;  %8957 = vmatmul.mubr.msk.f32.gmra.mrb[140].mxu1 %vm3158_vm5, %v3090_v23 }
 0x40a   : > { %v2351_v33 = vpop.f32.mrb[144].mxu0  ;;  %8959 = vmatprep.mubr.msk.f32.mxu1 %vm9335_vm0, %v9336_v4 }
 0x40b   : > { %5942 = vst.msk [vmem:[%s10103_s18 + $0x480] sm:$0xff] %vm3158_vm5, %v5685_v29  ;;  %v3091_v34 = vmax.f32 %v2347_v24, %v2834_v30  ;;  %v5429_v35 = vmul.f32 0.1, %v4726_v31  ;;  %v2352_v36 = vadd.f32 %v11504_v59, %v2351_v33  ;;  %v8189_v37 = vpop.f32.mrb[145].mxu0  ;;  %8347 = vmatmul.mubr.msk.f32.gmra.mrb[250].mxu0 %vm513_vm1, %v499_v28 }
 0x40c   : > { %v4730_v54 = vpop.f32.mrb[36].mxu1  ;;  %8349 = vmatprep.mubr.msk.f32.mxu0 %vm9335_vm0, %v9336_v4 }
 0x40d   : > { %v5686_v62 = vmax.f32 %v4726_v31, %v5429_v35  ;;  %v2835_v41 = vmul.f32 0.1, %v2352_v36  ;;  %v4731_v42 = vadd.f32 %v11536_v25, %v4730_v54  ;;  %v8802_v43 = vpop.f32.mrb[37].mxu1  ;;  %8960 = vmatmul.mubr.msk.f32.gmra.mrb[142].mxu1 %vm3158_vm5, %v3091_v34 }
 0x40e   : > { %v2356_v44 = vpop.f32.mrb[146].mxu0  ;;  %8962 = vmatprep.mubr.msk.f32.mxu1 %vm9335_vm0, %v9336_v4 }
 0x40f   : > { %5943 = vst.msk [vmem:[%s10103_s18 + $0x488] sm:$0xff] %vm3158_vm5, %v5686_v62  ;;  %v3092_v45 = vmax.f32 %v2352_v36, %v2835_v41  ;;  %v5430_v46 = vmul.f32 0.1, %v4731_v42  ;;  %v2357_v47 = vadd.f32 %v11504_v59, %v2356_v44  ;;  %v8192_v48 = vpop.f32.mrb[147].mxu0  ;;  %8350 = vmatmul.mubr.msk.f32.gmra.mrb[252].mxu0 %vm513_vm1, %v500_v38 }
 0x410   : > { %v4735_v49 = vpop.f32.mrb[38].mxu1  ;;  %8352 = vmatprep.mubr.msk.f32.mxu0 %vm9335_vm0, %v9336_v4 }
 0x411   : > { %v5687_v51 = vmax.f32 %v4731_v42, %v5430_v46  ;;  %v2836_v6 = vmul.f32 0.1, %v2357_v47  ;;  %v4736_v52 = vadd.f32 %v11536_v25, %v4735_v49  ;;  %v8805_v53 = vpop.f32.mrb[39].mxu1  ;;  %8963 = vmatmul.mubr.msk.f32.gmra.mrb[144].mxu1 %vm3158_vm5, %v3092_v45 }
 0x412   : > { %v2361_v55 = vpop.f32.mrb[148].mxu0  ;;  %8965 = vmatprep.mubr.msk.f32.mxu1 %vm9335_vm0, %v9336_v4 }
 0x413   : > { %5944 = vst.msk [vmem:[%s10103_s18 + $0x490] sm:$0xff] %vm3158_vm5, %v5687_v51  ;;  %v3093_v56 = vmax.f32 %v2357_v47, %v2836_v6  ;;  %v5431_v57 = vmul.f32 0.1, %v4736_v52  ;;  %v2362_v11 = vadd.f32 %v11504_v59, %v2361_v55  ;;  %v8195_v58 = vpop.f32.mrb[149].mxu0  ;;  %8353 = vmatmul.mubr.msk.f32.gmra.mrb[254].mxu0 %vm513_vm1, %v501_v50 }
 0x414   : > { %v4740_v60 = vpop.f32.mrb[40].mxu1  ;;  %8355 = vmatprep.mubr.msk.f32.mxu0 %vm9335_vm0, %v9336_v4 }
 0x415   : > { %v5688_v63 = vmax.f32 %v4736_v52, %v5431_v57  ;;  %v2837_v0 = vmul.f32 0.1, %v2362_v11  ;;  %v4741_v1 = vadd.f32 %v11536_v25, %v4740_v60  ;;  %v8808_v2 = vpop.f32.mrb[41].mxu1  ;;  %8966 = vmatmul.mubr.msk.f32.gmra.mrb[146].mxu1 %vm3158_vm5, %v3093_v56 }
 0x416   : > { %v2366_v15 = vpop.f32.mrb[150].mxu0  ;;  %8968 = vmatprep.mubr.msk.f32.mxu1 %vm9335_vm0, %v9336_v4 }
 0x417   : > { %5945 = vst.msk [vmem:[%s10103_s18 + $0x498] sm:$0xff] %vm3158_vm5, %v5688_v63  ;;  %v3094_v3 = vmax.f32 %v2362_v11, %v2837_v0  ;;  %v5432_v5 = vmul.f32 0.1, %v4741_v1  ;;  %v2367_v7 = vadd.f32 %v11504_v59, %v2366_v15  ;;  %v8198_v8 = vpop.f32.mrb[151].mxu0  ;;  %8356 = vmatmul.mubr.msk.f32.gmra.mrb[0].mxu0 %vm513_vm1, %v502_v61 }
 0x418   : > { %v4745_v9 = vpop.f32.mrb[42].mxu1 }
 0x419   : > { %v5689_v26 = vmax.f32 %v4741_v1, %v5432_v5  ;;  %v2838_v10 = vmul.f32 0.1, %v2367_v7  ;;  %v4746_v12 = vadd.f32 %v11536_v25, %v4745_v9  ;;  %v8811_v13 = vpop.f32.mrb[43].mxu1  ;;  %8969 = vmatmul.mubr.msk.f32.gmra.mrb[148].mxu1 %vm3158_vm5, %v3094_v3 }
 0x41a   : > { %v2371_v14 = vpop.f32.mrb[152].mxu0  ;;  %8971 = vmatprep.mubr.msk.f32.mxu1 %vm9335_vm0, %v9336_v4 }
 0x41b   : > { %5946 = vst.msk [vmem:[%s10103_s18 + $0x4a0] sm:$0xff] %vm3158_vm5, %v5689_v26  ;;  %v3095_v16 = vmax.f32 %v2367_v7, %v2838_v10  ;;  %v5433_v17 = vmul.f32 0.1, %v4746_v12  ;;  %v2372_v18 = vadd.f32 %v11504_v59, %v2371_v14  ;;  %v8201_v19 = vpop.f32.mrb[153].mxu0 }
 0x41c   : > { %v4750_v20 = vpop.f32.mrb[44].mxu1 }
 0x41d   : > { %v5690_v21 = vmax.f32 %v4746_v12, %v5433_v17  ;;  %v2839_v22 = vmul.f32 0.1, %v2372_v18  ;;  %v4751_v23 = vadd.f32 %v11536_v25, %v4750_v20  ;;  %v8814_v39 = vpop.f32.mrb[45].mxu1  ;;  %8972 = vmatmul.mubr.msk.f32.gmra.mrb[150].mxu1 %vm3158_vm5, %v3095_v16 }
 0x41e   : > { %v2376_v24 = vpop.f32.mrb[154].mxu0  ;;  %8974 = vmatprep.mubr.msk.f32.mxu1 %vm9335_vm0, %v9336_v4 }
 0x41f   : > { %5947 = vst.msk [vmem:[%s10103_s18 + $0x4a8] sm:$0xff] %vm3158_vm5, %v5690_v21  ;;  %v3096_v40 = vmax.f32 %v2372_v18, %v2839_v22  ;;  %v5434_v27 = vmul.f32 0.1, %v4751_v23  ;;  %v2377_v28 = vadd.f32 %v11504_v59, %v2376_v24  ;;  %v8204_v29 = vpop.f32.mrb[155].mxu0 }
 0x420   : > { %v4755_v30 = vpop.f32.mrb[46].mxu1 }
 0x421   : > { %v5691_v31 = vmax.f32 %v4751_v23, %v5434_v27  ;;  %v2840_v32 = vmul.f32 0.1, %v2377_v28  ;;  %v4756_v33 = vadd.f32 %v11536_v25, %v4755_v30  ;;  %v8817_v34 = vpop.f32.mrb[47].mxu1  ;;  %8975 = vmatmul.mubr.msk.f32.gmra.mrb[152].mxu1 %vm3158_vm5, %v3096_v40 }
 0x422   : > { %v2381_v35 = vpop.f32.mrb[156].mxu0  ;;  %8977 = vmatprep.mubr.msk.f32.mxu1 %vm9335_vm0, %v9336_v4 }
 0x423   : > { %5948 = vst.msk [vmem:[%s10103_s18 + $0x4b0] sm:$0xff] %vm3158_vm5, %v5691_v31  ;;  %v3097_v36 = vmax.f32 %v2377_v28, %v2840_v32  ;;  %v5435_v37 = vmul.f32 0.1, %v4756_v33  ;;  %v2382_v54 = vadd.f32 %v11504_v59, %v2381_v35  ;;  %v8207_v38 = vpop.f32.mrb[157].mxu0 }
 0x424   : > { %v4760_v62 = vpop.f32.mrb[48].mxu1 }
 0x425   : > { %v5692_v41 = vmax.f32 %v4756_v33, %v5435_v37  ;;  %v2841_v42 = vmul.f32 0.1, %v2382_v54  ;;  %v4761_v43 = vadd.f32 %v11536_v25, %v4760_v62  ;;  %v8820_v44 = vpop.f32.mrb[49].mxu1  ;;  %8978 = vmatmul.mubr.msk.f32.gmra.mrb[154].mxu1 %vm3158_vm5, %v3097_v36 }
 0x426   : > { %v2386_v45 = vpop.f32.mrb[158].mxu0  ;;  %8980 = vmatprep.mubr.msk.f32.mxu1 %vm9335_vm0, %v9336_v4 }
 0x427   : > { %5949 = vst.msk [vmem:[%s10103_s18 + $0x4b8] sm:$0xff] %vm3158_vm5, %v5692_v41  ;;  %v3098_v46 = vmax.f32 %v2382_v54, %v2841_v42  ;;  %v5436_v47 = vmul.f32 0.1, %v4761_v43  ;;  %v2387_v48 = vadd.f32 %v11504_v59, %v2386_v45  ;;  %v8210_v49 = vpop.f32.mrb[159].mxu0 }
 0x428   : > { %v4765_v50 = vpop.f32.mrb[50].mxu1 }
 0x429   : > { %v5693_v51 = vmax.f32 %v4761_v43, %v5436_v47  ;;  %v2842_v6 = vmul.f32 0.1, %v2387_v48  ;;  %v4766_v52 = vadd.f32 %v11536_v25, %v4765_v50  ;;  %v8823_v53 = vpop.f32.mrb[51].mxu1  ;;  %8981 = vmatmul.mubr.msk.f32.gmra.mrb[156].mxu1 %vm3158_vm5, %v3098_v46 }
 0x42a   : > { %v2391_v55 = vpop.f32.mrb[160].mxu0  ;;  %8983 = vmatprep.mubr.msk.f32.mxu1 %vm9335_vm0, %v9336_v4 }
 0x42b   : > { %5950 = vst.msk [vmem:[%s10103_s18 + $0x4c0] sm:$0xff] %vm3158_vm5, %v5693_v51  ;;  %v3099_v56 = vmax.f32 %v2387_v48, %v2842_v6  ;;  %v5437_v57 = vmul.f32 0.1, %v4766_v52  ;;  %v2392_v11 = vadd.f32 %v11504_v59, %v2391_v55  ;;  %v8213_v58 = vpop.f32.mrb[161].mxu0 }
 0x42c   : > { %v4770_v60 = vpop.f32.mrb[52].mxu1 }
 0x42d   : > { %v5694_v61 = vmax.f32 %v4766_v52, %v5437_v57  ;;  %v2843_v63 = vmul.f32 0.1, %v2392_v11  ;;  %v4771_v0 = vadd.f32 %v11536_v25, %v4770_v60  ;;  %v8826_v1 = vpop.f32.mrb[53].mxu1  ;;  %8984 = vmatmul.mubr.msk.f32.gmra.mrb[158].mxu1 %vm3158_vm5, %v3099_v56 }
 0x42e   : > { %v2396_v2 = vpop.f32.mrb[162].mxu0  ;;  %8986 = vmatprep.mubr.msk.f32.mxu1 %vm9335_vm0, %v9336_v4 }
 0x42f   : > { %5951 = vst.msk [vmem:[%s10103_s18 + $0x4c8] sm:$0xff] %vm3158_vm5, %v5694_v61  ;;  %v3100_v15 = vmax.f32 %v2392_v11, %v2843_v63  ;;  %v5438_v3 = vmul.f32 0.1, %v4771_v0  ;;  %v2397_v5 = vadd.f32 %v11504_v59, %v2396_v2  ;;  %v8216_v7 = vpop.f32.mrb[163].mxu0 }
 0x430   : > { %v4775_v8 = vpop.f32.mrb[54].mxu1 }
 0x431   : > { %v5695_v9 = vmax.f32 %v4771_v0, %v5438_v3  ;;  %v2844_v26 = vmul.f32 0.1, %v2397_v5  ;;  %v4776_v10 = vadd.f32 %v11536_v25, %v4775_v8  ;;  %v8829_v12 = vpop.f32.mrb[55].mxu1  ;;  %8987 = vmatmul.mubr.msk.f32.gmra.mrb[160].mxu1 %vm3158_vm5, %v3100_v15 }
 0x432   : > { %v2401_v13 = vpop.f32.mrb[164].mxu0  ;;  %8989 = vmatprep.mubr.msk.f32.mxu1 %vm9335_vm0, %v9336_v4 }
 0x433   : > { %5952 = vst.msk [vmem:[%s10103_s18 + $0x4d0] sm:$0xff] %vm3158_vm5, %v5695_v9  ;;  %v3101_v14 = vmax.f32 %v2397_v5, %v2844_v26  ;;  %v5439_v16 = vmul.f32 0.1, %v4776_v10  ;;  %v2402_v17 = vadd.f32 %v11504_v59, %v2401_v13  ;;  %v8219_v18 = vpop.f32.mrb[165].mxu0 }
 0x434   : > { %v4780_v19 = vpop.f32.mrb[56].mxu1 }
 0x435   : > { %v5696_v20 = vmax.f32 %v4776_v10, %v5439_v16  ;;  %v2845_v21 = vmul.f32 0.1, %v2402_v17  ;;  %v4781_v22 = vadd.f32 %v11536_v25, %v4780_v19  ;;  %v8832_v23 = vpop.f32.mrb[57].mxu1  ;;  %8990 = vmatmul.mubr.msk.f32.gmra.mrb[162].mxu1 %vm3158_vm5, %v3101_v14 }
 0x436   : > { %v2406_v39 = vpop.f32.mrb[166].mxu0  ;;  %8992 = vmatprep.mubr.msk.f32.mxu1 %vm9335_vm0, %v9336_v4 }
 0x437   : > { %5953 = vst.msk [vmem:[%s10103_s18 + $0x4d8] sm:$0xff] %vm3158_vm5, %v5696_v20  ;;  %v3102_v24 = vmax.f32 %v2402_v17, %v2845_v21  ;;  %v5440_v40 = vmul.f32 0.1, %v4781_v22  ;;  %v2407_v27 = vadd.f32 %v11504_v59, %v2406_v39  ;;  %v8222_v28 = vpop.f32.mrb[167].mxu0 }
 0x438   : > { %v4785_v29 = vpop.f32.mrb[58].mxu1 }
 0x439   : > { %v5697_v30 = vmax.f32 %v4781_v22, %v5440_v40  ;;  %v2846_v31 = vmul.f32 0.1, %v2407_v27  ;;  %v4786_v32 = vadd.f32 %v11536_v25, %v4785_v29  ;;  %v8835_v33 = vpop.f32.mrb[59].mxu1  ;;  %8993 = vmatmul.mubr.msk.f32.gmra.mrb[164].mxu1 %vm3158_vm5, %v3102_v24 }
 0x43a   : > { %v2411_v34 = vpop.f32.mrb[168].mxu0  ;;  %8995 = vmatprep.mubr.msk.f32.mxu1 %vm9335_vm0, %v9336_v4 }
 0x43b   : > { %5954 = vst.msk [vmem:[%s10103_s18 + $0x4e0] sm:$0xff] %vm3158_vm5, %v5697_v30  ;;  %v3103_v35 = vmax.f32 %v2407_v27, %v2846_v31  ;;  %v5441_v36 = vmul.f32 0.1, %v4786_v32  ;;  %v2412_v37 = vadd.f32 %v11504_v59, %v2411_v34  ;;  %v8225_v54 = vpop.f32.mrb[169].mxu0 }
 0x43c   : > { %v4790_v38 = vpop.f32.mrb[60].mxu1 }
 0x43d   : > { %v5698_v62 = vmax.f32 %v4786_v32, %v5441_v36  ;;  %v2847_v41 = vmul.f32 0.1, %v2412_v37  ;;  %v4791_v42 = vadd.f32 %v11536_v25, %v4790_v38  ;;  %v8838_v43 = vpop.f32.mrb[61].mxu1  ;;  %8996 = vmatmul.mubr.msk.f32.gmra.mrb[166].mxu1 %vm3158_vm5, %v3103_v35 }
 0x43e   : > { %v2416_v44 = vpop.f32.mrb[170].mxu0  ;;  %8998 = vmatprep.mubr.msk.f32.mxu1 %vm9335_vm0, %v9336_v4 }
 0x43f   : > { %5955 = vst.msk [vmem:[%s10103_s18 + $0x4e8] sm:$0xff] %vm3158_vm5, %v5698_v62  ;;  %v3104_v45 = vmax.f32 %v2412_v37, %v2847_v41  ;;  %v5442_v46 = vmul.f32 0.1, %v4791_v42  ;;  %v2417_v47 = vadd.f32 %v11504_v59, %v2416_v44  ;;  %v8228_v48 = vpop.f32.mrb[171].mxu0  ;;  %v11845_v59 = vld [vmem:[%s12531_s2] ss:$0 sm:$0xff] }
 0x440   : > { %v4795_v49 = vpop.f32.mrb[62].mxu1 }
 0x441   : > { %v5699_v50 = vmax.f32 %v4791_v42, %v5442_v46  ;;  %v2848_v51 = vmul.f32 0.1, %v2417_v47  ;;  %v4796_v6 = vadd.f32 %v11536_v25, %v4795_v49  ;;  %v8841_v52 = vpop.f32.mrb[63].mxu1  ;;  %8999 = vmatmul.mubr.msk.f32.gmra.mrb[168].mxu1 %vm3158_vm5, %v3104_v45 }
 0x442   : > { %v2421_v53 = vpop.f32.mrb[172].mxu0  ;;  %9001 = vmatprep.mubr.msk.f32.mxu1 %vm9335_vm0, %v9336_v4 }
 0x443   : > { %5956 = vst.msk [vmem:[%s10103_s18 + $0x4f0] sm:$0xff] %vm3158_vm5, %v5699_v50  ;;  %v3105_v55 = vmax.f32 %v2417_v47, %v2848_v51  ;;  %v5443_v56 = vmul.f32 0.1, %v4796_v6  ;;  %v2422_v57 = vadd.f32 %v11845_v59, %v2421_v53  ;;  %v8231_v11 = vpop.f32.mrb[173].mxu0 }
 0x444   : > { %v4800_v58 = vpop.f32.mrb[64].mxu1 }
 0x445   : > { %v5700_v60 = vmax.f32 %v4796_v6, %v5443_v56  ;;  %v2849_v61 = vmul.f32 0.1, %v2422_v57  ;;  %v4801_v63 = vadd.f32 %v11536_v25, %v4800_v58  ;;  %v8844_v0 = vpop.f32.mrb[65].mxu1  ;;  %9002 = vmatmul.mubr.msk.f32.gmra.mrb[170].mxu1 %vm3158_vm5, %v3105_v55 }
 0x446   : > { %v2426_v1 = vpop.f32.mrb[174].mxu0  ;;  %9004 = vmatprep.mubr.msk.f32.mxu1 %vm9335_vm0, %v9336_v4 }
 0x447   : > { %5957 = vst.msk [vmem:[%s10103_s18 + $0x4f8] sm:$0xff] %vm3158_vm5, %v5700_v60  ;;  %v3106_v2 = vmax.f32 %v2422_v57, %v2849_v61  ;;  %v5444_v15 = vmul.f32 0.1, %v4801_v63  ;;  %v2427_v3 = vadd.f32 %v11845_v59, %v2426_v1  ;;  %v8234_v5 = vpop.f32.mrb[175].mxu0 }
 0x448   : > { %v4805_v7 = vpop.f32.mrb[66].mxu1 }
 0x449   : > { %v5701_v8 = vmax.f32 %v4801_v63, %v5444_v15  ;;  %v2850_v9 = vmul.f32 0.1, %v2427_v3  ;;  %v4806_v26 = vadd.f32 %v11536_v25, %v4805_v7  ;;  %v8847_v10 = vpop.f32.mrb[67].mxu1  ;;  %9005 = vmatmul.mubr.msk.f32.gmra.mrb[172].mxu1 %vm3158_vm5, %v3106_v2 }
 0x44a   : > { %v2431_v12 = vpop.f32.mrb[176].mxu0  ;;  %9007 = vmatprep.mubr.msk.f32.mxu1 %vm9335_vm0, %v9336_v4 }
 0x44b   : > { %5958 = vst.msk [vmem:[%s10103_s18 + $0x500] sm:$0xff] %vm3158_vm5, %v5701_v8  ;;  %v3107_v13 = vmax.f32 %v2427_v3, %v2850_v9  ;;  %v5445_v14 = vmul.f32 0.1, %v4806_v26  ;;  %v2432_v16 = vadd.f32 %v11845_v59, %v2431_v12  ;;  %v8237_v17 = vpop.f32.mrb[177].mxu0 }
 0x44c   : > { %v4810_v18 = vpop.f32.mrb[68].mxu1 }
 0x44d   : > { %v5702_v19 = vmax.f32 %v4806_v26, %v5445_v14  ;;  %v2851_v20 = vmul.f32 0.1, %v2432_v16  ;;  %v4811_v21 = vadd.f32 %v11536_v25, %v4810_v18  ;;  %v8850_v22 = vpop.f32.mrb[69].mxu1  ;;  %9008 = vmatmul.mubr.msk.f32.gmra.mrb[174].mxu1 %vm3158_vm5, %v3107_v13  ;;  %v11872_v25 = vld [vmem:[%s12533_s4] ss:$0 sm:$0xff] }
 0x44e   : > { %v2436_v23 = vpop.f32.mrb[178].mxu0  ;;  %9010 = vmatprep.mubr.msk.f32.mxu1 %vm9335_vm0, %v9336_v4 }
 0x44f   : > { %5959 = vst.msk [vmem:[%s10103_s18 + $0x508] sm:$0xff] %vm3158_vm5, %v5702_v19  ;;  %v3108_v39 = vmax.f32 %v2432_v16, %v2851_v20  ;;  %v5446_v24 = vmul.f32 0.1, %v4811_v21  ;;  %v2437_v40 = vadd.f32 %v11845_v59, %v2436_v23  ;;  %v8240_v27 = vpop.f32.mrb[179].mxu0 }
 0x450   : > { %v4815_v28 = vpop.f32.mrb[70].mxu1 }
 0x451   : > { %v5703_v29 = vmax.f32 %v4811_v21, %v5446_v24  ;;  %v2852_v30 = vmul.f32 0.1, %v2437_v40  ;;  %v4816_v31 = vadd.f32 %v11872_v25, %v4815_v28  ;;  %v8853_v32 = vpop.f32.mrb[71].mxu1  ;;  %9011 = vmatmul.mubr.msk.f32.gmra.mrb[176].mxu1 %vm3158_vm5, %v3108_v39 }
 0x452   : > { %v2441_v33 = vpop.f32.mrb[180].mxu0  ;;  %9013 = vmatprep.mubr.msk.f32.mxu1 %vm9335_vm0, %v9336_v4 }
 0x453   : > { %5960 = vst.msk [vmem:[%s10103_s18 + $0x510] sm:$0xff] %vm3158_vm5, %v5703_v29  ;;  %v3109_v34 = vmax.f32 %v2437_v40, %v2852_v30  ;;  %v5447_v35 = vmul.f32 0.1, %v4816_v31  ;;  %v2442_v36 = vadd.f32 %v11845_v59, %v2441_v33  ;;  %v8243_v37 = vpop.f32.mrb[181].mxu0 }
 0x454   : > { %v4820_v54 = vpop.f32.mrb[72].mxu1 }
 0x455   : > { %v5704_v38 = vmax.f32 %v4816_v31, %v5447_v35  ;;  %v2853_v62 = vmul.f32 0.1, %v2442_v36  ;;  %v4821_v41 = vadd.f32 %v11872_v25, %v4820_v54  ;;  %v8856_v42 = vpop.f32.mrb[73].mxu1  ;;  %9014 = vmatmul.mubr.msk.f32.gmra.mrb[178].mxu1 %vm3158_vm5, %v3109_v34 }
 0x456   : > { %v2446_v43 = vpop.f32.mrb[182].mxu0  ;;  %9016 = vmatprep.mubr.msk.f32.mxu1 %vm9335_vm0, %v9336_v4 }
 0x457   : > { %5961 = vst.msk [vmem:[%s10103_s18 + $0x518] sm:$0xff] %vm3158_vm5, %v5704_v38  ;;  %v3110_v44 = vmax.f32 %v2442_v36, %v2853_v62  ;;  %v5448_v45 = vmul.f32 0.1, %v4821_v41  ;;  %v2447_v46 = vadd.f32 %v11845_v59, %v2446_v43  ;;  %v8246_v47 = vpop.f32.mrb[183].mxu0 }
 0x458   : > { %v4825_v48 = vpop.f32.mrb[74].mxu1 }
 0x459   : > { %v5705_v49 = vmax.f32 %v4821_v41, %v5448_v45  ;;  %v2854_v50 = vmul.f32 0.1, %v2447_v46  ;;  %v4826_v51 = vadd.f32 %v11872_v25, %v4825_v48  ;;  %v8859_v6 = vpop.f32.mrb[75].mxu1  ;;  %9017 = vmatmul.mubr.msk.f32.gmra.mrb[180].mxu1 %vm3158_vm5, %v3110_v44 }
 0x45a   : > { %v2451_v52 = vpop.f32.mrb[184].mxu0  ;;  %9019 = vmatprep.mubr.msk.f32.mxu1 %vm9335_vm0, %v9336_v4 }
 0x45b   : > { %5962 = vst.msk [vmem:[%s10103_s18 + $0x520] sm:$0xff] %vm3158_vm5, %v5705_v49  ;;  %v3111_v53 = vmax.f32 %v2447_v46, %v2854_v50  ;;  %v5449_v55 = vmul.f32 0.1, %v4826_v51  ;;  %v2452_v56 = vadd.f32 %v11845_v59, %v2451_v52  ;;  %v8249_v57 = vpop.f32.mrb[185].mxu0 }
 0x45c   : > { %v4830_v11 = vpop.f32.mrb[76].mxu1 }
 0x45d   : > { %v5706_v58 = vmax.f32 %v4826_v51, %v5449_v55  ;;  %v2855_v60 = vmul.f32 0.1, %v2452_v56  ;;  %v4831_v61 = vadd.f32 %v11872_v25, %v4830_v11  ;;  %v8862_v63 = vpop.f32.mrb[77].mxu1  ;;  %9020 = vmatmul.mubr.msk.f32.gmra.mrb[182].mxu1 %vm3158_vm5, %v3111_v53 }
 0x45e   : > { %v2456_v0 = vpop.f32.mrb[186].mxu0  ;;  %9022 = vmatprep.mubr.msk.f32.mxu1 %vm9335_vm0, %v9336_v4 }
 0x45f   : > { %5963 = vst.msk [vmem:[%s10103_s18 + $0x528] sm:$0xff] %vm3158_vm5, %v5706_v58  ;;  %v3112_v1 = vmax.f32 %v2452_v56, %v2855_v60  ;;  %v5450_v2 = vmul.f32 0.1, %v4831_v61  ;;  %v2457_v15 = vadd.f32 %v11845_v59, %v2456_v0  ;;  %v8252_v3 = vpop.f32.mrb[187].mxu0 }
 0x460   : > { %v4835_v5 = vpop.f32.mrb[78].mxu1 }
 0x461   : > { %v5707_v7 = vmax.f32 %v4831_v61, %v5450_v2  ;;  %v2856_v8 = vmul.f32 0.1, %v2457_v15  ;;  %v4836_v9 = vadd.f32 %v11872_v25, %v4835_v5  ;;  %v8865_v26 = vpop.f32.mrb[79].mxu1  ;;  %9023 = vmatmul.mubr.msk.f32.gmra.mrb[184].mxu1 %vm3158_vm5, %v3112_v1 }
 0x462   : > { %v2461_v10 = vpop.f32.mrb[188].mxu0  ;;  %9025 = vmatprep.mubr.msk.f32.mxu1 %vm9335_vm0, %v9336_v4 }
 0x463   : > { %5964 = vst.msk [vmem:[%s10103_s18 + $0x530] sm:$0xff] %vm3158_vm5, %v5707_v7  ;;  %v3113_v12 = vmax.f32 %v2457_v15, %v2856_v8  ;;  %v5451_v13 = vmul.f32 0.1, %v4836_v9  ;;  %v2462_v14 = vadd.f32 %v11845_v59, %v2461_v10  ;;  %v8255_v16 = vpop.f32.mrb[189].mxu0 }
 0x464   : > { %v4840_v17 = vpop.f32.mrb[80].mxu1 }
 0x465   : > { %v5708_v18 = vmax.f32 %v4836_v9, %v5451_v13  ;;  %v2857_v19 = vmul.f32 0.1, %v2462_v14  ;;  %v4841_v20 = vadd.f32 %v11872_v25, %v4840_v17  ;;  %v8868_v21 = vpop.f32.mrb[81].mxu1  ;;  %9026 = vmatmul.mubr.msk.f32.gmra.mrb[186].mxu1 %vm3158_vm5, %v3113_v12 }
 0x466   : > { %v2466_v22 = vpop.f32.mrb[190].mxu0  ;;  %9028 = vmatprep.mubr.msk.f32.mxu1 %vm9335_vm0, %v9336_v4 }
 0x467   : > { %5965 = vst.msk [vmem:[%s10103_s18 + $0x538] sm:$0xff] %vm3158_vm5, %v5708_v18  ;;  %v3114_v23 = vmax.f32 %v2462_v14, %v2857_v19  ;;  %v5452_v39 = vmul.f32 0.1, %v4841_v20  ;;  %v2467_v24 = vadd.f32 %v11845_v59, %v2466_v22  ;;  %v8258_v40 = vpop.f32.mrb[191].mxu0 }
 0x468   : > { %v4845_v27 = vpop.f32.mrb[82].mxu1 }
 0x469   : > { %v5709_v28 = vmax.f32 %v4841_v20, %v5452_v39  ;;  %v2858_v29 = vmul.f32 0.1, %v2467_v24  ;;  %v4846_v30 = vadd.f32 %v11872_v25, %v4845_v27  ;;  %v8871_v31 = vpop.f32.mrb[83].mxu1  ;;  %9029 = vmatmul.mubr.msk.f32.gmra.mrb[188].mxu1 %vm3158_vm5, %v3114_v23 }
 0x46a   : > { %v2471_v32 = vpop.f32.mrb[192].mxu0  ;;  %9031 = vmatprep.mubr.msk.f32.mxu1 %vm9335_vm0, %v9336_v4 }
 0x46b   : > { %5966 = vst.msk [vmem:[%s10103_s18 + $0x540] sm:$0xff] %vm3158_vm5, %v5709_v28  ;;  %v3115_v33 = vmax.f32 %v2467_v24, %v2858_v29  ;;  %v5453_v34 = vmul.f32 0.1, %v4846_v30  ;;  %v2472_v35 = vadd.f32 %v11845_v59, %v2471_v32  ;;  %v8261_v36 = vpop.f32.mrb[193].mxu0 }
 0x46c   : > { %v4850_v37 = vpop.f32.mrb[84].mxu1 }
 0x46d   : > { %v5710_v54 = vmax.f32 %v4846_v30, %v5453_v34  ;;  %v2859_v38 = vmul.f32 0.1, %v2472_v35  ;;  %v4851_v62 = vadd.f32 %v11872_v25, %v4850_v37  ;;  %v8874_v41 = vpop.f32.mrb[85].mxu1  ;;  %9032 = vmatmul.mubr.msk.f32.gmra.mrb[190].mxu1 %vm3158_vm5, %v3115_v33 }
 0x46e   : > { %v2476_v42 = vpop.f32.mrb[194].mxu0  ;;  %9034 = vmatprep.mubr.msk.f32.mxu1 %vm9335_vm0, %v9336_v4 }
 0x46f   : > { %5967 = vst.msk [vmem:[%s10103_s18 + $0x548] sm:$0xff] %vm3158_vm5, %v5710_v54  ;;  %v3116_v43 = vmax.f32 %v2472_v35, %v2859_v38  ;;  %v5454_v44 = vmul.f32 0.1, %v4851_v62  ;;  %v2477_v45 = vadd.f32 %v11845_v59, %v2476_v42  ;;  %v8264_v46 = vpop.f32.mrb[195].mxu0 }
 0x470   : > { %v4855_v47 = vpop.f32.mrb[86].mxu1 }
 0x471   : > { %v5711_v48 = vmax.f32 %v4851_v62, %v5454_v44  ;;  %v2860_v49 = vmul.f32 0.1, %v2477_v45  ;;  %v4856_v50 = vadd.f32 %v11872_v25, %v4855_v47  ;;  %v8877_v51 = vpop.f32.mrb[87].mxu1  ;;  %9035 = vmatmul.mubr.msk.f32.gmra.mrb[192].mxu1 %vm3158_vm5, %v3116_v43 }
 0x472   : > { %v2481_v6 = vpop.f32.mrb[196].mxu0  ;;  %9037 = vmatprep.mubr.msk.f32.mxu1 %vm9335_vm0, %v9336_v4 }
 0x473   : > { %5968 = vst.msk [vmem:[%s10103_s18 + $0x550] sm:$0xff] %vm3158_vm5, %v5711_v48  ;;  %v3117_v52 = vmax.f32 %v2477_v45, %v2860_v49  ;;  %v5455_v53 = vmul.f32 0.1, %v4856_v50  ;;  %v2482_v55 = vadd.f32 %v11845_v59, %v2481_v6  ;;  %v8267_v56 = vpop.f32.mrb[197].mxu0 }
 0x474   : > { %v4860_v57 = vpop.f32.mrb[88].mxu1 }
 0x475   : > { %v5712_v11 = vmax.f32 %v4856_v50, %v5455_v53  ;;  %v2861_v58 = vmul.f32 0.1, %v2482_v55  ;;  %v4861_v60 = vadd.f32 %v11872_v25, %v4860_v57  ;;  %v8880_v61 = vpop.f32.mrb[89].mxu1  ;;  %9038 = vmatmul.mubr.msk.f32.gmra.mrb[194].mxu1 %vm3158_vm5, %v3117_v52 }
 0x476   : > { %v2486_v63 = vpop.f32.mrb[198].mxu0  ;;  %9040 = vmatprep.mubr.msk.f32.mxu1 %vm9335_vm0, %v9336_v4 }
 0x477   : > { %5969 = vst.msk [vmem:[%s10103_s18 + $0x558] sm:$0xff] %vm3158_vm5, %v5712_v11  ;;  %v3118_v0 = vmax.f32 %v2482_v55, %v2861_v58  ;;  %v5456_v1 = vmul.f32 0.1, %v4861_v60  ;;  %v2487_v2 = vadd.f32 %v11845_v59, %v2486_v63  ;;  %v8270_v15 = vpop.f32.mrb[199].mxu0 }
 0x478   : > { %v4865_v3 = vpop.f32.mrb[90].mxu1 }
 0x479   : > { %v5713_v5 = vmax.f32 %v4861_v60, %v5456_v1  ;;  %v2862_v7 = vmul.f32 0.1, %v2487_v2  ;;  %v4866_v8 = vadd.f32 %v11872_v25, %v4865_v3  ;;  %v8883_v9 = vpop.f32.mrb[91].mxu1  ;;  %9041 = vmatmul.mubr.msk.f32.gmra.mrb[196].mxu1 %vm3158_vm5, %v3118_v0 }
 0x47a   : > { %v2491_v26 = vpop.f32.mrb[200].mxu0  ;;  %9043 = vmatprep.mubr.msk.f32.mxu1 %vm9335_vm0, %v9336_v4 }
 0x47b   : > { %5970 = vst.msk [vmem:[%s10103_s18 + $0x560] sm:$0xff] %vm3158_vm5, %v5713_v5  ;;  %v3119_v10 = vmax.f32 %v2487_v2, %v2862_v7  ;;  %v5457_v12 = vmul.f32 0.1, %v4866_v8  ;;  %v2492_v13 = vadd.f32 %v11845_v59, %v2491_v26  ;;  %v8273_v14 = vpop.f32.mrb[201].mxu0 }
 0x47c   : > { %v4870_v16 = vpop.f32.mrb[92].mxu1 }
 0x47d   : > { %v5714_v17 = vmax.f32 %v4866_v8, %v5457_v12  ;;  %v2863_v18 = vmul.f32 0.1, %v2492_v13  ;;  %v4871_v19 = vadd.f32 %v11872_v25, %v4870_v16  ;;  %v8886_v20 = vpop.f32.mrb[93].mxu1  ;;  %9044 = vmatmul.mubr.msk.f32.gmra.mrb[198].mxu1 %vm3158_vm5, %v3119_v10 }
 0x47e   : > { %v2496_v21 = vpop.f32.mrb[202].mxu0  ;;  %9046 = vmatprep.mubr.msk.f32.mxu1 %vm9335_vm0, %v9336_v4 }
 0x47f   : > { %5971 = vst.msk [vmem:[%s10103_s18 + $0x568] sm:$0xff] %vm3158_vm5, %v5714_v17  ;;  %v3120_v22 = vmax.f32 %v2492_v13, %v2863_v18  ;;  %v5458_v23 = vmul.f32 0.1, %v4871_v19  ;;  %v2497_v39 = vadd.f32 %v11845_v59, %v2496_v21  ;;  %v8276_v24 = vpop.f32.mrb[203].mxu0 }
 0x480   : > { %v4875_v40 = vpop.f32.mrb[94].mxu1 }
 0x481   : > { %v5715_v27 = vmax.f32 %v4871_v19, %v5458_v23  ;;  %v2864_v28 = vmul.f32 0.1, %v2497_v39  ;;  %v4876_v29 = vadd.f32 %v11872_v25, %v4875_v40  ;;  %v8889_v30 = vpop.f32.mrb[95].mxu1  ;;  %9047 = vmatmul.mubr.msk.f32.gmra.mrb[200].mxu1 %vm3158_vm5, %v3120_v22 }
 0x482   : > { %v2501_v31 = vpop.f32.mrb[204].mxu0  ;;  %9049 = vmatprep.mubr.msk.f32.mxu1 %vm9335_vm0, %v9336_v4 }
 0x483   : > { %5972 = vst.msk [vmem:[%s10103_s18 + $0x570] sm:$0xff] %vm3158_vm5, %v5715_v27  ;;  %v3121_v32 = vmax.f32 %v2497_v39, %v2864_v28  ;;  %v5459_v33 = vmul.f32 0.1, %v4876_v29  ;;  %v2502_v34 = vadd.f32 %v11845_v59, %v2501_v31  ;;  %v8279_v35 = vpop.f32.mrb[205].mxu0 }
 0x484   : > { %v4880_v36 = vpop.f32.mrb[96].mxu1 }
 0x485   : > { %v5716_v37 = vmax.f32 %v4876_v29, %v5459_v33  ;;  %v2865_v54 = vmul.f32 0.1, %v2502_v34  ;;  %v4881_v38 = vadd.f32 %v11872_v25, %v4880_v36  ;;  %v8892_v62 = vpop.f32.mrb[97].mxu1  ;;  %9050 = vmatmul.mubr.msk.f32.gmra.mrb[202].mxu1 %vm3158_vm5, %v3121_v32 }
 0x486   : > { %v2506_v41 = vpop.f32.mrb[206].mxu0  ;;  %9052 = vmatprep.mubr.msk.f32.mxu1 %vm9335_vm0, %v9336_v4 }
 0x487   : > { %5973 = vst.msk [vmem:[%s10103_s18 + $0x578] sm:$0xff] %vm3158_vm5, %v5716_v37  ;;  %v3122_v42 = vmax.f32 %v2502_v34, %v2865_v54  ;;  %v5460_v43 = vmul.f32 0.1, %v4881_v38  ;;  %v2507_v44 = vadd.f32 %v11845_v59, %v2506_v41  ;;  %v8282_v45 = vpop.f32.mrb[207].mxu0 }
 0x488   : > { %v4885_v46 = vpop.f32.mrb[98].mxu1 }
 0x489   : > { %v5717_v47 = vmax.f32 %v4881_v38, %v5460_v43  ;;  %v2866_v48 = vmul.f32 0.1, %v2507_v44  ;;  %v4886_v49 = vadd.f32 %v11872_v25, %v4885_v46  ;;  %v8895_v50 = vpop.f32.mrb[99].mxu1  ;;  %9053 = vmatmul.mubr.msk.f32.gmra.mrb[204].mxu1 %vm3158_vm5, %v3122_v42 }
 0x48a   : > { %v2511_v51 = vpop.f32.mrb[208].mxu0  ;;  %9055 = vmatprep.mubr.msk.f32.mxu1 %vm9335_vm0, %v9336_v4 }
 0x48b   : > { %5974 = vst.msk [vmem:[%s10103_s18 + $0x580] sm:$0xff] %vm3158_vm5, %v5717_v47  ;;  %v3123_v6 = vmax.f32 %v2507_v44, %v2866_v48  ;;  %v5461_v52 = vmul.f32 0.1, %v4886_v49  ;;  %v2512_v53 = vadd.f32 %v11845_v59, %v2511_v51  ;;  %v8285_v55 = vpop.f32.mrb[209].mxu0 }
 0x48c   : > { %v4890_v56 = vpop.f32.mrb[100].mxu1 }
 0x48d   : > { %v5718_v57 = vmax.f32 %v4886_v49, %v5461_v52  ;;  %v2867_v11 = vmul.f32 0.1, %v2512_v53  ;;  %v4891_v58 = vadd.f32 %v11872_v25, %v4890_v56  ;;  %v8898_v60 = vpop.f32.mrb[101].mxu1  ;;  %9056 = vmatmul.mubr.msk.f32.gmra.mrb[206].mxu1 %vm3158_vm5, %v3123_v6 }
 0x48e   : > { %v2516_v61 = vpop.f32.mrb[210].mxu0  ;;  %9058 = vmatprep.mubr.msk.f32.mxu1 %vm9335_vm0, %v9336_v4 }
 0x48f   : > { %5975 = vst.msk [vmem:[%s10103_s18 + $0x588] sm:$0xff] %vm3158_vm5, %v5718_v57  ;;  %v3124_v63 = vmax.f32 %v2512_v53, %v2867_v11  ;;  %v5462_v0 = vmul.f32 0.1, %v4891_v58  ;;  %v2517_v1 = vadd.f32 %v11845_v59, %v2516_v61  ;;  %v8288_v2 = vpop.f32.mrb[211].mxu0 }
 0x490   : > { %v4895_v15 = vpop.f32.mrb[102].mxu1 }
 0x491   : > { %v5719_v3 = vmax.f32 %v4891_v58, %v5462_v0  ;;  %v2868_v5 = vmul.f32 0.1, %v2517_v1  ;;  %v4896_v7 = vadd.f32 %v11872_v25, %v4895_v15  ;;  %v8901_v8 = vpop.f32.mrb[103].mxu1  ;;  %9059 = vmatmul.mubr.msk.f32.gmra.mrb[208].mxu1 %vm3158_vm5, %v3124_v63 }
 0x492   : > { %v2521_v9 = vpop.f32.mrb[212].mxu0  ;;  %9061 = vmatprep.mubr.msk.f32.mxu1 %vm9335_vm0, %v9336_v4 }
 0x493   : > { %5976 = vst.msk [vmem:[%s10103_s18 + $0x590] sm:$0xff] %vm3158_vm5, %v5719_v3  ;;  %v3125_v26 = vmax.f32 %v2517_v1, %v2868_v5  ;;  %v5463_v10 = vmul.f32 0.1, %v4896_v7  ;;  %v2522_v12 = vadd.f32 %v11845_v59, %v2521_v9  ;;  %v8291_v13 = vpop.f32.mrb[213].mxu0 }
 0x494   : > { %v4900_v14 = vpop.f32.mrb[104].mxu1 }
 0x495   : > { %v5720_v16 = vmax.f32 %v4896_v7, %v5463_v10  ;;  %v2869_v17 = vmul.f32 0.1, %v2522_v12  ;;  %v4901_v18 = vadd.f32 %v11872_v25, %v4900_v14  ;;  %v8904_v19 = vpop.f32.mrb[105].mxu1  ;;  %9062 = vmatmul.mubr.msk.f32.gmra.mrb[210].mxu1 %vm3158_vm5, %v3125_v26 }
 0x496   : > { %v2526_v20 = vpop.f32.mrb[214].mxu0  ;;  %9064 = vmatprep.mubr.msk.f32.mxu1 %vm9335_vm0, %v9336_v4 }
 0x497   : > { %5977 = vst.msk [vmem:[%s10103_s18 + $0x598] sm:$0xff] %vm3158_vm5, %v5720_v16  ;;  %v3126_v21 = vmax.f32 %v2522_v12, %v2869_v17  ;;  %v5464_v22 = vmul.f32 0.1, %v4901_v18  ;;  %v2527_v23 = vadd.f32 %v11845_v59, %v2526_v20  ;;  %v8294_v39 = vpop.f32.mrb[215].mxu0 }
 0x498   : > { %v4905_v24 = vpop.f32.mrb[106].mxu1 }
 0x499   : > { %v5721_v40 = vmax.f32 %v4901_v18, %v5464_v22  ;;  %v2870_v27 = vmul.f32 0.1, %v2527_v23  ;;  %v4906_v28 = vadd.f32 %v11872_v25, %v4905_v24  ;;  %v8907_v29 = vpop.f32.mrb[107].mxu1  ;;  %9065 = vmatmul.mubr.msk.f32.gmra.mrb[212].mxu1 %vm3158_vm5, %v3126_v21 }
 0x49a   : > { %v2531_v30 = vpop.f32.mrb[216].mxu0  ;;  %9067 = vmatprep.mubr.msk.f32.mxu1 %vm9335_vm0, %v9336_v4 }
 0x49b   : > { %5978 = vst.msk [vmem:[%s10103_s18 + $0x5a0] sm:$0xff] %vm3158_vm5, %v5721_v40  ;;  %v3127_v31 = vmax.f32 %v2527_v23, %v2870_v27  ;;  %v5465_v32 = vmul.f32 0.1, %v4906_v28  ;;  %v2532_v33 = vadd.f32 %v11845_v59, %v2531_v30  ;;  %v8297_v34 = vpop.f32.mrb[217].mxu0 }
 0x49c   : > { %v4910_v35 = vpop.f32.mrb[108].mxu1 }
 0x49d   : > { %v5722_v36 = vmax.f32 %v4906_v28, %v5465_v32  ;;  %v2871_v37 = vmul.f32 0.1, %v2532_v33  ;;  %v4911_v54 = vadd.f32 %v11872_v25, %v4910_v35  ;;  %v8910_v38 = vpop.f32.mrb[109].mxu1  ;;  %9068 = vmatmul.mubr.msk.f32.gmra.mrb[214].mxu1 %vm3158_vm5, %v3127_v31 }
 0x49e   : > { %v2536_v62 = vpop.f32.mrb[218].mxu0  ;;  %9070 = vmatprep.mubr.msk.f32.mxu1 %vm9335_vm0, %v9336_v4 }
 0x49f   : > { %5979 = vst.msk [vmem:[%s10103_s18 + $0x5a8] sm:$0xff] %vm3158_vm5, %v5722_v36  ;;  %v3128_v41 = vmax.f32 %v2532_v33, %v2871_v37  ;;  %v5466_v42 = vmul.f32 0.1, %v4911_v54  ;;  %v2537_v43 = vadd.f32 %v11845_v59, %v2536_v62  ;;  %v8300_v44 = vpop.f32.mrb[219].mxu0 }
 0x4a0   : > { %v4915_v45 = vpop.f32.mrb[110].mxu1 }
 0x4a1   : > { %v5723_v46 = vmax.f32 %v4911_v54, %v5466_v42  ;;  %v2872_v47 = vmul.f32 0.1, %v2537_v43  ;;  %v4916_v48 = vadd.f32 %v11872_v25, %v4915_v45  ;;  %v8913_v49 = vpop.f32.mrb[111].mxu1  ;;  %9071 = vmatmul.mubr.msk.f32.gmra.mrb[216].mxu1 %vm3158_vm5, %v3128_v41 }
 0x4a2   : > { %v2541_v50 = vpop.f32.mrb[220].mxu0  ;;  %9073 = vmatprep.mubr.msk.f32.mxu1 %vm9335_vm0, %v9336_v4 }
 0x4a3   : > { %5980 = vst.msk [vmem:[%s10103_s18 + $0x5b0] sm:$0xff] %vm3158_vm5, %v5723_v46  ;;  %v3129_v51 = vmax.f32 %v2537_v43, %v2872_v47  ;;  %v5467_v6 = vmul.f32 0.1, %v4916_v48  ;;  %v2542_v52 = vadd.f32 %v11845_v59, %v2541_v50  ;;  %v8303_v53 = vpop.f32.mrb[221].mxu0 }
 0x4a4   : > { %v4920_v55 = vpop.f32.mrb[112].mxu1 }
 0x4a5   : > { %v5724_v56 = vmax.f32 %v4916_v48, %v5467_v6  ;;  %v2873_v57 = vmul.f32 0.1, %v2542_v52  ;;  %v4921_v11 = vadd.f32 %v11872_v25, %v4920_v55  ;;  %v8916_v58 = vpop.f32.mrb[113].mxu1  ;;  %9074 = vmatmul.mubr.msk.f32.gmra.mrb[218].mxu1 %vm3158_vm5, %v3129_v51 }
 0x4a6   : > { %v2546_v60 = vpop.f32.mrb[222].mxu0  ;;  %9076 = vmatprep.mubr.msk.f32.mxu1 %vm9335_vm0, %v9336_v4 }
 0x4a7   : > { %5981 = vst.msk [vmem:[%s10103_s18 + $0x5b8] sm:$0xff] %vm3158_vm5, %v5724_v56  ;;  %v3130_v61 = vmax.f32 %v2542_v52, %v2873_v57  ;;  %v5468_v63 = vmul.f32 0.1, %v4921_v11  ;;  %v2547_v0 = vadd.f32 %v11845_v59, %v2546_v60  ;;  %v8306_v1 = vpop.f32.mrb[223].mxu0 }
 0x4a8   : > { %v4925_v2 = vpop.f32.mrb[114].mxu1 }
 0x4a9   : > { %v5725_v15 = vmax.f32 %v4921_v11, %v5468_v63  ;;  %v2874_v3 = vmul.f32 0.1, %v2547_v0  ;;  %v4926_v5 = vadd.f32 %v11872_v25, %v4925_v2  ;;  %v8919_v7 = vpop.f32.mrb[115].mxu1  ;;  %9077 = vmatmul.mubr.msk.f32.gmra.mrb[220].mxu1 %vm3158_vm5, %v3130_v61 }
 0x4aa   : > { %v2551_v8 = vpop.f32.mrb[224].mxu0  ;;  %9079 = vmatprep.mubr.msk.f32.mxu1 %vm9335_vm0, %v9336_v4 }
 0x4ab   : > { %5982 = vst.msk [vmem:[%s10103_s18 + $0x5c0] sm:$0xff] %vm3158_vm5, %v5725_v15  ;;  %v3131_v9 = vmax.f32 %v2547_v0, %v2874_v3  ;;  %v5469_v26 = vmul.f32 0.1, %v4926_v5  ;;  %v2552_v10 = vadd.f32 %v11845_v59, %v2551_v8  ;;  %v8309_v12 = vpop.f32.mrb[225].mxu0 }
 0x4ac   : > { %v4930_v13 = vpop.f32.mrb[116].mxu1 }
 0x4ad   : > { %v5726_v14 = vmax.f32 %v4926_v5, %v5469_v26  ;;  %v2875_v16 = vmul.f32 0.1, %v2552_v10  ;;  %v4931_v17 = vadd.f32 %v11872_v25, %v4930_v13  ;;  %v8922_v18 = vpop.f32.mrb[117].mxu1  ;;  %9080 = vmatmul.mubr.msk.f32.gmra.mrb[222].mxu1 %vm3158_vm5, %v3131_v9 }
 0x4ae   : > { %v2556_v19 = vpop.f32.mrb[226].mxu0  ;;  %9082 = vmatprep.mubr.msk.f32.mxu1 %vm9335_vm0, %v9336_v4 }
 0x4af   : > { %5983 = vst.msk [vmem:[%s10103_s18 + $0x5c8] sm:$0xff] %vm3158_vm5, %v5726_v14  ;;  %v3132_v20 = vmax.f32 %v2552_v10, %v2875_v16  ;;  %v5470_v21 = vmul.f32 0.1, %v4931_v17  ;;  %v2557_v22 = vadd.f32 %v11845_v59, %v2556_v19  ;;  %v8312_v23 = vpop.f32.mrb[227].mxu0 }
 0x4b0   : > { %v4935_v39 = vpop.f32.mrb[118].mxu1 }
 0x4b1   : > { %v5727_v24 = vmax.f32 %v4931_v17, %v5470_v21  ;;  %v2876_v40 = vmul.f32 0.1, %v2557_v22  ;;  %v4936_v27 = vadd.f32 %v11872_v25, %v4935_v39  ;;  %v8925_v28 = vpop.f32.mrb[119].mxu1  ;;  %9083 = vmatmul.mubr.msk.f32.gmra.mrb[224].mxu1 %vm3158_vm5, %v3132_v20 }
 0x4b2   : > { %v2561_v29 = vpop.f32.mrb[228].mxu0  ;;  %9085 = vmatprep.mubr.msk.f32.mxu1 %vm9335_vm0, %v9336_v4 }
 0x4b3   : > { %5984 = vst.msk [vmem:[%s10103_s18 + $0x5d0] sm:$0xff] %vm3158_vm5, %v5727_v24  ;;  %v3133_v30 = vmax.f32 %v2557_v22, %v2876_v40  ;;  %v5471_v31 = vmul.f32 0.1, %v4936_v27  ;;  %v2562_v32 = vadd.f32 %v11845_v59, %v2561_v29  ;;  %v8315_v33 = vpop.f32.mrb[229].mxu0 }
 0x4b4   : > { %v4940_v34 = vpop.f32.mrb[120].mxu1 }
 0x4b5   : > { %v5728_v35 = vmax.f32 %v4936_v27, %v5471_v31  ;;  %v2877_v36 = vmul.f32 0.1, %v2562_v32  ;;  %v4941_v37 = vadd.f32 %v11872_v25, %v4940_v34  ;;  %v8928_v54 = vpop.f32.mrb[121].mxu1  ;;  %9086 = vmatmul.mubr.msk.f32.gmra.mrb[226].mxu1 %vm3158_vm5, %v3133_v30 }
 0x4b6   : > { %v2566_v38 = vpop.f32.mrb[230].mxu0  ;;  %9088 = vmatprep.mubr.msk.f32.mxu1 %vm9335_vm0, %v9336_v4 }
 0x4b7   : > { %5985 = vst.msk [vmem:[%s10103_s18 + $0x5d8] sm:$0xff] %vm3158_vm5, %v5728_v35  ;;  %v3134_v62 = vmax.f32 %v2562_v32, %v2877_v36  ;;  %v5472_v41 = vmul.f32 0.1, %v4941_v37  ;;  %v2567_v42 = vadd.f32 %v11845_v59, %v2566_v38  ;;  %v8318_v43 = vpop.f32.mrb[231].mxu0 }
 0x4b8   : > { %v4945_v44 = vpop.f32.mrb[122].mxu1 }
 0x4b9   : > { %v5729_v45 = vmax.f32 %v4941_v37, %v5472_v41  ;;  %v2878_v46 = vmul.f32 0.1, %v2567_v42  ;;  %v4946_v47 = vadd.f32 %v11872_v25, %v4945_v44  ;;  %v8931_v48 = vpop.f32.mrb[123].mxu1  ;;  %9089 = vmatmul.mubr.msk.f32.gmra.mrb[228].mxu1 %vm3158_vm5, %v3134_v62 }
 0x4ba   : > { %v2571_v49 = vpop.f32.mrb[232].mxu0  ;;  %9091 = vmatprep.mubr.msk.f32.mxu1 %vm9335_vm0, %v9336_v4 }
 0x4bb   : > { %5986 = vst.msk [vmem:[%s10103_s18 + $0x5e0] sm:$0xff] %vm3158_vm5, %v5729_v45  ;;  %v3135_v50 = vmax.f32 %v2567_v42, %v2878_v46  ;;  %v5473_v51 = vmul.f32 0.1, %v4946_v47  ;;  %v2572_v6 = vadd.f32 %v11845_v59, %v2571_v49  ;;  %v8321_v52 = vpop.f32.mrb[233].mxu0 }
 0x4bc   : > { %v4950_v53 = vpop.f32.mrb[124].mxu1 }
 0x4bd   : > { %v5730_v55 = vmax.f32 %v4946_v47, %v5473_v51  ;;  %v2879_v56 = vmul.f32 0.1, %v2572_v6  ;;  %v4951_v57 = vadd.f32 %v11872_v25, %v4950_v53  ;;  %v8934_v11 = vpop.f32.mrb[125].mxu1  ;;  %9092 = vmatmul.mubr.msk.f32.gmra.mrb[230].mxu1 %vm3158_vm5, %v3135_v50 }
 0x4be   : > { %v2576_v58 = vpop.f32.mrb[234].mxu0  ;;  %9094 = vmatprep.mubr.msk.f32.mxu1 %vm9335_vm0, %v9336_v4 }
 0x4bf   : > { %5987 = vst.msk [vmem:[%s10103_s18 + $0x5e8] sm:$0xff] %vm3158_vm5, %v5730_v55  ;;  %v3136_v60 = vmax.f32 %v2572_v6, %v2879_v56  ;;  %v5474_v61 = vmul.f32 0.1, %v4951_v57  ;;  %v2577_v63 = vadd.f32 %v11845_v59, %v2576_v58  ;;  %v8324_v0 = vpop.f32.mrb[235].mxu0 }
 0x4c0   : > { %v4955_v1 = vpop.f32.mrb[126].mxu1 }
 0x4c1   : > { %v5731_v2 = vmax.f32 %v4951_v57, %v5474_v61  ;;  %v2880_v15 = vmul.f32 0.1, %v2577_v63  ;;  %v4956_v3 = vadd.f32 %v11872_v25, %v4955_v1  ;;  %v8937_v5 = vpop.f32.mrb[127].mxu1  ;;  %9095 = vmatmul.mubr.msk.f32.gmra.mrb[232].mxu1 %vm3158_vm5, %v3136_v60 }
 0x4c2   : > { %v2581_v7 = vpop.f32.mrb[236].mxu0  ;;  %9097 = vmatprep.mubr.msk.f32.mxu1 %vm9335_vm0, %v9336_v4 }
 0x4c3   : > { %5988 = vst.msk [vmem:[%s10103_s18 + $0x5f0] sm:$0xff] %vm3158_vm5, %v5731_v2  ;;  %v3137_v8 = vmax.f32 %v2577_v63, %v2880_v15  ;;  %v5475_v9 = vmul.f32 0.1, %v4956_v3  ;;  %v2582_v26 = vadd.f32 %v11845_v59, %v2581_v7  ;;  %v8327_v10 = vpop.f32.mrb[237].mxu0 }
 0x4c4   : > { %v4960_v12 = vpop.f32.mrb[128].mxu1 }
 0x4c5   : > { %v5732_v13 = vmax.f32 %v4956_v3, %v5475_v9  ;;  %v2881_v14 = vmul.f32 0.1, %v2582_v26  ;;  %v4961_v16 = vadd.f32 %v11872_v25, %v4960_v12  ;;  %v8940_v17 = vpop.f32.mrb[129].mxu1  ;;  %9098 = vmatmul.mubr.msk.f32.gmra.mrb[234].mxu1 %vm3158_vm5, %v3137_v8 }
 0x4c6   : > { %v2586_v18 = vpop.f32.mrb[238].mxu0  ;;  %9100 = vmatprep.mubr.msk.f32.mxu1 %vm9335_vm0, %v9336_v4 }
 0x4c7   : > { %5989 = vst.msk [vmem:[%s10103_s18 + $0x5f8] sm:$0xff] %vm3158_vm5, %v5732_v13  ;;  %v3138_v19 = vmax.f32 %v2582_v26, %v2881_v14  ;;  %v5476_v20 = vmul.f32 0.1, %v4961_v16  ;;  %v2587_v21 = vadd.f32 %v11845_v59, %v2586_v18  ;;  %v8330_v22 = vpop.f32.mrb[239].mxu0 }
 0x4c8   : > { %v4965_v23 = vpop.f32.mrb[130].mxu1 }
 0x4c9   : > { %v5733_v39 = vmax.f32 %v4961_v16, %v5476_v20  ;;  %v2882_v24 = vmul.f32 0.1, %v2587_v21  ;;  %v4966_v40 = vadd.f32 %v11872_v25, %v4965_v23  ;;  %v8943_v27 = vpop.f32.mrb[131].mxu1  ;;  %9101 = vmatmul.mubr.msk.f32.gmra.mrb[236].mxu1 %vm3158_vm5, %v3138_v19 }
 0x4ca   : > { %v2591_v28 = vpop.f32.mrb[240].mxu0  ;;  %9103 = vmatprep.mubr.msk.f32.mxu1 %vm9335_vm0, %v9336_v4 }
 0x4cb   : > { %5990 = vst.msk [vmem:[%s10103_s18 + $0x600] sm:$0xff] %vm3158_vm5, %v5733_v39  ;;  %v3139_v29 = vmax.f32 %v2587_v21, %v2882_v24  ;;  %v5477_v30 = vmul.f32 0.1, %v4966_v40  ;;  %v2592_v31 = vadd.f32 %v11845_v59, %v2591_v28  ;;  %v8333_v32 = vpop.f32.mrb[241].mxu0 }
 0x4cc   : > { %v4970_v33 = vpop.f32.mrb[132].mxu1 }
 0x4cd   : > { %v5734_v34 = vmax.f32 %v4966_v40, %v5477_v30  ;;  %v2883_v35 = vmul.f32 0.1, %v2592_v31  ;;  %v4971_v36 = vadd.f32 %v11872_v25, %v4970_v33  ;;  %v8946_v37 = vpop.f32.mrb[133].mxu1  ;;  %9104 = vmatmul.mubr.msk.f32.gmra.mrb[238].mxu1 %vm3158_vm5, %v3139_v29 }
 0x4ce   : > { %v2596_v54 = vpop.f32.mrb[242].mxu0  ;;  %9106 = vmatprep.mubr.msk.f32.mxu1 %vm9335_vm0, %v9336_v4 }
 0x4cf   : > { %5991 = vst.msk [vmem:[%s10103_s18 + $0x608] sm:$0xff] %vm3158_vm5, %v5734_v34  ;;  %v3140_v38 = vmax.f32 %v2592_v31, %v2883_v35  ;;  %v5478_v62 = vmul.f32 0.1, %v4971_v36  ;;  %v2597_v41 = vadd.f32 %v11845_v59, %v2596_v54  ;;  %v8336_v42 = vpop.f32.mrb[243].mxu0 }
 0x4d0   : > { %v4975_v43 = vpop.f32.mrb[134].mxu1 }
 0x4d1   : > { %v5735_v44 = vmax.f32 %v4971_v36, %v5478_v62  ;;  %v2884_v45 = vmul.f32 0.1, %v2597_v41  ;;  %v4976_v46 = vadd.f32 %v11872_v25, %v4975_v43  ;;  %v8949_v47 = vpop.f32.mrb[135].mxu1  ;;  %9107 = vmatmul.mubr.msk.f32.gmra.mrb[240].mxu1 %vm3158_vm5, %v3140_v38 }
 0x4d2   : > { %v2601_v48 = vpop.f32.mrb[244].mxu0  ;;  %9109 = vmatprep.mubr.msk.f32.mxu1 %vm9335_vm0, %v9336_v4 }
 0x4d3   : > { %5992 = vst.msk [vmem:[%s10103_s18 + $0x610] sm:$0xff] %vm3158_vm5, %v5735_v44  ;;  %v3141_v49 = vmax.f32 %v2597_v41, %v2884_v45  ;;  %v5479_v50 = vmul.f32 0.1, %v4976_v46  ;;  %v2602_v51 = vadd.f32 %v11845_v59, %v2601_v48  ;;  %v8339_v6 = vpop.f32.mrb[245].mxu0 }
 0x4d4   : > { %v4980_v52 = vpop.f32.mrb[136].mxu1 }
 0x4d5   : > { %v5736_v53 = vmax.f32 %v4976_v46, %v5479_v50  ;;  %v2885_v55 = vmul.f32 0.1, %v2602_v51  ;;  %v4981_v56 = vadd.f32 %v11872_v25, %v4980_v52  ;;  %v8952_v57 = vpop.f32.mrb[137].mxu1  ;;  %9110 = vmatmul.mubr.msk.f32.gmra.mrb[242].mxu1 %vm3158_vm5, %v3141_v49 }
 0x4d6   : > { %v2606_v11 = vpop.f32.mrb[246].mxu0  ;;  %9112 = vmatprep.mubr.msk.f32.mxu1 %vm9335_vm0, %v9336_v4 }
 0x4d7   : > { %5993 = vst.msk [vmem:[%s10103_s18 + $0x618] sm:$0xff] %vm3158_vm5, %v5736_v53  ;;  %v3142_v58 = vmax.f32 %v2602_v51, %v2885_v55  ;;  %v5480_v60 = vmul.f32 0.1, %v4981_v56  ;;  %v2607_v61 = vadd.f32 %v11845_v59, %v2606_v11  ;;  %v8342_v63 = vpop.f32.mrb[247].mxu0 }
 0x4d8   : > { %v4985_v0 = vpop.f32.mrb[138].mxu1 }
 0x4d9   : > { %v5737_v1 = vmax.f32 %v4981_v56, %v5480_v60  ;;  %v2886_v2 = vmul.f32 0.1, %v2607_v61  ;;  %v4986_v15 = vadd.f32 %v11872_v25, %v4985_v0  ;;  %v8955_v3 = vpop.f32.mrb[139].mxu1  ;;  %9113 = vmatmul.mubr.msk.f32.gmra.mrb[244].mxu1 %vm3158_vm5, %v3142_v58 }
 0x4da   : > { %v2611_v5 = vpop.f32.mrb[248].mxu0  ;;  %9115 = vmatprep.mubr.msk.f32.mxu1 %vm9335_vm0, %v9336_v4 }
 0x4db   : > { %5994 = vst.msk [vmem:[%s10103_s18 + $0x620] sm:$0xff] %vm3158_vm5, %v5737_v1  ;;  %v3143_v7 = vmax.f32 %v2607_v61, %v2886_v2  ;;  %v5481_v8 = vmul.f32 0.1, %v4986_v15  ;;  %v2612_v9 = vadd.f32 %v11845_v59, %v2611_v5  ;;  %v8345_v26 = vpop.f32.mrb[249].mxu0  ;;  %v12156_v61 = vld [vmem:[%s12533_s4] ss:$0 sm:$0xff] }
 0x4dc   : > { %v4990_v10 = vpop.f32.mrb[140].mxu1 }
 0x4dd   : > { %v5738_v12 = vmax.f32 %v4986_v15, %v5481_v8  ;;  %v2887_v13 = vmul.f32 0.1, %v2612_v9  ;;  %v4991_v14 = vadd.f32 %v11872_v25, %v4990_v10  ;;  %v8958_v16 = vpop.f32.mrb[141].mxu1  ;;  %9116 = vmatmul.mubr.msk.f32.gmra.mrb[246].mxu1 %vm3158_vm5, %v3143_v7 }
 0x4de   : > { %v2616_v17 = vpop.f32.mrb[250].mxu0  ;;  %9118 = vmatprep.mubr.msk.f32.mxu1 %vm9335_vm0, %v9336_v4 }
 0x4df   : > { %5995 = vst.msk [vmem:[%s10103_s18 + $0x628] sm:$0xff] %vm3158_vm5, %v5738_v12  ;;  %v3144_v18 = vmax.f32 %v2612_v9, %v2887_v13  ;;  %v5482_v19 = vmul.f32 0.1, %v4991_v14  ;;  %v2617_v20 = vadd.f32 %v11845_v59, %v2616_v17  ;;  %v8348_v21 = vpop.f32.mrb[251].mxu0  ;;  %v9244_v59 = vld [vmem:[%s12531_s2] ss:$0 sm:$0xff] }
 0x4e0   : > { %v4995_v22 = vpop.f32.mrb[142].mxu1 }
 0x4e1   : > { %v5739_v23 = vmax.f32 %v4991_v14, %v5482_v19  ;;  %v2888_v39 = vmul.f32 0.1, %v2617_v20  ;;  %v4996_v24 = vadd.f32 %v11872_v25, %v4995_v22  ;;  %v8961_v40 = vpop.f32.mrb[143].mxu1  ;;  %9119 = vmatmul.mubr.msk.f32.gmra.mrb[248].mxu1 %vm3158_vm5, %v3144_v18 }
 0x4e2   : > { %v2621_v27 = vpop.f32.mrb[252].mxu0  ;;  %9121 = vmatprep.mubr.msk.f32.mxu1 %vm9335_vm0, %v9336_v4 }
 0x4e3   : > { %5996 = vst.msk [vmem:[%s10103_s18 + $0x630] sm:$0xff] %vm3158_vm5, %v5739_v23  ;;  %v3145_v28 = vmax.f32 %v2617_v20, %v2888_v39  ;;  %v5483_v29 = vmul.f32 0.1, %v4996_v24  ;;  %v2622_v30 = vadd.f32 %v9244_v59, %v2621_v27  ;;  %v8351_v31 = vpop.f32.mrb[253].mxu0 }
 0x4e4   : > { %v5000_v32 = vpop.f32.mrb[144].mxu1 }
 0x4e5   : > { %v5740_v33 = vmax.f32 %v4996_v24, %v5483_v29  ;;  %v2889_v34 = vmul.f32 0.1, %v2622_v30  ;;  %v5001_v35 = vadd.f32 %v11872_v25, %v5000_v32  ;;  %v8964_v36 = vpop.f32.mrb[145].mxu1  ;;  %9122 = vmatmul.mubr.msk.f32.gmra.mrb[250].mxu1 %vm3158_vm5, %v3145_v28 }
 0x4e6   : > { %v2626_v37 = vpop.f32.mrb[254].mxu0  ;;  %9124 = vmatprep.mubr.msk.f32.mxu1 %vm9335_vm0, %v9336_v4 }
 0x4e7   : > { %5997 = vst.msk [vmem:[%s10103_s18 + $0x638] sm:$0xff] %vm3158_vm5, %v5740_v33  ;;  %v3146_v54 = vmax.f32 %v2622_v30, %v2889_v34  ;;  %v5484_v38 = vmul.f32 0.1, %v5001_v35  ;;  %v2627_v62 = vadd.f32 %v9244_v59, %v2626_v37  ;;  %v8354_v41 = vpop.f32.mrb[255].mxu0 }
 0x4e8   : > { %v5005_v42 = vpop.f32.mrb[146].mxu1 }
 0x4e9   : > { %v5741_v43 = vmax.f32 %v5001_v35, %v5484_v38  ;;  %v2890_v44 = vmul.f32 0.1, %v2627_v62  ;;  %v5006_v45 = vadd.f32 %v11872_v25, %v5005_v42  ;;  %v8967_v46 = vpop.f32.mrb[147].mxu1  ;;  %9125 = vmatmul.mubr.msk.f32.gmra.mrb[252].mxu1 %vm3158_vm5, %v3146_v54 }
 0x4ea   : > { %v2631_v47 = vpop.f32.mrb[0].mxu0  ;;  %9127 = vmatprep.mubr.msk.f32.mxu1 %vm9335_vm0, %v9336_v4 }
 0x4eb   : > { %5998 = vst.msk [vmem:[%s10103_s18 + $0x640] sm:$0xff] %vm3158_vm5, %v5741_v43  ;;  %v3147_v48 = vmax.f32 %v2627_v62, %v2890_v44  ;;  %v5485_v49 = vmul.f32 0.1, %v5006_v45  ;;  %v2632_v50 = vadd.f32 %v9244_v59, %v2631_v47  ;;  %v8357_v51 = vpop.f32.mrb[1].mxu0 }
 0x4ec   : > { %v5010_v6 = vpop.f32.mrb[148].mxu1 }
 0x4ed   : > { %v5742_v52 = vmax.f32 %v5006_v45, %v5485_v49  ;;  %v2891_v53 = vmul.f32 0.1, %v2632_v50  ;;  %v5011_v55 = vadd.f32 %v11872_v25, %v5010_v6  ;;  %v8970_v56 = vpop.f32.mrb[149].mxu1  ;;  %9128 = vmatmul.mubr.msk.f32.gmra.mrb[254].mxu1 %vm3158_vm5, %v3147_v48 }
 0x4ee   : > { %9130 = vmatprep.mubr.msk.f32.mxu1 %vm9335_vm0, %v9336_v4 }
 0x4ef   : > { %5999 = vst.msk [vmem:[%s10103_s18 + $0x648] sm:$0xff] %vm3158_vm5, %v5742_v52  ;;  %v3148_v57 = vmax.f32 %v2632_v50, %v2891_v53  ;;  %v5486_v11 = vmul.f32 0.1, %v5011_v55 }
 0x4f0   : > { %v5015_v58 = vpop.f32.mrb[150].mxu1 }
 0x4f1   : > { %v5743_v60 = vmax.f32 %v5011_v55, %v5486_v11  ;;  %v5016_v25 = vadd.f32 %v12156_v61, %v5015_v58  ;;  %v8973_v63 = vpop.f32.mrb[151].mxu1  ;;  %9131 = vmatmul.mubr.msk.f32.gmra.mrb[0].mxu1 %vm3158_vm5, %v3148_v57 }
 0x4f3   : > { %6000 = vst.msk [vmem:[%s10103_s18 + $0x650] sm:$0xff] %vm3158_vm5, %v5743_v60  ;;  %v5487_v4 = vmul.f32 0.1, %v5016_v25 }
 0x4f4   : > { %v5020_v0 = vpop.f32.mrb[152].mxu1 }
 0x4f5   : > { %v5744_v1 = vmax.f32 %v5016_v25, %v5487_v4  ;;  %v5021_v2 = vadd.f32 %v12156_v61, %v5020_v0  ;;  %v8976_v15 = vpop.f32.mrb[153].mxu1 }
 0x4f7   : > { %6001 = vst.msk [vmem:[%s10103_s18 + $0x658] sm:$0xff] %vm3158_vm5, %v5744_v1  ;;  %v5488_v3 = vmul.f32 0.1, %v5021_v2 }
 0x4f8   : > { %v5025_v5 = vpop.f32.mrb[154].mxu1 }
 0x4f9   : > { %v5745_v7 = vmax.f32 %v5021_v2, %v5488_v3  ;;  %v5026_v8 = vadd.f32 %v12156_v61, %v5025_v5  ;;  %v8979_v9 = vpop.f32.mrb[155].mxu1 }
 0x4fb   : > { %6002 = vst.msk [vmem:[%s10103_s18 + $0x660] sm:$0xff] %vm3158_vm5, %v5745_v7  ;;  %v5489_v26 = vmul.f32 0.1, %v5026_v8 }
 0x4fc   : > { %v5030_v10 = vpop.f32.mrb[156].mxu1 }
 0x4fd   : > { %v5746_v12 = vmax.f32 %v5026_v8, %v5489_v26  ;;  %v5031_v13 = vadd.f32 %v12156_v61, %v5030_v10  ;;  %v8982_v14 = vpop.f32.mrb[157].mxu1 }
 0x4ff   : > { %6003 = vst.msk [vmem:[%s10103_s18 + $0x668] sm:$0xff] %vm3158_vm5, %v5746_v12  ;;  %v5490_v16 = vmul.f32 0.1, %v5031_v13 }
 0x500   : > { %v5035_v17 = vpop.f32.mrb[158].mxu1 }
 0x501   : > { %v5747_v18 = vmax.f32 %v5031_v13, %v5490_v16  ;;  %v5036_v19 = vadd.f32 %v12156_v61, %v5035_v17  ;;  %v8985_v20 = vpop.f32.mrb[159].mxu1 }
 0x503   : > { %6004 = vst.msk [vmem:[%s10103_s18 + $0x670] sm:$0xff] %vm3158_vm5, %v5747_v18  ;;  %v5491_v21 = vmul.f32 0.1, %v5036_v19 }
 0x504   : > { %v5040_v22 = vpop.f32.mrb[160].mxu1 }
 0x505   : > { %v5748_v23 = vmax.f32 %v5036_v19, %v5491_v21  ;;  %v5041_v39 = vadd.f32 %v12156_v61, %v5040_v22  ;;  %v8988_v24 = vpop.f32.mrb[161].mxu1 }
 0x507   : > { %6005 = vst.msk [vmem:[%s10103_s18 + $0x678] sm:$0xff] %vm3158_vm5, %v5748_v23  ;;  %v5492_v40 = vmul.f32 0.1, %v5041_v39 }
 0x508   : > { %v5045_v27 = vpop.f32.mrb[162].mxu1 }
 0x509   : > { %v5749_v28 = vmax.f32 %v5041_v39, %v5492_v40  ;;  %v5046_v29 = vadd.f32 %v12156_v61, %v5045_v27  ;;  %v8991_v59 = vpop.f32.mrb[163].mxu1 }
 0x50b   : > { %6006 = vst.msk [vmem:[%s10103_s18 + $0x680] sm:$0xff] %vm3158_vm5, %v5749_v28  ;;  %v5493_v30 = vmul.f32 0.1, %v5046_v29 }
 0x50c   : > { %v5050_v31 = vpop.f32.mrb[164].mxu1 }
 0x50d   : > { %v5750_v32 = vmax.f32 %v5046_v29, %v5493_v30  ;;  %v5051_v33 = vadd.f32 %v12156_v61, %v5050_v31  ;;  %v8994_v34 = vpop.f32.mrb[165].mxu1 }
 0x50f   : > { %6007 = vst.msk [vmem:[%s10103_s18 + $0x688] sm:$0xff] %vm3158_vm5, %v5750_v32  ;;  %v5494_v35 = vmul.f32 0.1, %v5051_v33 }
 0x510   : > { %v5055_v36 = vpop.f32.mrb[166].mxu1 }
 0x511   : > { %v5751_v37 = vmax.f32 %v5051_v33, %v5494_v35  ;;  %v5056_v54 = vadd.f32 %v12156_v61, %v5055_v36  ;;  %v8997_v38 = vpop.f32.mrb[167].mxu1 }
 0x513   : > { %6008 = vst.msk [vmem:[%s10103_s18 + $0x690] sm:$0xff] %vm3158_vm5, %v5751_v37  ;;  %v5495_v62 = vmul.f32 0.1, %v5056_v54 }
 0x514   : > { %v5060_v41 = vpop.f32.mrb[168].mxu1 }
 0x515   : > { %v5752_v42 = vmax.f32 %v5056_v54, %v5495_v62  ;;  %v5061_v43 = vadd.f32 %v12156_v61, %v5060_v41  ;;  %v9000_v44 = vpop.f32.mrb[169].mxu1 }
 0x517   : > { %6009 = vst.msk [vmem:[%s10103_s18 + $0x698] sm:$0xff] %vm3158_vm5, %v5752_v42  ;;  %v5496_v45 = vmul.f32 0.1, %v5061_v43 }
 0x518   : > { %v5065_v46 = vpop.f32.mrb[170].mxu1 }
 0x519   : > { %v5753_v47 = vmax.f32 %v5061_v43, %v5496_v45  ;;  %v5066_v48 = vadd.f32 %v12156_v61, %v5065_v46  ;;  %v9003_v49 = vpop.f32.mrb[171].mxu1 }
 0x51b   : > { %6010 = vst.msk [vmem:[%s10103_s18 + $0x6a0] sm:$0xff] %vm3158_vm5, %v5753_v47  ;;  %v5497_v50 = vmul.f32 0.1, %v5066_v48 }
 0x51c   : > { %v5070_v51 = vpop.f32.mrb[172].mxu1 }
 0x51d   : > { %v5754_v6 = vmax.f32 %v5066_v48, %v5497_v50  ;;  %v5071_v52 = vadd.f32 %v12156_v61, %v5070_v51  ;;  %v9006_v53 = vpop.f32.mrb[173].mxu1 }
 0x51f   : > { %6011 = vst.msk [vmem:[%s10103_s18 + $0x6a8] sm:$0xff] %vm3158_vm5, %v5754_v6  ;;  %v5498_v55 = vmul.f32 0.1, %v5071_v52 }
 0x520   : > { %v5075_v56 = vpop.f32.mrb[174].mxu1 }
 0x521   : > { %v5755_v57 = vmax.f32 %v5071_v52, %v5498_v55  ;;  %v5076_v11 = vadd.f32 %v12156_v61, %v5075_v56  ;;  %v9009_v58 = vpop.f32.mrb[175].mxu1 }
 0x523   : > { %6012 = vst.msk [vmem:[%s10103_s18 + $0x6b0] sm:$0xff] %vm3158_vm5, %v5755_v57  ;;  %v5499_v60 = vmul.f32 0.1, %v5076_v11 }
 0x524   : > { %v5080_v25 = vpop.f32.mrb[176].mxu1 }
 0x525   : > { %v5756_v63 = vmax.f32 %v5076_v11, %v5499_v60  ;;  %v5081_v4 = vadd.f32 %v12156_v61, %v5080_v25  ;;  %v9012_v0 = vpop.f32.mrb[177].mxu1 }
 0x527   : > { %6013 = vst.msk [vmem:[%s10103_s18 + $0x6b8] sm:$0xff] %vm3158_vm5, %v5756_v63  ;;  %v5500_v1 = vmul.f32 0.1, %v5081_v4 }
 0x528   : > { %v5085_v2 = vpop.f32.mrb[178].mxu1 }
 0x529   : > { %v5757_v15 = vmax.f32 %v5081_v4, %v5500_v1  ;;  %v5086_v3 = vadd.f32 %v12156_v61, %v5085_v2  ;;  %v9015_v5 = vpop.f32.mrb[179].mxu1 }
 0x52b   : > { %6014 = vst.msk [vmem:[%s10103_s18 + $0x6c0] sm:$0xff] %vm3158_vm5, %v5757_v15  ;;  %v5501_v7 = vmul.f32 0.1, %v5086_v3 }
 0x52c   : > { %v5090_v8 = vpop.f32.mrb[180].mxu1 }
 0x52d   : > { %v5758_v9 = vmax.f32 %v5086_v3, %v5501_v7  ;;  %v5091_v26 = vadd.f32 %v12156_v61, %v5090_v8  ;;  %v9018_v10 = vpop.f32.mrb[181].mxu1 }
 0x52f   : > { %6015 = vst.msk [vmem:[%s10103_s18 + $0x6c8] sm:$0xff] %vm3158_vm5, %v5758_v9  ;;  %v5502_v12 = vmul.f32 0.1, %v5091_v26 }
 0x530   : > { %v5095_v13 = vpop.f32.mrb[182].mxu1 }
 0x531   : > { %v5759_v14 = vmax.f32 %v5091_v26, %v5502_v12  ;;  %v5096_v16 = vadd.f32 %v12156_v61, %v5095_v13  ;;  %v9021_v17 = vpop.f32.mrb[183].mxu1 }
 0x533   : > { %6016 = vst.msk [vmem:[%s10103_s18 + $0x6d0] sm:$0xff] %vm3158_vm5, %v5759_v14  ;;  %v5503_v18 = vmul.f32 0.1, %v5096_v16 }
 0x534   : > { %v5100_v19 = vpop.f32.mrb[184].mxu1 }
 0x535   : > { %v5760_v20 = vmax.f32 %v5096_v16, %v5503_v18  ;;  %v5101_v21 = vadd.f32 %v12156_v61, %v5100_v19  ;;  %v9024_v22 = vpop.f32.mrb[185].mxu1 }
 0x537   : > { %6017 = vst.msk [vmem:[%s10103_s18 + $0x6d8] sm:$0xff] %vm3158_vm5, %v5760_v20  ;;  %v5504_v23 = vmul.f32 0.1, %v5101_v21 }
 0x538   : > { %v5105_v39 = vpop.f32.mrb[186].mxu1 }
 0x539   : > { %v5761_v24 = vmax.f32 %v5101_v21, %v5504_v23  ;;  %v5106_v40 = vadd.f32 %v12156_v61, %v5105_v39  ;;  %v9027_v27 = vpop.f32.mrb[187].mxu1 }
 0x53b   : > { %6018 = vst.msk [vmem:[%s10103_s18 + $0x6e0] sm:$0xff] %vm3158_vm5, %v5761_v24  ;;  %v5505_v28 = vmul.f32 0.1, %v5106_v40 }
 0x53c   : > { %v5110_v29 = vpop.f32.mrb[188].mxu1 }
 0x53d   : > { %v5762_v59 = vmax.f32 %v5106_v40, %v5505_v28  ;;  %v5111_v30 = vadd.f32 %v12156_v61, %v5110_v29  ;;  %v9030_v31 = vpop.f32.mrb[189].mxu1 }
 0x53f   : > { %6019 = vst.msk [vmem:[%s10103_s18 + $0x6e8] sm:$0xff] %vm3158_vm5, %v5762_v59  ;;  %v5506_v32 = vmul.f32 0.1, %v5111_v30 }
 0x540   : > { %v5115_v33 = vpop.f32.mrb[190].mxu1 }
 0x541   : > { %v5763_v34 = vmax.f32 %v5111_v30, %v5506_v32  ;;  %v5116_v35 = vadd.f32 %v12156_v61, %v5115_v33  ;;  %v9033_v36 = vpop.f32.mrb[191].mxu1 }
 0x543   : > { %6020 = vst.msk [vmem:[%s10103_s18 + $0x6f0] sm:$0xff] %vm3158_vm5, %v5763_v34  ;;  %v5507_v37 = vmul.f32 0.1, %v5116_v35 }
 0x544   : > { %v5120_v54 = vpop.f32.mrb[192].mxu1 }
 0x545   : > { %v5764_v38 = vmax.f32 %v5116_v35, %v5507_v37  ;;  %v5121_v62 = vadd.f32 %v12156_v61, %v5120_v54  ;;  %v9036_v41 = vpop.f32.mrb[193].mxu1 }
 0x547   : > { %6021 = vst.msk [vmem:[%s10103_s18 + $0x6f8] sm:$0xff] %vm3158_vm5, %v5764_v38  ;;  %v5508_v42 = vmul.f32 0.1, %v5121_v62 }
 0x548   : > { %v5125_v43 = vpop.f32.mrb[194].mxu1 }
 0x549   : > { %v5765_v44 = vmax.f32 %v5121_v62, %v5508_v42  ;;  %v5126_v45 = vadd.f32 %v12156_v61, %v5125_v43  ;;  %v9039_v46 = vpop.f32.mrb[195].mxu1 }
 0x54b   : > { %6022 = vst.msk [vmem:[%s10103_s18 + $0x700] sm:$0xff] %vm3158_vm5, %v5765_v44  ;;  %v5509_v47 = vmul.f32 0.1, %v5126_v45 }
 0x54c   : > { %v5130_v48 = vpop.f32.mrb[196].mxu1 }
 0x54d   : > { %v5766_v49 = vmax.f32 %v5126_v45, %v5509_v47  ;;  %v5131_v50 = vadd.f32 %v12156_v61, %v5130_v48  ;;  %v9042_v51 = vpop.f32.mrb[197].mxu1 }
 0x54f   : > { %6023 = vst.msk [vmem:[%s10103_s18 + $0x708] sm:$0xff] %vm3158_vm5, %v5766_v49  ;;  %v5510_v6 = vmul.f32 0.1, %v5131_v50 }
 0x550   : > { %v5135_v52 = vpop.f32.mrb[198].mxu1 }
 0x551   : > { %v5767_v53 = vmax.f32 %v5131_v50, %v5510_v6  ;;  %v5136_v55 = vadd.f32 %v12156_v61, %v5135_v52  ;;  %v9045_v56 = vpop.f32.mrb[199].mxu1 }
 0x553   : > { %6024 = vst.msk [vmem:[%s10103_s18 + $0x710] sm:$0xff] %vm3158_vm5, %v5767_v53  ;;  %v5511_v57 = vmul.f32 0.1, %v5136_v55 }
 0x554   : > { %v5140_v11 = vpop.f32.mrb[200].mxu1 }
 0x555   : > { %v5768_v58 = vmax.f32 %v5136_v55, %v5511_v57  ;;  %v5141_v60 = vadd.f32 %v12156_v61, %v5140_v11  ;;  %v9048_v25 = vpop.f32.mrb[201].mxu1 }
 0x557   : > { %6025 = vst.msk [vmem:[%s10103_s18 + $0x718] sm:$0xff] %vm3158_vm5, %v5768_v58  ;;  %v5512_v63 = vmul.f32 0.1, %v5141_v60 }
 0x558   : > { %v5145_v4 = vpop.f32.mrb[202].mxu1 }
 0x559   : > { %v5769_v0 = vmax.f32 %v5141_v60, %v5512_v63  ;;  %v5146_v1 = vadd.f32 %v12156_v61, %v5145_v4  ;;  %v9051_v2 = vpop.f32.mrb[203].mxu1 }
 0x55b   : > { %6026 = vst.msk [vmem:[%s10103_s18 + $0x720] sm:$0xff] %vm3158_vm5, %v5769_v0  ;;  %v5513_v15 = vmul.f32 0.1, %v5146_v1 }
 0x55c   : > { %v5150_v3 = vpop.f32.mrb[204].mxu1 }
 0x55d   : > { %v5770_v5 = vmax.f32 %v5146_v1, %v5513_v15  ;;  %v5151_v7 = vadd.f32 %v12156_v61, %v5150_v3  ;;  %v9054_v8 = vpop.f32.mrb[205].mxu1 }
 0x55f   : > { %6027 = vst.msk [vmem:[%s10103_s18 + $0x728] sm:$0xff] %vm3158_vm5, %v5770_v5  ;;  %v5514_v9 = vmul.f32 0.1, %v5151_v7 }
 0x560   : > { %v5155_v26 = vpop.f32.mrb[206].mxu1 }
 0x561   : > { %v5771_v10 = vmax.f32 %v5151_v7, %v5514_v9  ;;  %v5156_v12 = vadd.f32 %v12156_v61, %v5155_v26  ;;  %v9057_v13 = vpop.f32.mrb[207].mxu1 }
 0x563   : > { %6028 = vst.msk [vmem:[%s10103_s18 + $0x730] sm:$0xff] %vm3158_vm5, %v5771_v10  ;;  %v5515_v14 = vmul.f32 0.1, %v5156_v12 }
 0x564   : > { %v5160_v16 = vpop.f32.mrb[208].mxu1 }
 0x565   : > { %v5772_v17 = vmax.f32 %v5156_v12, %v5515_v14  ;;  %v5161_v18 = vadd.f32 %v12156_v61, %v5160_v16  ;;  %v9060_v19 = vpop.f32.mrb[209].mxu1 }
 0x567   : > { %6029 = vst.msk [vmem:[%s10103_s18 + $0x738] sm:$0xff] %vm3158_vm5, %v5772_v17  ;;  %v5516_v20 = vmul.f32 0.1, %v5161_v18 }
 0x568   : > { %v5165_v21 = vpop.f32.mrb[210].mxu1 }
 0x569   : > { %v5773_v22 = vmax.f32 %v5161_v18, %v5516_v20  ;;  %v5166_v23 = vadd.f32 %v12156_v61, %v5165_v21  ;;  %v9063_v39 = vpop.f32.mrb[211].mxu1 }
 0x56b   : > { %6030 = vst.msk [vmem:[%s10103_s18 + $0x740] sm:$0xff] %vm3158_vm5, %v5773_v22  ;;  %v5517_v24 = vmul.f32 0.1, %v5166_v23 }
 0x56c   : > { %v5170_v40 = vpop.f32.mrb[212].mxu1 }
 0x56d   : > { %v5774_v27 = vmax.f32 %v5166_v23, %v5517_v24  ;;  %v5171_v28 = vadd.f32 %v12156_v61, %v5170_v40  ;;  %v9066_v29 = vpop.f32.mrb[213].mxu1 }
 0x56f   : > { %6031 = vst.msk [vmem:[%s10103_s18 + $0x748] sm:$0xff] %vm3158_vm5, %v5774_v27  ;;  %v5518_v59 = vmul.f32 0.1, %v5171_v28 }
 0x570   : > { %v5175_v30 = vpop.f32.mrb[214].mxu1 }
 0x571   : > { %v5775_v31 = vmax.f32 %v5171_v28, %v5518_v59  ;;  %v5176_v32 = vadd.f32 %v12156_v61, %v5175_v30  ;;  %v9069_v33 = vpop.f32.mrb[215].mxu1 }
 0x573   : > { %6032 = vst.msk [vmem:[%s10103_s18 + $0x750] sm:$0xff] %vm3158_vm5, %v5775_v31  ;;  %v5519_v34 = vmul.f32 0.1, %v5176_v32 }
 0x574   : > { %v5180_v35 = vpop.f32.mrb[216].mxu1 }
 0x575   : > { %v5776_v36 = vmax.f32 %v5176_v32, %v5519_v34  ;;  %v5181_v37 = vadd.f32 %v12156_v61, %v5180_v35  ;;  %v9072_v54 = vpop.f32.mrb[217].mxu1 }
 0x577   : > { %6033 = vst.msk [vmem:[%s10103_s18 + $0x758] sm:$0xff] %vm3158_vm5, %v5776_v36  ;;  %v5520_v38 = vmul.f32 0.1, %v5181_v37 }
 0x578   : > { %v5185_v62 = vpop.f32.mrb[218].mxu1 }
 0x579   : > { %v5777_v41 = vmax.f32 %v5181_v37, %v5520_v38  ;;  %v5186_v42 = vadd.f32 %v12156_v61, %v5185_v62  ;;  %v9075_v43 = vpop.f32.mrb[219].mxu1 }
 0x57b   : > { %6034 = vst.msk [vmem:[%s10103_s18 + $0x760] sm:$0xff] %vm3158_vm5, %v5777_v41  ;;  %v5521_v44 = vmul.f32 0.1, %v5186_v42 }
 0x57c   : > { %v5190_v45 = vpop.f32.mrb[220].mxu1 }
 0x57d   : > { %v5778_v46 = vmax.f32 %v5186_v42, %v5521_v44  ;;  %v5191_v47 = vadd.f32 %v12156_v61, %v5190_v45  ;;  %v9078_v48 = vpop.f32.mrb[221].mxu1 }
 0x57f   : > { %6035 = vst.msk [vmem:[%s10103_s18 + $0x768] sm:$0xff] %vm3158_vm5, %v5778_v46  ;;  %v5522_v49 = vmul.f32 0.1, %v5191_v47 }
 0x580   : > { %v5195_v50 = vpop.f32.mrb[222].mxu1 }
 0x581   : > { %v5779_v51 = vmax.f32 %v5191_v47, %v5522_v49  ;;  %v5196_v6 = vadd.f32 %v12156_v61, %v5195_v50  ;;  %v9081_v52 = vpop.f32.mrb[223].mxu1 }
 0x583   : > { %6036 = vst.msk [vmem:[%s10103_s18 + $0x770] sm:$0xff] %vm3158_vm5, %v5779_v51  ;;  %v5523_v53 = vmul.f32 0.1, %v5196_v6 }
 0x584   : > { %v5200_v55 = vpop.f32.mrb[224].mxu1 }
 0x585   : > { %v5780_v56 = vmax.f32 %v5196_v6, %v5523_v53  ;;  %v5201_v57 = vadd.f32 %v12156_v61, %v5200_v55  ;;  %v9084_v11 = vpop.f32.mrb[225].mxu1 }
 0x587   : > { %6037 = vst.msk [vmem:[%s10103_s18 + $0x778] sm:$0xff] %vm3158_vm5, %v5780_v56  ;;  %v5524_v58 = vmul.f32 0.1, %v5201_v57 }
 0x588   : > { %v5205_v60 = vpop.f32.mrb[226].mxu1 }
 0x589   : > { %v5781_v25 = vmax.f32 %v5201_v57, %v5524_v58  ;;  %v5206_v63 = vadd.f32 %v12156_v61, %v5205_v60  ;;  %v9087_v4 = vpop.f32.mrb[227].mxu1 }
 0x58b   : > { %6038 = vst.msk [vmem:[%s10103_s18 + $0x780] sm:$0xff] %vm3158_vm5, %v5781_v25  ;;  %v5525_v0 = vmul.f32 0.1, %v5206_v63 }
 0x58c   : > { %v5210_v1 = vpop.f32.mrb[228].mxu1 }
 0x58d   : > { %v5782_v2 = vmax.f32 %v5206_v63, %v5525_v0  ;;  %v5211_v15 = vadd.f32 %v12156_v61, %v5210_v1  ;;  %v9090_v3 = vpop.f32.mrb[229].mxu1 }
 0x58f   : > { %6039 = vst.msk [vmem:[%s10103_s18 + $0x788] sm:$0xff] %vm3158_vm5, %v5782_v2  ;;  %v5526_v5 = vmul.f32 0.1, %v5211_v15 }
 0x590   : > { %v5215_v7 = vpop.f32.mrb[230].mxu1 }
 0x591   : > { %v5783_v8 = vmax.f32 %v5211_v15, %v5526_v5  ;;  %v5216_v9 = vadd.f32 %v12156_v61, %v5215_v7  ;;  %v9093_v26 = vpop.f32.mrb[231].mxu1 }
 0x593   : > { %6040 = vst.msk [vmem:[%s10103_s18 + $0x790] sm:$0xff] %vm3158_vm5, %v5783_v8  ;;  %v5527_v10 = vmul.f32 0.1, %v5216_v9 }
 0x594   : > { %v5220_v12 = vpop.f32.mrb[232].mxu1 }
 0x595   : > { %v5784_v13 = vmax.f32 %v5216_v9, %v5527_v10  ;;  %v5221_v14 = vadd.f32 %v12156_v61, %v5220_v12  ;;  %v9096_v16 = vpop.f32.mrb[233].mxu1 }
 0x597   : > { %6041 = vst.msk [vmem:[%s10103_s18 + $0x798] sm:$0xff] %vm3158_vm5, %v5784_v13  ;;  %v5528_v17 = vmul.f32 0.1, %v5221_v14 }
 0x598   : > { %v5225_v18 = vpop.f32.mrb[234].mxu1 }
 0x599   : > { %v5785_v19 = vmax.f32 %v5221_v14, %v5528_v17  ;;  %v5226_v20 = vadd.f32 %v12156_v61, %v5225_v18  ;;  %v9099_v21 = vpop.f32.mrb[235].mxu1 }
 0x59b   : > { %6042 = vst.msk [vmem:[%s10103_s18 + $0x7a0] sm:$0xff] %vm3158_vm5, %v5785_v19  ;;  %v5529_v22 = vmul.f32 0.1, %v5226_v20 }
 0x59c   : > { %v5230_v23 = vpop.f32.mrb[236].mxu1 }
 0x59d   : > { %v5786_v39 = vmax.f32 %v5226_v20, %v5529_v22  ;;  %v5231_v24 = vadd.f32 %v12156_v61, %v5230_v23  ;;  %v9102_v40 = vpop.f32.mrb[237].mxu1 }
 0x59f   : > { %6043 = vst.msk [vmem:[%s10103_s18 + $0x7a8] sm:$0xff] %vm3158_vm5, %v5786_v39  ;;  %v5530_v27 = vmul.f32 0.1, %v5231_v24 }
 0x5a0   : > { %v5235_v28 = vpop.f32.mrb[238].mxu1 }
 0x5a1   : > { %v5787_v29 = vmax.f32 %v5231_v24, %v5530_v27  ;;  %v5236_v59 = vadd.f32 %v12156_v61, %v5235_v28  ;;  %v9105_v30 = vpop.f32.mrb[239].mxu1 }
 0x5a3   : > { %6044 = vst.msk [vmem:[%s10103_s18 + $0x7b0] sm:$0xff] %vm3158_vm5, %v5787_v29  ;;  %v5531_v31 = vmul.f32 0.1, %v5236_v59 }
 0x5a4   : > { %v5240_v32 = vpop.f32.mrb[240].mxu1 }
 0x5a5   : > { %v5788_v33 = vmax.f32 %v5236_v59, %v5531_v31  ;;  %v5241_v34 = vadd.f32 %v12156_v61, %v5240_v32  ;;  %v9108_v35 = vpop.f32.mrb[241].mxu1 }
 0x5a7   : > { %6045 = vst.msk [vmem:[%s10103_s18 + $0x7b8] sm:$0xff] %vm3158_vm5, %v5788_v33  ;;  %v5532_v36 = vmul.f32 0.1, %v5241_v34 }
 0x5a8   : > { %v5245_v37 = vpop.f32.mrb[242].mxu1 }
 0x5a9   : > { %v5789_v54 = vmax.f32 %v5241_v34, %v5532_v36  ;;  %v5246_v38 = vadd.f32 %v12156_v61, %v5245_v37  ;;  %v9111_v62 = vpop.f32.mrb[243].mxu1 }
 0x5ab   : > { %6046 = vst.msk [vmem:[%s10103_s18 + $0x7c0] sm:$0xff] %vm3158_vm5, %v5789_v54  ;;  %v5533_v41 = vmul.f32 0.1, %v5246_v38 }
 0x5ac   : > { %v5250_v42 = vpop.f32.mrb[244].mxu1 }
 0x5ad   : > { %v5790_v43 = vmax.f32 %v5246_v38, %v5533_v41  ;;  %v5251_v44 = vadd.f32 %v12156_v61, %v5250_v42  ;;  %v9114_v45 = vpop.f32.mrb[245].mxu1 }
 0x5af   : > { %6047 = vst.msk [vmem:[%s10103_s18 + $0x7c8] sm:$0xff] %vm3158_vm5, %v5790_v43  ;;  %v5534_v46 = vmul.f32 0.1, %v5251_v44 }
 0x5b0   : > { %v5255_v47 = vpop.f32.mrb[246].mxu1 }
 0x5b1   : > { %v5791_v48 = vmax.f32 %v5251_v44, %v5534_v46  ;;  %v5256_v49 = vadd.f32 %v12156_v61, %v5255_v47  ;;  %v9117_v50 = vpop.f32.mrb[247].mxu1 }
 0x5b3   : > { %6048 = vst.msk [vmem:[%s10103_s18 + $0x7d0] sm:$0xff] %vm3158_vm5, %v5791_v48  ;;  %v5535_v51 = vmul.f32 0.1, %v5256_v49 }
 0x5b4   : > { %v5260_v6 = vpop.f32.mrb[248].mxu1 }
 0x5b5   : > { %v5792_v52 = vmax.f32 %v5256_v49, %v5535_v51  ;;  %v5261_v53 = vadd.f32 %v12156_v61, %v5260_v6  ;;  %v9120_v55 = vpop.f32.mrb[249].mxu1 }
 0x5b7   : > { %6049 = vst.msk [vmem:[%s10103_s18 + $0x7d8] sm:$0xff] %vm3158_vm5, %v5792_v52  ;;  %v5536_v56 = vmul.f32 0.1, %v5261_v53 }
 0x5b8   : > { %v5265_v57 = vpop.f32.mrb[250].mxu1 }
 0x5b9   : > { %v5793_v11 = vmax.f32 %v5261_v53, %v5536_v56  ;;  %v5266_v58 = vadd.f32 %v12156_v61, %v5265_v57  ;;  %v9123_v60 = vpop.f32.mrb[251].mxu1 }
 0x5bb   : > { %6050 = vst.msk [vmem:[%s10103_s18 + $0x7e0] sm:$0xff] %vm3158_vm5, %v5793_v11  ;;  %v5537_v25 = vmul.f32 0.1, %v5266_v58 }
 0x5bc   : > { %v5270_v63 = vpop.f32.mrb[252].mxu1 }
 0x5bd   : > { %v5794_v4 = vmax.f32 %v5266_v58, %v5537_v25  ;;  %v5271_v0 = vadd.f32 %v12156_v61, %v5270_v63  ;;  %v9126_v1 = vpop.f32.mrb[253].mxu1 }
 0x5bf   : > { %6051 = vst.msk [vmem:[%s10103_s18 + $0x7e8] sm:$0xff] %vm3158_vm5, %v5794_v4  ;;  %v5538_v2 = vmul.f32 0.1, %v5271_v0 }
 0x5c0   : > { %v5275_v15 = vpop.f32.mrb[254].mxu1 }
 0x5c1   : > { %v5795_v3 = vmax.f32 %v5271_v0, %v5538_v2  ;;  %v5276_v5 = vadd.f32 %v12156_v61, %v5275_v15  ;;  %v9129_v7 = vpop.f32.mrb[255].mxu1 }
 0x5c3   : > { %6052 = vst.msk [vmem:[%s10103_s18 + $0x7f0] sm:$0xff] %vm3158_vm5, %v5795_v3  ;;  %v5539_v8 = vmul.f32 0.1, %v5276_v5 }
 0x5c4   : > { %v5280_v9 = vpop.f32.mrb[0].mxu1 }
 0x5c5   : > { %v5796_v26 = vmax.f32 %v5276_v5, %v5539_v8  ;;  %v5281_v10 = vadd.f32 %v12156_v61, %v5280_v9  ;;  %v9132_v12 = vpop.f32.mrb[1].mxu1  ;;  %6061 = sbr.rel (!%p9393_p4) target bundleno = 1556 (0x614), region = 44 }
 0x5c7   : > { %6053 = vst.msk [vmem:[%s10103_s18 + $0x7f8] sm:$0xff] %vm3158_vm5, %v5796_v26  ;;  %v5540_v13 = vmul.f32 0.1, %v5281_v10 }
 0x5c9   : > { %v5797_v14 = vmax.f32 %v5281_v10, %v5540_v13 }
 0x5cb   : > { %6054 = vst.msk [vmem:[%s10103_s18 + $0x800] sm:$0xff] %vm3158_vm5, %v5797_v14 }
 0x5cc   : > { %s12545_s15 = smov (!%p6064_p8, %s6063_s15), 257 }
 0x5cd   : > { %s7044_s24 = sshll.u32 %s12545_s15, 7 }
 0x5ce   : > { %p7047_p9 = scmp.eq.s32.totalorder %s7044_s24, 0 }
 0x5cf   : > { %s12336_s27 = sshrl.u32 (!%p7047_p9), %s12545_s15, 6 }
 0x5d0   : > { %6072 = sbr.rel (%p7047_p9) target bundleno = 1556 (0x614), region = 48  ;;  %p7048_p10 = scmp.le.s32.totalorder (!%p7047_p9), %s12336_s27, 0 }
 0x5d7   : > { %6478 = sbr.rel (%p7048_p10) target bundleno = 1535 (0x5ff), region = 124  ;;  %s12536_s21 = smov (!%p7048_p10), %s12330_s23 }
 0x5d8   : > { %s12537_s26 = smov (!%p7048_p10), %s10103_s18  ;;  %s12345_s6 = smov (!%p7048_p10), 0  }
 0x5d9   : > { %s12347_s28 = smov (!%p7048_p10), 0  }
 0x5de LB: >> { %v6260_v61 = vld [vmem:[%s9308_s26] sm:$0xff]  ;;  %v6262_v16 = vld [vmem:[%s9308_s26 + $0x8] sm:$0xff]  ;;  %v6264_v17 = vld [vmem:[%s9308_s26 + $0x10] sm:$0xff]  ;;  %s6388_s29 = sadd.s32 1, %s9312_s6  ;;  %s6254_s28 = sadd.s32 1, %s9316_s28   ;;  %s9316_s28 = sphi %s12347_s28, %s6254_s28   ;;  %s9312_s6 = sphi %s12345_s6, %s12540_s6   ;;  %s9308_s26 = sphi %s12537_s26, %s12539_s26   ;;  %s9304_s21 = sphi %s12536_s21, %s12538_s21  }
 0x5df   : >> { %6261 = vst [vmem:[%s9304_s21] sm:$0xff] %v6260_v61  ;;  %6263 = vst [vmem:[%s9304_s21 + $0x8] sm:$0xff] %v6262_v16  ;;  %v6266_v18 = vld [vmem:[%s9308_s26 + $0x18] sm:$0xff]  ;;  %v6268_v19 = vld [vmem:[%s9308_s26 + $0x20] sm:$0xff]  ;;  %p6389_p11 = scmp.ge.s32.totalorder %s6388_s29, %s12336_s27  ;;  %p6253_p12 = scmp.ge.s32.totalorder %s6254_s28, %s12336_s27 }
 0x5e0   : >> { %6265 = vst [vmem:[%s9304_s21 + $0x10] sm:$0xff] %v6264_v17  ;;  %v6270_v20 = vld [vmem:[%s9308_s26 + $0x28] sm:$0xff]  ;;  %6267 = vst [vmem:[%s9304_s21 + $0x18] sm:$0xff] %v6266_v18  ;;  %v6272_v21 = vld [vmem:[%s9308_s26 + $0x30] sm:$0xff] }
 0x5e1   : >> { %6269 = vst [vmem:[%s9304_s21 + $0x20] sm:$0xff] %v6268_v19  ;;  %6271 = vst [vmem:[%s9304_s21 + $0x28] sm:$0xff] %v6270_v20  ;;  %v6274_v22 = vld [vmem:[%s9308_s26 + $0x38] sm:$0xff]  ;;  %v6276_v23 = vld [vmem:[%s9308_s26 + $0x40] sm:$0xff]  ;;  %s12547_s29 = smov (%p6389_p11, %s6388_s29), 0 }
 0x5e2   : >> { %6273 = vst [vmem:[%s9304_s21 + $0x30] sm:$0xff] %v6272_v21  ;;  %6275 = vst [vmem:[%s9304_s21 + $0x38] sm:$0xff] %v6274_v22  ;;  %v6278_v39 = vld [vmem:[%s9308_s26 + $0x48] sm:$0xff]  ;;  %v6280_v24 = vld [vmem:[%s9308_s26 + $0x50] sm:$0xff]  ;;  %s7049_s30 = sshll.u32 %s12547_s29, 9  ;;  %s12540_s6 = smov %s12547_s29 }
 0x5e3   : >> { %6277 = vst [vmem:[%s9304_s21 + $0x40] sm:$0xff] %v6276_v23  ;;  %v6282_v40 = vld [vmem:[%s9308_s26 + $0x58] sm:$0xff]  ;;  %6279 = vst [vmem:[%s9304_s21 + $0x48] sm:$0xff] %v6278_v39  ;;  %v6284_v27 = vld [vmem:[%s9308_s26 + $0x60] sm:$0xff]  ;;  %s12403_s13 = scalar_lea.vmem %s10103_s18, %s7049_s30 [#allocation2]   ;;  %s12406_s7 = scalar_lea.vmem %s12330_s23, %s7049_s30  }
 0x5e4   : >> { %6281 = vst [vmem:[%s9304_s21 + $0x50] sm:$0xff] %v6280_v24  ;;  %6283 = vst [vmem:[%s9304_s21 + $0x58] sm:$0xff] %v6282_v40  ;;  %v6286_v28 = vld [vmem:[%s9308_s26 + $0x68] sm:$0xff]  ;;  %v6288_v29 = vld [vmem:[%s9308_s26 + $0x70] sm:$0xff] }
 0x5e5   : >> { %6285 = vst [vmem:[%s9304_s21 + $0x60] sm:$0xff] %v6284_v27  ;;  %6287 = vst [vmem:[%s9304_s21 + $0x68] sm:$0xff] %v6286_v28  ;;  %v6290_v59 = vld [vmem:[%s9308_s26 + $0x78] sm:$0xff]  ;;  %v6292_v30 = vld [vmem:[%s9308_s26 + $0x80] sm:$0xff] }
 0x5e6   : >> { %6289 = vst [vmem:[%s9304_s21 + $0x70] sm:$0xff] %v6288_v29  ;;  %v6294_v31 = vld [vmem:[%s9308_s26 + $0x88] sm:$0xff]  ;;  %6291 = vst [vmem:[%s9304_s21 + $0x78] sm:$0xff] %v6290_v59  ;;  %v6296_v32 = vld [vmem:[%s9308_s26 + $0x90] sm:$0xff] }
 0x5e7   : >> { %6293 = vst [vmem:[%s9304_s21 + $0x80] sm:$0xff] %v6292_v30  ;;  %6295 = vst [vmem:[%s9304_s21 + $0x88] sm:$0xff] %v6294_v31  ;;  %v6298_v33 = vld [vmem:[%s9308_s26 + $0x98] sm:$0xff]  ;;  %v6300_v34 = vld [vmem:[%s9308_s26 + $0xa0] sm:$0xff] }
 0x5e8   : >> { %6297 = vst [vmem:[%s9304_s21 + $0x90] sm:$0xff] %v6296_v32  ;;  %6299 = vst [vmem:[%s9304_s21 + $0x98] sm:$0xff] %v6298_v33  ;;  %v6302_v35 = vld [vmem:[%s9308_s26 + $0xa8] sm:$0xff]  ;;  %v6304_v36 = vld [vmem:[%s9308_s26 + $0xb0] sm:$0xff] }
 0x5e9   : >> { %6301 = vst [vmem:[%s9304_s21 + $0xa0] sm:$0xff] %v6300_v34  ;;  %v6306_v37 = vld [vmem:[%s9308_s26 + $0xb8] sm:$0xff]  ;;  %6303 = vst [vmem:[%s9304_s21 + $0xa8] sm:$0xff] %v6302_v35  ;;  %v6308_v54 = vld [vmem:[%s9308_s26 + $0xc0] sm:$0xff] }
 0x5ea   : >> { %6305 = vst [vmem:[%s9304_s21 + $0xb0] sm:$0xff] %v6304_v36  ;;  %6307 = vst [vmem:[%s9304_s21 + $0xb8] sm:$0xff] %v6306_v37  ;;  %v6310_v38 = vld [vmem:[%s9308_s26 + $0xc8] sm:$0xff]  ;;  %v6312_v62 = vld [vmem:[%s9308_s26 + $0xd0] sm:$0xff] }
 0x5eb   : >> { %6309 = vst [vmem:[%s9304_s21 + $0xc0] sm:$0xff] %v6308_v54  ;;  %6311 = vst [vmem:[%s9304_s21 + $0xc8] sm:$0xff] %v6310_v38  ;;  %v6314_v41 = vld [vmem:[%s9308_s26 + $0xd8] sm:$0xff]  ;;  %v6316_v42 = vld [vmem:[%s9308_s26 + $0xe0] sm:$0xff] }
 0x5ec   : >> { %6313 = vst [vmem:[%s9304_s21 + $0xd0] sm:$0xff] %v6312_v62  ;;  %v6318_v43 = vld [vmem:[%s9308_s26 + $0xe8] sm:$0xff]  ;;  %6315 = vst [vmem:[%s9304_s21 + $0xd8] sm:$0xff] %v6314_v41  ;;  %v6320_v44 = vld [vmem:[%s9308_s26 + $0xf0] sm:$0xff] }
 0x5ed   : >> { %6317 = vst [vmem:[%s9304_s21 + $0xe0] sm:$0xff] %v6316_v42  ;;  %6319 = vst [vmem:[%s9304_s21 + $0xe8] sm:$0xff] %v6318_v43  ;;  %v6322_v45 = vld [vmem:[%s9308_s26 + $0xf8] sm:$0xff]  ;;  %v6324_v46 = vld [vmem:[%s9308_s26 + $0x100] sm:$0xff] }
 0x5ee   : >> { %6321 = vst [vmem:[%s9304_s21 + $0xf0] sm:$0xff] %v6320_v44  ;;  %6323 = vst [vmem:[%s9304_s21 + $0xf8] sm:$0xff] %v6322_v45  ;;  %v6326_v47 = vld [vmem:[%s9308_s26 + $0x108] sm:$0xff]  ;;  %v6328_v48 = vld [vmem:[%s9308_s26 + $0x110] sm:$0xff] }
 0x5ef   : >> { %6325 = vst [vmem:[%s9304_s21 + $0x100] sm:$0xff] %v6324_v46  ;;  %v6330_v49 = vld [vmem:[%s9308_s26 + $0x118] sm:$0xff]  ;;  %6327 = vst [vmem:[%s9304_s21 + $0x108] sm:$0xff] %v6326_v47  ;;  %v6332_v50 = vld [vmem:[%s9308_s26 + $0x120] sm:$0xff] }
 0x5f0   : >> { %6329 = vst [vmem:[%s9304_s21 + $0x110] sm:$0xff] %v6328_v48  ;;  %6331 = vst [vmem:[%s9304_s21 + $0x118] sm:$0xff] %v6330_v49  ;;  %v6334_v51 = vld [vmem:[%s9308_s26 + $0x128] sm:$0xff]  ;;  %v6336_v6 = vld [vmem:[%s9308_s26 + $0x130] sm:$0xff] }
 0x5f1   : >> { %6333 = vst [vmem:[%s9304_s21 + $0x120] sm:$0xff] %v6332_v50  ;;  %6335 = vst [vmem:[%s9304_s21 + $0x128] sm:$0xff] %v6334_v51  ;;  %v6338_v52 = vld [vmem:[%s9308_s26 + $0x138] sm:$0xff]  ;;  %v6340_v53 = vld [vmem:[%s9308_s26 + $0x140] sm:$0xff] }
 0x5f2   : >> { %6337 = vst [vmem:[%s9304_s21 + $0x130] sm:$0xff] %v6336_v6  ;;  %v6342_v55 = vld [vmem:[%s9308_s26 + $0x148] sm:$0xff]  ;;  %6339 = vst [vmem:[%s9304_s21 + $0x138] sm:$0xff] %v6338_v52  ;;  %v6344_v56 = vld [vmem:[%s9308_s26 + $0x150] sm:$0xff] }
 0x5f3   : >> { %6341 = vst [vmem:[%s9304_s21 + $0x140] sm:$0xff] %v6340_v53  ;;  %6343 = vst [vmem:[%s9304_s21 + $0x148] sm:$0xff] %v6342_v55  ;;  %v6346_v57 = vld [vmem:[%s9308_s26 + $0x158] sm:$0xff]  ;;  %v6348_v11 = vld [vmem:[%s9308_s26 + $0x160] sm:$0xff] }
 0x5f4   : >> { %6345 = vst [vmem:[%s9304_s21 + $0x150] sm:$0xff] %v6344_v56  ;;  %6347 = vst [vmem:[%s9304_s21 + $0x158] sm:$0xff] %v6346_v57  ;;  %v6350_v58 = vld [vmem:[%s9308_s26 + $0x168] sm:$0xff]  ;;  %v6352_v60 = vld [vmem:[%s9308_s26 + $0x170] sm:$0xff] }
 0x5f5   : >> { %6349 = vst [vmem:[%s9304_s21 + $0x160] sm:$0xff] %v6348_v11  ;;  %v6354_v25 = vld [vmem:[%s9308_s26 + $0x178] sm:$0xff]  ;;  %6351 = vst [vmem:[%s9304_s21 + $0x168] sm:$0xff] %v6350_v58  ;;  %v6356_v63 = vld [vmem:[%s9308_s26 + $0x180] sm:$0xff] }
 0x5f6   : >> { %6353 = vst [vmem:[%s9304_s21 + $0x170] sm:$0xff] %v6352_v60  ;;  %6355 = vst [vmem:[%s9304_s21 + $0x178] sm:$0xff] %v6354_v25  ;;  %v6358_v4 = vld [vmem:[%s9308_s26 + $0x188] sm:$0xff]  ;;  %v6360_v0 = vld [vmem:[%s9308_s26 + $0x190] sm:$0xff] }
 0x5f7   : >> { %6357 = vst [vmem:[%s9304_s21 + $0x180] sm:$0xff] %v6356_v63  ;;  %6359 = vst [vmem:[%s9304_s21 + $0x188] sm:$0xff] %v6358_v4  ;;  %v6362_v1 = vld [vmem:[%s9308_s26 + $0x198] sm:$0xff]  ;;  %v6364_v2 = vld [vmem:[%s9308_s26 + $0x1a0] sm:$0xff] }
 0x5f8   : >> { %6361 = vst [vmem:[%s9304_s21 + $0x190] sm:$0xff] %v6360_v0  ;;  %v6366_v15 = vld [vmem:[%s9308_s26 + $0x1a8] sm:$0xff]  ;;  %6363 = vst [vmem:[%s9304_s21 + $0x198] sm:$0xff] %v6362_v1  ;;  %v6368_v3 = vld [vmem:[%s9308_s26 + $0x1b0] sm:$0xff]  ;;  %6256 = sbr.rel (!%p6253_p12) target bundleno = 1502 (0x5de), region = 130 }
 0x5f9   : >> { %6365 = vst [vmem:[%s9304_s21 + $0x1a0] sm:$0xff] %v6364_v2  ;;  %6367 = vst [vmem:[%s9304_s21 + $0x1a8] sm:$0xff] %v6366_v15  ;;  %v6370_v5 = vld [vmem:[%s9308_s26 + $0x1b8] sm:$0xff]  ;;  %v6372_v7 = vld [vmem:[%s9308_s26 + $0x1c0] sm:$0xff] }
 0x5fa   : >> { %6369 = vst [vmem:[%s9304_s21 + $0x1b0] sm:$0xff] %v6368_v3  ;;  %6371 = vst [vmem:[%s9304_s21 + $0x1b8] sm:$0xff] %v6370_v5  ;;  %v6374_v8 = vld [vmem:[%s9308_s26 + $0x1c8] sm:$0xff]  ;;  %v6376_v9 = vld [vmem:[%s9308_s26 + $0x1d0] sm:$0xff] }
 0x5fb   : >> { %6373 = vst [vmem:[%s9304_s21 + $0x1c0] sm:$0xff] %v6372_v7  ;;  %v6378_v26 = vld [vmem:[%s9308_s26 + $0x1d8] sm:$0xff]  ;;  %6375 = vst [vmem:[%s9304_s21 + $0x1c8] sm:$0xff] %v6374_v8  ;;  %v6380_v10 = vld [vmem:[%s9308_s26 + $0x1e0] sm:$0xff] }
 0x5fc   : >> { %6377 = vst [vmem:[%s9304_s21 + $0x1d0] sm:$0xff] %v6376_v9  ;;  %6379 = vst [vmem:[%s9304_s21 + $0x1d8] sm:$0xff] %v6378_v26  ;;  %v6382_v12 = vld [vmem:[%s9308_s26 + $0x1e8] sm:$0xff]  ;;  %v6384_v13 = vld [vmem:[%s9308_s26 + $0x1f0] sm:$0xff] }
 0x5fd   : >> { %6381 = vst [vmem:[%s9304_s21 + $0x1e0] sm:$0xff] %v6380_v10  ;;  %6383 = vst [vmem:[%s9304_s21 + $0x1e8] sm:$0xff] %v6382_v12  ;;  %v6386_v14 = vld [vmem:[%s9308_s26 + $0x1f8] sm:$0xff]  ;;  %s12539_s26 = smov %s12403_s13 }
 0x5fe   : >> { %6385 = vst [vmem:[%s9304_s21 + $0x1f0] sm:$0xff] %v6384_v13  ;;  %6387 = vst [vmem:[%s9304_s21 + $0x1f8] sm:$0xff] %v6386_v14  ;;  %s12538_s21 = smov %s12406_s7 }
 0x5ff PF: > { %s12511_s8 = sand.u32 63, %s12545_s15   ;;  %s7060_s9 = sshll.u32 %s12336_s27, 9 }
 0x600   : > { %s6399_s10 = scalar_lea.vmem %s10103_s18, %s7060_s9 [#allocation2]   ;;  %s6401_s11 = scalar_lea.vmem %s12330_s23, %s7060_s9  }
 0x601   : > { %p7054_p13 = scmp.le.s32.totalorder %s12511_s8, 0 }
 0x602   : > { %s9318_s12 = smov (!%p7054_p13), %s6401_s11   ;;  %s9322_s14 = smov (!%p7054_p13), %s6399_s10  }
 0x603   : > { %6492 = sbr.rel (%p7054_p13) target bundleno = 1556 (0x614), region = 135  ;;  %s9326_s16 = smov (!%p7054_p13), 0  }
 0x604   : > { %s9330_s17 = smov (!%p7054_p13), 0  }
 0x60a LB: >> { %v6411_v61 = vld [vmem:[%s9324_s14] sm:$0xff]  ;;  %s6413_s15 = sadd.s32 1, %s9328_s16  ;;  %s6405_s17 = sadd.s32 1, %s9332_s17   ;;  %s9332_s17 = sphi %s9330_s17, %s6405_s17   ;;  %s9328_s16 = sphi %s9326_s16, %s9327_s16   ;;  %s9324_s14 = sphi %s9322_s14, %s6418_s14   ;;  %s9320_s12 = sphi %s9318_s12, %s6419_s12  }
 0x60b   : >> { %6412 = vst [vmem:[%s9320_s12] sm:$0xff] %v6411_v61  ;;  %p6414_p0 = scmp.ge.s32.totalorder %s6413_s15, %s12511_s8  ;;  %p6404_p1 = scmp.ge.s32.totalorder %s6405_s17, %s12511_s8 }
 0x60d   : >> { %s12549_s15 = smov (%p6414_p0, %s6413_s15), 0  ;;  %6407 = sbr.rel (!%p6404_p1) target bundleno = 1546 (0x60a), region = 141 }
 0x60e   : >> { %s7055_s18 = sshll.u32 %s12549_s15, 3  ;;  %s9327_s16 = smov %s12549_s15  }
 0x60f   : >> { %s6418_s14 = scalar_lea.vmem %s6399_s10, %s7055_s18 [#allocation2]   ;;  %s6419_s12 = scalar_lea.vmem %s6401_s11, %s7055_s18  }
 0x614 PF: > { %p12_p2 = scmp.ge.s32.totalorder %s9383_s22, 4   ;;  %s12541_s18 = smov %s9296_s19 }
 0x615   : > { %s12542_s19 = smov %s9391_s25  ;;  %s12543_s20 = smov %s9383_s22 }
 0x616   :  { %14 = sbr.rel (!%p12_p2) target bundleno = 2 (0x2), region = 152 }

</bundles_post_ra>
